<compile_context>
chip_gen: v7x
topology: tpu7x:2x2x1
jax: 0.10.0
libtpu: 0.0.40
codegen_flags: <defaults>
</compile_context>

<pallas_src>
import math
import jax
import jax.numpy as jnp
import numpy as np
from jax.experimental import pallas as pl
from jax.experimental.pallas import tpu as pltpu

# Layer widths exactly as in the PyTorch module.
LAYER_DIMS = [1000, 900, 800, 700, 600, 500, 400, 300, 200, 100, 50, 25, 12, 6, 3, 1]
NUM_LAYERS = len(LAYER_DIMS) - 1


def _round_up(x: int, m: int) -> int:
    return ((x + m - 1) // m) * m


# Padded per-layer (in, out) feature sizes (multiples of 128 -> clean (8,128) tiles).
KP = [_round_up(LAYER_DIMS[i], 128) for i in range(NUM_LAYERS)]
NP = [_round_up(LAYER_DIMS[i + 1], 128) for i in range(NUM_LAYERS)]
BIAS_W = max(NP)                                   # 1024: width of the packed bias slab

# The padding rule guarantees layer i's padded output width equals layer i+1's padded
# input width, so zero-padded columns flow through the whole stack consistently.
for _i in range(NUM_LAYERS - 1):
    assert NP[_i] == KP[_i + 1], (_i, NP[_i], KP[_i + 1])

# Split the stack: "head" layers get individual exactly-shaped VMEM slabs; the tiny
# "tail" layers (all padded to 128x128) are coalesced into one slab / one DMA.
N_HEAD = next(j for j in range(NUM_LAYERS) if KP[j] == 128 and NP[j] == 128)
N_TAIL = NUM_LAYERS - N_HEAD
assert all(KP[j] == 128 and NP[j] == 128 for j in range(N_HEAD, NUM_LAYERS))


# ------------------------------ Pallas kernel ------------------------------ #
def fused_mlp_kernel(*refs):
    # refs = [x, w_head_hbm(N_HEAD), w_tail_hbm, b_all, out,
    #         w_head_vmem(N_HEAD), w_tail_vmem, sem]
    x_ref = refs[0]
    w_head_hbm = refs[1:1 + N_HEAD]
    w_tail_hbm = refs[1 + N_HEAD]
    b_ref = refs[2 + N_HEAD]
    o_ref = refs[3 + N_HEAD]
    scratch = refs[4 + N_HEAD:]
    w_head = scratch[:N_HEAD]
    w_tail = scratch[N_HEAD]
    sem = scratch[N_HEAD + 1]

    # Issue EVERY weight DMA up front: dedicated destination slab + semaphore per copy,
    # so there is nothing to serialize on.  HBM stays saturated while the MXU works.
    copies = [pltpu.make_async_copy(w_head_hbm[j], w_head[j], sem.at[j])
              for j in range(N_HEAD)]
    copies.append(pltpu.make_async_copy(w_tail_hbm, w_tail, sem.at[N_HEAD]))
    for c in copies:
        c.start()

    # Layer 0 feeds straight from the input ref (cast to bf16 at the first dot).
    x = x_ref[...].astype(jnp.bfloat16)

    # Static Python unroll: every layer shape is a compile-time constant.
    for i in range(NUM_LAYERS):
        np_ = NP[i]
        if i < N_HEAD:
            copies[i].wait()                        # layer i weights now in VMEM
            w = w_head[i][...]
        else:
            if i == N_HEAD:
                copies[N_HEAD].wait()               # one wait covers all tail layers
            w = w_tail[i - N_HEAD]                  # (128, 128) bf16 slice of the slab

        y = jnp.dot(x, w, preferred_element_type=jnp.float32)   # f32 MXU accumulate
        y = y + b_ref[i:i + 1, 0:np_]               # (1, np_) f32, broadcasts over batch
        y = jnp.maximum(y, 0.0)                     # ReLU in f32

        if i + 1 < NUM_LAYERS:
            x = y.astype(jnp.bfloat16)              # bf16 between layers (next dot casts anyway)
        else:
            o_ref[...] = y                          # final layer: write f32, no bf16 round-trip


def fused_forward_padded(x_pad, ws_head, w_tail, b_all):
    """Run the whole padded MLP in one pallas_call."""
    Bp = x_pad.shape[0]
    in_specs = (
        [pl.BlockSpec((Bp, KP[0]), lambda i: (0, 0))]                 # activations
        + [pl.BlockSpec(memory_space=pl.ANY)] * N_HEAD                # head weights (HBM)
        + [pl.BlockSpec(memory_space=pl.ANY)]                         # coalesced tail slab
        + [pl.BlockSpec((NUM_LAYERS, BIAS_W), lambda i: (0, 0))]      # packed biases
    )
    scratch_shapes = (
        [pltpu.VMEM((KP[j], NP[j]), jnp.bfloat16) for j in range(N_HEAD)]  # ~7.8 MiB
        + [pltpu.VMEM((N_TAIL, 128, 128), jnp.bfloat16),                   # 192 KiB
           pltpu.SemaphoreType.DMA((N_HEAD + 1,))]
    )
    return pl.pallas_call(
        fused_mlp_kernel,
        out_shape=jax.ShapeDtypeStruct((Bp, NP[-1]), jnp.float32),
        grid_spec=pltpu.PrefetchScalarGridSpec(
            num_scalar_prefetch=0,
            grid=(1,),
            in_specs=in_specs,
            out_specs=pl.BlockSpec((Bp, NP[-1]), lambda i: (0, 0)),
            scratch_shapes=scratch_shapes,
        ),
        compiler_params=pltpu.CompilerParams(vmem_limit_bytes=16 << 20),
    )(x_pad, *ws_head, w_tail, b_all)


# ------------------------------ Model wrapper ------------------------------ #
def init_params(key):
    """Deterministic init mimicking nn.Linear default: U(-1/sqrt(in), 1/sqrt(in))."""
    params = []
    for i in range(NUM_LAYERS):
        fan_in, fan_out = LAYER_DIMS[i], LAYER_DIMS[i + 1]
        key, kw, kb = jax.random.split(key, 3)
        bound = 1.0 / math.sqrt(fan_in)
        w = jax.random.uniform(kw, (fan_in, fan_out), jnp.float32, -bound, bound)
        b = jax.random.uniform(kb, (fan_out,), jnp.float32, -bound, bound)
        params.append((w, b))
    return params


def pack_params(params):
    """One-time packing (hoisted out of the forward):
       - head weights padded to (KP, NP) bf16 slabs,
       - tail weights (all 128x128 after padding) stacked into one (N_TAIL,128,128) slab,
       - all biases packed into a single (NUM_LAYERS, BIAS_W) f32 array."""
    ws_head, tail = [], []
    b_all = jnp.zeros((NUM_LAYERS, BIAS_W), jnp.float32)
    for i, (w, b) in enumerate(params):
        fan_in, fan_out = w.shape
        kp, np_ = KP[i], NP[i]
        w_pad = (jnp.zeros((kp, np_), jnp.bfloat16)
                 .at[:fan_in, :fan_out].set(w.astype(jnp.bfloat16)))
        if i < N_HEAD:
            ws_head.append(w_pad)
        else:
            tail.append(w_pad)
        b_all = b_all.at[i, :fan_out].set(b)
    w_tail = jnp.stack(tail, axis=0)     # (N_TAIL, 128, 128) bf16
    return ws_head, w_tail, b_all


@jax.jit
def stress_test_forward(x, ws_head, w_tail, b_all):
    """Pallas forward: pad batch/input once, run the single fused kernel, slice out."""
    B = x.shape[0]
    Bp = max(_round_up(B, 8), 8)
    x_pad = jnp.zeros((Bp, KP[0]), jnp.float32).at[:B, :LAYER_DIMS[0]].set(x)
    out_pad = fused_forward_padded(x_pad, ws_head, w_tail, b_all)
    return out_pad[:B, :LAYER_DIMS[-1]]


def reference_forward(x, params):
    """Plain-JAX reference with identical precision choices (bf16 operands, f32 accumulate)."""
    for (w, b) in params:
        y = jnp.dot(x.astype(jnp.bfloat16), w.astype(jnp.bfloat16),
                    preferred_element_type=jnp.float32) + b
        x = jnp.maximum(y, 0.0)
    return x


if __name__ == "__main__":
    key = jax.random.PRNGKey(0)
    key, kx = jax.random.split(key)

    B = 4
    x = jax.random.normal(kx, (B, LAYER_DIMS[0]), jnp.float32)
    params = init_params(key)
    ws_head, w_tail, b_all = pack_params(params)   # one-time packing

    out = stress_test_forward(x, ws_head, w_tail, b_all)
    out = jax.block_until_ready(out)

    ref = reference_forward(x, params)
    assert out.shape == (B, 1), out.shape
    np.testing.assert_allclose(np.asarray(out), np.asarray(ref), rtol=5e-3, atol=5e-3)

    print("KERNEL_OK")
</pallas_src>

<mosaic_0001>
module attributes {stable_mosaic.version = 11 : i64} {
  func.func @fused_mlp_kernel(%arg0: i32, %arg1: memref<8x1024xf32, #tpu.memory_space<vmem>>, %arg2: memref<1024x1024xbf16, #tpu.memory_space<any>>, %arg3: memref<1024x896xbf16, #tpu.memory_space<any>>, %arg4: memref<896x768xbf16, #tpu.memory_space<any>>, %arg5: memref<768x640xbf16, #tpu.memory_space<any>>, %arg6: memref<640x512xbf16, #tpu.memory_space<any>>, %arg7: memref<512x512xbf16, #tpu.memory_space<any>>, %arg8: memref<512x384xbf16, #tpu.memory_space<any>>, %arg9: memref<384x256xbf16, #tpu.memory_space<any>>, %arg10: memref<256x128xbf16, #tpu.memory_space<any>>, %arg11: memref<6x128x128xbf16, #tpu.memory_space<any>>, %arg12: memref<15x1024xf32, #tpu.memory_space<vmem>>, %arg13: memref<8x128xf32, #tpu.memory_space<vmem>>, %arg14: memref<1024x1024xbf16, #tpu.memory_space<vmem>>, %arg15: memref<1024x896xbf16, #tpu.memory_space<vmem>>, %arg16: memref<896x768xbf16, #tpu.memory_space<vmem>>, %arg17: memref<768x640xbf16, #tpu.memory_space<vmem>>, %arg18: memref<640x512xbf16, #tpu.memory_space<vmem>>, %arg19: memref<512x512xbf16, #tpu.memory_space<vmem>>, %arg20: memref<512x384xbf16, #tpu.memory_space<vmem>>, %arg21: memref<384x256xbf16, #tpu.memory_space<vmem>>, %arg22: memref<256x128xbf16, #tpu.memory_space<vmem>>, %arg23: memref<6x128x128xbf16, #tpu.memory_space<vmem>>, %arg24: memref<10x!tpu.dma_semaphore, #tpu.memory_space<semaphore_mem>>) attributes {dimension_semantics = [#tpu.dimension_semantics<arbitrary>], iteration_bounds = array<i64: 1>, scalar_prefetch = 0 : i64, scratch_operands = 11 : i64, tpu.core_type = #tpu.core_type<tc>, window_params = [{pipeline_mode = #tpu.pipeline_mode<synchronous>, transform_indices = @transform_0, window_bounds = array<i64: 8, 1024>}, {}, {}, {}, {}, {}, {}, {}, {}, {}, {}, {pipeline_mode = #tpu.pipeline_mode<synchronous>, transform_indices = @transform_11, window_bounds = array<i64: 15, 1024>}, {pipeline_mode = #tpu.pipeline_mode<synchronous>, transform_indices = @transform_12, window_bounds = array<i64: 8, 128>}]} {
    %c0_i32 = arith.constant 0 : i32
    %0 = tpu.memref_slice %arg24[%c0_i32] : memref<10x!tpu.dma_semaphore, #tpu.memory_space<semaphore_mem>> -> memref<1x!tpu.dma_semaphore, #tpu.memory_space<semaphore_mem>>
    %1 = tpu.memref_squeeze %0 : memref<1x!tpu.dma_semaphore, #tpu.memory_space<semaphore_mem>> -> memref<!tpu.dma_semaphore, #tpu.memory_space<semaphore_mem>>
    tpu.enqueue_dma source(%arg2 : memref<1024x1024xbf16, #tpu.memory_space<any>>) target(%arg14 : memref<1024x1024xbf16, #tpu.memory_space<vmem>>) target_semaphore(%1 : memref<!tpu.dma_semaphore, #tpu.memory_space<semaphore_mem>>)
    %c1_i32 = arith.constant 1 : i32
    %2 = tpu.memref_slice %arg24[%c1_i32] : memref<10x!tpu.dma_semaphore, #tpu.memory_space<semaphore_mem>> -> memref<1x!tpu.dma_semaphore, #tpu.memory_space<semaphore_mem>>
    %3 = tpu.memref_squeeze %2 : memref<1x!tpu.dma_semaphore, #tpu.memory_space<semaphore_mem>> -> memref<!tpu.dma_semaphore, #tpu.memory_space<semaphore_mem>>
    tpu.enqueue_dma source(%arg3 : memref<1024x896xbf16, #tpu.memory_space<any>>) target(%arg15 : memref<1024x896xbf16, #tpu.memory_space<vmem>>) target_semaphore(%3 : memref<!tpu.dma_semaphore, #tpu.memory_space<semaphore_mem>>)
    %c2_i32 = arith.constant 2 : i32
    %4 = tpu.memref_slice %arg24[%c2_i32] : memref<10x!tpu.dma_semaphore, #tpu.memory_space<semaphore_mem>> -> memref<1x!tpu.dma_semaphore, #tpu.memory_space<semaphore_mem>>
    %5 = tpu.memref_squeeze %4 : memref<1x!tpu.dma_semaphore, #tpu.memory_space<semaphore_mem>> -> memref<!tpu.dma_semaphore, #tpu.memory_space<semaphore_mem>>
    tpu.enqueue_dma source(%arg4 : memref<896x768xbf16, #tpu.memory_space<any>>) target(%arg16 : memref<896x768xbf16, #tpu.memory_space<vmem>>) target_semaphore(%5 : memref<!tpu.dma_semaphore, #tpu.memory_space<semaphore_mem>>)
    %c3_i32 = arith.constant 3 : i32
    %6 = tpu.memref_slice %arg24[%c3_i32] : memref<10x!tpu.dma_semaphore, #tpu.memory_space<semaphore_mem>> -> memref<1x!tpu.dma_semaphore, #tpu.memory_space<semaphore_mem>>
    %7 = tpu.memref_squeeze %6 : memref<1x!tpu.dma_semaphore, #tpu.memory_space<semaphore_mem>> -> memref<!tpu.dma_semaphore, #tpu.memory_space<semaphore_mem>>
    tpu.enqueue_dma source(%arg5 : memref<768x640xbf16, #tpu.memory_space<any>>) target(%arg17 : memref<768x640xbf16, #tpu.memory_space<vmem>>) target_semaphore(%7 : memref<!tpu.dma_semaphore, #tpu.memory_space<semaphore_mem>>)
    %c4_i32 = arith.constant 4 : i32
    %8 = tpu.memref_slice %arg24[%c4_i32] : memref<10x!tpu.dma_semaphore, #tpu.memory_space<semaphore_mem>> -> memref<1x!tpu.dma_semaphore, #tpu.memory_space<semaphore_mem>>
    %9 = tpu.memref_squeeze %8 : memref<1x!tpu.dma_semaphore, #tpu.memory_space<semaphore_mem>> -> memref<!tpu.dma_semaphore, #tpu.memory_space<semaphore_mem>>
    tpu.enqueue_dma source(%arg6 : memref<640x512xbf16, #tpu.memory_space<any>>) target(%arg18 : memref<640x512xbf16, #tpu.memory_space<vmem>>) target_semaphore(%9 : memref<!tpu.dma_semaphore, #tpu.memory_space<semaphore_mem>>)
    %c5_i32 = arith.constant 5 : i32
    %10 = tpu.memref_slice %arg24[%c5_i32] : memref<10x!tpu.dma_semaphore, #tpu.memory_space<semaphore_mem>> -> memref<1x!tpu.dma_semaphore, #tpu.memory_space<semaphore_mem>>
    %11 = tpu.memref_squeeze %10 : memref<1x!tpu.dma_semaphore, #tpu.memory_space<semaphore_mem>> -> memref<!tpu.dma_semaphore, #tpu.memory_space<semaphore_mem>>
    tpu.enqueue_dma source(%arg7 : memref<512x512xbf16, #tpu.memory_space<any>>) target(%arg19 : memref<512x512xbf16, #tpu.memory_space<vmem>>) target_semaphore(%11 : memref<!tpu.dma_semaphore, #tpu.memory_space<semaphore_mem>>)
    %c6_i32 = arith.constant 6 : i32
    %12 = tpu.memref_slice %arg24[%c6_i32] : memref<10x!tpu.dma_semaphore, #tpu.memory_space<semaphore_mem>> -> memref<1x!tpu.dma_semaphore, #tpu.memory_space<semaphore_mem>>
    %13 = tpu.memref_squeeze %12 : memref<1x!tpu.dma_semaphore, #tpu.memory_space<semaphore_mem>> -> memref<!tpu.dma_semaphore, #tpu.memory_space<semaphore_mem>>
    tpu.enqueue_dma source(%arg8 : memref<512x384xbf16, #tpu.memory_space<any>>) target(%arg20 : memref<512x384xbf16, #tpu.memory_space<vmem>>) target_semaphore(%13 : memref<!tpu.dma_semaphore, #tpu.memory_space<semaphore_mem>>)
    %c7_i32 = arith.constant 7 : i32
    %14 = tpu.memref_slice %arg24[%c7_i32] : memref<10x!tpu.dma_semaphore, #tpu.memory_space<semaphore_mem>> -> memref<1x!tpu.dma_semaphore, #tpu.memory_space<semaphore_mem>>
    %15 = tpu.memref_squeeze %14 : memref<1x!tpu.dma_semaphore, #tpu.memory_space<semaphore_mem>> -> memref<!tpu.dma_semaphore, #tpu.memory_space<semaphore_mem>>
    tpu.enqueue_dma source(%arg9 : memref<384x256xbf16, #tpu.memory_space<any>>) target(%arg21 : memref<384x256xbf16, #tpu.memory_space<vmem>>) target_semaphore(%15 : memref<!tpu.dma_semaphore, #tpu.memory_space<semaphore_mem>>)
    %c8_i32 = arith.constant 8 : i32
    %16 = tpu.memref_slice %arg24[%c8_i32] : memref<10x!tpu.dma_semaphore, #tpu.memory_space<semaphore_mem>> -> memref<1x!tpu.dma_semaphore, #tpu.memory_space<semaphore_mem>>
    %17 = tpu.memref_squeeze %16 : memref<1x!tpu.dma_semaphore, #tpu.memory_space<semaphore_mem>> -> memref<!tpu.dma_semaphore, #tpu.memory_space<semaphore_mem>>
    tpu.enqueue_dma source(%arg10 : memref<256x128xbf16, #tpu.memory_space<any>>) target(%arg22 : memref<256x128xbf16, #tpu.memory_space<vmem>>) target_semaphore(%17 : memref<!tpu.dma_semaphore, #tpu.memory_space<semaphore_mem>>)
    %c9_i32 = arith.constant 9 : i32
    %18 = tpu.memref_slice %arg24[%c9_i32] : memref<10x!tpu.dma_semaphore, #tpu.memory_space<semaphore_mem>> -> memref<1x!tpu.dma_semaphore, #tpu.memory_space<semaphore_mem>>
    %19 = tpu.memref_squeeze %18 : memref<1x!tpu.dma_semaphore, #tpu.memory_space<semaphore_mem>> -> memref<!tpu.dma_semaphore, #tpu.memory_space<semaphore_mem>>
    tpu.enqueue_dma source(%arg11 : memref<6x128x128xbf16, #tpu.memory_space<any>>) target(%arg23 : memref<6x128x128xbf16, #tpu.memory_space<vmem>>) target_semaphore(%19 : memref<!tpu.dma_semaphore, #tpu.memory_space<semaphore_mem>>)
    %c0 = arith.constant 0 : index
    %c0_0 = arith.constant 0 : index
    %20 = vector.load %arg1[%c0, %c0_0] : memref<8x1024xf32, #tpu.memory_space<vmem>>, vector<8x1024xf32>
    %21 = arith.truncf %20 : vector<8x1024xf32> to vector<8x1024xbf16>
    %c0_i32_1 = arith.constant 0 : i32
    %22 = tpu.memref_slice %arg24[%c0_i32_1] : memref<10x!tpu.dma_semaphore, #tpu.memory_space<semaphore_mem>> -> memref<1x!tpu.dma_semaphore, #tpu.memory_space<semaphore_mem>>
    %23 = tpu.memref_squeeze %22 : memref<1x!tpu.dma_semaphore, #tpu.memory_space<semaphore_mem>> -> memref<!tpu.dma_semaphore, #tpu.memory_space<semaphore_mem>>
    tpu.wait_dma2 semaphore(%23 : memref<!tpu.dma_semaphore, #tpu.memory_space<semaphore_mem>>) src(%arg2 : memref<1024x1024xbf16, #tpu.memory_space<any>>) dst(%arg14 : memref<1024x1024xbf16, #tpu.memory_space<vmem>>)
    %c0_2 = arith.constant 0 : index
    %c0_3 = arith.constant 0 : index
    %24 = vector.load %arg14[%c0_2, %c0_3] : memref<1024x1024xbf16, #tpu.memory_space<vmem>>, vector<1024x1024xbf16>
    %cst = arith.constant dense<0.000000e+00> : vector<8x1024xf32>
    %25 = tpu.matmul %21, %24, %cst {dimension_numbers = #tpu.dot_dimension_numbers<[1], [0], [0], [1], [0, 0, 1, 1], [], []>} : vector<8x1024xbf16>, vector<1024x1024xbf16>, vector<8x1024xf32> -> vector<8x1024xf32>
    %c0_4 = arith.constant 0 : index
    %c0_5 = arith.constant 0 : index
    %26 = vector.load %arg12[%c0_4, %c0_5] : memref<15x1024xf32, #tpu.memory_space<vmem>>, vector<1x1024xf32>
    %27 = vector.broadcast %26 : vector<1x1024xf32> to vector<8x1024xf32>
    %28 = arith.addf %25, %27 : vector<8x1024xf32>
    %cst_6 = arith.constant 0.000000e+00 : f32
    %29 = vector.broadcast %cst_6 : f32 to vector<8x1024xf32>
    %30 = arith.maximumf %28, %29 : vector<8x1024xf32>
    %31 = arith.truncf %30 : vector<8x1024xf32> to vector<8x1024xbf16>
    %c1_i32_7 = arith.constant 1 : i32
    %32 = tpu.memref_slice %arg24[%c1_i32_7] : memref<10x!tpu.dma_semaphore, #tpu.memory_space<semaphore_mem>> -> memref<1x!tpu.dma_semaphore, #tpu.memory_space<semaphore_mem>>
    %33 = tpu.memref_squeeze %32 : memref<1x!tpu.dma_semaphore, #tpu.memory_space<semaphore_mem>> -> memref<!tpu.dma_semaphore, #tpu.memory_space<semaphore_mem>>
    tpu.wait_dma2 semaphore(%33 : memref<!tpu.dma_semaphore, #tpu.memory_space<semaphore_mem>>) src(%arg3 : memref<1024x896xbf16, #tpu.memory_space<any>>) dst(%arg15 : memref<1024x896xbf16, #tpu.memory_space<vmem>>)
    %c0_8 = arith.constant 0 : index
    %c0_9 = arith.constant 0 : index
    %34 = vector.load %arg15[%c0_8, %c0_9] : memref<1024x896xbf16, #tpu.memory_space<vmem>>, vector<1024x896xbf16>
    %cst_10 = arith.constant dense<0.000000e+00> : vector<8x896xf32>
    %35 = tpu.matmul %31, %34, %cst_10 {dimension_numbers = #tpu.dot_dimension_numbers<[1], [0], [0], [1], [0, 0, 1, 1], [], []>} : vector<8x1024xbf16>, vector<1024x896xbf16>, vector<8x896xf32> -> vector<8x896xf32>
    %c1 = arith.constant 1 : index
    %c0_11 = arith.constant 0 : index
    %36 = vector.load %arg12[%c1, %c0_11] : memref<15x1024xf32, #tpu.memory_space<vmem>>, vector<1x896xf32>
    %37 = vector.broadcast %36 : vector<1x896xf32> to vector<8x896xf32>
    %38 = arith.addf %35, %37 : vector<8x896xf32>
    %cst_12 = arith.constant 0.000000e+00 : f32
    %39 = vector.broadcast %cst_12 : f32 to vector<8x896xf32>
    %40 = arith.maximumf %38, %39 : vector<8x896xf32>
    %41 = arith.truncf %40 : vector<8x896xf32> to vector<8x896xbf16>
    %c2_i32_13 = arith.constant 2 : i32
    %42 = tpu.memref_slice %arg24[%c2_i32_13] : memref<10x!tpu.dma_semaphore, #tpu.memory_space<semaphore_mem>> -> memref<1x!tpu.dma_semaphore, #tpu.memory_space<semaphore_mem>>
    %43 = tpu.memref_squeeze %42 : memref<1x!tpu.dma_semaphore, #tpu.memory_space<semaphore_mem>> -> memref<!tpu.dma_semaphore, #tpu.memory_space<semaphore_mem>>
    tpu.wait_dma2 semaphore(%43 : memref<!tpu.dma_semaphore, #tpu.memory_space<semaphore_mem>>) src(%arg4 : memref<896x768xbf16, #tpu.memory_space<any>>) dst(%arg16 : memref<896x768xbf16, #tpu.memory_space<vmem>>)
    %c0_14 = arith.constant 0 : index
    %c0_15 = arith.constant 0 : index
    %44 = vector.load %arg16[%c0_14, %c0_15] : memref<896x768xbf16, #tpu.memory_space<vmem>>, vector<896x768xbf16>
    %cst_16 = arith.constant dense<0.000000e+00> : vector<8x768xf32>
    %45 = tpu.matmul %41, %44, %cst_16 {dimension_numbers = #tpu.dot_dimension_numbers<[1], [0], [0], [1], [0, 0, 1, 1], [], []>} : vector<8x896xbf16>, vector<896x768xbf16>, vector<8x768xf32> -> vector<8x768xf32>
    %c2 = arith.constant 2 : index
    %c0_17 = arith.constant 0 : index
    %46 = vector.load %arg12[%c2, %c0_17] : memref<15x1024xf32, #tpu.memory_space<vmem>>, vector<1x768xf32>
    %47 = vector.broadcast %46 : vector<1x768xf32> to vector<8x768xf32>
    %48 = arith.addf %45, %47 : vector<8x768xf32>
    %cst_18 = arith.constant 0.000000e+00 : f32
    %49 = vector.broadcast %cst_18 : f32 to vector<8x768xf32>
    %50 = arith.maximumf %48, %49 : vector<8x768xf32>
    %51 = arith.truncf %50 : vector<8x768xf32> to vector<8x768xbf16>
    %c3_i32_19 = arith.constant 3 : i32
    %52 = tpu.memref_slice %arg24[%c3_i32_19] : memref<10x!tpu.dma_semaphore, #tpu.memory_space<semaphore_mem>> -> memref<1x!tpu.dma_semaphore, #tpu.memory_space<semaphore_mem>>
    %53 = tpu.memref_squeeze %52 : memref<1x!tpu.dma_semaphore, #tpu.memory_space<semaphore_mem>> -> memref<!tpu.dma_semaphore, #tpu.memory_space<semaphore_mem>>
    tpu.wait_dma2 semaphore(%53 : memref<!tpu.dma_semaphore, #tpu.memory_space<semaphore_mem>>) src(%arg5 : memref<768x640xbf16, #tpu.memory_space<any>>) dst(%arg17 : memref<768x640xbf16, #tpu.memory_space<vmem>>)
    %c0_20 = arith.constant 0 : index
    %c0_21 = arith.constant 0 : index
    %54 = vector.load %arg17[%c0_20, %c0_21] : memref<768x640xbf16, #tpu.memory_space<vmem>>, vector<768x640xbf16>
    %cst_22 = arith.constant dense<0.000000e+00> : vector<8x640xf32>
    %55 = tpu.matmul %51, %54, %cst_22 {dimension_numbers = #tpu.dot_dimension_numbers<[1], [0], [0], [1], [0, 0, 1, 1], [], []>} : vector<8x768xbf16>, vector<768x640xbf16>, vector<8x640xf32> -> vector<8x640xf32>
    %c3 = arith.constant 3 : index
    %c0_23 = arith.constant 0 : index
    %56 = vector.load %arg12[%c3, %c0_23] : memref<15x1024xf32, #tpu.memory_space<vmem>>, vector<1x640xf32>
    %57 = vector.broadcast %56 : vector<1x640xf32> to vector<8x640xf32>
    %58 = arith.addf %55, %57 : vector<8x640xf32>
    %cst_24 = arith.constant 0.000000e+00 : f32
    %59 = vector.broadcast %cst_24 : f32 to vector<8x640xf32>
    %60 = arith.maximumf %58, %59 : vector<8x640xf32>
    %61 = arith.truncf %60 : vector<8x640xf32> to vector<8x640xbf16>
    %c4_i32_25 = arith.constant 4 : i32
    %62 = tpu.memref_slice %arg24[%c4_i32_25] : memref<10x!tpu.dma_semaphore, #tpu.memory_space<semaphore_mem>> -> memref<1x!tpu.dma_semaphore, #tpu.memory_space<semaphore_mem>>
    %63 = tpu.memref_squeeze %62 : memref<1x!tpu.dma_semaphore, #tpu.memory_space<semaphore_mem>> -> memref<!tpu.dma_semaphore, #tpu.memory_space<semaphore_mem>>
    tpu.wait_dma2 semaphore(%63 : memref<!tpu.dma_semaphore, #tpu.memory_space<semaphore_mem>>) src(%arg6 : memref<640x512xbf16, #tpu.memory_space<any>>) dst(%arg18 : memref<640x512xbf16, #tpu.memory_space<vmem>>)
    %c0_26 = arith.constant 0 : index
    %c0_27 = arith.constant 0 : index
    %64 = vector.load %arg18[%c0_26, %c0_27] : memref<640x512xbf16, #tpu.memory_space<vmem>>, vector<640x512xbf16>
    %cst_28 = arith.constant dense<0.000000e+00> : vector<8x512xf32>
    %65 = tpu.matmul %61, %64, %cst_28 {dimension_numbers = #tpu.dot_dimension_numbers<[1], [0], [0], [1], [0, 0, 1, 1], [], []>} : vector<8x640xbf16>, vector<640x512xbf16>, vector<8x512xf32> -> vector<8x512xf32>
    %c4 = arith.constant 4 : index
    %c0_29 = arith.constant 0 : index
    %66 = vector.load %arg12[%c4, %c0_29] : memref<15x1024xf32, #tpu.memory_space<vmem>>, vector<1x512xf32>
    %67 = vector.broadcast %66 : vector<1x512xf32> to vector<8x512xf32>
    %68 = arith.addf %65, %67 : vector<8x512xf32>
    %cst_30 = arith.constant 0.000000e+00 : f32
    %69 = vector.broadcast %cst_30 : f32 to vector<8x512xf32>
    %70 = arith.maximumf %68, %69 : vector<8x512xf32>
    %71 = arith.truncf %70 : vector<8x512xf32> to vector<8x512xbf16>
    %c5_i32_31 = arith.constant 5 : i32
    %72 = tpu.memref_slice %arg24[%c5_i32_31] : memref<10x!tpu.dma_semaphore, #tpu.memory_space<semaphore_mem>> -> memref<1x!tpu.dma_semaphore, #tpu.memory_space<semaphore_mem>>
    %73 = tpu.memref_squeeze %72 : memref<1x!tpu.dma_semaphore, #tpu.memory_space<semaphore_mem>> -> memref<!tpu.dma_semaphore, #tpu.memory_space<semaphore_mem>>
    tpu.wait_dma2 semaphore(%73 : memref<!tpu.dma_semaphore, #tpu.memory_space<semaphore_mem>>) src(%arg7 : memref<512x512xbf16, #tpu.memory_space<any>>) dst(%arg19 : memref<512x512xbf16, #tpu.memory_space<vmem>>)
    %c0_32 = arith.constant 0 : index
    %c0_33 = arith.constant 0 : index
    %74 = vector.load %arg19[%c0_32, %c0_33] : memref<512x512xbf16, #tpu.memory_space<vmem>>, vector<512x512xbf16>
    %cst_34 = arith.constant dense<0.000000e+00> : vector<8x512xf32>
    %75 = tpu.matmul %71, %74, %cst_34 {dimension_numbers = #tpu.dot_dimension_numbers<[1], [0], [0], [1], [0, 0, 1, 1], [], []>} : vector<8x512xbf16>, vector<512x512xbf16>, vector<8x512xf32> -> vector<8x512xf32>
    %c5 = arith.constant 5 : index
    %c0_35 = arith.constant 0 : index
    %76 = vector.load %arg12[%c5, %c0_35] : memref<15x1024xf32, #tpu.memory_space<vmem>>, vector<1x512xf32>
    %77 = vector.broadcast %76 : vector<1x512xf32> to vector<8x512xf32>
    %78 = arith.addf %75, %77 : vector<8x512xf32>
    %cst_36 = arith.constant 0.000000e+00 : f32
    %79 = vector.broadcast %cst_36 : f32 to vector<8x512xf32>
    %80 = arith.maximumf %78, %79 : vector<8x512xf32>
    %81 = arith.truncf %80 : vector<8x512xf32> to vector<8x512xbf16>
    %c6_i32_37 = arith.constant 6 : i32
    %82 = tpu.memref_slice %arg24[%c6_i32_37] : memref<10x!tpu.dma_semaphore, #tpu.memory_space<semaphore_mem>> -> memref<1x!tpu.dma_semaphore, #tpu.memory_space<semaphore_mem>>
    %83 = tpu.memref_squeeze %82 : memref<1x!tpu.dma_semaphore, #tpu.memory_space<semaphore_mem>> -> memref<!tpu.dma_semaphore, #tpu.memory_space<semaphore_mem>>
    tpu.wait_dma2 semaphore(%83 : memref<!tpu.dma_semaphore, #tpu.memory_space<semaphore_mem>>) src(%arg8 : memref<512x384xbf16, #tpu.memory_space<any>>) dst(%arg20 : memref<512x384xbf16, #tpu.memory_space<vmem>>)
    %c0_38 = arith.constant 0 : index
    %c0_39 = arith.constant 0 : index
    %84 = vector.load %arg20[%c0_38, %c0_39] : memref<512x384xbf16, #tpu.memory_space<vmem>>, vector<512x384xbf16>
    %cst_40 = arith.constant dense<0.000000e+00> : vector<8x384xf32>
    %85 = tpu.matmul %81, %84, %cst_40 {dimension_numbers = #tpu.dot_dimension_numbers<[1], [0], [0], [1], [0, 0, 1, 1], [], []>} : vector<8x512xbf16>, vector<512x384xbf16>, vector<8x384xf32> -> vector<8x384xf32>
    %c6 = arith.constant 6 : index
    %c0_41 = arith.constant 0 : index
    %86 = vector.load %arg12[%c6, %c0_41] : memref<15x1024xf32, #tpu.memory_space<vmem>>, vector<1x384xf32>
    %87 = vector.broadcast %86 : vector<1x384xf32> to vector<8x384xf32>
    %88 = arith.addf %85, %87 : vector<8x384xf32>
    %cst_42 = arith.constant 0.000000e+00 : f32
    %89 = vector.broadcast %cst_42 : f32 to vector<8x384xf32>
    %90 = arith.maximumf %88, %89 : vector<8x384xf32>
    %91 = arith.truncf %90 : vector<8x384xf32> to vector<8x384xbf16>
    %c7_i32_43 = arith.constant 7 : i32
    %92 = tpu.memref_slice %arg24[%c7_i32_43] : memref<10x!tpu.dma_semaphore, #tpu.memory_space<semaphore_mem>> -> memref<1x!tpu.dma_semaphore, #tpu.memory_space<semaphore_mem>>
    %93 = tpu.memref_squeeze %92 : memref<1x!tpu.dma_semaphore, #tpu.memory_space<semaphore_mem>> -> memref<!tpu.dma_semaphore, #tpu.memory_space<semaphore_mem>>
    tpu.wait_dma2 semaphore(%93 : memref<!tpu.dma_semaphore, #tpu.memory_space<semaphore_mem>>) src(%arg9 : memref<384x256xbf16, #tpu.memory_space<any>>) dst(%arg21 : memref<384x256xbf16, #tpu.memory_space<vmem>>)
    %c0_44 = arith.constant 0 : index
    %c0_45 = arith.constant 0 : index
    %94 = vector.load %arg21[%c0_44, %c0_45] : memref<384x256xbf16, #tpu.memory_space<vmem>>, vector<384x256xbf16>
    %cst_46 = arith.constant dense<0.000000e+00> : vector<8x256xf32>
    %95 = tpu.matmul %91, %94, %cst_46 {dimension_numbers = #tpu.dot_dimension_numbers<[1], [0], [0], [1], [0, 0, 1, 1], [], []>} : vector<8x384xbf16>, vector<384x256xbf16>, vector<8x256xf32> -> vector<8x256xf32>
    %c7 = arith.constant 7 : index
    %c0_47 = arith.constant 0 : index
    %96 = vector.load %arg12[%c7, %c0_47] : memref<15x1024xf32, #tpu.memory_space<vmem>>, vector<1x256xf32>
    %97 = vector.broadcast %96 : vector<1x256xf32> to vector<8x256xf32>
    %98 = arith.addf %95, %97 : vector<8x256xf32>
    %cst_48 = arith.constant 0.000000e+00 : f32
    %99 = vector.broadcast %cst_48 : f32 to vector<8x256xf32>
    %100 = arith.maximumf %98, %99 : vector<8x256xf32>
    %101 = arith.truncf %100 : vector<8x256xf32> to vector<8x256xbf16>
    %c8_i32_49 = arith.constant 8 : i32
    %102 = tpu.memref_slice %arg24[%c8_i32_49] : memref<10x!tpu.dma_semaphore, #tpu.memory_space<semaphore_mem>> -> memref<1x!tpu.dma_semaphore, #tpu.memory_space<semaphore_mem>>
    %103 = tpu.memref_squeeze %102 : memref<1x!tpu.dma_semaphore, #tpu.memory_space<semaphore_mem>> -> memref<!tpu.dma_semaphore, #tpu.memory_space<semaphore_mem>>
    tpu.wait_dma2 semaphore(%103 : memref<!tpu.dma_semaphore, #tpu.memory_space<semaphore_mem>>) src(%arg10 : memref<256x128xbf16, #tpu.memory_space<any>>) dst(%arg22 : memref<256x128xbf16, #tpu.memory_space<vmem>>)
    %c0_50 = arith.constant 0 : index
    %c0_51 = arith.constant 0 : index
    %104 = vector.load %arg22[%c0_50, %c0_51] : memref<256x128xbf16, #tpu.memory_space<vmem>>, vector<256x128xbf16>
    %cst_52 = arith.constant dense<0.000000e+00> : vector<8x128xf32>
    %105 = tpu.matmul %101, %104, %cst_52 {dimension_numbers = #tpu.dot_dimension_numbers<[1], [0], [0], [1], [0, 0, 1, 1], [], []>} : vector<8x256xbf16>, vector<256x128xbf16>, vector<8x128xf32> -> vector<8x128xf32>
    %c8 = arith.constant 8 : index
    %c0_53 = arith.constant 0 : index
    %106 = vector.load %arg12[%c8, %c0_53] : memref<15x1024xf32, #tpu.memory_space<vmem>>, vector<1x128xf32>
    %107 = vector.broadcast %106 : vector<1x128xf32> to vector<8x128xf32>
    %108 = arith.addf %105, %107 : vector<8x128xf32>
    %cst_54 = arith.constant 0.000000e+00 : f32
    %109 = vector.broadcast %cst_54 : f32 to vector<8x128xf32>
    %110 = arith.maximumf %108, %109 : vector<8x128xf32>
    %111 = arith.truncf %110 : vector<8x128xf32> to vector<8x128xbf16>
    %c9_i32_55 = arith.constant 9 : i32
    %112 = tpu.memref_slice %arg24[%c9_i32_55] : memref<10x!tpu.dma_semaphore, #tpu.memory_space<semaphore_mem>> -> memref<1x!tpu.dma_semaphore, #tpu.memory_space<semaphore_mem>>
    %113 = tpu.memref_squeeze %112 : memref<1x!tpu.dma_semaphore, #tpu.memory_space<semaphore_mem>> -> memref<!tpu.dma_semaphore, #tpu.memory_space<semaphore_mem>>
    tpu.wait_dma2 semaphore(%113 : memref<!tpu.dma_semaphore, #tpu.memory_space<semaphore_mem>>) src(%arg11 : memref<6x128x128xbf16, #tpu.memory_space<any>>) dst(%arg23 : memref<6x128x128xbf16, #tpu.memory_space<vmem>>)
    %c0_56 = arith.constant 0 : index
    %c0_57 = arith.constant 0 : index
    %c0_58 = arith.constant 0 : index
    %114 = vector.load %arg23[%c0_56, %c0_57, %c0_58] : memref<6x128x128xbf16, #tpu.memory_space<vmem>>, vector<1x128x128xbf16>
    %115 = vector.shape_cast %114 : vector<1x128x128xbf16> to vector<128x128xbf16>
    %cst_59 = arith.constant dense<0.000000e+00> : vector<8x128xf32>
    %116 = tpu.matmul %111, %115, %cst_59 {dimension_numbers = #tpu.dot_dimension_numbers<[1], [0], [0], [1], [0, 0, 1, 1], [], []>} : vector<8x128xbf16>, vector<128x128xbf16>, vector<8x128xf32> -> vector<8x128xf32>
    %c9 = arith.constant 9 : index
    %c0_60 = arith.constant 0 : index
    %117 = vector.load %arg12[%c9, %c0_60] : memref<15x1024xf32, #tpu.memory_space<vmem>>, vector<1x128xf32>
    %118 = vector.broadcast %117 : vector<1x128xf32> to vector<8x128xf32>
    %119 = arith.addf %116, %118 : vector<8x128xf32>
    %cst_61 = arith.constant 0.000000e+00 : f32
    %120 = vector.broadcast %cst_61 : f32 to vector<8x128xf32>
    %121 = arith.maximumf %119, %120 : vector<8x128xf32>
    %122 = arith.truncf %121 : vector<8x128xf32> to vector<8x128xbf16>
    %c1_62 = arith.constant 1 : index
    %c0_63 = arith.constant 0 : index
    %c0_64 = arith.constant 0 : index
    %123 = vector.load %arg23[%c1_62, %c0_63, %c0_64] : memref<6x128x128xbf16, #tpu.memory_space<vmem>>, vector<1x128x128xbf16>
    %124 = vector.shape_cast %123 : vector<1x128x128xbf16> to vector<128x128xbf16>
    %cst_65 = arith.constant dense<0.000000e+00> : vector<8x128xf32>
    %125 = tpu.matmul %122, %124, %cst_65 {dimension_numbers = #tpu.dot_dimension_numbers<[1], [0], [0], [1], [0, 0, 1, 1], [], []>} : vector<8x128xbf16>, vector<128x128xbf16>, vector<8x128xf32> -> vector<8x128xf32>
    %c10 = arith.constant 10 : index
    %c0_66 = arith.constant 0 : index
    %126 = vector.load %arg12[%c10, %c0_66] : memref<15x1024xf32, #tpu.memory_space<vmem>>, vector<1x128xf32>
    %127 = vector.broadcast %126 : vector<1x128xf32> to vector<8x128xf32>
    %128 = arith.addf %125, %127 : vector<8x128xf32>
    %cst_67 = arith.constant 0.000000e+00 : f32
    %129 = vector.broadcast %cst_67 : f32 to vector<8x128xf32>
    %130 = arith.maximumf %128, %129 : vector<8x128xf32>
    %131 = arith.truncf %130 : vector<8x128xf32> to vector<8x128xbf16>
    %c2_68 = arith.constant 2 : index
    %c0_69 = arith.constant 0 : index
    %c0_70 = arith.constant 0 : index
    %132 = vector.load %arg23[%c2_68, %c0_69, %c0_70] : memref<6x128x128xbf16, #tpu.memory_space<vmem>>, vector<1x128x128xbf16>
    %133 = vector.shape_cast %132 : vector<1x128x128xbf16> to vector<128x128xbf16>
    %cst_71 = arith.constant dense<0.000000e+00> : vector<8x128xf32>
    %134 = tpu.matmul %131, %133, %cst_71 {dimension_numbers = #tpu.dot_dimension_numbers<[1], [0], [0], [1], [0, 0, 1, 1], [], []>} : vector<8x128xbf16>, vector<128x128xbf16>, vector<8x128xf32> -> vector<8x128xf32>
    %c11 = arith.constant 11 : index
    %c0_72 = arith.constant 0 : index
    %135 = vector.load %arg12[%c11, %c0_72] : memref<15x1024xf32, #tpu.memory_space<vmem>>, vector<1x128xf32>
    %136 = vector.broadcast %135 : vector<1x128xf32> to vector<8x128xf32>
    %137 = arith.addf %134, %136 : vector<8x128xf32>
    %cst_73 = arith.constant 0.000000e+00 : f32
    %138 = vector.broadcast %cst_73 : f32 to vector<8x128xf32>
    %139 = arith.maximumf %137, %138 : vector<8x128xf32>
    %140 = arith.truncf %139 : vector<8x128xf32> to vector<8x128xbf16>
    %c3_74 = arith.constant 3 : index
    %c0_75 = arith.constant 0 : index
    %c0_76 = arith.constant 0 : index
    %141 = vector.load %arg23[%c3_74, %c0_75, %c0_76] : memref<6x128x128xbf16, #tpu.memory_space<vmem>>, vector<1x128x128xbf16>
    %142 = vector.shape_cast %141 : vector<1x128x128xbf16> to vector<128x128xbf16>
    %cst_77 = arith.constant dense<0.000000e+00> : vector<8x128xf32>
    %143 = tpu.matmul %140, %142, %cst_77 {dimension_numbers = #tpu.dot_dimension_numbers<[1], [0], [0], [1], [0, 0, 1, 1], [], []>} : vector<8x128xbf16>, vector<128x128xbf16>, vector<8x128xf32> -> vector<8x128xf32>
    %c12 = arith.constant 12 : index
    %c0_78 = arith.constant 0 : index
    %144 = vector.load %arg12[%c12, %c0_78] : memref<15x1024xf32, #tpu.memory_space<vmem>>, vector<1x128xf32>
    %145 = vector.broadcast %144 : vector<1x128xf32> to vector<8x128xf32>
    %146 = arith.addf %143, %145 : vector<8x128xf32>
    %cst_79 = arith.constant 0.000000e+00 : f32
    %147 = vector.broadcast %cst_79 : f32 to vector<8x128xf32>
    %148 = arith.maximumf %146, %147 : vector<8x128xf32>
    %149 = arith.truncf %148 : vector<8x128xf32> to vector<8x128xbf16>
    %c4_80 = arith.constant 4 : index
    %c0_81 = arith.constant 0 : index
    %c0_82 = arith.constant 0 : index
    %150 = vector.load %arg23[%c4_80, %c0_81, %c0_82] : memref<6x128x128xbf16, #tpu.memory_space<vmem>>, vector<1x128x128xbf16>
    %151 = vector.shape_cast %150 : vector<1x128x128xbf16> to vector<128x128xbf16>
    %cst_83 = arith.constant dense<0.000000e+00> : vector<8x128xf32>
    %152 = tpu.matmul %149, %151, %cst_83 {dimension_numbers = #tpu.dot_dimension_numbers<[1], [0], [0], [1], [0, 0, 1, 1], [], []>} : vector<8x128xbf16>, vector<128x128xbf16>, vector<8x128xf32> -> vector<8x128xf32>
    %c13 = arith.constant 13 : index
    %c0_84 = arith.constant 0 : index
    %153 = vector.load %arg12[%c13, %c0_84] : memref<15x1024xf32, #tpu.memory_space<vmem>>, vector<1x128xf32>
    %154 = vector.broadcast %153 : vector<1x128xf32> to vector<8x128xf32>
    %155 = arith.addf %152, %154 : vector<8x128xf32>
    %cst_85 = arith.constant 0.000000e+00 : f32
    %156 = vector.broadcast %cst_85 : f32 to vector<8x128xf32>
    %157 = arith.maximumf %155, %156 : vector<8x128xf32>
    %158 = arith.truncf %157 : vector<8x128xf32> to vector<8x128xbf16>
    %c5_86 = arith.constant 5 : index
    %c0_87 = arith.constant 0 : index
    %c0_88 = arith.constant 0 : index
    %159 = vector.load %arg23[%c5_86, %c0_87, %c0_88] : memref<6x128x128xbf16, #tpu.memory_space<vmem>>, vector<1x128x128xbf16>
    %160 = vector.shape_cast %159 : vector<1x128x128xbf16> to vector<128x128xbf16>
    %cst_89 = arith.constant dense<0.000000e+00> : vector<8x128xf32>
    %161 = tpu.matmul %158, %160, %cst_89 {dimension_numbers = #tpu.dot_dimension_numbers<[1], [0], [0], [1], [0, 0, 1, 1], [], []>} : vector<8x128xbf16>, vector<128x128xbf16>, vector<8x128xf32> -> vector<8x128xf32>
    %c14 = arith.constant 14 : index
    %c0_90 = arith.constant 0 : index
    %162 = vector.load %arg12[%c14, %c0_90] : memref<15x1024xf32, #tpu.memory_space<vmem>>, vector<1x128xf32>
    %163 = vector.broadcast %162 : vector<1x128xf32> to vector<8x128xf32>
    %164 = arith.addf %161, %163 : vector<8x128xf32>
    %cst_91 = arith.constant 0.000000e+00 : f32
    %165 = vector.broadcast %cst_91 : f32 to vector<8x128xf32>
    %166 = arith.maximumf %164, %165 : vector<8x128xf32>
    %c0_92 = arith.constant 0 : index
    %c0_93 = arith.constant 0 : index
    %167 = vector.load %arg13[%c0_92, %c0_93] : memref<8x128xf32, #tpu.memory_space<vmem>>, vector<8x128xf32>
    tpu.vector_store %arg13[%c0_92, %c0_93], %166 {strides = array<i32>} : memref<8x128xf32, #tpu.memory_space<vmem>>, vector<8x128xf32>,
    return
  }
  func.func @transform_0(%arg0: i32) -> (i32, i32) {
    %c0_i32 = arith.constant 0 : i32
    %c0_i32_0 = arith.constant 0 : i32
    %c0_i32_1 = arith.constant 0 : i32
    return %c0_i32, %c0_i32_0 : i32, i32
  }
  func.func @transform_11(%arg0: i32) -> (i32, i32) {
    %c0_i32 = arith.constant 0 : i32
    %c0_i32_0 = arith.constant 0 : i32
    %c0_i32_1 = arith.constant 0 : i32
    return %c0_i32, %c0_i32_0 : i32, i32
  }
  func.func @transform_12(%arg0: i32) -> (i32, i32) {
    %c0_i32 = arith.constant 0 : i32
    %c0_i32_0 = arith.constant 0 : i32
    %c0_i32_1 = arith.constant 0 : i32
    return %c0_i32, %c0_i32_0 : i32, i32
  }
}

</mosaic_0001>

<bundles_post_ra>
// kernel: stress_test_forward.1
= control target key start
LH: loop header
LB: loop body
LE: loop exit
PB: predicated region body
PF: predicated region fallthrough
CT: control target
= control target key end

     0   :  { %17 = vsyncpa [#allocation14], 0  ;;  %s6692_s21 = smov [#allocation13]   ;;  %s7321_s0 = inlined_call_operand.vmem [shape: f32[8,1024], index: 0, kind: input, shape index: {}]   ;;  %s7322_s1 = inlined_call_operand.hbm [shape: bf16[1024,1024], index: 1, kind: input, shape index: {}]   ;;  %s7323_s2 = inlined_call_operand.hbm [shape: bf16[1024,896], index: 2, kind: input, shape index: {}]   ;;  %s7324_s3 = inlined_call_operand.hbm [shape: bf16[896,768], index: 3, kind: input, shape index: {}]   ;;  %s7325_s4 = inlined_call_operand.hbm [shape: bf16[768,640], index: 4, kind: input, shape index: {}]   ;;  %s7326_s5 = inlined_call_operand.hbm [shape: bf16[640,512], index: 5, kind: input, shape index: {}]   ;;  %s7327_s6 = inlined_call_operand.hbm [shape: bf16[512,512], index: 6, kind: input, shape index: {}]   ;;  %s7328_s7 = inlined_call_operand.hbm [shape: bf16[512,384], index: 7, kind: input, shape index: {}]   ;;  %s7329_s8 = inlined_call_operand.hbm [shape: bf16[384,256], index: 8, kind: input, shape index: {}]   ;;  %s7330_s9 = inlined_call_operand.hbm [shape: bf16[256,128], index: 9, kind: input, shape index: {}]   ;;  %s7331_s10 = inlined_call_operand.hbm [shape: bf16[6,128,128], index: 10, kind: input, shape index: {}]   ;;  %s7332_s11 = inlined_call_operand.hbm [shape: f32[15,1024], index: 11, kind: input, shape index: {}]   ;;  %s7333_s12 = inlined_call_operand.vmem [shape: f32[8,128], index: 12, kind: output, shape index: {}]  }
   0x1   :  { %s25_s22 = sshll.u32 %s6692_s21, 4  ;;  %s6604_s25 = scalar_lea.hbm %s7332_s11, 2048  ;;  %s26_s22 = int_to_ptr.vmem [resolvable:$true] %s25_s22 }
   0x2   :  { %p6605_p0 = scmp.ne.s32.totalorder %s7332_s11, %s6604_s25  ;;  %p6608_p1 = scmp.lt.u32.totalorder %s6604_s25, %s7332_s11 }
   0x4   :  { %p6610_p2 = pnand %p6608_p1, %p6605_p0 }
   0x6   :  { %6613 = shalt.err (!%p6610_p2)
}
   0x7   :  { %s6614_s30 = scalar_lea.vmem %s26_s22, 2048  ;;  %p6619_p4 = scmp.lt.s32.totalorder %s26_s22, %s26_s22 }
   0x8   :  { %p6615_p3 = scmp.ne.s32.totalorder %s26_s22, %s6614_s30  ;;  %p6620_p5 = scmp.lt.s32.totalorder %s6614_s30, %s6614_s30 }
   0xa   :  { %p6621_p6 = por %p6620_p5, %p6619_p4 }
   0xc   :  { %p6622_p7 = pnand %p6621_p6, %p6615_p3 }
   0xe   :  { %6625 = shalt.err (!%p6622_p7)
}
   0xf   :  { %s6693_s13 = smov 1024   ;;  %s6694_s14 = smov 64  }
  0x10   :  { %31 = dma.hbm_to_vmem [thread:$0]  %s7332_s11, 2048, %s26_s22, [#allocation14], %s6693_s13, %s6693_s13, %s6694_s14  }
  0x11   :  { %6670 = dma.done.wait [#allocation14], 2048  }
  0x12   :  { %6671 = vsyncadd [#allocation14], 4294965248  ;;  %s40_s17 = sld [smem:[#allocation0]]   ;;  %52 = sst [smem:[#allocation16]] %s6693_s13 }
  0x13   :  { %54 = sst [smem:[#allocation16 + $0x1]] %s6693_s13  ;;  %s6695_s18 = smov 8  }
  0x14   :  { %56 = sst [smem:[#allocation16 + $0x2]] %s6695_s18  ;;  %s6696_s19 = smov 128  }
  0x15   :  { %58 = sst [smem:[#allocation16 + $0x3]] %s6694_s14  ;;  %s6697_s20 = smov 2  }
  0x16   :  { %60 = sst [smem:[#allocation16 + $0x4]] %s6696_s19  ;;  %s6698_s21 = smov [#allocation2]  }
  0x17   :  { %62 = sst [smem:[#allocation16 + $0x5]] %s6697_s20  ;;  %s48_s23 = sshll.u32 %s6698_s21, 4  ;;  %s49_s23 = int_to_ptr.vmem [resolvable:$true] %s48_s23 }
  0x18   :  { %s5931_s24 = sshll.u32 %s40_s17, 26  ;;  %s6699_s25 = smov 512  }
  0x19   :  { %64 = sst [smem:[#allocation16 + $0x6]] %s6699_s25  ;;  %s6823_s11 = sadd.s32 134217728, %s5931_s24 }
  0x1a   :  { %66 = sst [smem:[#allocation16 + $0x7]] %s6694_s14  ;;  %s6700_s22 = smov 4  }
  0x1b   :  { %68 = sst [smem:[#allocation16 + $0x8]] %s6700_s22  ;;  %s6701_s26 = smov [#allocation12]  }
  0x1c   :  { %s6702_s27 = smov [#allocation15]   ;;  %s6703_s30 = smov 896  }
  0x1d   :  { %70 = dma.general %s7322_s1, 65536, %s49_s23, %s6701_s26, %s6702_s27, [#allocation16], %s6823_s11, 0  }
  0x1e   :  { %87 = sst [smem:[#allocation18]] %s6703_s30  ;;  %s6704_s13 = smov 7  }
  0x1f   :  { %89 = sst [smem:[#allocation18 + $0x1]] %s6703_s30  ;;  %s6705_s15 = smov [#allocation3]  }
  0x20   :  { %91 = sst [smem:[#allocation18 + $0x2]] %s6704_s13  ;;  %s83_s16 = sshll.u32 %s6705_s15, 4  ;;  %s84_s16 = int_to_ptr.vmem [resolvable:$true] %s83_s16 }
  0x21   :  { %93 = sst [smem:[#allocation18 + $0x3]] %s6694_s14  ;;  %s6706_s17 = smov 448  }
  0x22   :  { %95 = sst [smem:[#allocation18 + $0x4]] %s6696_s19  ;;  %s6707_s1 = smov [#allocation12 + $0x1]  }
  0x23   :  { %97 = sst [smem:[#allocation18 + $0x5]] %s6697_s20  ;;  %s6708_s18 = smov [#allocation17]  }
  0x24   :  { %99 = sst [smem:[#allocation18 + $0x6]] %s6706_s17  ;;  %s6709_s24 = smov 768  }
  0x25   :  { %101 = sst [smem:[#allocation18 + $0x7]] %s6694_s14  ;;  %s6710_s26 = smov [#allocation4]  }
  0x26   :  { %103 = sst [smem:[#allocation18 + $0x8]] %s6700_s22  ;;  %s118_s27 = sshll.u32 %s6710_s26, 4  ;;  %s119_s27 = int_to_ptr.vmem [resolvable:$true] %s118_s27 }
  0x27   :  { %105 = dma.general %s7323_s2, 57344, %s84_s16, %s6707_s1, %s6708_s18, [#allocation18], %s6823_s11, 0  }
  0x28   :  { %122 = sst [smem:[#allocation20]] %s6709_s24  ;;  %s6711_s28 = smov 6  }
  0x29   :  { %124 = sst [smem:[#allocation20 + $0x1]] %s6709_s24  ;;  %s6712_s29 = smov 384  }
  0x2a   :  { %126 = sst [smem:[#allocation20 + $0x2]] %s6711_s28  ;;  %s6713_s2 = smov [#allocation12 + $0x2]  }
  0x2b   :  { %128 = sst [smem:[#allocation20 + $0x3]] %s6694_s14  ;;  %s6714_s30 = smov [#allocation19]  }
  0x2c   :  { %130 = sst [smem:[#allocation20 + $0x4]] %s6696_s19  ;;  %s6715_s16 = smov 640  }
  0x2d   :  { %132 = sst [smem:[#allocation20 + $0x5]] %s6697_s20  ;;  %s6716_s17 = smov [#allocation5]  }
  0x2e   :  { %134 = sst [smem:[#allocation20 + $0x6]] %s6712_s29  ;;  %s153_s1 = sshll.u32 %s6716_s17, 4  ;;  %s154_s1 = int_to_ptr.vmem [resolvable:$true] %s153_s1 }
  0x2f   :  { %136 = sst [smem:[#allocation20 + $0x7]] %s6694_s14  ;;  %s6717_s18 = smov 5  }
  0x30   :  { %138 = sst [smem:[#allocation20 + $0x8]] %s6700_s22  ;;  %s6718_s21 = smov 320  }
  0x31   :  { %140 = dma.general %s7324_s3, 43008, %s119_s27, %s6713_s2, %s6714_s30, [#allocation20], %s6823_s11, 0  }
  0x32   :  { %157 = sst [smem:[#allocation22]] %s6715_s16  ;;  %s6719_s3 = smov [#allocation12 + $0x3]  }
  0x33   :  { %159 = sst [smem:[#allocation22 + $0x1]] %s6715_s16  ;;  %s6720_s23 = smov [#allocation21]  }
  0x34   :  { %161 = sst [smem:[#allocation22 + $0x2]] %s6717_s18  ;;  %s6721_s27 = smov [#allocation6]  }
  0x35   :  { %163 = sst [smem:[#allocation22 + $0x3]] %s6694_s14  ;;  %s188_s28 = sshll.u32 %s6721_s27, 4  ;;  %s189_s28 = int_to_ptr.vmem [resolvable:$true] %s188_s28 }
  0x36   :  { %165 = sst [smem:[#allocation22 + $0x4]] %s6696_s19  ;;  %s6722_s2 = smov 256  }
  0x37   :  { %167 = sst [smem:[#allocation22 + $0x5]] %s6697_s20  ;;  %s6724_s30 = smov [#allocation23]  }
  0x38   :  { %169 = sst [smem:[#allocation22 + $0x6]] %s6718_s21  ;;  %s6725_s16 = smov [#allocation7]  }
  0x39   :  { %171 = sst [smem:[#allocation22 + $0x7]] %s6694_s14  ;;  %s223_s17 = sshll.u32 %s6725_s16, 4  ;;  %s224_s17 = int_to_ptr.vmem [resolvable:$true] %s223_s17 }
  0x3a   :  { %173 = sst [smem:[#allocation22 + $0x8]] %s6700_s22  ;;  %s6728_s21 = smov [#allocation8]  }
  0x3b   :  { %175 = dma.general %s7325_s4, 30720, %s154_s1, %s6719_s3, %s6720_s23, [#allocation22], %s6823_s11, 0  }
  0x3c   :  { %192 = sst [smem:[#allocation24]] %s6699_s25  ;;  %s6723_s4 = smov [#allocation12 + $0x4]  }
  0x3d   :  { %194 = sst [smem:[#allocation24 + $0x1]] %s6699_s25  ;;  %s6727_s1 = smov [#allocation25]  }
  0x3e   :  { %196 = sst [smem:[#allocation24 + $0x2]] %s6700_s22  ;;  %s258_s3 = sshll.u32 %s6728_s21, 4  ;;  %s259_s3 = int_to_ptr.vmem [resolvable:$true] %s258_s3 }
  0x3f   :  { %198 = sst [smem:[#allocation24 + $0x3]] %s6694_s14  ;;  %s6729_s23 = smov 3  }
  0x40   :  { %200 = sst [smem:[#allocation24 + $0x4]] %s6696_s19  ;;  %s6730_s24 = smov 192  }
  0x41   :  { %202 = sst [smem:[#allocation24 + $0x5]] %s6697_s20  ;;  %s6732_s27 = smov [#allocation12 + $0x6]  }
  0x42   :  { %204 = sst [smem:[#allocation24 + $0x6]] %s6722_s2  ;;  %s6735_s15 = smov [#allocation11]  }
  0x43   :  { %206 = sst [smem:[#allocation24 + $0x7]] %s6694_s14  ;;  %s336_s16 = sshll.u32 %s6735_s15, 4  ;;  %s6905_s16 = int_to_ptr.vmem [resolvable:$true] %s336_s16 }
  0x44   :  { %208 = sst [smem:[#allocation24 + $0x8]] %s6700_s22 }
  0x45   :  { %210 = dma.general %s7326_s5, 20480, %s189_s28, %s6723_s4, %s6724_s30, [#allocation24], %s6823_s11, 0  }
  0x46   :  { %227 = sst [smem:[#allocation26]] %s6699_s25  ;;  %s6726_s5 = smov [#allocation12 + $0x5]  }
  0x47   :  { %229 = sst [smem:[#allocation26 + $0x1]] %s6699_s25  ;;  %s6733_s28 = smov [#allocation27]  }
  0x48   :  { %231 = sst [smem:[#allocation26 + $0x2]] %s6700_s22  ;;  %s6734_s30 = smov [#allocation10]  }
  0x49   :  { %233 = sst [smem:[#allocation26 + $0x3]] %s6694_s14  ;;  %s324_s13 = sshll.u32 %s6734_s30, 4  ;;  %s325_s13 = int_to_ptr.vmem [resolvable:$true] %s324_s13 }
  0x4a   :  { %235 = sst [smem:[#allocation26 + $0x4]] %s6696_s19 }
  0x4b   :  { %237 = sst [smem:[#allocation26 + $0x5]] %s6697_s20 }
  0x4c   :  { %239 = sst [smem:[#allocation26 + $0x6]] %s6722_s2 }
  0x4d   :  { %241 = sst [smem:[#allocation26 + $0x7]] %s6694_s14 }
  0x4e   :  { %243 = sst [smem:[#allocation26 + $0x8]] %s6700_s22 }
  0x4f   :  { %245 = dma.general %s7327_s6, 16384, %s224_s17, %s6726_s5, %s6727_s1, [#allocation26], %s6823_s11, 0  }
  0x50   :  { %262 = sst [smem:[#allocation28]] %s6712_s29  ;;  %s6731_s6 = smov [#allocation9]  }
  0x51   :  { %264 = sst [smem:[#allocation28 + $0x1]] %s6712_s29  ;;  %s293_s26 = sshll.u32 %s6731_s6, 4  ;;  %s294_s26 = int_to_ptr.vmem [resolvable:$true] %s293_s26 }
  0x52   :  { %266 = sst [smem:[#allocation28 + $0x2]] %s6729_s23 }
  0x53   :  { %268 = sst [smem:[#allocation28 + $0x3]] %s6694_s14 }
  0x54   :  { %270 = sst [smem:[#allocation28 + $0x4]] %s6696_s19 }
  0x55   :  { %272 = sst [smem:[#allocation28 + $0x5]] %s6697_s20 }
  0x56   :  { %274 = sst [smem:[#allocation28 + $0x6]] %s6730_s24 }
  0x57   :  { %276 = sst [smem:[#allocation28 + $0x7]] %s6694_s14 }
  0x58   :  { %278 = sst [smem:[#allocation28 + $0x8]] %s6700_s22 }
  0x59   :  { %280 = dma.general %s7328_s7, 12288, %s259_s3, %s6732_s27, %s6733_s28, [#allocation28], %s6823_s11, 0  }
  0x5a   :  { %297 = sst [smem:[#allocation30]] %s6722_s2  ;;  %s6736_s7 = smov [#allocation12 + $0x7]  }
  0x5b   :  { %299 = sst [smem:[#allocation30 + $0x1]] %s6722_s2  ;;  %s6737_s2 = smov [#allocation29]  }
  0x5c   :  { %301 = sst [smem:[#allocation30 + $0x2]] %s6697_s20 }
  0x5d   :  { %303 = sst [smem:[#allocation30 + $0x3]] %s6694_s14 }
  0x5e   :  { %305 = sst [smem:[#allocation30 + $0x4]] %s6696_s19 }
  0x5f   :  { %307 = sst [smem:[#allocation30 + $0x5]] %s6697_s20  ;;  %s6626_s20 = scalar_lea.hbm %s7330_s9, 2048 }
  0x60   :  { %309 = sst [smem:[#allocation30 + $0x6]] %s6696_s19  ;;  %p6627_p8 = scmp.ne.s32.totalorder %s7330_s9, %s6626_s20 }
  0x61   :  { %311 = sst [smem:[#allocation30 + $0x7]] %s6694_s14  ;;  %p6630_p9 = scmp.lt.u32.totalorder %s6626_s20, %s7330_s9 }
  0x62   :  { %313 = sst [smem:[#allocation30 + $0x8]] %s6700_s22 }
  0x63   :  { %315 = dma.general %s7329_s8, 6144, %s294_s26, %s6736_s7, %s6737_s2, [#allocation30], %s6823_s11, 0  }
  0x64   :  { %p6632_p10 = pnand %p6630_p9, %p6627_p8 }
  0x66   :  { %6635 = shalt.err (!%p6632_p10)  }
  0x67   :  { %s6636_s22 = scalar_lea.vmem %s325_s13, 2048  ;;  %p6641_p12 = scmp.lt.s32.totalorder %s325_s13, %s325_s13 }
  0x68   :  { %p6637_p11 = scmp.ne.s32.totalorder %s325_s13, %s6636_s22  ;;  %p6642_p13 = scmp.lt.s32.totalorder %s6636_s22, %s6636_s22 }
  0x6a   :  { %p6643_p0 = por %p6642_p13, %p6641_p12 }
  0x6c   :  { %p6644_p1 = pnand %p6643_p0, %p6637_p11 }
  0x6e   :  { %6647 = shalt.err (!%p6644_p1)  }
  0x6f   :  { %327 = dma.hbm_to_vmem [thread:$0]  %s7330_s9, 2048, %s325_s13, [#allocation12 + $0x8] }
  0x70   :  { %s6648_s24 = scalar_lea.hbm %s7331_s10, 6144 }
  0x71   :  { %p6649_p2 = scmp.ne.s32.totalorder %s7331_s10, %s6648_s24  ;;  %p6652_p3 = scmp.lt.u32.totalorder %s6648_s24, %s7331_s10 }
  0x73   :  { %p6654_p4 = pnand %p6652_p3, %p6649_p2 }
  0x75   :  { %6657 = shalt.err (!%p6654_p4)  }
  0x76   :  { %s6658_s29 = scalar_lea.vmem %s6905_s16, 6144  ;;  %p6663_p6 = scmp.lt.s32.totalorder %s6905_s16, %s6905_s16 }
  0x77   :  { %p6659_p5 = scmp.ne.s32.totalorder %s6905_s16, %s6658_s29  ;;  %p6664_p7 = scmp.lt.s32.totalorder %s6658_s29, %s6658_s29 }
  0x79   :  { %p6665_p8 = por %p6664_p7, %p6663_p6 }
  0x7b   :  { %p6666_p9 = pnand %p6665_p8, %p6659_p5 }
  0x7d   :  { %6669 = shalt.err (!%p6666_p9)  }
  0x7e   :  { %339 = dma.hbm_to_vmem [thread:$0]  %s7331_s10, 6144, %s6905_s16, [#allocation12 + $0x9]  ;;  %v340_v0 = vld [vmem:[%s7321_s0] sm:$0xff]  ;;  %v341_v1 = vld [vmem:[%s7321_s0 + $0x8] sm:$0xff]  ;;  %v342_v2 = vld [vmem:[%s7321_s0 + $0x10] sm:$0xff] }
  0x7f   :  { %v343_v3 = vld [vmem:[%s7321_s0 + $0x18] sm:$0xff]  ;;  %v344_v4 = vld [vmem:[%s7321_s0 + $0x20] sm:$0xff]  ;;  %v345_v5 = vld [vmem:[%s7321_s0 + $0x28] sm:$0xff]  ;;  %v6958_v6 = vpack.c.bf16 %v340_v0, %v340_v0  ;;  %v6960_v7 = vpack.c.bf16 %v341_v1, %v341_v1  ;;  %v6962_v8 = vpack.c.bf16 %v342_v2, %v342_v2 }
  0x80   :  { %v346_v9 = vld [vmem:[%s7321_s0 + $0x30] sm:$0xff]  ;;  %v347_v10 = vld [vmem:[%s7321_s0 + $0x38] sm:$0xff]  ;;  %v6970_v11 = vpack.c.bf16 %v343_v3, %v343_v3  ;;  %v6972_v12 = vpack.c.bf16 %v344_v4, %v344_v4  ;;  %v6974_v13 = vpack.c.bf16 %v345_v5, %v345_v5 }
  0x81   :  { %v6976_v14 = vpack.c.bf16 %v346_v9, %v346_v9  ;;  %v6978_v15 = vpack.c.bf16 %v347_v10, %v347_v10 }
  0x82   :  { %6672 = dma.done.wait [#allocation12], 65536 }
  0x83   :  { %6673 = vsyncadd [#allocation12], 4294901760  ;;  %948 = vmatprep.mubr.bf16.mxu0 %v6960_v7  ;;  %1112 = vmatprep.mubr.bf16.mxu1 %v6960_v7  ;;  %v361_v16 = vld [vmem:[#allocation2 + $0x8] sm:$0xff]  ;;  %v363_v17 = vld [vmem:[#allocation2 + $0x18] sm:$0xff] }
  0x84   :  { %v360_v18 = vld [vmem:[#allocation2] sm:$0xff]  ;;  %916 = vmatprep.subr.bf16.mxu0 %v361_v16  ;;  %1080 = vmatprep.subr.bf16.mxu1 %v363_v17  ;;  %v362_v19 = vld [vmem:[#allocation2 + $0x10] sm:$0xff]  ;;  %v369_v20 = vld [vmem:[#allocation2 + $0x48] sm:$0xff] }
  0x85   :  { %v371_v21 = vld [vmem:[#allocation2 + $0x58] sm:$0xff]  ;;  %917 = vmatpush1.bf16.msra.mxu0 %v360_v18  ;;  %1081 = vmatpush1.bf16.msra.mxu1 %v362_v19  ;;  %v368_v22 = vld [vmem:[#allocation2 + $0x40] sm:$0xff]  ;;  %v370_v23 = vld [vmem:[#allocation2 + $0x50] sm:$0xff] }
  0x86   :  { %918 = vmatprep.subr.bf16.mxu0 %v369_v20  ;;  %1082 = vmatprep.subr.bf16.mxu1 %v371_v21  ;;  %v377_v24 = vld [vmem:[#allocation2 + $0x88] sm:$0xff]  ;;  %v379_v25 = vld [vmem:[#allocation2 + $0x98] sm:$0xff]  ;;  %v376_v26 = vld [vmem:[#allocation2 + $0x80] sm:$0xff] }
  0x87   :  { %v378_v27 = vld [vmem:[#allocation2 + $0x90] sm:$0xff]  ;;  %v385_v28 = vld [vmem:[#allocation2 + $0xc8] sm:$0xff]  ;;  %v387_v29 = vld [vmem:[#allocation2 + $0xd8] sm:$0xff] }
  0x88   :  { %v384_v30 = vld [vmem:[#allocation2 + $0xc0] sm:$0xff]  ;;  %v386_v31 = vld [vmem:[#allocation2 + $0xd0] sm:$0xff]  ;;  %v393_v32 = vld [vmem:[#allocation2 + $0x108] sm:$0xff] }
  0x89   :  { %919 = vmatpush1.bf16.msra.mxu0 %v368_v22  ;;  %1083 = vmatpush1.bf16.msra.mxu1 %v370_v23  ;;  %v395_v33 = vld [vmem:[#allocation2 + $0x118] sm:$0xff]  ;;  %v392_v34 = vld [vmem:[#allocation2 + $0x100] sm:$0xff]  ;;  %v394_v35 = vld [vmem:[#allocation2 + $0x110] sm:$0xff] }
  0x8a   :  { %920 = vmatprep.subr.bf16.mxu0 %v377_v24  ;;  %1084 = vmatprep.subr.bf16.mxu1 %v379_v25  ;;  %v401_v36 = vld [vmem:[#allocation2 + $0x148] sm:$0xff]  ;;  %v403_v37 = vld [vmem:[#allocation2 + $0x158] sm:$0xff]  ;;  %v400_v38 = vld [vmem:[#allocation2 + $0x140] sm:$0xff] }
  0x8b   :  { %v402_v39 = vld [vmem:[#allocation2 + $0x150] sm:$0xff]  ;;  %v409_v40 = vld [vmem:[#allocation2 + $0x188] sm:$0xff]  ;;  %v411_v41 = vld [vmem:[#allocation2 + $0x198] sm:$0xff] }
  0x8c   :  { %v408_v42 = vld [vmem:[#allocation2 + $0x180] sm:$0xff]  ;;  %v410_v43 = vld [vmem:[#allocation2 + $0x190] sm:$0xff]  ;;  %v417_v44 = vld [vmem:[#allocation2 + $0x1c8] sm:$0xff] }
  0x8d   :  { %921 = vmatpush1.bf16.msra.mxu0 %v376_v26  ;;  %1085 = vmatpush1.bf16.msra.mxu1 %v378_v27  ;;  %v419_v45 = vld [vmem:[#allocation2 + $0x1d8] sm:$0xff]  ;;  %v416_v46 = vld [vmem:[#allocation2 + $0x1c0] sm:$0xff]  ;;  %v418_v47 = vld [vmem:[#allocation2 + $0x1d0] sm:$0xff] }
  0x8e   :  { %922 = vmatprep.subr.bf16.mxu0 %v385_v28  ;;  %1086 = vmatprep.subr.bf16.mxu1 %v387_v29  ;;  %v425_v48 = vld [vmem:[#allocation2 + $0x208] sm:$0xff]  ;;  %v427_v49 = vld [vmem:[#allocation2 + $0x218] sm:$0xff]  ;;  %v424_v50 = vld [vmem:[#allocation2 + $0x200] sm:$0xff] }
  0x8f   :  { %v426_v51 = vld [vmem:[#allocation2 + $0x210] sm:$0xff]  ;;  %v433_v52 = vld [vmem:[#allocation2 + $0x248] sm:$0xff]  ;;  %v435_v53 = vld [vmem:[#allocation2 + $0x258] sm:$0xff] }
  0x90   :  { %v432_v54 = vld [vmem:[#allocation2 + $0x240] sm:$0xff]  ;;  %v434_v55 = vld [vmem:[#allocation2 + $0x250] sm:$0xff]  ;;  %v441_v56 = vld [vmem:[#allocation2 + $0x288] sm:$0xff] }
  0x91   :  { %923 = vmatpush1.bf16.msra.mxu0 %v384_v30  ;;  %1087 = vmatpush1.bf16.msra.mxu1 %v386_v31  ;;  %v443_v57 = vld [vmem:[#allocation2 + $0x298] sm:$0xff]  ;;  %v440_v58 = vld [vmem:[#allocation2 + $0x280] sm:$0xff]  ;;  %v442_v59 = vld [vmem:[#allocation2 + $0x290] sm:$0xff] }
  0x92   :  { %924 = vmatprep.subr.bf16.mxu0 %v393_v32  ;;  %1088 = vmatprep.subr.bf16.mxu1 %v395_v33  ;;  %v449_v60 = vld [vmem:[#allocation2 + $0x2c8] sm:$0xff]  ;;  %v451_v61 = vld [vmem:[#allocation2 + $0x2d8] sm:$0xff]  ;;  %v448_v62 = vld [vmem:[#allocation2 + $0x2c0] sm:$0xff] }
  0x93   :  { %v450_v63 = vld [vmem:[#allocation2 + $0x2d0] sm:$0xff]  ;;  %v457_v0 = vld [vmem:[#allocation2 + $0x308] sm:$0xff]  ;;  %v459_v1 = vld [vmem:[#allocation2 + $0x318] sm:$0xff] }
  0x94   :  { %v456_v2 = vld [vmem:[#allocation2 + $0x300] sm:$0xff]  ;;  %v458_v3 = vld [vmem:[#allocation2 + $0x310] sm:$0xff]  ;;  %v465_v4 = vld [vmem:[#allocation2 + $0x348] sm:$0xff] }
  0x95   :  { %925 = vmatpush1.bf16.msra.mxu0 %v392_v34  ;;  %1089 = vmatpush1.bf16.msra.mxu1 %v394_v35  ;;  %v467_v5 = vld [vmem:[#allocation2 + $0x358] sm:$0xff]  ;;  %v464_v9 = vld [vmem:[#allocation2 + $0x340] sm:$0xff]  ;;  %v466_v10 = vld [vmem:[#allocation2 + $0x350] sm:$0xff] }
  0x96   :  { %926 = vmatprep.subr.bf16.mxu0 %v401_v36  ;;  %1090 = vmatprep.subr.bf16.mxu1 %v403_v37  ;;  %v473_v16 = vld [vmem:[#allocation2 + $0x388] sm:$0xff]  ;;  %v475_v17 = vld [vmem:[#allocation2 + $0x398] sm:$0xff]  ;;  %v472_v18 = vld [vmem:[#allocation2 + $0x380] sm:$0xff] }
  0x97   :  { %v474_v19 = vld [vmem:[#allocation2 + $0x390] sm:$0xff]  ;;  %v481_v20 = vld [vmem:[#allocation2 + $0x3c8] sm:$0xff]  ;;  %v483_v21 = vld [vmem:[#allocation2 + $0x3d8] sm:$0xff] }
  0x98   :  { %v480_v22 = vld [vmem:[#allocation2 + $0x3c0] sm:$0xff]  ;;  %v482_v23 = vld [vmem:[#allocation2 + $0x3d0] sm:$0xff]  ;;  %v489_v24 = vld [vmem:[#allocation2 + $0x408] sm:$0xff] }
  0x99   :  { %927 = vmatpush1.bf16.msra.mxu0 %v400_v38  ;;  %1091 = vmatpush1.bf16.msra.mxu1 %v402_v39  ;;  %v491_v25 = vld [vmem:[#allocation2 + $0x418] sm:$0xff]  ;;  %v488_v26 = vld [vmem:[#allocation2 + $0x400] sm:$0xff]  ;;  %v490_v27 = vld [vmem:[#allocation2 + $0x410] sm:$0xff] }
  0x9a   :  { %928 = vmatprep.subr.bf16.mxu0 %v409_v40  ;;  %1092 = vmatprep.subr.bf16.mxu1 %v411_v41  ;;  %v497_v28 = vld [vmem:[#allocation2 + $0x448] sm:$0xff]  ;;  %v499_v29 = vld [vmem:[#allocation2 + $0x458] sm:$0xff]  ;;  %v496_v30 = vld [vmem:[#allocation2 + $0x440] sm:$0xff] }
  0x9b   :  { %v498_v31 = vld [vmem:[#allocation2 + $0x450] sm:$0xff]  ;;  %v505_v32 = vld [vmem:[#allocation2 + $0x488] sm:$0xff]  ;;  %v507_v33 = vld [vmem:[#allocation2 + $0x498] sm:$0xff] }
  0x9c   :  { %v504_v34 = vld [vmem:[#allocation2 + $0x480] sm:$0xff]  ;;  %v506_v35 = vld [vmem:[#allocation2 + $0x490] sm:$0xff]  ;;  %v513_v36 = vld [vmem:[#allocation2 + $0x4c8] sm:$0xff] }
  0x9d   :  { %929 = vmatpush1.bf16.msra.mxu0 %v408_v42  ;;  %1093 = vmatpush1.bf16.msra.mxu1 %v410_v43  ;;  %v515_v37 = vld [vmem:[#allocation2 + $0x4d8] sm:$0xff]  ;;  %v512_v38 = vld [vmem:[#allocation2 + $0x4c0] sm:$0xff]  ;;  %v514_v39 = vld [vmem:[#allocation2 + $0x4d0] sm:$0xff] }
  0x9e   :  { %930 = vmatprep.subr.bf16.mxu0 %v417_v44  ;;  %1094 = vmatprep.subr.bf16.mxu1 %v419_v45  ;;  %v521_v40 = vld [vmem:[#allocation2 + $0x508] sm:$0xff]  ;;  %v523_v41 = vld [vmem:[#allocation2 + $0x518] sm:$0xff]  ;;  %v520_v42 = vld [vmem:[#allocation2 + $0x500] sm:$0xff] }
  0x9f   :  { %v522_v43 = vld [vmem:[#allocation2 + $0x510] sm:$0xff]  ;;  %v529_v44 = vld [vmem:[#allocation2 + $0x548] sm:$0xff]  ;;  %v531_v45 = vld [vmem:[#allocation2 + $0x558] sm:$0xff] }
  0xa1   :  { %931 = vmatpush1.bf16.msra.mxu0 %v416_v46  ;;  %1095 = vmatpush1.bf16.msra.mxu1 %v418_v47  ;;  %v528_v46 = vld [vmem:[#allocation2 + $0x540] sm:$0xff]  ;;  %v530_v47 = vld [vmem:[#allocation2 + $0x550] sm:$0xff] }
  0xa2   :  { %932 = vmatprep.subr.bf16.mxu0 %v425_v48  ;;  %1096 = vmatprep.subr.bf16.mxu1 %v427_v49  ;;  %v537_v48 = vld [vmem:[#allocation2 + $0x588] sm:$0xff]  ;;  %v539_v49 = vld [vmem:[#allocation2 + $0x598] sm:$0xff] }
  0xa5   :  { %933 = vmatpush1.bf16.msra.mxu0 %v424_v50  ;;  %1097 = vmatpush1.bf16.msra.mxu1 %v426_v51  ;;  %v536_v50 = vld [vmem:[#allocation2 + $0x580] sm:$0xff]  ;;  %v538_v51 = vld [vmem:[#allocation2 + $0x590] sm:$0xff] }
  0xa6   :  { %934 = vmatprep.subr.bf16.mxu0 %v433_v52  ;;  %1098 = vmatprep.subr.bf16.mxu1 %v435_v53  ;;  %v545_v52 = vld [vmem:[#allocation2 + $0x5c8] sm:$0xff]  ;;  %v547_v53 = vld [vmem:[#allocation2 + $0x5d8] sm:$0xff] }
  0xa9   :  { %935 = vmatpush1.bf16.msra.mxu0 %v432_v54  ;;  %1099 = vmatpush1.bf16.msra.mxu1 %v434_v55  ;;  %v544_v54 = vld [vmem:[#allocation2 + $0x5c0] sm:$0xff]  ;;  %v546_v55 = vld [vmem:[#allocation2 + $0x5d0] sm:$0xff] }
  0xaa   :  { %936 = vmatprep.subr.bf16.mxu0 %v441_v56  ;;  %1100 = vmatprep.subr.bf16.mxu1 %v443_v57  ;;  %v553_v56 = vld [vmem:[#allocation2 + $0x608] sm:$0xff]  ;;  %v555_v57 = vld [vmem:[#allocation2 + $0x618] sm:$0xff] }
  0xad   :  { %937 = vmatpush1.bf16.msra.mxu0 %v440_v58  ;;  %1101 = vmatpush1.bf16.msra.mxu1 %v442_v59  ;;  %v552_v58 = vld [vmem:[#allocation2 + $0x600] sm:$0xff]  ;;  %v554_v59 = vld [vmem:[#allocation2 + $0x610] sm:$0xff] }
  0xae   :  { %938 = vmatprep.subr.bf16.mxu0 %v449_v60  ;;  %1102 = vmatprep.subr.bf16.mxu1 %v451_v61  ;;  %v561_v60 = vld [vmem:[#allocation2 + $0x648] sm:$0xff]  ;;  %v563_v61 = vld [vmem:[#allocation2 + $0x658] sm:$0xff] }
  0xb1   :  { %939 = vmatpush1.bf16.msra.mxu0 %v448_v62  ;;  %1103 = vmatpush1.bf16.msra.mxu1 %v450_v63  ;;  %v560_v62 = vld [vmem:[#allocation2 + $0x640] sm:$0xff]  ;;  %v562_v63 = vld [vmem:[#allocation2 + $0x650] sm:$0xff] }
  0xb2   :  { %940 = vmatprep.subr.bf16.mxu0 %v457_v0  ;;  %1104 = vmatprep.subr.bf16.mxu1 %v459_v1  ;;  %v569_v0 = vld [vmem:[#allocation2 + $0x688] sm:$0xff]  ;;  %v571_v1 = vld [vmem:[#allocation2 + $0x698] sm:$0xff] }
  0xb5   :  { %941 = vmatpush1.bf16.msra.mxu0 %v456_v2  ;;  %1105 = vmatpush1.bf16.msra.mxu1 %v458_v3  ;;  %v568_v2 = vld [vmem:[#allocation2 + $0x680] sm:$0xff]  ;;  %v570_v3 = vld [vmem:[#allocation2 + $0x690] sm:$0xff] }
  0xb6   :  { %942 = vmatprep.subr.bf16.mxu0 %v465_v4  ;;  %1106 = vmatprep.subr.bf16.mxu1 %v467_v5  ;;  %v577_v4 = vld [vmem:[#allocation2 + $0x6c8] sm:$0xff]  ;;  %v579_v5 = vld [vmem:[#allocation2 + $0x6d8] sm:$0xff] }
  0xb9   :  { %943 = vmatpush1.bf16.msra.mxu0 %v464_v9  ;;  %1107 = vmatpush1.bf16.msra.mxu1 %v466_v10  ;;  %v576_v9 = vld [vmem:[#allocation2 + $0x6c0] sm:$0xff]  ;;  %v578_v10 = vld [vmem:[#allocation2 + $0x6d0] sm:$0xff] }
  0xba   :  { %944 = vmatprep.subr.bf16.mxu0 %v473_v16  ;;  %1108 = vmatprep.subr.bf16.mxu1 %v475_v17  ;;  %v585_v16 = vld [vmem:[#allocation2 + $0x708] sm:$0xff]  ;;  %v587_v17 = vld [vmem:[#allocation2 + $0x718] sm:$0xff] }
  0xbd   :  { %945 = vmatpush1.bf16.msra.mxu0 %v472_v18  ;;  %1109 = vmatpush1.bf16.msra.mxu1 %v474_v19  ;;  %v584_v18 = vld [vmem:[#allocation2 + $0x700] sm:$0xff]  ;;  %v586_v19 = vld [vmem:[#allocation2 + $0x710] sm:$0xff] }
  0xbe   :  { %946 = vmatprep.subr.bf16.mxu0 %v481_v20  ;;  %1110 = vmatprep.subr.bf16.mxu1 %v483_v21  ;;  %v593_v20 = vld [vmem:[#allocation2 + $0x748] sm:$0xff]  ;;  %v595_v21 = vld [vmem:[#allocation2 + $0x758] sm:$0xff] }
  0xc1   :  { %947 = vmatpush1.bf16.msra.mxu0 %v480_v22  ;;  %1111 = vmatpush1.bf16.msra.mxu1 %v482_v23  ;;  %v592_v22 = vld [vmem:[#allocation2 + $0x740] sm:$0xff]  ;;  %v594_v23 = vld [vmem:[#allocation2 + $0x750] sm:$0xff] }
  0xc2   :  { %957 = vmatprep.subr.bf16.mxu0 %v489_v24  ;;  %1121 = vmatprep.subr.bf16.mxu1 %v491_v25  ;;  %v601_v24 = vld [vmem:[#allocation2 + $0x788] sm:$0xff]  ;;  %v603_v25 = vld [vmem:[#allocation2 + $0x798] sm:$0xff] }
  0xc4   :  { %949 = vmatmul.mubr.bf16.vlgmr.msra.gmra.mrb[0].mxu0 %v6958_v6  ;;  %1113 = vmatmul.mubr.bf16.vlgmr.msra.gmra.mrb[0].mxu1 %v6958_v6 }
  0xc5   :  { %958 = vmatpush1.bf16.msra.mxu0 %v488_v26  ;;  %1122 = vmatpush1.bf16.msra.mxu1 %v490_v27  ;;  %v600_v26 = vld [vmem:[#allocation2 + $0x780] sm:$0xff]  ;;  %v602_v27 = vld [vmem:[#allocation2 + $0x790] sm:$0xff] }
  0xc6   :  { %959 = vmatprep.subr.bf16.mxu0 %v497_v28  ;;  %1123 = vmatprep.subr.bf16.mxu1 %v499_v29  ;;  %v609_v28 = vld [vmem:[#allocation2 + $0x7c8] sm:$0xff]  ;;  %v611_v29 = vld [vmem:[#allocation2 + $0x7d8] sm:$0xff] }
  0xc7   :  { %989 = vmatprep.mubr.bf16.mxu0 %v6970_v11  ;;  %1153 = vmatprep.mubr.bf16.mxu1 %v6970_v11 }
  0xc9   :  { %960 = vmatpush1.bf16.msra.mxu0 %v496_v30  ;;  %1124 = vmatpush1.bf16.msra.mxu1 %v498_v31  ;;  %v608_v30 = vld [vmem:[#allocation2 + $0x7c0] sm:$0xff]  ;;  %v610_v31 = vld [vmem:[#allocation2 + $0x7d0] sm:$0xff] }
  0xca   :  { %961 = vmatprep.subr.bf16.mxu0 %v505_v32  ;;  %1125 = vmatprep.subr.bf16.mxu1 %v507_v33  ;;  %v617_v32 = vld [vmem:[#allocation2 + $0x808] sm:$0xff]  ;;  %v619_v33 = vld [vmem:[#allocation2 + $0x818] sm:$0xff] }
  0xcd   :  { %962 = vmatpush1.bf16.msra.mxu0 %v504_v34  ;;  %1126 = vmatpush1.bf16.msra.mxu1 %v506_v35  ;;  %v616_v34 = vld [vmem:[#allocation2 + $0x800] sm:$0xff]  ;;  %v618_v35 = vld [vmem:[#allocation2 + $0x810] sm:$0xff] }
  0xce   :  { %963 = vmatprep.subr.bf16.mxu0 %v513_v36  ;;  %1127 = vmatprep.subr.bf16.mxu1 %v515_v37  ;;  %v625_v36 = vld [vmem:[#allocation2 + $0x848] sm:$0xff]  ;;  %v627_v37 = vld [vmem:[#allocation2 + $0x858] sm:$0xff] }
  0xd1   :  { %964 = vmatpush1.bf16.msra.mxu0 %v512_v38  ;;  %1128 = vmatpush1.bf16.msra.mxu1 %v514_v39  ;;  %v624_v38 = vld [vmem:[#allocation2 + $0x840] sm:$0xff]  ;;  %v626_v39 = vld [vmem:[#allocation2 + $0x850] sm:$0xff] }
  0xd2   :  { %965 = vmatprep.subr.bf16.mxu0 %v521_v40  ;;  %1129 = vmatprep.subr.bf16.mxu1 %v523_v41  ;;  %v633_v40 = vld [vmem:[#allocation2 + $0x888] sm:$0xff]  ;;  %v635_v41 = vld [vmem:[#allocation2 + $0x898] sm:$0xff] }
  0xd5   :  { %966 = vmatpush1.bf16.msra.mxu0 %v520_v42  ;;  %1130 = vmatpush1.bf16.msra.mxu1 %v522_v43  ;;  %v632_v42 = vld [vmem:[#allocation2 + $0x880] sm:$0xff]  ;;  %v634_v43 = vld [vmem:[#allocation2 + $0x890] sm:$0xff] }
  0xd6   :  { %967 = vmatprep.subr.bf16.mxu0 %v529_v44  ;;  %1131 = vmatprep.subr.bf16.mxu1 %v531_v45  ;;  %v641_v44 = vld [vmem:[#allocation2 + $0x8c8] sm:$0xff]  ;;  %v643_v45 = vld [vmem:[#allocation2 + $0x8d8] sm:$0xff] }
  0xd9   :  { %968 = vmatpush1.bf16.msra.mxu0 %v528_v46  ;;  %1132 = vmatpush1.bf16.msra.mxu1 %v530_v47  ;;  %v640_v46 = vld [vmem:[#allocation2 + $0x8c0] sm:$0xff]  ;;  %v642_v47 = vld [vmem:[#allocation2 + $0x8d0] sm:$0xff] }
  0xda   :  { %969 = vmatprep.subr.bf16.mxu0 %v537_v48  ;;  %1133 = vmatprep.subr.bf16.mxu1 %v539_v49  ;;  %v649_v48 = vld [vmem:[#allocation2 + $0x908] sm:$0xff]  ;;  %v651_v49 = vld [vmem:[#allocation2 + $0x918] sm:$0xff] }
  0xdd   :  { %970 = vmatpush1.bf16.msra.mxu0 %v536_v50  ;;  %1134 = vmatpush1.bf16.msra.mxu1 %v538_v51  ;;  %v648_v50 = vld [vmem:[#allocation2 + $0x900] sm:$0xff]  ;;  %v650_v51 = vld [vmem:[#allocation2 + $0x910] sm:$0xff] }
  0xde   :  { %971 = vmatprep.subr.bf16.mxu0 %v545_v52  ;;  %1135 = vmatprep.subr.bf16.mxu1 %v547_v53  ;;  %v657_v52 = vld [vmem:[#allocation2 + $0x948] sm:$0xff]  ;;  %v659_v53 = vld [vmem:[#allocation2 + $0x958] sm:$0xff] }
  0xe1   :  { %972 = vmatpush1.bf16.msra.mxu0 %v544_v54  ;;  %1136 = vmatpush1.bf16.msra.mxu1 %v546_v55  ;;  %v656_v54 = vld [vmem:[#allocation2 + $0x940] sm:$0xff]  ;;  %v658_v55 = vld [vmem:[#allocation2 + $0x950] sm:$0xff] }
  0xe2   :  { %973 = vmatprep.subr.bf16.mxu0 %v553_v56  ;;  %1137 = vmatprep.subr.bf16.mxu1 %v555_v57  ;;  %v665_v56 = vld [vmem:[#allocation2 + $0x988] sm:$0xff]  ;;  %v667_v57 = vld [vmem:[#allocation2 + $0x998] sm:$0xff] }
  0xe5   :  { %974 = vmatpush1.bf16.msra.mxu0 %v552_v58  ;;  %1138 = vmatpush1.bf16.msra.mxu1 %v554_v59  ;;  %v664_v58 = vld [vmem:[#allocation2 + $0x980] sm:$0xff]  ;;  %v666_v59 = vld [vmem:[#allocation2 + $0x990] sm:$0xff] }
  0xe6   :  { %975 = vmatprep.subr.bf16.mxu0 %v561_v60  ;;  %1139 = vmatprep.subr.bf16.mxu1 %v563_v61  ;;  %v673_v60 = vld [vmem:[#allocation2 + $0x9c8] sm:$0xff]  ;;  %v675_v61 = vld [vmem:[#allocation2 + $0x9d8] sm:$0xff] }
  0xe9   :  { %976 = vmatpush1.bf16.msra.mxu0 %v560_v62  ;;  %1140 = vmatpush1.bf16.msra.mxu1 %v562_v63  ;;  %v672_v62 = vld [vmem:[#allocation2 + $0x9c0] sm:$0xff]  ;;  %v674_v63 = vld [vmem:[#allocation2 + $0x9d0] sm:$0xff] }
  0xea   :  { %977 = vmatprep.subr.bf16.mxu0 %v569_v0  ;;  %1141 = vmatprep.subr.bf16.mxu1 %v571_v1  ;;  %v681_v0 = vld [vmem:[#allocation2 + $0xa08] sm:$0xff]  ;;  %v683_v1 = vld [vmem:[#allocation2 + $0xa18] sm:$0xff] }
  0xed   :  { %978 = vmatpush1.bf16.msra.mxu0 %v568_v2  ;;  %1142 = vmatpush1.bf16.msra.mxu1 %v570_v3  ;;  %v680_v2 = vld [vmem:[#allocation2 + $0xa00] sm:$0xff]  ;;  %v682_v3 = vld [vmem:[#allocation2 + $0xa10] sm:$0xff] }
  0xee   :  { %979 = vmatprep.subr.bf16.mxu0 %v577_v4  ;;  %1143 = vmatprep.subr.bf16.mxu1 %v579_v5  ;;  %v689_v4 = vld [vmem:[#allocation2 + $0xa48] sm:$0xff]  ;;  %v691_v5 = vld [vmem:[#allocation2 + $0xa58] sm:$0xff] }
  0xf1   :  { %980 = vmatpush1.bf16.msra.mxu0 %v576_v9  ;;  %1144 = vmatpush1.bf16.msra.mxu1 %v578_v10  ;;  %v688_v9 = vld [vmem:[#allocation2 + $0xa40] sm:$0xff]  ;;  %v690_v10 = vld [vmem:[#allocation2 + $0xa50] sm:$0xff] }
  0xf2   :  { %981 = vmatprep.subr.bf16.mxu0 %v585_v16  ;;  %1145 = vmatprep.subr.bf16.mxu1 %v587_v17  ;;  %v697_v16 = vld [vmem:[#allocation2 + $0xa88] sm:$0xff]  ;;  %v699_v17 = vld [vmem:[#allocation2 + $0xa98] sm:$0xff] }
  0xf5   :  { %982 = vmatpush1.bf16.msra.mxu0 %v584_v18  ;;  %1146 = vmatpush1.bf16.msra.mxu1 %v586_v19  ;;  %v696_v18 = vld [vmem:[#allocation2 + $0xa80] sm:$0xff]  ;;  %v698_v19 = vld [vmem:[#allocation2 + $0xa90] sm:$0xff] }
  0xf6   :  { %983 = vmatprep.subr.bf16.mxu0 %v593_v20  ;;  %1147 = vmatprep.subr.bf16.mxu1 %v595_v21  ;;  %v705_v20 = vld [vmem:[#allocation2 + $0xac8] sm:$0xff]  ;;  %v707_v21 = vld [vmem:[#allocation2 + $0xad8] sm:$0xff] }
  0xf9   :  { %984 = vmatpush1.bf16.msra.mxu0 %v592_v22  ;;  %1148 = vmatpush1.bf16.msra.mxu1 %v594_v23  ;;  %v704_v22 = vld [vmem:[#allocation2 + $0xac0] sm:$0xff]  ;;  %v706_v23 = vld [vmem:[#allocation2 + $0xad0] sm:$0xff] }
  0xfa   :  { %985 = vmatprep.subr.bf16.mxu0 %v601_v24  ;;  %1149 = vmatprep.subr.bf16.mxu1 %v603_v25  ;;  %v713_v24 = vld [vmem:[#allocation2 + $0xb08] sm:$0xff]  ;;  %v715_v25 = vld [vmem:[#allocation2 + $0xb18] sm:$0xff] }
  0xfd   :  { %986 = vmatpush1.bf16.msra.mxu0 %v600_v26  ;;  %1150 = vmatpush1.bf16.msra.mxu1 %v602_v27  ;;  %v712_v26 = vld [vmem:[#allocation2 + $0xb00] sm:$0xff]  ;;  %v714_v27 = vld [vmem:[#allocation2 + $0xb10] sm:$0xff] }
  0xfe   :  { %987 = vmatprep.subr.bf16.mxu0 %v609_v28  ;;  %1151 = vmatprep.subr.bf16.mxu1 %v611_v29  ;;  %v721_v28 = vld [vmem:[#allocation2 + $0xb48] sm:$0xff]  ;;  %v723_v29 = vld [vmem:[#allocation2 + $0xb58] sm:$0xff] }
 0x101   :  { %988 = vmatpush1.bf16.msra.mxu0 %v608_v30  ;;  %1152 = vmatpush1.bf16.msra.mxu1 %v610_v31  ;;  %v720_v30 = vld [vmem:[#allocation2 + $0xb40] sm:$0xff]  ;;  %v722_v31 = vld [vmem:[#allocation2 + $0xb50] sm:$0xff] }
 0x102   :  { %998 = vmatprep.subr.bf16.mxu0 %v617_v32  ;;  %1162 = vmatprep.subr.bf16.mxu1 %v619_v33  ;;  %v729_v32 = vld [vmem:[#allocation2 + $0xb88] sm:$0xff]  ;;  %v731_v33 = vld [vmem:[#allocation2 + $0xb98] sm:$0xff] }
 0x104   :  { %990 = vmatmul.mubr.bf16.vlgmr.msra.gmra.mrb[0].mxu0 %v6962_v8  ;;  %1154 = vmatmul.mubr.bf16.vlgmr.msra.gmra.mrb[0].mxu1 %v6962_v8 }
 0x105   :  { %999 = vmatpush1.bf16.msra.mxu0 %v616_v34  ;;  %1163 = vmatpush1.bf16.msra.mxu1 %v618_v35  ;;  %v728_v34 = vld [vmem:[#allocation2 + $0xb80] sm:$0xff]  ;;  %v730_v35 = vld [vmem:[#allocation2 + $0xb90] sm:$0xff] }
 0x106   :  { %1000 = vmatprep.subr.bf16.mxu0 %v625_v36  ;;  %1164 = vmatprep.subr.bf16.mxu1 %v627_v37  ;;  %v737_v36 = vld [vmem:[#allocation2 + $0xbc8] sm:$0xff]  ;;  %v739_v37 = vld [vmem:[#allocation2 + $0xbd8] sm:$0xff] }
 0x107   :  { %1030 = vmatprep.mubr.bf16.mxu0 %v6974_v13  ;;  %1194 = vmatprep.mubr.bf16.mxu1 %v6974_v13 }
 0x109   :  { %1001 = vmatpush1.bf16.msra.mxu0 %v624_v38  ;;  %1165 = vmatpush1.bf16.msra.mxu1 %v626_v39  ;;  %v736_v38 = vld [vmem:[#allocation2 + $0xbc0] sm:$0xff]  ;;  %v738_v39 = vld [vmem:[#allocation2 + $0xbd0] sm:$0xff] }
 0x10a   :  { %1002 = vmatprep.subr.bf16.mxu0 %v633_v40  ;;  %1166 = vmatprep.subr.bf16.mxu1 %v635_v41  ;;  %v745_v40 = vld [vmem:[#allocation2 + $0xc08] sm:$0xff]  ;;  %v747_v41 = vld [vmem:[#allocation2 + $0xc18] sm:$0xff] }
 0x10d   :  { %1003 = vmatpush1.bf16.msra.mxu0 %v632_v42  ;;  %1167 = vmatpush1.bf16.msra.mxu1 %v634_v43  ;;  %v744_v42 = vld [vmem:[#allocation2 + $0xc00] sm:$0xff]  ;;  %v746_v43 = vld [vmem:[#allocation2 + $0xc10] sm:$0xff] }
 0x10e   :  { %1004 = vmatprep.subr.bf16.mxu0 %v641_v44  ;;  %1168 = vmatprep.subr.bf16.mxu1 %v643_v45  ;;  %v753_v44 = vld [vmem:[#allocation2 + $0xc48] sm:$0xff]  ;;  %v755_v45 = vld [vmem:[#allocation2 + $0xc58] sm:$0xff] }
 0x111   :  { %1005 = vmatpush1.bf16.msra.mxu0 %v640_v46  ;;  %1169 = vmatpush1.bf16.msra.mxu1 %v642_v47  ;;  %v752_v46 = vld [vmem:[#allocation2 + $0xc40] sm:$0xff]  ;;  %v754_v47 = vld [vmem:[#allocation2 + $0xc50] sm:$0xff] }
 0x112   :  { %1006 = vmatprep.subr.bf16.mxu0 %v649_v48  ;;  %1170 = vmatprep.subr.bf16.mxu1 %v651_v49  ;;  %v761_v48 = vld [vmem:[#allocation2 + $0xc88] sm:$0xff]  ;;  %v763_v49 = vld [vmem:[#allocation2 + $0xc98] sm:$0xff] }
 0x115   :  { %1007 = vmatpush1.bf16.msra.mxu0 %v648_v50  ;;  %1171 = vmatpush1.bf16.msra.mxu1 %v650_v51  ;;  %v760_v50 = vld [vmem:[#allocation2 + $0xc80] sm:$0xff]  ;;  %v762_v51 = vld [vmem:[#allocation2 + $0xc90] sm:$0xff] }
 0x116   :  { %1008 = vmatprep.subr.bf16.mxu0 %v657_v52  ;;  %1172 = vmatprep.subr.bf16.mxu1 %v659_v53  ;;  %v769_v52 = vld [vmem:[#allocation2 + $0xcc8] sm:$0xff]  ;;  %v771_v53 = vld [vmem:[#allocation2 + $0xcd8] sm:$0xff] }
 0x119   :  { %1009 = vmatpush1.bf16.msra.mxu0 %v656_v54  ;;  %1173 = vmatpush1.bf16.msra.mxu1 %v658_v55  ;;  %v768_v54 = vld [vmem:[#allocation2 + $0xcc0] sm:$0xff]  ;;  %v770_v55 = vld [vmem:[#allocation2 + $0xcd0] sm:$0xff] }
 0x11a   :  { %1010 = vmatprep.subr.bf16.mxu0 %v665_v56  ;;  %1174 = vmatprep.subr.bf16.mxu1 %v667_v57  ;;  %v777_v56 = vld [vmem:[#allocation2 + $0xd08] sm:$0xff]  ;;  %v779_v57 = vld [vmem:[#allocation2 + $0xd18] sm:$0xff] }
 0x11d   :  { %1011 = vmatpush1.bf16.msra.mxu0 %v664_v58  ;;  %1175 = vmatpush1.bf16.msra.mxu1 %v666_v59  ;;  %v776_v58 = vld [vmem:[#allocation2 + $0xd00] sm:$0xff]  ;;  %v778_v59 = vld [vmem:[#allocation2 + $0xd10] sm:$0xff] }
 0x11e   :  { %1012 = vmatprep.subr.bf16.mxu0 %v673_v60  ;;  %1176 = vmatprep.subr.bf16.mxu1 %v675_v61  ;;  %v785_v60 = vld [vmem:[#allocation2 + $0xd48] sm:$0xff]  ;;  %v787_v61 = vld [vmem:[#allocation2 + $0xd58] sm:$0xff] }
 0x121   :  { %1013 = vmatpush1.bf16.msra.mxu0 %v672_v62  ;;  %1177 = vmatpush1.bf16.msra.mxu1 %v674_v63  ;;  %v784_v62 = vld [vmem:[#allocation2 + $0xd40] sm:$0xff]  ;;  %v786_v63 = vld [vmem:[#allocation2 + $0xd50] sm:$0xff] }
 0x122   :  { %1014 = vmatprep.subr.bf16.mxu0 %v681_v0  ;;  %1178 = vmatprep.subr.bf16.mxu1 %v683_v1  ;;  %v793_v0 = vld [vmem:[#allocation2 + $0xd88] sm:$0xff]  ;;  %v795_v1 = vld [vmem:[#allocation2 + $0xd98] sm:$0xff] }
 0x125   :  { %1015 = vmatpush1.bf16.msra.mxu0 %v680_v2  ;;  %1179 = vmatpush1.bf16.msra.mxu1 %v682_v3  ;;  %v792_v2 = vld [vmem:[#allocation2 + $0xd80] sm:$0xff]  ;;  %v794_v3 = vld [vmem:[#allocation2 + $0xd90] sm:$0xff] }
 0x126   :  { %1016 = vmatprep.subr.bf16.mxu0 %v689_v4  ;;  %1180 = vmatprep.subr.bf16.mxu1 %v691_v5  ;;  %v801_v4 = vld [vmem:[#allocation2 + $0xdc8] sm:$0xff]  ;;  %v803_v5 = vld [vmem:[#allocation2 + $0xdd8] sm:$0xff] }
 0x129   :  { %1017 = vmatpush1.bf16.msra.mxu0 %v688_v9  ;;  %1181 = vmatpush1.bf16.msra.mxu1 %v690_v10  ;;  %v800_v9 = vld [vmem:[#allocation2 + $0xdc0] sm:$0xff]  ;;  %v802_v10 = vld [vmem:[#allocation2 + $0xdd0] sm:$0xff] }
 0x12a   :  { %1018 = vmatprep.subr.bf16.mxu0 %v697_v16  ;;  %1182 = vmatprep.subr.bf16.mxu1 %v699_v17  ;;  %v809_v16 = vld [vmem:[#allocation2 + $0xe08] sm:$0xff]  ;;  %v811_v17 = vld [vmem:[#allocation2 + $0xe18] sm:$0xff] }
 0x12d   :  { %1019 = vmatpush1.bf16.msra.mxu0 %v696_v18  ;;  %1183 = vmatpush1.bf16.msra.mxu1 %v698_v19  ;;  %v808_v18 = vld [vmem:[#allocation2 + $0xe00] sm:$0xff]  ;;  %v810_v19 = vld [vmem:[#allocation2 + $0xe10] sm:$0xff] }
 0x12e   :  { %1020 = vmatprep.subr.bf16.mxu0 %v705_v20  ;;  %1184 = vmatprep.subr.bf16.mxu1 %v707_v21  ;;  %v817_v20 = vld [vmem:[#allocation2 + $0xe48] sm:$0xff]  ;;  %v819_v21 = vld [vmem:[#allocation2 + $0xe58] sm:$0xff] }
 0x131   :  { %1021 = vmatpush1.bf16.msra.mxu0 %v704_v22  ;;  %1185 = vmatpush1.bf16.msra.mxu1 %v706_v23  ;;  %v816_v22 = vld [vmem:[#allocation2 + $0xe40] sm:$0xff]  ;;  %v818_v23 = vld [vmem:[#allocation2 + $0xe50] sm:$0xff] }
 0x132   :  { %1022 = vmatprep.subr.bf16.mxu0 %v713_v24  ;;  %1186 = vmatprep.subr.bf16.mxu1 %v715_v25  ;;  %v825_v24 = vld [vmem:[#allocation2 + $0xe88] sm:$0xff]  ;;  %v827_v25 = vld [vmem:[#allocation2 + $0xe98] sm:$0xff] }
 0x135   :  { %1023 = vmatpush1.bf16.msra.mxu0 %v712_v26  ;;  %1187 = vmatpush1.bf16.msra.mxu1 %v714_v27  ;;  %v824_v26 = vld [vmem:[#allocation2 + $0xe80] sm:$0xff]  ;;  %v826_v27 = vld [vmem:[#allocation2 + $0xe90] sm:$0xff] }
 0x136   :  { %1024 = vmatprep.subr.bf16.mxu0 %v721_v28  ;;  %1188 = vmatprep.subr.bf16.mxu1 %v723_v29  ;;  %v833_v28 = vld [vmem:[#allocation2 + $0xec8] sm:$0xff]  ;;  %v835_v29 = vld [vmem:[#allocation2 + $0xed8] sm:$0xff] }
 0x139   :  { %1025 = vmatpush1.bf16.msra.mxu0 %v720_v30  ;;  %1189 = vmatpush1.bf16.msra.mxu1 %v722_v31  ;;  %v832_v30 = vld [vmem:[#allocation2 + $0xec0] sm:$0xff]  ;;  %v834_v31 = vld [vmem:[#allocation2 + $0xed0] sm:$0xff] }
 0x13a   :  { %1026 = vmatprep.subr.bf16.mxu0 %v729_v32  ;;  %1190 = vmatprep.subr.bf16.mxu1 %v731_v33  ;;  %v841_v32 = vld [vmem:[#allocation2 + $0xf08] sm:$0xff]  ;;  %v843_v33 = vld [vmem:[#allocation2 + $0xf18] sm:$0xff] }
 0x13d   :  { %1027 = vmatpush1.bf16.msra.mxu0 %v728_v34  ;;  %1191 = vmatpush1.bf16.msra.mxu1 %v730_v35  ;;  %v840_v34 = vld [vmem:[#allocation2 + $0xf00] sm:$0xff]  ;;  %v842_v35 = vld [vmem:[#allocation2 + $0xf10] sm:$0xff] }
 0x13e   :  { %1028 = vmatprep.subr.bf16.mxu0 %v737_v36  ;;  %1192 = vmatprep.subr.bf16.mxu1 %v739_v37  ;;  %v849_v36 = vld [vmem:[#allocation2 + $0xf48] sm:$0xff]  ;;  %v851_v37 = vld [vmem:[#allocation2 + $0xf58] sm:$0xff] }
 0x141   :  { %1029 = vmatpush1.bf16.msra.mxu0 %v736_v38  ;;  %1193 = vmatpush1.bf16.msra.mxu1 %v738_v39  ;;  %v848_v38 = vld [vmem:[#allocation2 + $0xf40] sm:$0xff]  ;;  %v850_v39 = vld [vmem:[#allocation2 + $0xf50] sm:$0xff] }
 0x142   :  { %1039 = vmatprep.subr.bf16.mxu0 %v745_v40  ;;  %1203 = vmatprep.subr.bf16.mxu1 %v747_v41  ;;  %v857_v40 = vld [vmem:[#allocation2 + $0xf88] sm:$0xff]  ;;  %v859_v41 = vld [vmem:[#allocation2 + $0xf98] sm:$0xff] }
 0x144   :  { %1031 = vmatmul.mubr.bf16.vlgmr.msra.gmra.mrb[0].mxu0 %v6972_v12  ;;  %1195 = vmatmul.mubr.bf16.vlgmr.msra.gmra.mrb[0].mxu1 %v6972_v12 }
 0x145   :  { %1040 = vmatpush1.bf16.msra.mxu0 %v744_v42  ;;  %1204 = vmatpush1.bf16.msra.mxu1 %v746_v43  ;;  %v856_v42 = vld [vmem:[#allocation2 + $0xf80] sm:$0xff]  ;;  %v858_v43 = vld [vmem:[#allocation2 + $0xf90] sm:$0xff] }
 0x146   :  { %1041 = vmatprep.subr.bf16.mxu0 %v753_v44  ;;  %1205 = vmatprep.subr.bf16.mxu1 %v755_v45  ;;  %v865_v44 = vld [vmem:[#allocation2 + $0xfc8] sm:$0xff]  ;;  %v867_v45 = vld [vmem:[#allocation2 + $0xfd8] sm:$0xff] }
 0x147   :  { %1071 = vmatprep.mubr.bf16.mxu0 %v6978_v15  ;;  %1235 = vmatprep.mubr.bf16.mxu1 %v6978_v15 }
 0x149   :  { %1042 = vmatpush1.bf16.msra.mxu0 %v752_v46  ;;  %1206 = vmatpush1.bf16.msra.mxu1 %v754_v47  ;;  %v864_v46 = vld [vmem:[#allocation2 + $0xfc0] sm:$0xff]  ;;  %v866_v47 = vld [vmem:[#allocation2 + $0xfd0] sm:$0xff] }
 0x14a   :  { %1043 = vmatprep.subr.bf16.mxu0 %v761_v48  ;;  %1207 = vmatprep.subr.bf16.mxu1 %v763_v49  ;;  %v365_v48 = vld [vmem:[#allocation2 + $0x28] sm:$0xff]  ;;  %v367_v49 = vld [vmem:[#allocation2 + $0x38] sm:$0xff] }
 0x14d   :  { %1044 = vmatpush1.bf16.msra.mxu0 %v760_v50  ;;  %1208 = vmatpush1.bf16.msra.mxu1 %v762_v51  ;;  %v364_v50 = vld [vmem:[#allocation2 + $0x20] sm:$0xff]  ;;  %v366_v51 = vld [vmem:[#allocation2 + $0x30] sm:$0xff] }
 0x14e   :  { %1045 = vmatprep.subr.bf16.mxu0 %v769_v52  ;;  %1209 = vmatprep.subr.bf16.mxu1 %v771_v53  ;;  %v373_v52 = vld [vmem:[#allocation2 + $0x68] sm:$0xff]  ;;  %v375_v53 = vld [vmem:[#allocation2 + $0x78] sm:$0xff] }
 0x151   :  { %1046 = vmatpush1.bf16.msra.mxu0 %v768_v54  ;;  %1210 = vmatpush1.bf16.msra.mxu1 %v770_v55  ;;  %v372_v54 = vld [vmem:[#allocation2 + $0x60] sm:$0xff]  ;;  %v374_v55 = vld [vmem:[#allocation2 + $0x70] sm:$0xff] }
 0x152   :  { %1047 = vmatprep.subr.bf16.mxu0 %v777_v56  ;;  %1211 = vmatprep.subr.bf16.mxu1 %v779_v57  ;;  %v381_v56 = vld [vmem:[#allocation2 + $0xa8] sm:$0xff]  ;;  %v383_v57 = vld [vmem:[#allocation2 + $0xb8] sm:$0xff] }
 0x155   :  { %1048 = vmatpush1.bf16.msra.mxu0 %v776_v58  ;;  %1212 = vmatpush1.bf16.msra.mxu1 %v778_v59  ;;  %v380_v58 = vld [vmem:[#allocation2 + $0xa0] sm:$0xff]  ;;  %v382_v59 = vld [vmem:[#allocation2 + $0xb0] sm:$0xff] }
 0x156   :  { %1049 = vmatprep.subr.bf16.mxu0 %v785_v60  ;;  %1213 = vmatprep.subr.bf16.mxu1 %v787_v61  ;;  %v389_v60 = vld [vmem:[#allocation2 + $0xe8] sm:$0xff]  ;;  %v391_v61 = vld [vmem:[#allocation2 + $0xf8] sm:$0xff] }
 0x159   :  { %1050 = vmatpush1.bf16.msra.mxu0 %v784_v62  ;;  %1214 = vmatpush1.bf16.msra.mxu1 %v786_v63  ;;  %v388_v62 = vld [vmem:[#allocation2 + $0xe0] sm:$0xff]  ;;  %v390_v63 = vld [vmem:[#allocation2 + $0xf0] sm:$0xff] }
 0x15a   :  { %1051 = vmatprep.subr.bf16.mxu0 %v793_v0  ;;  %1215 = vmatprep.subr.bf16.mxu1 %v795_v1  ;;  %v397_v0 = vld [vmem:[#allocation2 + $0x128] sm:$0xff]  ;;  %v399_v1 = vld [vmem:[#allocation2 + $0x138] sm:$0xff] }
 0x15d   :  { %1052 = vmatpush1.bf16.msra.mxu0 %v792_v2  ;;  %1216 = vmatpush1.bf16.msra.mxu1 %v794_v3  ;;  %v398_v2 = vld [vmem:[#allocation2 + $0x130] sm:$0xff]  ;;  %v405_v3 = vld [vmem:[#allocation2 + $0x168] sm:$0xff] }
 0x15e   :  { %1053 = vmatprep.subr.bf16.mxu0 %v801_v4  ;;  %1217 = vmatprep.subr.bf16.mxu1 %v803_v5  ;;  %v407_v4 = vld [vmem:[#allocation2 + $0x178] sm:$0xff]  ;;  %v404_v5 = vld [vmem:[#allocation2 + $0x160] sm:$0xff] }
 0x161   :  { %1054 = vmatpush1.bf16.msra.mxu0 %v800_v9  ;;  %1218 = vmatpush1.bf16.msra.mxu1 %v802_v10  ;;  %v406_v9 = vld [vmem:[#allocation2 + $0x170] sm:$0xff]  ;;  %v413_v10 = vld [vmem:[#allocation2 + $0x1a8] sm:$0xff] }
 0x162   :  { %1055 = vmatprep.subr.bf16.mxu0 %v809_v16  ;;  %1219 = vmatprep.subr.bf16.mxu1 %v811_v17  ;;  %v415_v16 = vld [vmem:[#allocation2 + $0x1b8] sm:$0xff]  ;;  %v412_v17 = vld [vmem:[#allocation2 + $0x1a0] sm:$0xff] }
 0x165   :  { %1056 = vmatpush1.bf16.msra.mxu0 %v808_v18  ;;  %1220 = vmatpush1.bf16.msra.mxu1 %v810_v19  ;;  %v414_v18 = vld [vmem:[#allocation2 + $0x1b0] sm:$0xff]  ;;  %v421_v19 = vld [vmem:[#allocation2 + $0x1e8] sm:$0xff] }
 0x166   :  { %1057 = vmatprep.subr.bf16.mxu0 %v817_v20  ;;  %1221 = vmatprep.subr.bf16.mxu1 %v819_v21  ;;  %v423_v20 = vld [vmem:[#allocation2 + $0x1f8] sm:$0xff]  ;;  %v420_v21 = vld [vmem:[#allocation2 + $0x1e0] sm:$0xff] }
 0x169   :  { %1058 = vmatpush1.bf16.msra.mxu0 %v816_v22  ;;  %1222 = vmatpush1.bf16.msra.mxu1 %v818_v23  ;;  %v422_v22 = vld [vmem:[#allocation2 + $0x1f0] sm:$0xff]  ;;  %v429_v23 = vld [vmem:[#allocation2 + $0x228] sm:$0xff] }
 0x16a   :  { %1059 = vmatprep.subr.bf16.mxu0 %v825_v24  ;;  %1223 = vmatprep.subr.bf16.mxu1 %v827_v25  ;;  %v431_v24 = vld [vmem:[#allocation2 + $0x238] sm:$0xff]  ;;  %v428_v25 = vld [vmem:[#allocation2 + $0x220] sm:$0xff] }
 0x16d   :  { %1060 = vmatpush1.bf16.msra.mxu0 %v824_v26  ;;  %1224 = vmatpush1.bf16.msra.mxu1 %v826_v27  ;;  %v430_v26 = vld [vmem:[#allocation2 + $0x230] sm:$0xff]  ;;  %v437_v27 = vld [vmem:[#allocation2 + $0x268] sm:$0xff] }
 0x16e   :  { %1061 = vmatprep.subr.bf16.mxu0 %v833_v28  ;;  %1225 = vmatprep.subr.bf16.mxu1 %v835_v29  ;;  %v439_v28 = vld [vmem:[#allocation2 + $0x278] sm:$0xff]  ;;  %v436_v29 = vld [vmem:[#allocation2 + $0x260] sm:$0xff] }
 0x171   :  { %1062 = vmatpush1.bf16.msra.mxu0 %v832_v30  ;;  %1226 = vmatpush1.bf16.msra.mxu1 %v834_v31  ;;  %v438_v30 = vld [vmem:[#allocation2 + $0x270] sm:$0xff]  ;;  %v445_v31 = vld [vmem:[#allocation2 + $0x2a8] sm:$0xff] }
 0x172   :  { %1063 = vmatprep.subr.bf16.mxu0 %v841_v32  ;;  %1227 = vmatprep.subr.bf16.mxu1 %v843_v33  ;;  %v447_v32 = vld [vmem:[#allocation2 + $0x2b8] sm:$0xff]  ;;  %v444_v33 = vld [vmem:[#allocation2 + $0x2a0] sm:$0xff] }
 0x175   :  { %1064 = vmatpush1.bf16.msra.mxu0 %v840_v34  ;;  %1228 = vmatpush1.bf16.msra.mxu1 %v842_v35  ;;  %v446_v34 = vld [vmem:[#allocation2 + $0x2b0] sm:$0xff]  ;;  %v453_v35 = vld [vmem:[#allocation2 + $0x2e8] sm:$0xff] }
 0x176   :  { %1065 = vmatprep.subr.bf16.mxu0 %v849_v36  ;;  %1229 = vmatprep.subr.bf16.mxu1 %v851_v37  ;;  %v455_v36 = vld [vmem:[#allocation2 + $0x2f8] sm:$0xff]  ;;  %v452_v37 = vld [vmem:[#allocation2 + $0x2e0] sm:$0xff] }
 0x179   :  { %1066 = vmatpush1.bf16.msra.mxu0 %v848_v38  ;;  %1230 = vmatpush1.bf16.msra.mxu1 %v850_v39  ;;  %v454_v38 = vld [vmem:[#allocation2 + $0x2f0] sm:$0xff]  ;;  %v461_v39 = vld [vmem:[#allocation2 + $0x328] sm:$0xff] }
 0x17a   :  { %1067 = vmatprep.subr.bf16.mxu0 %v857_v40  ;;  %1231 = vmatprep.subr.bf16.mxu1 %v859_v41  ;;  %v463_v40 = vld [vmem:[#allocation2 + $0x338] sm:$0xff]  ;;  %v460_v41 = vld [vmem:[#allocation2 + $0x320] sm:$0xff] }
 0x17d   :  { %1068 = vmatpush1.bf16.msra.mxu0 %v856_v42  ;;  %1232 = vmatpush1.bf16.msra.mxu1 %v858_v43  ;;  %v462_v42 = vld [vmem:[#allocation2 + $0x330] sm:$0xff]  ;;  %v469_v43 = vld [vmem:[#allocation2 + $0x368] sm:$0xff] }
 0x17e   :  { %1069 = vmatprep.subr.bf16.mxu0 %v865_v44  ;;  %1233 = vmatprep.subr.bf16.mxu1 %v867_v45  ;;  %v471_v44 = vld [vmem:[#allocation2 + $0x378] sm:$0xff]  ;;  %v468_v45 = vld [vmem:[#allocation2 + $0x360] sm:$0xff] }
 0x181   :  { %1070 = vmatpush1.bf16.msra.mxu0 %v864_v46  ;;  %1234 = vmatpush1.bf16.msra.mxu1 %v866_v47  ;;  %v470_v46 = vld [vmem:[#allocation2 + $0x370] sm:$0xff]  ;;  %v477_v47 = vld [vmem:[#allocation2 + $0x3a8] sm:$0xff] }
 0x182   :  { %1244 = vmatprep.subr.bf16.mxu0 %v365_v48  ;;  %1408 = vmatprep.subr.bf16.mxu1 %v367_v49  ;;  %v479_v48 = vld [vmem:[#allocation2 + $0x3b8] sm:$0xff]  ;;  %v476_v49 = vld [vmem:[#allocation2 + $0x3a0] sm:$0xff] }
 0x184   :  { %1072 = vmatmul.mubr.bf16.vlgmr.msra.gmra.mrb[0].mxu0 %v6976_v14  ;;  %1236 = vmatmul.mubr.bf16.vlgmr.msra.gmra.mrb[0].mxu1 %v6976_v14 }
 0x185   :  { %1245 = vmatpush1.bf16.msra.mxu0 %v364_v50  ;;  %1409 = vmatpush1.bf16.msra.mxu1 %v366_v51  ;;  %v478_v50 = vld [vmem:[#allocation2 + $0x3b0] sm:$0xff]  ;;  %v485_v51 = vld [vmem:[#allocation2 + $0x3e8] sm:$0xff] }
 0x186   :  { %1246 = vmatprep.subr.bf16.mxu0 %v373_v52  ;;  %1410 = vmatprep.subr.bf16.mxu1 %v375_v53  ;;  %v487_v52 = vld [vmem:[#allocation2 + $0x3f8] sm:$0xff]  ;;  %v484_v53 = vld [vmem:[#allocation2 + $0x3e0] sm:$0xff] }
 0x187   :  { %1276 = vmatprep.mubr.bf16.mxu0 %v6960_v7  ;;  %1440 = vmatprep.mubr.bf16.mxu1 %v6960_v7  ;;  %v396_v7 = vld [vmem:[#allocation2 + $0x120] sm:$0xff] }
 0x189   :  { %1247 = vmatpush1.bf16.msra.mxu0 %v372_v54  ;;  %1411 = vmatpush1.bf16.msra.mxu1 %v374_v55  ;;  %v486_v54 = vld [vmem:[#allocation2 + $0x3f0] sm:$0xff]  ;;  %v493_v55 = vld [vmem:[#allocation2 + $0x428] sm:$0xff] }
 0x18a   :  { %1248 = vmatprep.subr.bf16.mxu0 %v381_v56  ;;  %1412 = vmatprep.subr.bf16.mxu1 %v383_v57  ;;  %v495_v56 = vld [vmem:[#allocation2 + $0x438] sm:$0xff]  ;;  %v492_v57 = vld [vmem:[#allocation2 + $0x420] sm:$0xff] }
 0x18d   :  { %1249 = vmatpush1.bf16.msra.mxu0 %v380_v58  ;;  %1413 = vmatpush1.bf16.msra.mxu1 %v382_v59  ;;  %v494_v58 = vld [vmem:[#allocation2 + $0x430] sm:$0xff]  ;;  %v501_v59 = vld [vmem:[#allocation2 + $0x468] sm:$0xff] }
 0x18e   :  { %1250 = vmatprep.subr.bf16.mxu0 %v389_v60  ;;  %1414 = vmatprep.subr.bf16.mxu1 %v391_v61  ;;  %v503_v60 = vld [vmem:[#allocation2 + $0x478] sm:$0xff]  ;;  %v500_v61 = vld [vmem:[#allocation2 + $0x460] sm:$0xff] }
 0x191   :  { %1251 = vmatpush1.bf16.msra.mxu0 %v388_v62  ;;  %1415 = vmatpush1.bf16.msra.mxu1 %v390_v63  ;;  %v502_v62 = vld [vmem:[#allocation2 + $0x470] sm:$0xff]  ;;  %v509_v63 = vld [vmem:[#allocation2 + $0x4a8] sm:$0xff] }
 0x192   :  { %1252 = vmatprep.subr.bf16.mxu0 %v397_v0  ;;  %1416 = vmatprep.subr.bf16.mxu1 %v399_v1  ;;  %v511_v0 = vld [vmem:[#allocation2 + $0x4b8] sm:$0xff]  ;;  %v508_v1 = vld [vmem:[#allocation2 + $0x4a0] sm:$0xff] }
 0x195   :  { %1253 = vmatpush1.bf16.msra.mxu0 %v396_v7  ;;  %1417 = vmatpush1.bf16.msra.mxu1 %v398_v2  ;;  %v510_v7 = vld [vmem:[#allocation2 + $0x4b0] sm:$0xff]  ;;  %v517_v2 = vld [vmem:[#allocation2 + $0x4e8] sm:$0xff] }
 0x196   :  { %1254 = vmatprep.subr.bf16.mxu0 %v405_v3  ;;  %1418 = vmatprep.subr.bf16.mxu1 %v407_v4  ;;  %v516_v3 = vld [vmem:[#allocation2 + $0x4e0] sm:$0xff]  ;;  %v518_v4 = vld [vmem:[#allocation2 + $0x4f0] sm:$0xff] }
 0x199   :  { %1255 = vmatpush1.bf16.msra.mxu0 %v404_v5  ;;  %1419 = vmatpush1.bf16.msra.mxu1 %v406_v9  ;;  %v525_v5 = vld [vmem:[#allocation2 + $0x528] sm:$0xff]  ;;  %v527_v9 = vld [vmem:[#allocation2 + $0x538] sm:$0xff] }
 0x19a   :  { %1256 = vmatprep.subr.bf16.mxu0 %v413_v10  ;;  %1420 = vmatprep.subr.bf16.mxu1 %v415_v16  ;;  %v526_v10 = vld [vmem:[#allocation2 + $0x530] sm:$0xff]  ;;  %v533_v16 = vld [vmem:[#allocation2 + $0x568] sm:$0xff] }
 0x19d   :  { %1257 = vmatpush1.bf16.msra.mxu0 %v412_v17  ;;  %1421 = vmatpush1.bf16.msra.mxu1 %v414_v18  ;;  %v535_v17 = vld [vmem:[#allocation2 + $0x578] sm:$0xff]  ;;  %v532_v18 = vld [vmem:[#allocation2 + $0x560] sm:$0xff] }
 0x19e   :  { %1258 = vmatprep.subr.bf16.mxu0 %v421_v19  ;;  %1422 = vmatprep.subr.bf16.mxu1 %v423_v20  ;;  %v534_v19 = vld [vmem:[#allocation2 + $0x570] sm:$0xff]  ;;  %v541_v20 = vld [vmem:[#allocation2 + $0x5a8] sm:$0xff] }
 0x1a1   :  { %1259 = vmatpush1.bf16.msra.mxu0 %v420_v21  ;;  %1423 = vmatpush1.bf16.msra.mxu1 %v422_v22  ;;  %v543_v21 = vld [vmem:[#allocation2 + $0x5b8] sm:$0xff]  ;;  %v540_v22 = vld [vmem:[#allocation2 + $0x5a0] sm:$0xff] }
 0x1a2   :  { %1260 = vmatprep.subr.bf16.mxu0 %v429_v23  ;;  %1424 = vmatprep.subr.bf16.mxu1 %v431_v24  ;;  %v542_v23 = vld [vmem:[#allocation2 + $0x5b0] sm:$0xff]  ;;  %v549_v24 = vld [vmem:[#allocation2 + $0x5e8] sm:$0xff] }
 0x1a5   :  { %1261 = vmatpush1.bf16.msra.mxu0 %v428_v25  ;;  %1425 = vmatpush1.bf16.msra.mxu1 %v430_v26  ;;  %v551_v25 = vld [vmem:[#allocation2 + $0x5f8] sm:$0xff]  ;;  %v548_v26 = vld [vmem:[#allocation2 + $0x5e0] sm:$0xff] }
 0x1a6   :  { %1262 = vmatprep.subr.bf16.mxu0 %v437_v27  ;;  %1426 = vmatprep.subr.bf16.mxu1 %v439_v28  ;;  %v550_v27 = vld [vmem:[#allocation2 + $0x5f0] sm:$0xff]  ;;  %v557_v28 = vld [vmem:[#allocation2 + $0x628] sm:$0xff] }
 0x1a9   :  { %1263 = vmatpush1.bf16.msra.mxu0 %v436_v29  ;;  %1427 = vmatpush1.bf16.msra.mxu1 %v438_v30  ;;  %v559_v29 = vld [vmem:[#allocation2 + $0x638] sm:$0xff]  ;;  %v556_v30 = vld [vmem:[#allocation2 + $0x620] sm:$0xff] }
 0x1aa   :  { %1264 = vmatprep.subr.bf16.mxu0 %v445_v31  ;;  %1428 = vmatprep.subr.bf16.mxu1 %v447_v32  ;;  %v558_v31 = vld [vmem:[#allocation2 + $0x630] sm:$0xff]  ;;  %v565_v32 = vld [vmem:[#allocation2 + $0x668] sm:$0xff] }
 0x1ad   :  { %1265 = vmatpush1.bf16.msra.mxu0 %v444_v33  ;;  %1429 = vmatpush1.bf16.msra.mxu1 %v446_v34  ;;  %v567_v33 = vld [vmem:[#allocation2 + $0x678] sm:$0xff]  ;;  %v564_v34 = vld [vmem:[#allocation2 + $0x660] sm:$0xff] }
 0x1ae   :  { %1266 = vmatprep.subr.bf16.mxu0 %v453_v35  ;;  %1430 = vmatprep.subr.bf16.mxu1 %v455_v36  ;;  %v566_v35 = vld [vmem:[#allocation2 + $0x670] sm:$0xff]  ;;  %v573_v36 = vld [vmem:[#allocation2 + $0x6a8] sm:$0xff] }
 0x1b1   :  { %1267 = vmatpush1.bf16.msra.mxu0 %v452_v37  ;;  %1431 = vmatpush1.bf16.msra.mxu1 %v454_v38  ;;  %v575_v37 = vld [vmem:[#allocation2 + $0x6b8] sm:$0xff]  ;;  %v572_v38 = vld [vmem:[#allocation2 + $0x6a0] sm:$0xff] }
 0x1b2   :  { %1268 = vmatprep.subr.bf16.mxu0 %v461_v39  ;;  %1432 = vmatprep.subr.bf16.mxu1 %v463_v40  ;;  %v574_v39 = vld [vmem:[#allocation2 + $0x6b0] sm:$0xff]  ;;  %v581_v40 = vld [vmem:[#allocation2 + $0x6e8] sm:$0xff] }
 0x1b5   :  { %1269 = vmatpush1.bf16.msra.mxu0 %v460_v41  ;;  %1433 = vmatpush1.bf16.msra.mxu1 %v462_v42  ;;  %v583_v41 = vld [vmem:[#allocation2 + $0x6f8] sm:$0xff]  ;;  %v580_v42 = vld [vmem:[#allocation2 + $0x6e0] sm:$0xff] }
 0x1b6   :  { %1270 = vmatprep.subr.bf16.mxu0 %v469_v43  ;;  %1434 = vmatprep.subr.bf16.mxu1 %v471_v44  ;;  %v582_v43 = vld [vmem:[#allocation2 + $0x6f0] sm:$0xff]  ;;  %v589_v44 = vld [vmem:[#allocation2 + $0x728] sm:$0xff] }
 0x1b9   :  { %1271 = vmatpush1.bf16.msra.mxu0 %v468_v45  ;;  %1435 = vmatpush1.bf16.msra.mxu1 %v470_v46  ;;  %v591_v45 = vld [vmem:[#allocation2 + $0x738] sm:$0xff]  ;;  %v588_v46 = vld [vmem:[#allocation2 + $0x720] sm:$0xff] }
 0x1ba   :  { %1272 = vmatprep.subr.bf16.mxu0 %v477_v47  ;;  %1436 = vmatprep.subr.bf16.mxu1 %v479_v48  ;;  %v590_v47 = vld [vmem:[#allocation2 + $0x730] sm:$0xff]  ;;  %v597_v48 = vld [vmem:[#allocation2 + $0x768] sm:$0xff] }
 0x1bd   :  { %1273 = vmatpush1.bf16.msra.mxu0 %v476_v49  ;;  %1437 = vmatpush1.bf16.msra.mxu1 %v478_v50  ;;  %v599_v49 = vld [vmem:[#allocation2 + $0x778] sm:$0xff]  ;;  %v596_v50 = vld [vmem:[#allocation2 + $0x760] sm:$0xff] }
 0x1be   :  { %1274 = vmatprep.subr.bf16.mxu0 %v485_v51  ;;  %1438 = vmatprep.subr.bf16.mxu1 %v487_v52  ;;  %v598_v51 = vld [vmem:[#allocation2 + $0x770] sm:$0xff]  ;;  %v605_v52 = vld [vmem:[#allocation2 + $0x7a8] sm:$0xff] }
 0x1c1   :  { %1275 = vmatpush1.bf16.msra.mxu0 %v484_v53  ;;  %1439 = vmatpush1.bf16.msra.mxu1 %v486_v54  ;;  %v607_v53 = vld [vmem:[#allocation2 + $0x7b8] sm:$0xff]  ;;  %v604_v54 = vld [vmem:[#allocation2 + $0x7a0] sm:$0xff] }
 0x1c2   :  { %1285 = vmatprep.subr.bf16.mxu0 %v493_v55  ;;  %1449 = vmatprep.subr.bf16.mxu1 %v495_v56  ;;  %v606_v55 = vld [vmem:[#allocation2 + $0x7b0] sm:$0xff]  ;;  %v613_v56 = vld [vmem:[#allocation2 + $0x7e8] sm:$0xff] }
 0x1c4   :  { %1277 = vmatmul.mubr.bf16.vlgmr.msra.gmra.mrb[4].mxu0 %v6958_v6  ;;  %1441 = vmatmul.mubr.bf16.vlgmr.msra.gmra.mrb[4].mxu1 %v6958_v6  ;;  %v519_v6 = vld [vmem:[#allocation2 + $0x4f8] sm:$0xff] }
 0x1c5   :  { %1286 = vmatpush1.bf16.msra.mxu0 %v492_v57  ;;  %1450 = vmatpush1.bf16.msra.mxu1 %v494_v58  ;;  %v615_v57 = vld [vmem:[#allocation2 + $0x7f8] sm:$0xff]  ;;  %v612_v58 = vld [vmem:[#allocation2 + $0x7e0] sm:$0xff] }
 0x1c6   :  { %1287 = vmatprep.subr.bf16.mxu0 %v501_v59  ;;  %1451 = vmatprep.subr.bf16.mxu1 %v503_v60  ;;  %v614_v59 = vld [vmem:[#allocation2 + $0x7f0] sm:$0xff]  ;;  %v621_v60 = vld [vmem:[#allocation2 + $0x828] sm:$0xff] }
 0x1c7   :  { %1317 = vmatprep.mubr.bf16.mxu0 %v6970_v11  ;;  %1481 = vmatprep.mubr.bf16.mxu1 %v6970_v11  ;;  %v524_v11 = vld [vmem:[#allocation2 + $0x520] sm:$0xff] }
 0x1c9   :  { %1288 = vmatpush1.bf16.msra.mxu0 %v500_v61  ;;  %1452 = vmatpush1.bf16.msra.mxu1 %v502_v62  ;;  %v623_v61 = vld [vmem:[#allocation2 + $0x838] sm:$0xff]  ;;  %v620_v62 = vld [vmem:[#allocation2 + $0x820] sm:$0xff] }
 0x1ca   :  { %1289 = vmatprep.subr.bf16.mxu0 %v509_v63  ;;  %1453 = vmatprep.subr.bf16.mxu1 %v511_v0  ;;  %v622_v63 = vld [vmem:[#allocation2 + $0x830] sm:$0xff]  ;;  %v629_v0 = vld [vmem:[#allocation2 + $0x868] sm:$0xff] }
 0x1cd   :  { %1290 = vmatpush1.bf16.msra.mxu0 %v508_v1  ;;  %1454 = vmatpush1.bf16.msra.mxu1 %v510_v7  ;;  %v631_v1 = vld [vmem:[#allocation2 + $0x878] sm:$0xff]  ;;  %v628_v7 = vld [vmem:[#allocation2 + $0x860] sm:$0xff] }
 0x1ce   :  { %1291 = vmatprep.subr.bf16.mxu0 %v517_v2  ;;  %1455 = vmatprep.subr.bf16.mxu1 %v519_v6  ;;  %v630_v2 = vld [vmem:[#allocation2 + $0x870] sm:$0xff]  ;;  %v637_v6 = vld [vmem:[#allocation2 + $0x8a8] sm:$0xff] }
 0x1d1   :  { %1292 = vmatpush1.bf16.msra.mxu0 %v516_v3  ;;  %1456 = vmatpush1.bf16.msra.mxu1 %v518_v4  ;;  %v639_v3 = vld [vmem:[#allocation2 + $0x8b8] sm:$0xff]  ;;  %v636_v4 = vld [vmem:[#allocation2 + $0x8a0] sm:$0xff] }
 0x1d2   :  { %1293 = vmatprep.subr.bf16.mxu0 %v525_v5  ;;  %1457 = vmatprep.subr.bf16.mxu1 %v527_v9  ;;  %v638_v5 = vld [vmem:[#allocation2 + $0x8b0] sm:$0xff]  ;;  %v645_v9 = vld [vmem:[#allocation2 + $0x8e8] sm:$0xff] }
 0x1d5   :  { %1294 = vmatpush1.bf16.msra.mxu0 %v524_v11  ;;  %1458 = vmatpush1.bf16.msra.mxu1 %v526_v10  ;;  %v644_v11 = vld [vmem:[#allocation2 + $0x8e0] sm:$0xff]  ;;  %v646_v10 = vld [vmem:[#allocation2 + $0x8f0] sm:$0xff] }
 0x1d6   :  { %1295 = vmatprep.subr.bf16.mxu0 %v533_v16  ;;  %1459 = vmatprep.subr.bf16.mxu1 %v535_v17  ;;  %v653_v16 = vld [vmem:[#allocation2 + $0x928] sm:$0xff]  ;;  %v655_v17 = vld [vmem:[#allocation2 + $0x938] sm:$0xff] }
 0x1d9   :  { %1296 = vmatpush1.bf16.msra.mxu0 %v532_v18  ;;  %1460 = vmatpush1.bf16.msra.mxu1 %v534_v19  ;;  %v654_v18 = vld [vmem:[#allocation2 + $0x930] sm:$0xff]  ;;  %v661_v19 = vld [vmem:[#allocation2 + $0x968] sm:$0xff] }
 0x1da   :  { %1297 = vmatprep.subr.bf16.mxu0 %v541_v20  ;;  %1461 = vmatprep.subr.bf16.mxu1 %v543_v21  ;;  %v663_v20 = vld [vmem:[#allocation2 + $0x978] sm:$0xff]  ;;  %v660_v21 = vld [vmem:[#allocation2 + $0x960] sm:$0xff] }
 0x1dd   :  { %1298 = vmatpush1.bf16.msra.mxu0 %v540_v22  ;;  %1462 = vmatpush1.bf16.msra.mxu1 %v542_v23  ;;  %v662_v22 = vld [vmem:[#allocation2 + $0x970] sm:$0xff]  ;;  %v669_v23 = vld [vmem:[#allocation2 + $0x9a8] sm:$0xff] }
 0x1de   :  { %1299 = vmatprep.subr.bf16.mxu0 %v549_v24  ;;  %1463 = vmatprep.subr.bf16.mxu1 %v551_v25  ;;  %v671_v24 = vld [vmem:[#allocation2 + $0x9b8] sm:$0xff]  ;;  %v668_v25 = vld [vmem:[#allocation2 + $0x9a0] sm:$0xff] }
 0x1e1   :  { %1300 = vmatpush1.bf16.msra.mxu0 %v548_v26  ;;  %1464 = vmatpush1.bf16.msra.mxu1 %v550_v27  ;;  %v670_v26 = vld [vmem:[#allocation2 + $0x9b0] sm:$0xff]  ;;  %v677_v27 = vld [vmem:[#allocation2 + $0x9e8] sm:$0xff] }
 0x1e2   :  { %1301 = vmatprep.subr.bf16.mxu0 %v557_v28  ;;  %1465 = vmatprep.subr.bf16.mxu1 %v559_v29  ;;  %v679_v28 = vld [vmem:[#allocation2 + $0x9f8] sm:$0xff]  ;;  %v676_v29 = vld [vmem:[#allocation2 + $0x9e0] sm:$0xff] }
 0x1e5   :  { %1302 = vmatpush1.bf16.msra.mxu0 %v556_v30  ;;  %1466 = vmatpush1.bf16.msra.mxu1 %v558_v31  ;;  %v678_v30 = vld [vmem:[#allocation2 + $0x9f0] sm:$0xff]  ;;  %v685_v31 = vld [vmem:[#allocation2 + $0xa28] sm:$0xff] }
 0x1e6   :  { %1303 = vmatprep.subr.bf16.mxu0 %v565_v32  ;;  %1467 = vmatprep.subr.bf16.mxu1 %v567_v33  ;;  %v687_v32 = vld [vmem:[#allocation2 + $0xa38] sm:$0xff]  ;;  %v684_v33 = vld [vmem:[#allocation2 + $0xa20] sm:$0xff] }
 0x1e9   :  { %1304 = vmatpush1.bf16.msra.mxu0 %v564_v34  ;;  %1468 = vmatpush1.bf16.msra.mxu1 %v566_v35  ;;  %v686_v34 = vld [vmem:[#allocation2 + $0xa30] sm:$0xff]  ;;  %v693_v35 = vld [vmem:[#allocation2 + $0xa68] sm:$0xff] }
 0x1ea   :  { %1305 = vmatprep.subr.bf16.mxu0 %v573_v36  ;;  %1469 = vmatprep.subr.bf16.mxu1 %v575_v37  ;;  %v695_v36 = vld [vmem:[#allocation2 + $0xa78] sm:$0xff]  ;;  %v692_v37 = vld [vmem:[#allocation2 + $0xa60] sm:$0xff] }
 0x1ed   :  { %1306 = vmatpush1.bf16.msra.mxu0 %v572_v38  ;;  %1470 = vmatpush1.bf16.msra.mxu1 %v574_v39  ;;  %v694_v38 = vld [vmem:[#allocation2 + $0xa70] sm:$0xff]  ;;  %v701_v39 = vld [vmem:[#allocation2 + $0xaa8] sm:$0xff] }
 0x1ee   :  { %1307 = vmatprep.subr.bf16.mxu0 %v581_v40  ;;  %1471 = vmatprep.subr.bf16.mxu1 %v583_v41  ;;  %v703_v40 = vld [vmem:[#allocation2 + $0xab8] sm:$0xff]  ;;  %v700_v41 = vld [vmem:[#allocation2 + $0xaa0] sm:$0xff] }
 0x1f1   :  { %1308 = vmatpush1.bf16.msra.mxu0 %v580_v42  ;;  %1472 = vmatpush1.bf16.msra.mxu1 %v582_v43  ;;  %v702_v42 = vld [vmem:[#allocation2 + $0xab0] sm:$0xff]  ;;  %v709_v43 = vld [vmem:[#allocation2 + $0xae8] sm:$0xff] }
 0x1f2   :  { %1309 = vmatprep.subr.bf16.mxu0 %v589_v44  ;;  %1473 = vmatprep.subr.bf16.mxu1 %v591_v45  ;;  %v711_v44 = vld [vmem:[#allocation2 + $0xaf8] sm:$0xff]  ;;  %v708_v45 = vld [vmem:[#allocation2 + $0xae0] sm:$0xff] }
 0x1f5   :  { %1310 = vmatpush1.bf16.msra.mxu0 %v588_v46  ;;  %1474 = vmatpush1.bf16.msra.mxu1 %v590_v47  ;;  %v710_v46 = vld [vmem:[#allocation2 + $0xaf0] sm:$0xff]  ;;  %v717_v47 = vld [vmem:[#allocation2 + $0xb28] sm:$0xff] }
 0x1f6   :  { %1311 = vmatprep.subr.bf16.mxu0 %v597_v48  ;;  %1475 = vmatprep.subr.bf16.mxu1 %v599_v49  ;;  %v719_v48 = vld [vmem:[#allocation2 + $0xb38] sm:$0xff]  ;;  %v716_v49 = vld [vmem:[#allocation2 + $0xb20] sm:$0xff] }
 0x1f9   :  { %1312 = vmatpush1.bf16.msra.mxu0 %v596_v50  ;;  %1476 = vmatpush1.bf16.msra.mxu1 %v598_v51  ;;  %v718_v50 = vld [vmem:[#allocation2 + $0xb30] sm:$0xff]  ;;  %v725_v51 = vld [vmem:[#allocation2 + $0xb68] sm:$0xff] }
 0x1fa   :  { %1313 = vmatprep.subr.bf16.mxu0 %v605_v52  ;;  %1477 = vmatprep.subr.bf16.mxu1 %v607_v53  ;;  %v727_v52 = vld [vmem:[#allocation2 + $0xb78] sm:$0xff]  ;;  %v724_v53 = vld [vmem:[#allocation2 + $0xb60] sm:$0xff] }
 0x1fd   :  { %1314 = vmatpush1.bf16.msra.mxu0 %v604_v54  ;;  %1478 = vmatpush1.bf16.msra.mxu1 %v606_v55  ;;  %v726_v54 = vld [vmem:[#allocation2 + $0xb70] sm:$0xff]  ;;  %v733_v55 = vld [vmem:[#allocation2 + $0xba8] sm:$0xff] }
 0x1fe   :  { %1315 = vmatprep.subr.bf16.mxu0 %v613_v56  ;;  %1479 = vmatprep.subr.bf16.mxu1 %v615_v57  ;;  %v735_v56 = vld [vmem:[#allocation2 + $0xbb8] sm:$0xff]  ;;  %v732_v57 = vld [vmem:[#allocation2 + $0xba0] sm:$0xff] }
 0x201   :  { %1316 = vmatpush1.bf16.msra.mxu0 %v612_v58  ;;  %1480 = vmatpush1.bf16.msra.mxu1 %v614_v59  ;;  %v734_v58 = vld [vmem:[#allocation2 + $0xbb0] sm:$0xff]  ;;  %v741_v59 = vld [vmem:[#allocation2 + $0xbe8] sm:$0xff] }
 0x202   :  { %1326 = vmatprep.subr.bf16.mxu0 %v621_v60  ;;  %1490 = vmatprep.subr.bf16.mxu1 %v623_v61  ;;  %v743_v60 = vld [vmem:[#allocation2 + $0xbf8] sm:$0xff]  ;;  %v740_v61 = vld [vmem:[#allocation2 + $0xbe0] sm:$0xff] }
 0x204   :  { %1318 = vmatmul.mubr.bf16.vlgmr.msra.gmra.mrb[4].mxu0 %v6962_v8  ;;  %1482 = vmatmul.mubr.bf16.vlgmr.msra.gmra.mrb[4].mxu1 %v6962_v8  ;;  %v647_v8 = vld [vmem:[#allocation2 + $0x8f8] sm:$0xff] }
 0x205   :  { %1327 = vmatpush1.bf16.msra.mxu0 %v620_v62  ;;  %1491 = vmatpush1.bf16.msra.mxu1 %v622_v63  ;;  %v742_v62 = vld [vmem:[#allocation2 + $0xbf0] sm:$0xff]  ;;  %v749_v63 = vld [vmem:[#allocation2 + $0xc28] sm:$0xff] }
 0x206   :  { %1328 = vmatprep.subr.bf16.mxu0 %v629_v0  ;;  %1492 = vmatprep.subr.bf16.mxu1 %v631_v1  ;;  %v751_v0 = vld [vmem:[#allocation2 + $0xc38] sm:$0xff]  ;;  %v748_v1 = vld [vmem:[#allocation2 + $0xc20] sm:$0xff] }
 0x207   :  { %1358 = vmatprep.mubr.bf16.mxu0 %v6974_v13  ;;  %1522 = vmatprep.mubr.bf16.mxu1 %v6974_v13  ;;  %v652_v13 = vld [vmem:[#allocation2 + $0x920] sm:$0xff] }
 0x209   :  { %1329 = vmatpush1.bf16.msra.mxu0 %v628_v7  ;;  %1493 = vmatpush1.bf16.msra.mxu1 %v630_v2  ;;  %v750_v7 = vld [vmem:[#allocation2 + $0xc30] sm:$0xff]  ;;  %v757_v2 = vld [vmem:[#allocation2 + $0xc68] sm:$0xff] }
 0x20a   :  { %1330 = vmatprep.subr.bf16.mxu0 %v637_v6  ;;  %1494 = vmatprep.subr.bf16.mxu1 %v639_v3  ;;  %v759_v6 = vld [vmem:[#allocation2 + $0xc78] sm:$0xff]  ;;  %v756_v3 = vld [vmem:[#allocation2 + $0xc60] sm:$0xff] }
 0x20d   :  { %1331 = vmatpush1.bf16.msra.mxu0 %v636_v4  ;;  %1495 = vmatpush1.bf16.msra.mxu1 %v638_v5  ;;  %v758_v4 = vld [vmem:[#allocation2 + $0xc70] sm:$0xff]  ;;  %v765_v5 = vld [vmem:[#allocation2 + $0xca8] sm:$0xff] }
 0x20e   :  { %1332 = vmatprep.subr.bf16.mxu0 %v645_v9  ;;  %1496 = vmatprep.subr.bf16.mxu1 %v647_v8  ;;  %v767_v9 = vld [vmem:[#allocation2 + $0xcb8] sm:$0xff]  ;;  %v876_v8 = vlaneseq }
 0x211   :  { %1333 = vmatpush1.bf16.msra.mxu0 %v644_v11  ;;  %1497 = vmatpush1.bf16.msra.mxu1 %v646_v10  ;;  %v764_v11 = vld [vmem:[#allocation2 + $0xca0] sm:$0xff]  ;;  %v766_v10 = vld [vmem:[#allocation2 + $0xcb0] sm:$0xff] }
 0x212   :  { %1334 = vmatprep.subr.bf16.mxu0 %v653_v16  ;;  %1498 = vmatprep.subr.bf16.mxu1 %v655_v17  ;;  %v775_v16 = vld [vmem:[#allocation2 + $0xcf8] sm:$0xff]  ;;  %v7010_v17 = vshrl.u32 %v876_v8, 7  ;;  %v829_v8 = vld [vmem:[#allocation2 + $0xea8] sm:$0xff] }
 0x215   :  { %1335 = vmatpush1.bf16.msra.mxu0 %v652_v13  ;;  %1499 = vmatpush1.bf16.msra.mxu1 %v654_v18  ;;  %v872_v13 = vld [vmem:[#allocation13] ss:$8 sm:$0xf] }
 0x216   :  { %1336 = vmatprep.subr.bf16.mxu0 %v661_v19  ;;  %1500 = vmatprep.subr.bf16.mxu1 %v663_v20  ;;  %v873_v18 = vld [vmem:[#allocation13] ss:$8 sm:$0xf0] }
 0x217   :  { %v772_v19 = vld [vmem:[#allocation2 + $0xce0] sm:$0xff]  ;;  %v774_v20 = vld [vmem:[#allocation2 + $0xcf0] sm:$0xff] }
 0x219   :  { %1337 = vmatpush1.bf16.msra.mxu0 %v660_v21  ;;  %1501 = vmatpush1.bf16.msra.mxu1 %v662_v22  ;;  %v783_v21 = vld [vmem:[#allocation2 + $0xd38] sm:$0xff]  ;;  %v7012_v22 = vor.u32 %v873_v18, %v872_v13  ;;  %v836_v18 = vld [vmem:[#allocation2 + $0xee0] sm:$0xff] }
 0x21a   :  { %1338 = vmatprep.subr.bf16.mxu0 %v669_v23  ;;  %1502 = vmatprep.subr.bf16.mxu1 %v671_v24  ;;  %v7015_v23 = vsub.s32 0, %v7010_v17  ;;  %v7018_v24 = vsub.s32 2, %v7010_v17  ;;  %v839_v13 = vld [vmem:[#allocation2 + $0xef8] sm:$0xff] }
 0x21d   :  { %1339 = vmatpush1.bf16.msra.mxu0 %v668_v25  ;;  %1503 = vmatpush1.bf16.msra.mxu1 %v670_v26  ;;  %v7021_v25 = vsub.s32 1, %v7010_v17  ;;  %v7024_v26 = vsub.s32 3, %v7010_v17 }
 0x21e   :  { %1340 = vmatprep.subr.bf16.mxu0 %v677_v27  ;;  %1504 = vmatprep.subr.bf16.mxu1 %v679_v28  ;;  %v780_v27 = vld [vmem:[#allocation2 + $0xd20] sm:$0xff]  ;;  %v782_v28 = vld [vmem:[#allocation2 + $0xd30] sm:$0xff] }
 0x221   :  { %1341 = vmatpush1.bf16.msra.mxu0 %v676_v29  ;;  %1505 = vmatpush1.bf16.msra.mxu1 %v678_v30  ;;  %v789_v29 = vld [vmem:[#allocation2 + $0xd68] sm:$0xff]  ;;  %v791_v30 = vld [vmem:[#allocation2 + $0xd78] sm:$0xff] }
 0x222   :  { %1342 = vmatprep.subr.bf16.mxu0 %v685_v31  ;;  %1506 = vmatprep.subr.bf16.mxu1 %v687_v32  ;;  %v879_v31 = vrot.slane %v7012_v22, %v7015_v23  ;;  %v887_v32 = vrot.slane %v7012_v22, %v7018_v24 }
 0x225   :  { %1343 = vmatpush1.bf16.msra.mxu0 %v684_v33  ;;  %1507 = vmatpush1.bf16.msra.mxu1 %v686_v34  ;;  %v883_v33 = vrot.slane %v7012_v22, %v7021_v25  ;;  %v891_v34 = vrot.slane %v7012_v22, %v7024_v26 }
 0x226   :  { %1344 = vmatprep.subr.bf16.mxu0 %v693_v35  ;;  %1508 = vmatprep.subr.bf16.mxu1 %v695_v36  ;;  %v788_v35 = vld [vmem:[#allocation2 + $0xd60] sm:$0xff]  ;;  %v790_v36 = vld [vmem:[#allocation2 + $0xd70] sm:$0xff] }
 0x229   :  { %1345 = vmatpush1.bf16.msra.mxu0 %v692_v37  ;;  %1509 = vmatpush1.bf16.msra.mxu1 %v694_v38 }
 0x22a   :  { %1346 = vmatprep.subr.bf16.mxu0 %v701_v39  ;;  %1510 = vmatprep.subr.bf16.mxu1 %v703_v40  ;;  %v797_v39 = vld [vmem:[#allocation2 + $0xda8] sm:$0xff]  ;;  %v799_v40 = vld [vmem:[#allocation2 + $0xdb8] sm:$0xff] }
 0x22d   :  { %1347 = vmatpush1.bf16.msra.mxu0 %v700_v41  ;;  %1511 = vmatpush1.bf16.msra.mxu1 %v702_v42 }
 0x22e   :  { %1348 = vmatprep.subr.bf16.mxu0 %v709_v43  ;;  %1512 = vmatprep.subr.bf16.mxu1 %v711_v44 }
 0x231   :  { %1349 = vmatpush1.bf16.msra.mxu0 %v708_v45  ;;  %1513 = vmatpush1.bf16.msra.mxu1 %v710_v46 }
 0x232   :  { %1350 = vmatprep.subr.bf16.mxu0 %v717_v47  ;;  %1514 = vmatprep.subr.bf16.mxu1 %v719_v48 }
 0x235   :  { %1351 = vmatpush1.bf16.msra.mxu0 %v716_v49  ;;  %1515 = vmatpush1.bf16.msra.mxu1 %v718_v50 }
 0x236   :  { %1352 = vmatprep.subr.bf16.mxu0 %v725_v51  ;;  %1516 = vmatprep.subr.bf16.mxu1 %v727_v52 }
 0x239   :  { %1353 = vmatpush1.bf16.msra.mxu0 %v724_v53  ;;  %1517 = vmatpush1.bf16.msra.mxu1 %v726_v54  ;;  %v796_v53 = vld [vmem:[#allocation2 + $0xda0] sm:$0xff]  ;;  %v798_v54 = vld [vmem:[#allocation2 + $0xdb0] sm:$0xff] }
 0x23a   :  { %1354 = vmatprep.subr.bf16.mxu0 %v733_v55  ;;  %1518 = vmatprep.subr.bf16.mxu1 %v735_v56 }
 0x23d   :  { %1355 = vmatpush1.bf16.msra.mxu0 %v732_v57  ;;  %1519 = vmatpush1.bf16.msra.mxu1 %v734_v58  ;;  %v805_v57 = vld [vmem:[#allocation2 + $0xde8] sm:$0xff]  ;;  %v807_v58 = vld [vmem:[#allocation2 + $0xdf8] sm:$0xff] }
 0x23e   :  { %1356 = vmatprep.subr.bf16.mxu0 %v741_v59  ;;  %1520 = vmatprep.subr.bf16.mxu1 %v743_v60 }
 0x241   :  { %1357 = vmatpush1.bf16.msra.mxu0 %v740_v61  ;;  %1521 = vmatpush1.bf16.msra.mxu1 %v742_v62 }
 0x242   :  { %1367 = vmatprep.subr.bf16.mxu0 %v749_v63  ;;  %1531 = vmatprep.subr.bf16.mxu1 %v751_v0  ;;  %v804_v63 = vld [vmem:[#allocation2 + $0xde0] sm:$0xff]  ;;  %v806_v0 = vld [vmem:[#allocation2 + $0xdf0] sm:$0xff] }
 0x244   :  { %1359 = vmatmul.mubr.bf16.vlgmr.msra.gmra.mrb[4].mxu0 %v6972_v12  ;;  %1523 = vmatmul.mubr.bf16.vlgmr.msra.gmra.mrb[4].mxu1 %v6972_v12  ;;  %v773_v12 = vld [vmem:[#allocation2 + $0xce8] sm:$0xff] }
 0x245   :  { %1368 = vmatpush1.bf16.msra.mxu0 %v748_v1  ;;  %1532 = vmatpush1.bf16.msra.mxu1 %v750_v7  ;;  %v813_v1 = vld [vmem:[#allocation2 + $0xe28] sm:$0xff]  ;;  %v815_v7 = vld [vmem:[#allocation2 + $0xe38] sm:$0xff] }
 0x246   :  { %1369 = vmatprep.subr.bf16.mxu0 %v757_v2  ;;  %1533 = vmatprep.subr.bf16.mxu1 %v759_v6  ;;  %v812_v2 = vld [vmem:[#allocation2 + $0xe20] sm:$0xff]  ;;  %v814_v6 = vld [vmem:[#allocation2 + $0xe30] sm:$0xff] }
 0x247   :  { %1399 = vmatprep.mubr.bf16.mxu0 %v6978_v15  ;;  %1563 = vmatprep.mubr.bf16.mxu1 %v6978_v15  ;;  %v781_v15 = vld [vmem:[#allocation2 + $0xd28] sm:$0xff] }
 0x249   :  { %1370 = vmatpush1.bf16.msra.mxu0 %v756_v3  ;;  %1534 = vmatpush1.bf16.msra.mxu1 %v758_v4  ;;  %v821_v3 = vld [vmem:[#allocation2 + $0xe68] sm:$0xff]  ;;  %v823_v4 = vld [vmem:[#allocation2 + $0xe78] sm:$0xff] }
 0x24a   :  { %1371 = vmatprep.subr.bf16.mxu0 %v765_v5  ;;  %1535 = vmatprep.subr.bf16.mxu1 %v767_v9  ;;  %v820_v5 = vld [vmem:[#allocation2 + $0xe60] sm:$0xff]  ;;  %v822_v9 = vld [vmem:[#allocation2 + $0xe70] sm:$0xff] }
 0x24d   :  { %1372 = vmatpush1.bf16.msra.mxu0 %v764_v11  ;;  %1536 = vmatpush1.bf16.msra.mxu1 %v766_v10  ;;  %v831_v11 = vld [vmem:[#allocation2 + $0xeb8] sm:$0xff]  ;;  %v828_v10 = vld [vmem:[#allocation2 + $0xea0] sm:$0xff] }
 0x24e   :  { %1373 = vmatprep.subr.bf16.mxu0 %v773_v12  ;;  %1537 = vmatprep.subr.bf16.mxu1 %v775_v16  ;;  %v830_v12 = vld [vmem:[#allocation2 + $0xeb0] sm:$0xff]  ;;  %v837_v16 = vld [vmem:[#allocation2 + $0xee8] sm:$0xff] }
 0x251   :  { %1374 = vmatpush1.bf16.msra.mxu0 %v772_v19  ;;  %1538 = vmatpush1.bf16.msra.mxu1 %v774_v20  ;;  %v838_v19 = vld [vmem:[#allocation2 + $0xef0] sm:$0xff]  ;;  %v845_v20 = vld [vmem:[#allocation2 + $0xf28] sm:$0xff] }
 0x252   :  { %1375 = vmatprep.subr.bf16.mxu0 %v781_v15  ;;  %1539 = vmatprep.subr.bf16.mxu1 %v783_v21  ;;  %v847_v15 = vld [vmem:[#allocation2 + $0xf38] sm:$0xff]  ;;  %v844_v21 = vld [vmem:[#allocation2 + $0xf20] sm:$0xff] }
 0x255   :  { %1376 = vmatpush1.bf16.msra.mxu0 %v780_v27  ;;  %1540 = vmatpush1.bf16.msra.mxu1 %v782_v28  ;;  %v846_v27 = vld [vmem:[#allocation2 + $0xf30] sm:$0xff]  ;;  %v853_v28 = vld [vmem:[#allocation2 + $0xf68] sm:$0xff] }
 0x256   :  { %1377 = vmatprep.subr.bf16.mxu0 %v789_v29  ;;  %1541 = vmatprep.subr.bf16.mxu1 %v791_v30  ;;  %v855_v29 = vld [vmem:[#allocation2 + $0xf78] sm:$0xff]  ;;  %v852_v30 = vld [vmem:[#allocation2 + $0xf60] sm:$0xff] }
 0x257   :  { %v1073_v37 = vpop.f32.mrb[0].mxu0  ;;  %v1237_v38 = vpop.f32.mrb[0].mxu1 }
 0x258   :  { %v6351_v41 = vadd.f32 %v1073_v37, %v879_v31  ;;  %v6353_v42 = vadd.f32 %v1237_v38, %v887_v32  ;;  %v1075_v43 = vpop.f32.mrb[1].mxu0  ;;  %v1239_v44 = vpop.f32.mrb[1].mxu1  ;;  %v854_v31 = vld [vmem:[#allocation2 + $0xf70] sm:$0xff]  ;;  %v861_v32 = vld [vmem:[#allocation2 + $0xfa8] sm:$0xff]  ;;  %v871_v37 = vld [vmem:[#allocation2 + $0xff8] sm:$0xff] }
 0x259   :  { %v6352_v45 = vadd.f32 %v1075_v43, %v883_v33  ;;  %v6354_v46 = vadd.f32 %v1239_v44, %v891_v34  ;;  %v1077_v47 = vpop.f32.mrb[2].mxu0  ;;  %v1241_v48 = vpop.f32.mrb[2].mxu1  ;;  %1378 = vmatpush1.bf16.msra.mxu0 %v788_v35  ;;  %1542 = vmatpush1.bf16.msra.mxu1 %v790_v36  ;;  %v863_v33 = vld [vmem:[#allocation2 + $0xfb8] sm:$0xff]  ;;  %v860_v34 = vld [vmem:[#allocation2 + $0xfa0] sm:$0xff]  ;;  %v862_v35 = vld [vmem:[#allocation2 + $0xfb0] sm:$0xff]  ;;  %v906_v43 = vsub.s32 7, %v7010_v17 }
 0x25a   :  { %v1572_v49 = vmax.f32 %v6351_v41, 0.0  ;;  %v1574_v50 = vmax.f32 %v6353_v42, 0.0  ;;  %v1078_v51 = vpop.f32.mrb[3].mxu0  ;;  %v1242_v52 = vpop.f32.mrb[3].mxu1  ;;  %1379 = vmatprep.subr.bf16.mxu0 %v797_v39  ;;  %1543 = vmatprep.subr.bf16.mxu1 %v799_v40  ;;  %v869_v36 = vld [vmem:[#allocation2 + $0xfe8] sm:$0xff]  ;;  %v868_v38 = vld [vmem:[#allocation2 + $0xfe0] sm:$0xff] }
 0x25b   :  { %v1573_v55 = vmax.f32 %v6352_v45, 0.0  ;;  %v1575_v56 = vmax.f32 %v6354_v46, 0.0  ;;  %v870_v39 = vld [vmem:[#allocation2 + $0xff0] sm:$0xff]  ;;  %v7045_v40 = vsub.s32 4, %v7010_v17  ;;  %v902_v41 = vsub.s32 6, %v7010_v17 }
 0x25c   :  { %v7034_v59 = vpack.c.bf16 %v1572_v49, %v1572_v49  ;;  %v7036_v60 = vpack.c.bf16 %v1574_v50, %v1574_v50  ;;  %v7049_v42 = vsub.s32 5, %v7010_v17  ;;  %v907_v46 = vrot.slane %v7012_v22, %v906_v43 }
 0x25d   :  { %v7038_v61 = vpack.c.bf16 %v1573_v55, %v1573_v55  ;;  %v7040_v62 = vpack.c.bf16 %v1575_v56, %v1575_v56  ;;  %1380 = vmatpush1.bf16.msra.mxu0 %v796_v53  ;;  %1544 = vmatpush1.bf16.msra.mxu1 %v798_v54  ;;  %v895_v44 = vrot.slane %v7012_v22, %v7045_v40 }
 0x25e   :  { %1381 = vmatprep.subr.bf16.mxu0 %v805_v57  ;;  %1545 = vmatprep.subr.bf16.mxu1 %v807_v58  ;;  %v903_v45 = vrot.slane %v7012_v22, %v902_v41 }
 0x261   :  { %1382 = vmatpush1.bf16.msra.mxu0 %v804_v63  ;;  %1546 = vmatpush1.bf16.msra.mxu1 %v806_v0 }
 0x262   :  { %1383 = vmatprep.subr.bf16.mxu0 %v813_v1  ;;  %1547 = vmatprep.subr.bf16.mxu1 %v815_v7 }
 0x265   :  { %1384 = vmatpush1.bf16.msra.mxu0 %v812_v2  ;;  %1548 = vmatpush1.bf16.msra.mxu1 %v814_v6 }
 0x266   :  { %1385 = vmatprep.subr.bf16.mxu0 %v821_v3  ;;  %1549 = vmatprep.subr.bf16.mxu1 %v823_v4 }
 0x269   :  { %1386 = vmatpush1.bf16.msra.mxu0 %v820_v5  ;;  %1550 = vmatpush1.bf16.msra.mxu1 %v822_v9 }
 0x26a   :  { %1387 = vmatprep.subr.bf16.mxu0 %v829_v8  ;;  %1551 = vmatprep.subr.bf16.mxu1 %v831_v11 }
 0x26d   :  { %1388 = vmatpush1.bf16.msra.mxu0 %v828_v10  ;;  %1552 = vmatpush1.bf16.msra.mxu1 %v830_v12 }
 0x26e   :  { %1389 = vmatprep.subr.bf16.mxu0 %v837_v16  ;;  %1553 = vmatprep.subr.bf16.mxu1 %v839_v13 }
 0x271   :  { %1390 = vmatpush1.bf16.msra.mxu0 %v836_v18  ;;  %1554 = vmatpush1.bf16.msra.mxu1 %v838_v19 }
 0x272   :  { %1391 = vmatprep.subr.bf16.mxu0 %v845_v20  ;;  %1555 = vmatprep.subr.bf16.mxu1 %v847_v15 }
 0x275   :  { %1392 = vmatpush1.bf16.msra.mxu0 %v844_v21  ;;  %1556 = vmatpush1.bf16.msra.mxu1 %v846_v27 }
 0x276   :  { %1393 = vmatprep.subr.bf16.mxu0 %v853_v28  ;;  %1557 = vmatprep.subr.bf16.mxu1 %v855_v29 }
 0x279   :  { %1394 = vmatpush1.bf16.msra.mxu0 %v852_v30  ;;  %1558 = vmatpush1.bf16.msra.mxu1 %v854_v31 }
 0x27a   :  { %1395 = vmatprep.subr.bf16.mxu0 %v861_v32  ;;  %1559 = vmatprep.subr.bf16.mxu1 %v863_v33 }
 0x27d   :  { %1396 = vmatpush1.bf16.msra.mxu0 %v860_v34  ;;  %1560 = vmatpush1.bf16.msra.mxu1 %v862_v35 }
 0x27e   :  { %1397 = vmatprep.subr.bf16.mxu0 %v869_v36  ;;  %1561 = vmatprep.subr.bf16.mxu1 %v871_v37 }
 0x281   :  { %1398 = vmatpush1.bf16.msra.mxu0 %v868_v38  ;;  %1562 = vmatpush1.bf16.msra.mxu1 %v870_v39 }
 0x284   :  { %1400 = vmatmul.mubr.bf16.vlgmr.msra.gmra.mrb[4].mxu0 %v6976_v14  ;;  %1564 = vmatmul.mubr.bf16.vlgmr.msra.gmra.mrb[4].mxu1 %v6976_v14  ;;  %v899_v14 = vrot.slane %v7012_v22, %v7049_v42 }
 0x357   :  { %v1401_v47 = vpop.f32.mrb[4].mxu0  ;;  %v1565_v48 = vpop.f32.mrb[4].mxu1 }
 0x358   :  { %v6355_v49 = vadd.f32 %v1401_v47, %v895_v44  ;;  %v6357_v50 = vadd.f32 %v1565_v48, %v903_v45  ;;  %v1403_v51 = vpop.f32.mrb[5].mxu0  ;;  %v1567_v52 = vpop.f32.mrb[5].mxu1 }
 0x359   :  { %v6356_v53 = vadd.f32 %v1403_v51, %v899_v14  ;;  %v6358_v54 = vadd.f32 %v1567_v52, %v907_v46  ;;  %v1405_v55 = vpop.f32.mrb[6].mxu0  ;;  %v1569_v56 = vpop.f32.mrb[6].mxu1 }
 0x35a   :  { %v1576_v57 = vmax.f32 %v6355_v49, 0.0  ;;  %v1578_v58 = vmax.f32 %v6357_v50, 0.0  ;;  %v1406_v63 = vpop.f32.mrb[7].mxu0  ;;  %v1570_v0 = vpop.f32.mrb[7].mxu1 }
 0x35b   :  { %v1577_v1 = vmax.f32 %v6356_v53, 0.0  ;;  %v1579_v7 = vmax.f32 %v6358_v54, 0.0 }
 0x35c   :  { %v7060_v2 = vpack.c.bf16 %v1576_v57, %v1576_v57  ;;  %v7062_v6 = vpack.c.bf16 %v1578_v58, %v1578_v58 }
 0x35d   :  { %v7064_v22 = vpack.c.bf16 %v1577_v1, %v1577_v1  ;;  %v7066_v3 = vpack.c.bf16 %v1579_v7, %v1579_v7 }
 0x35e   :  { %6674 = dma.done.wait [#allocation12 + $0x1], 57344 }
 0x35f   :  { %6675 = vsyncadd [#allocation12 + $0x1], 4294909952  ;;  %2111 = vmatprep.mubr.bf16.mxu0 %v7038_v61  ;;  %2275 = vmatprep.mubr.bf16.mxu1 %v7038_v61  ;;  %v1592_v4 = vld [vmem:[#allocation3 + $0x8] sm:$0xff]  ;;  %v1594_v5 = vld [vmem:[#allocation3 + $0x18] sm:$0xff] }
 0x360   :  { %v1591_v9 = vld [vmem:[#allocation3] sm:$0xff]  ;;  %2079 = vmatprep.subr.bf16.mxu0 %v1592_v4  ;;  %2243 = vmatprep.subr.bf16.mxu1 %v1594_v5  ;;  %v1593_v8 = vld [vmem:[#allocation3 + $0x10] sm:$0xff]  ;;  %v1598_v12 = vld [vmem:[#allocation3 + $0x38] sm:$0xff] }
 0x361   :  { %v1599_v11 = vld [vmem:[#allocation3 + $0x40] sm:$0xff]  ;;  %v1601_v10 = vld [vmem:[#allocation3 + $0x50] sm:$0xff]  ;;  %2080 = vmatpush1.bf16.msra.mxu0 %v1591_v9  ;;  %2244 = vmatpush1.bf16.msra.mxu1 %v1593_v8  ;;  %v1600_v16 = vld [vmem:[#allocation3 + $0x48] sm:$0xff] }
 0x362   :  { %2081 = vmatprep.subr.bf16.mxu0 %v1599_v11  ;;  %2245 = vmatprep.subr.bf16.mxu1 %v1601_v10  ;;  %v1606_v13 = vld [vmem:[#allocation3 + $0x78] sm:$0xff]  ;;  %v1608_v18 = vld [vmem:[#allocation3 + $0x88] sm:$0xff]  ;;  %v1605_v19 = vld [vmem:[#allocation3 + $0x70] sm:$0xff] }
 0x363   :  { %v1607_v20 = vld [vmem:[#allocation3 + $0x80] sm:$0xff]  ;;  %v1613_v15 = vld [vmem:[#allocation3 + $0xb0] sm:$0xff]  ;;  %v1612_v27 = vld [vmem:[#allocation3 + $0xa8] sm:$0xff] }
 0x364   :  { %v1615_v21 = vld [vmem:[#allocation3 + $0xc0] sm:$0xff]  ;;  %v1614_v28 = vld [vmem:[#allocation3 + $0xb8] sm:$0xff]  ;;  %v1620_v29 = vld [vmem:[#allocation3 + $0xe8] sm:$0xff] }
 0x365   :  { %2082 = vmatpush1.bf16.msra.mxu0 %v1598_v12  ;;  %2246 = vmatpush1.bf16.msra.mxu1 %v1600_v16  ;;  %v1622_v30 = vld [vmem:[#allocation3 + $0xf8] sm:$0xff]  ;;  %v1619_v31 = vld [vmem:[#allocation3 + $0xe0] sm:$0xff]  ;;  %v1621_v32 = vld [vmem:[#allocation3 + $0xf0] sm:$0xff] }
 0x366   :  { %2083 = vmatprep.subr.bf16.mxu0 %v1606_v13  ;;  %2247 = vmatprep.subr.bf16.mxu1 %v1608_v18  ;;  %v1627_v33 = vld [vmem:[#allocation3 + $0x120] sm:$0xff]  ;;  %v1629_v34 = vld [vmem:[#allocation3 + $0x130] sm:$0xff]  ;;  %v1626_v35 = vld [vmem:[#allocation3 + $0x118] sm:$0xff] }
 0x367   :  { %v1628_v36 = vld [vmem:[#allocation3 + $0x128] sm:$0xff]  ;;  %v1634_v37 = vld [vmem:[#allocation3 + $0x158] sm:$0xff]  ;;  %v1633_v39 = vld [vmem:[#allocation3 + $0x150] sm:$0xff] }
 0x368   :  { %v1636_v38 = vld [vmem:[#allocation3 + $0x168] sm:$0xff]  ;;  %v1635_v43 = vld [vmem:[#allocation3 + $0x160] sm:$0xff]  ;;  %v1641_v44 = vld [vmem:[#allocation3 + $0x190] sm:$0xff] }
 0x369   :  { %2084 = vmatpush1.bf16.msra.mxu0 %v1605_v19  ;;  %2248 = vmatpush1.bf16.msra.mxu1 %v1607_v20  ;;  %v1643_v45 = vld [vmem:[#allocation3 + $0x1a0] sm:$0xff]  ;;  %v1640_v14 = vld [vmem:[#allocation3 + $0x188] sm:$0xff]  ;;  %v1642_v46 = vld [vmem:[#allocation3 + $0x198] sm:$0xff] }
 0x36a   :  { %2085 = vmatprep.subr.bf16.mxu0 %v1613_v15  ;;  %2249 = vmatprep.subr.bf16.mxu1 %v1615_v21  ;;  %v1648_v47 = vld [vmem:[#allocation3 + $0x1c8] sm:$0xff]  ;;  %v1650_v48 = vld [vmem:[#allocation3 + $0x1d8] sm:$0xff]  ;;  %v1647_v49 = vld [vmem:[#allocation3 + $0x1c0] sm:$0xff] }
 0x36b   :  { %v1649_v50 = vld [vmem:[#allocation3 + $0x1d0] sm:$0xff]  ;;  %v1655_v51 = vld [vmem:[#allocation3 + $0x200] sm:$0xff]  ;;  %v1654_v53 = vld [vmem:[#allocation3 + $0x1f8] sm:$0xff] }
 0x36c   :  { %v1657_v52 = vld [vmem:[#allocation3 + $0x210] sm:$0xff]  ;;  %v1656_v54 = vld [vmem:[#allocation3 + $0x208] sm:$0xff]  ;;  %v1662_v55 = vld [vmem:[#allocation3 + $0x238] sm:$0xff] }
 0x36d   :  { %2086 = vmatpush1.bf16.msra.mxu0 %v1612_v27  ;;  %2250 = vmatpush1.bf16.msra.mxu1 %v1614_v28  ;;  %v1664_v56 = vld [vmem:[#allocation3 + $0x248] sm:$0xff]  ;;  %v1661_v57 = vld [vmem:[#allocation3 + $0x230] sm:$0xff]  ;;  %v1663_v58 = vld [vmem:[#allocation3 + $0x240] sm:$0xff] }
 0x36e   :  { %2087 = vmatprep.subr.bf16.mxu0 %v1620_v29  ;;  %2251 = vmatprep.subr.bf16.mxu1 %v1622_v30  ;;  %v1669_v63 = vld [vmem:[#allocation3 + $0x270] sm:$0xff]  ;;  %v1671_v0 = vld [vmem:[#allocation3 + $0x280] sm:$0xff]  ;;  %v1668_v1 = vld [vmem:[#allocation3 + $0x268] sm:$0xff] }
 0x36f   :  { %v1670_v7 = vld [vmem:[#allocation3 + $0x278] sm:$0xff]  ;;  %v1676_v4 = vld [vmem:[#allocation3 + $0x2a8] sm:$0xff]  ;;  %v1675_v9 = vld [vmem:[#allocation3 + $0x2a0] sm:$0xff] }
 0x370   :  { %v1678_v5 = vld [vmem:[#allocation3 + $0x2b8] sm:$0xff]  ;;  %v1677_v8 = vld [vmem:[#allocation3 + $0x2b0] sm:$0xff]  ;;  %v1683_v11 = vld [vmem:[#allocation3 + $0x2e0] sm:$0xff] }
 0x371   :  { %2088 = vmatpush1.bf16.msra.mxu0 %v1619_v31  ;;  %2252 = vmatpush1.bf16.msra.mxu1 %v1621_v32  ;;  %v1685_v10 = vld [vmem:[#allocation3 + $0x2f0] sm:$0xff]  ;;  %v1682_v12 = vld [vmem:[#allocation3 + $0x2d8] sm:$0xff]  ;;  %v1684_v16 = vld [vmem:[#allocation3 + $0x2e8] sm:$0xff] }
 0x372   :  { %2089 = vmatprep.subr.bf16.mxu0 %v1627_v33  ;;  %2253 = vmatprep.subr.bf16.mxu1 %v1629_v34  ;;  %v1690_v13 = vld [vmem:[#allocation3 + $0x318] sm:$0xff]  ;;  %v1692_v18 = vld [vmem:[#allocation3 + $0x328] sm:$0xff]  ;;  %v1689_v19 = vld [vmem:[#allocation3 + $0x310] sm:$0xff] }
 0x373   :  { %v1691_v20 = vld [vmem:[#allocation3 + $0x320] sm:$0xff]  ;;  %v1697_v15 = vld [vmem:[#allocation3 + $0x350] sm:$0xff]  ;;  %v1696_v27 = vld [vmem:[#allocation3 + $0x348] sm:$0xff] }
 0x374   :  { %v1699_v21 = vld [vmem:[#allocation3 + $0x360] sm:$0xff]  ;;  %v1698_v28 = vld [vmem:[#allocation3 + $0x358] sm:$0xff]  ;;  %v1704_v29 = vld [vmem:[#allocation3 + $0x388] sm:$0xff] }
 0x375   :  { %2090 = vmatpush1.bf16.msra.mxu0 %v1626_v35  ;;  %2254 = vmatpush1.bf16.msra.mxu1 %v1628_v36  ;;  %v1706_v30 = vld [vmem:[#allocation3 + $0x398] sm:$0xff]  ;;  %v1703_v31 = vld [vmem:[#allocation3 + $0x380] sm:$0xff]  ;;  %v1705_v32 = vld [vmem:[#allocation3 + $0x390] sm:$0xff] }
 0x376   :  { %2091 = vmatprep.subr.bf16.mxu0 %v1634_v37  ;;  %2255 = vmatprep.subr.bf16.mxu1 %v1636_v38  ;;  %v1711_v33 = vld [vmem:[#allocation3 + $0x3c0] sm:$0xff]  ;;  %v1713_v34 = vld [vmem:[#allocation3 + $0x3d0] sm:$0xff]  ;;  %v1710_v35 = vld [vmem:[#allocation3 + $0x3b8] sm:$0xff] }
 0x377   :  { %v1712_v36 = vld [vmem:[#allocation3 + $0x3c8] sm:$0xff]  ;;  %v1718_v37 = vld [vmem:[#allocation3 + $0x3f8] sm:$0xff] }
 0x378   :  { %v1720_v38 = vld [vmem:[#allocation3 + $0x408] sm:$0xff] }
 0x379   :  { %2092 = vmatpush1.bf16.msra.mxu0 %v1633_v39  ;;  %2256 = vmatpush1.bf16.msra.mxu1 %v1635_v43  ;;  %v1717_v39 = vld [vmem:[#allocation3 + $0x3f0] sm:$0xff]  ;;  %v1719_v43 = vld [vmem:[#allocation3 + $0x400] sm:$0xff] }
 0x37a   :  { %2093 = vmatprep.subr.bf16.mxu0 %v1641_v44  ;;  %2257 = vmatprep.subr.bf16.mxu1 %v1643_v45  ;;  %v1725_v44 = vld [vmem:[#allocation3 + $0x430] sm:$0xff]  ;;  %v1727_v45 = vld [vmem:[#allocation3 + $0x440] sm:$0xff] }
 0x37d   :  { %2094 = vmatpush1.bf16.msra.mxu0 %v1640_v14  ;;  %2258 = vmatpush1.bf16.msra.mxu1 %v1642_v46  ;;  %v1724_v14 = vld [vmem:[#allocation3 + $0x428] sm:$0xff]  ;;  %v1726_v46 = vld [vmem:[#allocation3 + $0x438] sm:$0xff] }
 0x37e   :  { %2095 = vmatprep.subr.bf16.mxu0 %v1648_v47  ;;  %2259 = vmatprep.subr.bf16.mxu1 %v1650_v48  ;;  %v1732_v47 = vld [vmem:[#allocation3 + $0x468] sm:$0xff]  ;;  %v1734_v48 = vld [vmem:[#allocation3 + $0x478] sm:$0xff] }
 0x381   :  { %2096 = vmatpush1.bf16.msra.mxu0 %v1647_v49  ;;  %2260 = vmatpush1.bf16.msra.mxu1 %v1649_v50  ;;  %v1731_v49 = vld [vmem:[#allocation3 + $0x460] sm:$0xff]  ;;  %v1733_v50 = vld [vmem:[#allocation3 + $0x470] sm:$0xff] }
 0x382   :  { %2097 = vmatprep.subr.bf16.mxu0 %v1655_v51  ;;  %2261 = vmatprep.subr.bf16.mxu1 %v1657_v52  ;;  %v1739_v51 = vld [vmem:[#allocation3 + $0x4a0] sm:$0xff]  ;;  %v1741_v52 = vld [vmem:[#allocation3 + $0x4b0] sm:$0xff] }
 0x385   :  { %2098 = vmatpush1.bf16.msra.mxu0 %v1654_v53  ;;  %2262 = vmatpush1.bf16.msra.mxu1 %v1656_v54  ;;  %v1738_v53 = vld [vmem:[#allocation3 + $0x498] sm:$0xff]  ;;  %v1740_v54 = vld [vmem:[#allocation3 + $0x4a8] sm:$0xff] }
 0x386   :  { %2099 = vmatprep.subr.bf16.mxu0 %v1662_v55  ;;  %2263 = vmatprep.subr.bf16.mxu1 %v1664_v56  ;;  %v1746_v55 = vld [vmem:[#allocation3 + $0x4d8] sm:$0xff]  ;;  %v1748_v56 = vld [vmem:[#allocation3 + $0x4e8] sm:$0xff] }
 0x389   :  { %2100 = vmatpush1.bf16.msra.mxu0 %v1661_v57  ;;  %2264 = vmatpush1.bf16.msra.mxu1 %v1663_v58  ;;  %v1745_v57 = vld [vmem:[#allocation3 + $0x4d0] sm:$0xff]  ;;  %v1747_v58 = vld [vmem:[#allocation3 + $0x4e0] sm:$0xff] }
 0x38a   :  { %2101 = vmatprep.subr.bf16.mxu0 %v1669_v63  ;;  %2265 = vmatprep.subr.bf16.mxu1 %v1671_v0  ;;  %v1753_v63 = vld [vmem:[#allocation3 + $0x510] sm:$0xff]  ;;  %v1755_v0 = vld [vmem:[#allocation3 + $0x520] sm:$0xff] }
 0x38d   :  { %2102 = vmatpush1.bf16.msra.mxu0 %v1668_v1  ;;  %2266 = vmatpush1.bf16.msra.mxu1 %v1670_v7  ;;  %v1752_v1 = vld [vmem:[#allocation3 + $0x508] sm:$0xff]  ;;  %v1754_v7 = vld [vmem:[#allocation3 + $0x518] sm:$0xff] }
 0x38e   :  { %2103 = vmatprep.subr.bf16.mxu0 %v1676_v4  ;;  %2267 = vmatprep.subr.bf16.mxu1 %v1678_v5  ;;  %v1760_v4 = vld [vmem:[#allocation3 + $0x548] sm:$0xff]  ;;  %v1762_v5 = vld [vmem:[#allocation3 + $0x558] sm:$0xff] }
 0x391   :  { %2104 = vmatpush1.bf16.msra.mxu0 %v1675_v9  ;;  %2268 = vmatpush1.bf16.msra.mxu1 %v1677_v8  ;;  %v1759_v9 = vld [vmem:[#allocation3 + $0x540] sm:$0xff]  ;;  %v1761_v8 = vld [vmem:[#allocation3 + $0x550] sm:$0xff] }
 0x392   :  { %2105 = vmatprep.subr.bf16.mxu0 %v1683_v11  ;;  %2269 = vmatprep.subr.bf16.mxu1 %v1685_v10  ;;  %v1767_v11 = vld [vmem:[#allocation3 + $0x580] sm:$0xff]  ;;  %v1769_v10 = vld [vmem:[#allocation3 + $0x590] sm:$0xff] }
 0x395   :  { %2106 = vmatpush1.bf16.msra.mxu0 %v1682_v12  ;;  %2270 = vmatpush1.bf16.msra.mxu1 %v1684_v16  ;;  %v1766_v12 = vld [vmem:[#allocation3 + $0x578] sm:$0xff]  ;;  %v1768_v16 = vld [vmem:[#allocation3 + $0x588] sm:$0xff] }
 0x396   :  { %2107 = vmatprep.subr.bf16.mxu0 %v1690_v13  ;;  %2271 = vmatprep.subr.bf16.mxu1 %v1692_v18  ;;  %v1774_v13 = vld [vmem:[#allocation3 + $0x5b8] sm:$0xff]  ;;  %v1776_v18 = vld [vmem:[#allocation3 + $0x5c8] sm:$0xff] }
 0x399   :  { %2108 = vmatpush1.bf16.msra.mxu0 %v1689_v19  ;;  %2272 = vmatpush1.bf16.msra.mxu1 %v1691_v20  ;;  %v1773_v19 = vld [vmem:[#allocation3 + $0x5b0] sm:$0xff]  ;;  %v1775_v20 = vld [vmem:[#allocation3 + $0x5c0] sm:$0xff] }
 0x39a   :  { %2109 = vmatprep.subr.bf16.mxu0 %v1697_v15  ;;  %2273 = vmatprep.subr.bf16.mxu1 %v1699_v21  ;;  %v1781_v15 = vld [vmem:[#allocation3 + $0x5f0] sm:$0xff]  ;;  %v1783_v21 = vld [vmem:[#allocation3 + $0x600] sm:$0xff] }
 0x39d   :  { %2110 = vmatpush1.bf16.msra.mxu0 %v1696_v27  ;;  %2274 = vmatpush1.bf16.msra.mxu1 %v1698_v28  ;;  %v1780_v27 = vld [vmem:[#allocation3 + $0x5e8] sm:$0xff]  ;;  %v1782_v28 = vld [vmem:[#allocation3 + $0x5f8] sm:$0xff] }
 0x39e   :  { %2120 = vmatprep.subr.bf16.mxu0 %v1704_v29  ;;  %2284 = vmatprep.subr.bf16.mxu1 %v1706_v30  ;;  %v1788_v29 = vld [vmem:[#allocation3 + $0x628] sm:$0xff]  ;;  %v1790_v30 = vld [vmem:[#allocation3 + $0x638] sm:$0xff] }
 0x3a0   :  { %2112 = vmatmul.mubr.bf16.vlgmr.msra.gmra.mrb[8].mxu0 %v7034_v59  ;;  %2276 = vmatmul.mubr.bf16.vlgmr.msra.gmra.mrb[8].mxu1 %v7034_v59 }
 0x3a1   :  { %2121 = vmatpush1.bf16.msra.mxu0 %v1703_v31  ;;  %2285 = vmatpush1.bf16.msra.mxu1 %v1705_v32  ;;  %v1787_v31 = vld [vmem:[#allocation3 + $0x620] sm:$0xff]  ;;  %v1789_v32 = vld [vmem:[#allocation3 + $0x630] sm:$0xff] }
 0x3a2   :  { %2122 = vmatprep.subr.bf16.mxu0 %v1711_v33  ;;  %2286 = vmatprep.subr.bf16.mxu1 %v1713_v34  ;;  %v1795_v33 = vld [vmem:[#allocation3 + $0x660] sm:$0xff]  ;;  %v1797_v34 = vld [vmem:[#allocation3 + $0x670] sm:$0xff] }
 0x3a3   :  { %2152 = vmatprep.mubr.bf16.mxu0 %v7040_v62  ;;  %2316 = vmatprep.mubr.bf16.mxu1 %v7040_v62 }
 0x3a5   :  { %2123 = vmatpush1.bf16.msra.mxu0 %v1710_v35  ;;  %2287 = vmatpush1.bf16.msra.mxu1 %v1712_v36  ;;  %v1794_v35 = vld [vmem:[#allocation3 + $0x658] sm:$0xff]  ;;  %v1796_v36 = vld [vmem:[#allocation3 + $0x668] sm:$0xff] }
 0x3a6   :  { %2124 = vmatprep.subr.bf16.mxu0 %v1718_v37  ;;  %2288 = vmatprep.subr.bf16.mxu1 %v1720_v38  ;;  %v1802_v37 = vld [vmem:[#allocation3 + $0x698] sm:$0xff]  ;;  %v1804_v38 = vld [vmem:[#allocation3 + $0x6a8] sm:$0xff] }
 0x3a9   :  { %2125 = vmatpush1.bf16.msra.mxu0 %v1717_v39  ;;  %2289 = vmatpush1.bf16.msra.mxu1 %v1719_v43  ;;  %v1801_v39 = vld [vmem:[#allocation3 + $0x690] sm:$0xff]  ;;  %v1803_v43 = vld [vmem:[#allocation3 + $0x6a0] sm:$0xff] }
 0x3aa   :  { %2126 = vmatprep.subr.bf16.mxu0 %v1725_v44  ;;  %2290 = vmatprep.subr.bf16.mxu1 %v1727_v45  ;;  %v1809_v44 = vld [vmem:[#allocation3 + $0x6d0] sm:$0xff]  ;;  %v1811_v45 = vld [vmem:[#allocation3 + $0x6e0] sm:$0xff] }
 0x3ad   :  { %2127 = vmatpush1.bf16.msra.mxu0 %v1724_v14  ;;  %2291 = vmatpush1.bf16.msra.mxu1 %v1726_v46  ;;  %v1808_v14 = vld [vmem:[#allocation3 + $0x6c8] sm:$0xff]  ;;  %v1810_v46 = vld [vmem:[#allocation3 + $0x6d8] sm:$0xff] }
 0x3ae   :  { %2128 = vmatprep.subr.bf16.mxu0 %v1732_v47  ;;  %2292 = vmatprep.subr.bf16.mxu1 %v1734_v48  ;;  %v1816_v47 = vld [vmem:[#allocation3 + $0x708] sm:$0xff]  ;;  %v1818_v48 = vld [vmem:[#allocation3 + $0x718] sm:$0xff] }
 0x3b1   :  { %2129 = vmatpush1.bf16.msra.mxu0 %v1731_v49  ;;  %2293 = vmatpush1.bf16.msra.mxu1 %v1733_v50  ;;  %v1815_v49 = vld [vmem:[#allocation3 + $0x700] sm:$0xff]  ;;  %v1817_v50 = vld [vmem:[#allocation3 + $0x710] sm:$0xff] }
 0x3b2   :  { %2130 = vmatprep.subr.bf16.mxu0 %v1739_v51  ;;  %2294 = vmatprep.subr.bf16.mxu1 %v1741_v52  ;;  %v1823_v51 = vld [vmem:[#allocation3 + $0x740] sm:$0xff]  ;;  %v1825_v52 = vld [vmem:[#allocation3 + $0x750] sm:$0xff] }
 0x3b5   :  { %2131 = vmatpush1.bf16.msra.mxu0 %v1738_v53  ;;  %2295 = vmatpush1.bf16.msra.mxu1 %v1740_v54  ;;  %v1822_v53 = vld [vmem:[#allocation3 + $0x738] sm:$0xff]  ;;  %v1824_v54 = vld [vmem:[#allocation3 + $0x748] sm:$0xff] }
 0x3b6   :  { %2132 = vmatprep.subr.bf16.mxu0 %v1746_v55  ;;  %2296 = vmatprep.subr.bf16.mxu1 %v1748_v56  ;;  %v1830_v55 = vld [vmem:[#allocation3 + $0x778] sm:$0xff]  ;;  %v1832_v56 = vld [vmem:[#allocation3 + $0x788] sm:$0xff] }
 0x3b9   :  { %2133 = vmatpush1.bf16.msra.mxu0 %v1745_v57  ;;  %2297 = vmatpush1.bf16.msra.mxu1 %v1747_v58  ;;  %v1829_v57 = vld [vmem:[#allocation3 + $0x770] sm:$0xff]  ;;  %v1831_v58 = vld [vmem:[#allocation3 + $0x780] sm:$0xff] }
 0x3ba   :  { %2134 = vmatprep.subr.bf16.mxu0 %v1753_v63  ;;  %2298 = vmatprep.subr.bf16.mxu1 %v1755_v0  ;;  %v1837_v63 = vld [vmem:[#allocation3 + $0x7b0] sm:$0xff]  ;;  %v1839_v0 = vld [vmem:[#allocation3 + $0x7c0] sm:$0xff] }
 0x3bd   :  { %2135 = vmatpush1.bf16.msra.mxu0 %v1752_v1  ;;  %2299 = vmatpush1.bf16.msra.mxu1 %v1754_v7  ;;  %v1836_v1 = vld [vmem:[#allocation3 + $0x7a8] sm:$0xff]  ;;  %v1838_v7 = vld [vmem:[#allocation3 + $0x7b8] sm:$0xff] }
 0x3be   :  { %2136 = vmatprep.subr.bf16.mxu0 %v1760_v4  ;;  %2300 = vmatprep.subr.bf16.mxu1 %v1762_v5  ;;  %v1844_v4 = vld [vmem:[#allocation3 + $0x7e8] sm:$0xff]  ;;  %v1846_v5 = vld [vmem:[#allocation3 + $0x7f8] sm:$0xff] }
 0x3c1   :  { %2137 = vmatpush1.bf16.msra.mxu0 %v1759_v9  ;;  %2301 = vmatpush1.bf16.msra.mxu1 %v1761_v8  ;;  %v1843_v9 = vld [vmem:[#allocation3 + $0x7e0] sm:$0xff]  ;;  %v1845_v8 = vld [vmem:[#allocation3 + $0x7f0] sm:$0xff] }
 0x3c2   :  { %2138 = vmatprep.subr.bf16.mxu0 %v1767_v11  ;;  %2302 = vmatprep.subr.bf16.mxu1 %v1769_v10  ;;  %v1851_v11 = vld [vmem:[#allocation3 + $0x820] sm:$0xff]  ;;  %v1853_v10 = vld [vmem:[#allocation3 + $0x830] sm:$0xff] }
 0x3c5   :  { %2139 = vmatpush1.bf16.msra.mxu0 %v1766_v12  ;;  %2303 = vmatpush1.bf16.msra.mxu1 %v1768_v16  ;;  %v1850_v12 = vld [vmem:[#allocation3 + $0x818] sm:$0xff]  ;;  %v1852_v16 = vld [vmem:[#allocation3 + $0x828] sm:$0xff] }
 0x3c6   :  { %2140 = vmatprep.subr.bf16.mxu0 %v1774_v13  ;;  %2304 = vmatprep.subr.bf16.mxu1 %v1776_v18  ;;  %v1858_v13 = vld [vmem:[#allocation3 + $0x858] sm:$0xff]  ;;  %v1860_v18 = vld [vmem:[#allocation3 + $0x868] sm:$0xff] }
 0x3c9   :  { %2141 = vmatpush1.bf16.msra.mxu0 %v1773_v19  ;;  %2305 = vmatpush1.bf16.msra.mxu1 %v1775_v20  ;;  %v1857_v19 = vld [vmem:[#allocation3 + $0x850] sm:$0xff]  ;;  %v1859_v20 = vld [vmem:[#allocation3 + $0x860] sm:$0xff] }
 0x3ca   :  { %2142 = vmatprep.subr.bf16.mxu0 %v1781_v15  ;;  %2306 = vmatprep.subr.bf16.mxu1 %v1783_v21  ;;  %v1865_v15 = vld [vmem:[#allocation3 + $0x890] sm:$0xff]  ;;  %v1867_v21 = vld [vmem:[#allocation3 + $0x8a0] sm:$0xff] }
 0x3cd   :  { %2143 = vmatpush1.bf16.msra.mxu0 %v1780_v27  ;;  %2307 = vmatpush1.bf16.msra.mxu1 %v1782_v28  ;;  %v1864_v27 = vld [vmem:[#allocation3 + $0x888] sm:$0xff]  ;;  %v1866_v28 = vld [vmem:[#allocation3 + $0x898] sm:$0xff] }
 0x3ce   :  { %2144 = vmatprep.subr.bf16.mxu0 %v1788_v29  ;;  %2308 = vmatprep.subr.bf16.mxu1 %v1790_v30  ;;  %v1872_v29 = vld [vmem:[#allocation3 + $0x8c8] sm:$0xff]  ;;  %v1874_v30 = vld [vmem:[#allocation3 + $0x8d8] sm:$0xff] }
 0x3d1   :  { %2145 = vmatpush1.bf16.msra.mxu0 %v1787_v31  ;;  %2309 = vmatpush1.bf16.msra.mxu1 %v1789_v32  ;;  %v1871_v31 = vld [vmem:[#allocation3 + $0x8c0] sm:$0xff]  ;;  %v1873_v32 = vld [vmem:[#allocation3 + $0x8d0] sm:$0xff] }
 0x3d2   :  { %2146 = vmatprep.subr.bf16.mxu0 %v1795_v33  ;;  %2310 = vmatprep.subr.bf16.mxu1 %v1797_v34  ;;  %v1879_v33 = vld [vmem:[#allocation3 + $0x900] sm:$0xff]  ;;  %v1881_v34 = vld [vmem:[#allocation3 + $0x910] sm:$0xff] }
 0x3d5   :  { %2147 = vmatpush1.bf16.msra.mxu0 %v1794_v35  ;;  %2311 = vmatpush1.bf16.msra.mxu1 %v1796_v36  ;;  %v1878_v35 = vld [vmem:[#allocation3 + $0x8f8] sm:$0xff]  ;;  %v1880_v36 = vld [vmem:[#allocation3 + $0x908] sm:$0xff] }
 0x3d6   :  { %2148 = vmatprep.subr.bf16.mxu0 %v1802_v37  ;;  %2312 = vmatprep.subr.bf16.mxu1 %v1804_v38  ;;  %v1886_v37 = vld [vmem:[#allocation3 + $0x938] sm:$0xff]  ;;  %v1888_v38 = vld [vmem:[#allocation3 + $0x948] sm:$0xff] }
 0x3d9   :  { %2149 = vmatpush1.bf16.msra.mxu0 %v1801_v39  ;;  %2313 = vmatpush1.bf16.msra.mxu1 %v1803_v43  ;;  %v1885_v39 = vld [vmem:[#allocation3 + $0x930] sm:$0xff]  ;;  %v1887_v43 = vld [vmem:[#allocation3 + $0x940] sm:$0xff] }
 0x3da   :  { %2150 = vmatprep.subr.bf16.mxu0 %v1809_v44  ;;  %2314 = vmatprep.subr.bf16.mxu1 %v1811_v45  ;;  %v1893_v44 = vld [vmem:[#allocation3 + $0x970] sm:$0xff]  ;;  %v1895_v45 = vld [vmem:[#allocation3 + $0x980] sm:$0xff] }
 0x3dd   :  { %2151 = vmatpush1.bf16.msra.mxu0 %v1808_v14  ;;  %2315 = vmatpush1.bf16.msra.mxu1 %v1810_v46  ;;  %v1892_v14 = vld [vmem:[#allocation3 + $0x968] sm:$0xff]  ;;  %v1894_v46 = vld [vmem:[#allocation3 + $0x978] sm:$0xff] }
 0x3de   :  { %2161 = vmatprep.subr.bf16.mxu0 %v1816_v47  ;;  %2325 = vmatprep.subr.bf16.mxu1 %v1818_v48  ;;  %v1900_v47 = vld [vmem:[#allocation3 + $0x9a8] sm:$0xff]  ;;  %v1902_v48 = vld [vmem:[#allocation3 + $0x9b8] sm:$0xff] }
 0x3e0   :  { %2153 = vmatmul.mubr.bf16.vlgmr.msra.gmra.mrb[8].mxu0 %v7036_v60  ;;  %2317 = vmatmul.mubr.bf16.vlgmr.msra.gmra.mrb[8].mxu1 %v7036_v60 }
 0x3e1   :  { %2162 = vmatpush1.bf16.msra.mxu0 %v1815_v49  ;;  %2326 = vmatpush1.bf16.msra.mxu1 %v1817_v50  ;;  %v1899_v49 = vld [vmem:[#allocation3 + $0x9a0] sm:$0xff]  ;;  %v1901_v50 = vld [vmem:[#allocation3 + $0x9b0] sm:$0xff] }
 0x3e2   :  { %2163 = vmatprep.subr.bf16.mxu0 %v1823_v51  ;;  %2327 = vmatprep.subr.bf16.mxu1 %v1825_v52  ;;  %v1907_v51 = vld [vmem:[#allocation3 + $0x9e0] sm:$0xff]  ;;  %v1909_v52 = vld [vmem:[#allocation3 + $0x9f0] sm:$0xff] }
 0x3e3   :  { %2193 = vmatprep.mubr.bf16.mxu0 %v7064_v22  ;;  %2357 = vmatprep.mubr.bf16.mxu1 %v7064_v22 }
 0x3e5   :  { %2164 = vmatpush1.bf16.msra.mxu0 %v1822_v53  ;;  %2328 = vmatpush1.bf16.msra.mxu1 %v1824_v54  ;;  %v1906_v53 = vld [vmem:[#allocation3 + $0x9d8] sm:$0xff]  ;;  %v1908_v54 = vld [vmem:[#allocation3 + $0x9e8] sm:$0xff] }
 0x3e6   :  { %2165 = vmatprep.subr.bf16.mxu0 %v1830_v55  ;;  %2329 = vmatprep.subr.bf16.mxu1 %v1832_v56  ;;  %v1914_v55 = vld [vmem:[#allocation3 + $0xa18] sm:$0xff]  ;;  %v1916_v56 = vld [vmem:[#allocation3 + $0xa28] sm:$0xff] }
 0x3e9   :  { %2166 = vmatpush1.bf16.msra.mxu0 %v1829_v57  ;;  %2330 = vmatpush1.bf16.msra.mxu1 %v1831_v58  ;;  %v1913_v57 = vld [vmem:[#allocation3 + $0xa10] sm:$0xff]  ;;  %v1915_v58 = vld [vmem:[#allocation3 + $0xa20] sm:$0xff] }
 0x3ea   :  { %2167 = vmatprep.subr.bf16.mxu0 %v1837_v63  ;;  %2331 = vmatprep.subr.bf16.mxu1 %v1839_v0  ;;  %v1921_v63 = vld [vmem:[#allocation3 + $0xa50] sm:$0xff]  ;;  %v1923_v0 = vld [vmem:[#allocation3 + $0xa60] sm:$0xff] }
 0x3ed   :  { %2168 = vmatpush1.bf16.msra.mxu0 %v1836_v1  ;;  %2332 = vmatpush1.bf16.msra.mxu1 %v1838_v7  ;;  %v1920_v1 = vld [vmem:[#allocation3 + $0xa48] sm:$0xff]  ;;  %v1922_v7 = vld [vmem:[#allocation3 + $0xa58] sm:$0xff] }
 0x3ee   :  { %2169 = vmatprep.subr.bf16.mxu0 %v1844_v4  ;;  %2333 = vmatprep.subr.bf16.mxu1 %v1846_v5  ;;  %v1928_v4 = vld [vmem:[#allocation3 + $0xa88] sm:$0xff]  ;;  %v1930_v5 = vld [vmem:[#allocation3 + $0xa98] sm:$0xff] }
 0x3f1   :  { %2170 = vmatpush1.bf16.msra.mxu0 %v1843_v9  ;;  %2334 = vmatpush1.bf16.msra.mxu1 %v1845_v8  ;;  %v1927_v9 = vld [vmem:[#allocation3 + $0xa80] sm:$0xff]  ;;  %v1929_v8 = vld [vmem:[#allocation3 + $0xa90] sm:$0xff] }
 0x3f2   :  { %2171 = vmatprep.subr.bf16.mxu0 %v1851_v11  ;;  %2335 = vmatprep.subr.bf16.mxu1 %v1853_v10  ;;  %v1935_v11 = vld [vmem:[#allocation3 + $0xac0] sm:$0xff]  ;;  %v1937_v10 = vld [vmem:[#allocation3 + $0xad0] sm:$0xff] }
 0x3f5   :  { %2172 = vmatpush1.bf16.msra.mxu0 %v1850_v12  ;;  %2336 = vmatpush1.bf16.msra.mxu1 %v1852_v16  ;;  %v1934_v12 = vld [vmem:[#allocation3 + $0xab8] sm:$0xff]  ;;  %v1936_v16 = vld [vmem:[#allocation3 + $0xac8] sm:$0xff] }
 0x3f6   :  { %2173 = vmatprep.subr.bf16.mxu0 %v1858_v13  ;;  %2337 = vmatprep.subr.bf16.mxu1 %v1860_v18  ;;  %v1942_v13 = vld [vmem:[#allocation3 + $0xaf8] sm:$0xff]  ;;  %v1944_v18 = vld [vmem:[#allocation3 + $0xb08] sm:$0xff] }
 0x3f9   :  { %2174 = vmatpush1.bf16.msra.mxu0 %v1857_v19  ;;  %2338 = vmatpush1.bf16.msra.mxu1 %v1859_v20  ;;  %v1941_v19 = vld [vmem:[#allocation3 + $0xaf0] sm:$0xff]  ;;  %v1943_v20 = vld [vmem:[#allocation3 + $0xb00] sm:$0xff] }
 0x3fa   :  { %2175 = vmatprep.subr.bf16.mxu0 %v1865_v15  ;;  %2339 = vmatprep.subr.bf16.mxu1 %v1867_v21  ;;  %v1949_v15 = vld [vmem:[#allocation3 + $0xb30] sm:$0xff]  ;;  %v1951_v21 = vld [vmem:[#allocation3 + $0xb40] sm:$0xff] }
 0x3fd   :  { %2176 = vmatpush1.bf16.msra.mxu0 %v1864_v27  ;;  %2340 = vmatpush1.bf16.msra.mxu1 %v1866_v28  ;;  %v1948_v27 = vld [vmem:[#allocation3 + $0xb28] sm:$0xff]  ;;  %v1950_v28 = vld [vmem:[#allocation3 + $0xb38] sm:$0xff] }
 0x3fe   :  { %2177 = vmatprep.subr.bf16.mxu0 %v1872_v29  ;;  %2341 = vmatprep.subr.bf16.mxu1 %v1874_v30  ;;  %v1956_v29 = vld [vmem:[#allocation3 + $0xb68] sm:$0xff]  ;;  %v1958_v30 = vld [vmem:[#allocation3 + $0xb78] sm:$0xff] }
 0x401   :  { %2178 = vmatpush1.bf16.msra.mxu0 %v1871_v31  ;;  %2342 = vmatpush1.bf16.msra.mxu1 %v1873_v32  ;;  %v1955_v31 = vld [vmem:[#allocation3 + $0xb60] sm:$0xff]  ;;  %v1957_v32 = vld [vmem:[#allocation3 + $0xb70] sm:$0xff] }
 0x402   :  { %2179 = vmatprep.subr.bf16.mxu0 %v1879_v33  ;;  %2343 = vmatprep.subr.bf16.mxu1 %v1881_v34  ;;  %v1963_v33 = vld [vmem:[#allocation3 + $0xba0] sm:$0xff]  ;;  %v1965_v34 = vld [vmem:[#allocation3 + $0xbb0] sm:$0xff] }
 0x405   :  { %2180 = vmatpush1.bf16.msra.mxu0 %v1878_v35  ;;  %2344 = vmatpush1.bf16.msra.mxu1 %v1880_v36  ;;  %v1962_v35 = vld [vmem:[#allocation3 + $0xb98] sm:$0xff]  ;;  %v1964_v36 = vld [vmem:[#allocation3 + $0xba8] sm:$0xff] }
 0x406   :  { %2181 = vmatprep.subr.bf16.mxu0 %v1886_v37  ;;  %2345 = vmatprep.subr.bf16.mxu1 %v1888_v38  ;;  %v1970_v37 = vld [vmem:[#allocation3 + $0xbd8] sm:$0xff]  ;;  %v1972_v38 = vld [vmem:[#allocation3 + $0xbe8] sm:$0xff] }
 0x409   :  { %2182 = vmatpush1.bf16.msra.mxu0 %v1885_v39  ;;  %2346 = vmatpush1.bf16.msra.mxu1 %v1887_v43  ;;  %v1969_v39 = vld [vmem:[#allocation3 + $0xbd0] sm:$0xff]  ;;  %v1971_v43 = vld [vmem:[#allocation3 + $0xbe0] sm:$0xff] }
 0x40a   :  { %2183 = vmatprep.subr.bf16.mxu0 %v1893_v44  ;;  %2347 = vmatprep.subr.bf16.mxu1 %v1895_v45  ;;  %v1977_v44 = vld [vmem:[#allocation3 + $0xc10] sm:$0xff]  ;;  %v1979_v45 = vld [vmem:[#allocation3 + $0xc20] sm:$0xff] }
 0x40d   :  { %2184 = vmatpush1.bf16.msra.mxu0 %v1892_v14  ;;  %2348 = vmatpush1.bf16.msra.mxu1 %v1894_v46  ;;  %v1976_v14 = vld [vmem:[#allocation3 + $0xc08] sm:$0xff]  ;;  %v1978_v46 = vld [vmem:[#allocation3 + $0xc18] sm:$0xff] }
 0x40e   :  { %2185 = vmatprep.subr.bf16.mxu0 %v1900_v47  ;;  %2349 = vmatprep.subr.bf16.mxu1 %v1902_v48  ;;  %v1984_v47 = vld [vmem:[#allocation3 + $0xc48] sm:$0xff]  ;;  %v1986_v48 = vld [vmem:[#allocation3 + $0xc58] sm:$0xff] }
 0x411   :  { %2186 = vmatpush1.bf16.msra.mxu0 %v1899_v49  ;;  %2350 = vmatpush1.bf16.msra.mxu1 %v1901_v50  ;;  %v1983_v49 = vld [vmem:[#allocation3 + $0xc40] sm:$0xff]  ;;  %v1985_v50 = vld [vmem:[#allocation3 + $0xc50] sm:$0xff] }
 0x412   :  { %2187 = vmatprep.subr.bf16.mxu0 %v1907_v51  ;;  %2351 = vmatprep.subr.bf16.mxu1 %v1909_v52  ;;  %v1991_v51 = vld [vmem:[#allocation3 + $0xc80] sm:$0xff]  ;;  %v1993_v52 = vld [vmem:[#allocation3 + $0xc90] sm:$0xff] }
 0x415   :  { %2188 = vmatpush1.bf16.msra.mxu0 %v1906_v53  ;;  %2352 = vmatpush1.bf16.msra.mxu1 %v1908_v54  ;;  %v1990_v53 = vld [vmem:[#allocation3 + $0xc78] sm:$0xff]  ;;  %v1992_v54 = vld [vmem:[#allocation3 + $0xc88] sm:$0xff] }
 0x416   :  { %2189 = vmatprep.subr.bf16.mxu0 %v1914_v55  ;;  %2353 = vmatprep.subr.bf16.mxu1 %v1916_v56  ;;  %v1998_v55 = vld [vmem:[#allocation3 + $0xcb8] sm:$0xff]  ;;  %v2000_v56 = vld [vmem:[#allocation3 + $0xcc8] sm:$0xff] }
 0x419   :  { %2190 = vmatpush1.bf16.msra.mxu0 %v1913_v57  ;;  %2354 = vmatpush1.bf16.msra.mxu1 %v1915_v58  ;;  %v1997_v57 = vld [vmem:[#allocation3 + $0xcb0] sm:$0xff]  ;;  %v1999_v58 = vld [vmem:[#allocation3 + $0xcc0] sm:$0xff] }
 0x41a   :  { %2191 = vmatprep.subr.bf16.mxu0 %v1921_v63  ;;  %2355 = vmatprep.subr.bf16.mxu1 %v1923_v0  ;;  %v2005_v63 = vld [vmem:[#allocation3 + $0xcf0] sm:$0xff]  ;;  %v2007_v0 = vld [vmem:[#allocation3 + $0xd00] sm:$0xff] }
 0x41d   :  { %2192 = vmatpush1.bf16.msra.mxu0 %v1920_v1  ;;  %2356 = vmatpush1.bf16.msra.mxu1 %v1922_v7  ;;  %v2004_v1 = vld [vmem:[#allocation3 + $0xce8] sm:$0xff]  ;;  %v2006_v7 = vld [vmem:[#allocation3 + $0xcf8] sm:$0xff] }
 0x41e   :  { %2202 = vmatprep.subr.bf16.mxu0 %v1928_v4  ;;  %2366 = vmatprep.subr.bf16.mxu1 %v1930_v5  ;;  %v2012_v4 = vld [vmem:[#allocation3 + $0xd28] sm:$0xff]  ;;  %v2014_v5 = vld [vmem:[#allocation3 + $0xd38] sm:$0xff] }
 0x420   :  { %2194 = vmatmul.mubr.bf16.vlgmr.msra.gmra.mrb[8].mxu0 %v7060_v2  ;;  %2358 = vmatmul.mubr.bf16.vlgmr.msra.gmra.mrb[8].mxu1 %v7060_v2 }
 0x421   :  { %2203 = vmatpush1.bf16.msra.mxu0 %v1927_v9  ;;  %2367 = vmatpush1.bf16.msra.mxu1 %v1929_v8  ;;  %v2011_v9 = vld [vmem:[#allocation3 + $0xd20] sm:$0xff]  ;;  %v2013_v8 = vld [vmem:[#allocation3 + $0xd30] sm:$0xff] }
 0x422   :  { %2204 = vmatprep.subr.bf16.mxu0 %v1935_v11  ;;  %2368 = vmatprep.subr.bf16.mxu1 %v1937_v10  ;;  %v2019_v11 = vld [vmem:[#allocation3 + $0xd60] sm:$0xff]  ;;  %v2021_v10 = vld [vmem:[#allocation3 + $0xd70] sm:$0xff] }
 0x423   :  { %2234 = vmatprep.mubr.bf16.mxu0 %v7066_v3  ;;  %2398 = vmatprep.mubr.bf16.mxu1 %v7066_v3 }
 0x425   :  { %2205 = vmatpush1.bf16.msra.mxu0 %v1934_v12  ;;  %2369 = vmatpush1.bf16.msra.mxu1 %v1936_v16  ;;  %v2018_v12 = vld [vmem:[#allocation3 + $0xd58] sm:$0xff]  ;;  %v2020_v16 = vld [vmem:[#allocation3 + $0xd68] sm:$0xff] }
 0x426   :  { %2206 = vmatprep.subr.bf16.mxu0 %v1942_v13  ;;  %2370 = vmatprep.subr.bf16.mxu1 %v1944_v18  ;;  %v2026_v13 = vld [vmem:[#allocation3 + $0xd98] sm:$0xff]  ;;  %v2028_v18 = vld [vmem:[#allocation3 + $0xda8] sm:$0xff] }
 0x429   :  { %2207 = vmatpush1.bf16.msra.mxu0 %v1941_v19  ;;  %2371 = vmatpush1.bf16.msra.mxu1 %v1943_v20  ;;  %v2025_v19 = vld [vmem:[#allocation3 + $0xd90] sm:$0xff]  ;;  %v2027_v20 = vld [vmem:[#allocation3 + $0xda0] sm:$0xff] }
 0x42a   :  { %2208 = vmatprep.subr.bf16.mxu0 %v1949_v15  ;;  %2372 = vmatprep.subr.bf16.mxu1 %v1951_v21  ;;  %v2033_v15 = vld [vmem:[#allocation3 + $0xdd0] sm:$0xff]  ;;  %v2035_v21 = vld [vmem:[#allocation3 + $0xde0] sm:$0xff] }
 0x42d   :  { %2209 = vmatpush1.bf16.msra.mxu0 %v1948_v27  ;;  %2373 = vmatpush1.bf16.msra.mxu1 %v1950_v28  ;;  %v2032_v27 = vld [vmem:[#allocation3 + $0xdc8] sm:$0xff]  ;;  %v2034_v28 = vld [vmem:[#allocation3 + $0xdd8] sm:$0xff] }
 0x42e   :  { %2210 = vmatprep.subr.bf16.mxu0 %v1956_v29  ;;  %2374 = vmatprep.subr.bf16.mxu1 %v1958_v30  ;;  %v1596_v29 = vld [vmem:[#allocation3 + $0x28] sm:$0xff]  ;;  %v1653_v30 = vld [vmem:[#allocation3 + $0x1f0] sm:$0xff] }
 0x431   :  { %2211 = vmatpush1.bf16.msra.mxu0 %v1955_v31  ;;  %2375 = vmatpush1.bf16.msra.mxu1 %v1957_v32  ;;  %v1595_v31 = vld [vmem:[#allocation3 + $0x20] sm:$0xff]  ;;  %v1597_v32 = vld [vmem:[#allocation3 + $0x30] sm:$0xff] }
 0x432   :  { %2212 = vmatprep.subr.bf16.mxu0 %v1963_v33  ;;  %2376 = vmatprep.subr.bf16.mxu1 %v1965_v34  ;;  %v1603_v33 = vld [vmem:[#allocation3 + $0x60] sm:$0xff]  ;;  %v1660_v34 = vld [vmem:[#allocation3 + $0x228] sm:$0xff] }
 0x435   :  { %2213 = vmatpush1.bf16.msra.mxu0 %v1962_v35  ;;  %2377 = vmatpush1.bf16.msra.mxu1 %v1964_v36  ;;  %v1602_v35 = vld [vmem:[#allocation3 + $0x58] sm:$0xff]  ;;  %v1604_v36 = vld [vmem:[#allocation3 + $0x68] sm:$0xff] }
 0x436   :  { %2214 = vmatprep.subr.bf16.mxu0 %v1970_v37  ;;  %2378 = vmatprep.subr.bf16.mxu1 %v1972_v38  ;;  %v1610_v37 = vld [vmem:[#allocation3 + $0x98] sm:$0xff]  ;;  %v1667_v38 = vld [vmem:[#allocation3 + $0x260] sm:$0xff] }
 0x439   :  { %2215 = vmatpush1.bf16.msra.mxu0 %v1969_v39  ;;  %2379 = vmatpush1.bf16.msra.mxu1 %v1971_v43  ;;  %v1609_v39 = vld [vmem:[#allocation3 + $0x90] sm:$0xff]  ;;  %v1611_v43 = vld [vmem:[#allocation3 + $0xa0] sm:$0xff] }
 0x43a   :  { %2216 = vmatprep.subr.bf16.mxu0 %v1977_v44  ;;  %2380 = vmatprep.subr.bf16.mxu1 %v1979_v45  ;;  %v1617_v44 = vld [vmem:[#allocation3 + $0xd0] sm:$0xff]  ;;  %v1674_v45 = vld [vmem:[#allocation3 + $0x298] sm:$0xff] }
 0x43d   :  { %2217 = vmatpush1.bf16.msra.mxu0 %v1976_v14  ;;  %2381 = vmatpush1.bf16.msra.mxu1 %v1978_v46  ;;  %v1616_v14 = vld [vmem:[#allocation3 + $0xc8] sm:$0xff]  ;;  %v1618_v46 = vld [vmem:[#allocation3 + $0xd8] sm:$0xff] }
 0x43e   :  { %2218 = vmatprep.subr.bf16.mxu0 %v1984_v47  ;;  %2382 = vmatprep.subr.bf16.mxu1 %v1986_v48  ;;  %v1624_v47 = vld [vmem:[#allocation3 + $0x108] sm:$0xff]  ;;  %v1681_v48 = vld [vmem:[#allocation3 + $0x2d0] sm:$0xff] }
 0x441   :  { %2219 = vmatpush1.bf16.msra.mxu0 %v1983_v49  ;;  %2383 = vmatpush1.bf16.msra.mxu1 %v1985_v50  ;;  %v1625_v49 = vld [vmem:[#allocation3 + $0x110] sm:$0xff]  ;;  %v1631_v50 = vld [vmem:[#allocation3 + $0x140] sm:$0xff] }
 0x442   :  { %2220 = vmatprep.subr.bf16.mxu0 %v1991_v51  ;;  %2384 = vmatprep.subr.bf16.mxu1 %v1993_v52  ;;  %v1688_v51 = vld [vmem:[#allocation3 + $0x308] sm:$0xff]  ;;  %v1630_v52 = vld [vmem:[#allocation3 + $0x138] sm:$0xff] }
 0x445   :  { %2221 = vmatpush1.bf16.msra.mxu0 %v1990_v53  ;;  %2385 = vmatpush1.bf16.msra.mxu1 %v1992_v54  ;;  %v1632_v53 = vld [vmem:[#allocation3 + $0x148] sm:$0xff]  ;;  %v1638_v54 = vld [vmem:[#allocation3 + $0x178] sm:$0xff] }
 0x446   :  { %2222 = vmatprep.subr.bf16.mxu0 %v1998_v55  ;;  %2386 = vmatprep.subr.bf16.mxu1 %v2000_v56  ;;  %v1695_v55 = vld [vmem:[#allocation3 + $0x340] sm:$0xff]  ;;  %v1637_v56 = vld [vmem:[#allocation3 + $0x170] sm:$0xff] }
 0x449   :  { %2223 = vmatpush1.bf16.msra.mxu0 %v1997_v57  ;;  %2387 = vmatpush1.bf16.msra.mxu1 %v1999_v58  ;;  %v1639_v57 = vld [vmem:[#allocation3 + $0x180] sm:$0xff]  ;;  %v1645_v58 = vld [vmem:[#allocation3 + $0x1b0] sm:$0xff] }
 0x44a   :  { %2224 = vmatprep.subr.bf16.mxu0 %v2005_v63  ;;  %2388 = vmatprep.subr.bf16.mxu1 %v2007_v0  ;;  %v1702_v63 = vld [vmem:[#allocation3 + $0x378] sm:$0xff]  ;;  %v1644_v0 = vld [vmem:[#allocation3 + $0x1a8] sm:$0xff] }
 0x44d   :  { %2225 = vmatpush1.bf16.msra.mxu0 %v2004_v1  ;;  %2389 = vmatpush1.bf16.msra.mxu1 %v2006_v7  ;;  %v1646_v1 = vld [vmem:[#allocation3 + $0x1b8] sm:$0xff]  ;;  %v1652_v7 = vld [vmem:[#allocation3 + $0x1e8] sm:$0xff] }
 0x44e   :  { %2226 = vmatprep.subr.bf16.mxu0 %v2012_v4  ;;  %2390 = vmatprep.subr.bf16.mxu1 %v2014_v5  ;;  %v1765_v4 = vld [vmem:[#allocation3 + $0x570] sm:$0xff]  ;;  %v1651_v5 = vld [vmem:[#allocation3 + $0x1e0] sm:$0xff] }
 0x451   :  { %2227 = vmatpush1.bf16.msra.mxu0 %v2011_v9  ;;  %2391 = vmatpush1.bf16.msra.mxu1 %v2013_v8  ;;  %v1709_v9 = vld [vmem:[#allocation3 + $0x3b0] sm:$0xff]  ;;  %v1659_v8 = vld [vmem:[#allocation3 + $0x220] sm:$0xff] }
 0x452   :  { %2228 = vmatprep.subr.bf16.mxu0 %v2019_v11  ;;  %2392 = vmatprep.subr.bf16.mxu1 %v2021_v10  ;;  %v1772_v11 = vld [vmem:[#allocation3 + $0x5a8] sm:$0xff]  ;;  %v1658_v10 = vld [vmem:[#allocation3 + $0x218] sm:$0xff] }
 0x455   :  { %2229 = vmatpush1.bf16.msra.mxu0 %v2018_v12  ;;  %2393 = vmatpush1.bf16.msra.mxu1 %v2020_v16  ;;  %v1716_v12 = vld [vmem:[#allocation3 + $0x3e8] sm:$0xff]  ;;  %v1666_v16 = vld [vmem:[#allocation3 + $0x258] sm:$0xff] }
 0x456   :  { %2230 = vmatprep.subr.bf16.mxu0 %v2026_v13  ;;  %2394 = vmatprep.subr.bf16.mxu1 %v2028_v18  ;;  %v1779_v13 = vld [vmem:[#allocation3 + $0x5e0] sm:$0xff]  ;;  %v1665_v18 = vld [vmem:[#allocation3 + $0x250] sm:$0xff] }
 0x459   :  { %2231 = vmatpush1.bf16.msra.mxu0 %v2025_v19  ;;  %2395 = vmatpush1.bf16.msra.mxu1 %v2027_v20  ;;  %v1723_v19 = vld [vmem:[#allocation3 + $0x420] sm:$0xff]  ;;  %v1673_v20 = vld [vmem:[#allocation3 + $0x290] sm:$0xff] }
 0x45a   :  { %2232 = vmatprep.subr.bf16.mxu0 %v2033_v15  ;;  %2396 = vmatprep.subr.bf16.mxu1 %v2035_v21  ;;  %v1786_v15 = vld [vmem:[#allocation3 + $0x618] sm:$0xff]  ;;  %v1672_v21 = vld [vmem:[#allocation3 + $0x288] sm:$0xff] }
 0x45d   :  { %2233 = vmatpush1.bf16.msra.mxu0 %v2032_v27  ;;  %2397 = vmatpush1.bf16.msra.mxu1 %v2034_v28  ;;  %v1730_v27 = vld [vmem:[#allocation3 + $0x458] sm:$0xff]  ;;  %v1680_v28 = vld [vmem:[#allocation3 + $0x2c8] sm:$0xff] }
 0x45e   :  { %2407 = vmatprep.subr.bf16.mxu0 %v1596_v29  ;;  %5957 = vmatprep.subr.bf16.mxu1 %v1653_v30  ;;  %v1793_v29 = vld [vmem:[#allocation3 + $0x650] sm:$0xff]  ;;  %v1679_v30 = vld [vmem:[#allocation3 + $0x2c0] sm:$0xff] }
 0x460   :  { %2235 = vmatmul.mubr.bf16.vlgmr.msra.gmra.mrb[8].mxu0 %v7062_v6  ;;  %2399 = vmatmul.mubr.bf16.vlgmr.msra.gmra.mrb[8].mxu1 %v7062_v6 }
 0x461   :  { %2408 = vmatpush1.bf16.msra.mxu0 %v1595_v31  ;;  %5958 = vmatpush3.bf16.msra.mxu1 %v1597_v32  ;;  %v1737_v31 = vld [vmem:[#allocation3 + $0x490] sm:$0xff]  ;;  %v1687_v32 = vld [vmem:[#allocation3 + $0x300] sm:$0xff] }
 0x462   :  { %2409 = vmatprep.subr.bf16.mxu0 %v1603_v33  ;;  %5959 = vmatprep.subr.bf16.mxu1 %v1660_v34  ;;  %v1800_v33 = vld [vmem:[#allocation3 + $0x688] sm:$0xff]  ;;  %v1686_v34 = vld [vmem:[#allocation3 + $0x2f8] sm:$0xff] }
 0x463   :  { %2439 = vmatprep.mubr.bf16.mxu0 %v7038_v61  ;;  %2603 = vmatprep.mubr.bf16.mxu1 %v7038_v61  ;;  %v1623_v61 = vld [vmem:[#allocation3 + $0x100] sm:$0xff] }
 0x465   :  { %2410 = vmatpush1.bf16.msra.mxu0 %v1602_v35  ;;  %5960 = vmatpush3.bf16.msra.mxu1 %v1604_v36  ;;  %v1744_v35 = vld [vmem:[#allocation3 + $0x4c8] sm:$0xff]  ;;  %v1694_v36 = vld [vmem:[#allocation3 + $0x338] sm:$0xff] }
 0x466   :  { %2411 = vmatprep.subr.bf16.mxu0 %v1610_v37  ;;  %5961 = vmatprep.subr.bf16.mxu1 %v1667_v38  ;;  %v1807_v37 = vld [vmem:[#allocation3 + $0x6c0] sm:$0xff]  ;;  %v1693_v38 = vld [vmem:[#allocation3 + $0x330] sm:$0xff] }
 0x469   :  { %2412 = vmatpush1.bf16.msra.mxu0 %v1609_v39  ;;  %5962 = vmatpush3.bf16.msra.mxu1 %v1611_v43  ;;  %v1751_v39 = vld [vmem:[#allocation3 + $0x500] sm:$0xff]  ;;  %v1701_v43 = vld [vmem:[#allocation3 + $0x370] sm:$0xff] }
 0x46a   :  { %2413 = vmatprep.subr.bf16.mxu0 %v1617_v44  ;;  %5963 = vmatprep.subr.bf16.mxu1 %v1674_v45  ;;  %v1814_v44 = vld [vmem:[#allocation3 + $0x6f8] sm:$0xff]  ;;  %v1700_v45 = vld [vmem:[#allocation3 + $0x368] sm:$0xff] }
 0x46d   :  { %2414 = vmatpush1.bf16.msra.mxu0 %v1616_v14  ;;  %5964 = vmatpush3.bf16.msra.mxu1 %v1618_v46  ;;  %v1758_v14 = vld [vmem:[#allocation3 + $0x538] sm:$0xff]  ;;  %v1708_v46 = vld [vmem:[#allocation3 + $0x3a8] sm:$0xff] }
 0x46e   :  { %2415 = vmatprep.subr.bf16.mxu0 %v1624_v47  ;;  %5965 = vmatprep.subr.bf16.mxu1 %v1681_v48  ;;  %v1877_v47 = vld [vmem:[#allocation3 + $0x8f0] sm:$0xff]  ;;  %v1707_v48 = vld [vmem:[#allocation3 + $0x3a0] sm:$0xff] }
 0x471   :  { %2416 = vmatpush1.bf16.msra.mxu0 %v1623_v61  ;;  %5966 = vmatpush3.bf16.msra.mxu1 %v1625_v49  ;;  %v1821_v61 = vld [vmem:[#allocation3 + $0x730] sm:$0xff]  ;;  %v1715_v49 = vld [vmem:[#allocation3 + $0x3e0] sm:$0xff] }
 0x472   :  { %2417 = vmatprep.subr.bf16.mxu0 %v1631_v50  ;;  %5967 = vmatprep.subr.bf16.mxu1 %v1688_v51  ;;  %v1884_v50 = vld [vmem:[#allocation3 + $0x928] sm:$0xff]  ;;  %v1714_v51 = vld [vmem:[#allocation3 + $0x3d8] sm:$0xff] }
 0x475   :  { %2418 = vmatpush1.bf16.msra.mxu0 %v1630_v52  ;;  %5968 = vmatpush3.bf16.msra.mxu1 %v1632_v53  ;;  %v1828_v52 = vld [vmem:[#allocation3 + $0x768] sm:$0xff]  ;;  %v1722_v53 = vld [vmem:[#allocation3 + $0x418] sm:$0xff] }
 0x476   :  { %2419 = vmatprep.subr.bf16.mxu0 %v1638_v54  ;;  %5969 = vmatprep.subr.bf16.mxu1 %v1695_v55  ;;  %v1891_v54 = vld [vmem:[#allocation3 + $0x960] sm:$0xff]  ;;  %v1721_v55 = vld [vmem:[#allocation3 + $0x410] sm:$0xff] }
 0x479   :  { %2420 = vmatpush1.bf16.msra.mxu0 %v1637_v56  ;;  %5970 = vmatpush3.bf16.msra.mxu1 %v1639_v57  ;;  %v1729_v56 = vld [vmem:[#allocation3 + $0x450] sm:$0xff]  ;;  %v1898_v57 = vld [vmem:[#allocation3 + $0x998] sm:$0xff] }
 0x47a   :  { %2421 = vmatprep.subr.bf16.mxu0 %v1645_v58  ;;  %5971 = vmatprep.subr.bf16.mxu1 %v1702_v63  ;;  %v1728_v58 = vld [vmem:[#allocation3 + $0x448] sm:$0xff]  ;;  %v1842_v63 = vld [vmem:[#allocation3 + $0x7d8] sm:$0xff] }
 0x47d   :  { %2422 = vmatpush1.bf16.msra.mxu0 %v1644_v0  ;;  %5972 = vmatpush3.bf16.msra.mxu1 %v1646_v1  ;;  %v1736_v0 = vld [vmem:[#allocation3 + $0x488] sm:$0xff]  ;;  %v1905_v1 = vld [vmem:[#allocation3 + $0x9d0] sm:$0xff] }
 0x47e   :  { %2423 = vmatprep.subr.bf16.mxu0 %v1652_v7  ;;  %5979 = vmatprep.subr.bf16.mxu1 %v1765_v4  ;;  %v1849_v7 = vld [vmem:[#allocation3 + $0x810] sm:$0xff]  ;;  %v1743_v4 = vld [vmem:[#allocation3 + $0x4c0] sm:$0xff] }
 0x480   :  { %2604 = vmatmul.mubr.bf16.vlgmr.msra.gmra.mrb[12].mxu1 %v7034_v59 }
 0x481   :  { %2424 = vmatpush1.bf16.msra.mxu0 %v1651_v5  ;;  %5980 = vmatpush3.bf16.msra.mxu1 %v1709_v9  ;;  %v1912_v5 = vld [vmem:[#allocation3 + $0xa08] sm:$0xff]  ;;  %v1742_v9 = vld [vmem:[#allocation3 + $0x4b8] sm:$0xff] }
 0x482   :  { %2425 = vmatprep.subr.bf16.mxu0 %v1659_v8  ;;  %5981 = vmatprep.subr.bf16.mxu1 %v1772_v11  ;;  %v1856_v8 = vld [vmem:[#allocation3 + $0x848] sm:$0xff]  ;;  %v1750_v11 = vld [vmem:[#allocation3 + $0x4f8] sm:$0xff] }
 0x483   :  { %2643 = vmatprep.mubr.bf16.mxu1 %v7040_v62 }
 0x485   :  { %2426 = vmatpush1.bf16.msra.mxu0 %v1658_v10  ;;  %5982 = vmatpush3.bf16.msra.mxu1 %v1716_v12  ;;  %v1919_v10 = vld [vmem:[#allocation3 + $0xa40] sm:$0xff]  ;;  %v1749_v12 = vld [vmem:[#allocation3 + $0x4f0] sm:$0xff] }
 0x486   :  { %2427 = vmatprep.subr.bf16.mxu0 %v1666_v16  ;;  %5983 = vmatprep.subr.bf16.mxu1 %v1779_v13  ;;  %v1863_v16 = vld [vmem:[#allocation3 + $0x880] sm:$0xff]  ;;  %v1757_v13 = vld [vmem:[#allocation3 + $0x530] sm:$0xff] }
 0x489   :  { %2428 = vmatpush1.bf16.msra.mxu0 %v1665_v18  ;;  %5984 = vmatpush3.bf16.msra.mxu1 %v1723_v19  ;;  %v1926_v18 = vld [vmem:[#allocation3 + $0xa78] sm:$0xff]  ;;  %v1756_v19 = vld [vmem:[#allocation3 + $0x528] sm:$0xff] }
 0x48a   :  { %2429 = vmatprep.subr.bf16.mxu0 %v1673_v20  ;;  %5985 = vmatprep.subr.bf16.mxu1 %v1786_v15  ;;  %v1870_v20 = vld [vmem:[#allocation3 + $0x8b8] sm:$0xff]  ;;  %v1764_v15 = vld [vmem:[#allocation3 + $0x568] sm:$0xff] }
 0x48d   :  { %2430 = vmatpush1.bf16.msra.mxu0 %v1672_v21  ;;  %5986 = vmatpush3.bf16.msra.mxu1 %v1730_v27  ;;  %v1989_v21 = vld [vmem:[#allocation3 + $0xc70] sm:$0xff]  ;;  %v1763_v27 = vld [vmem:[#allocation3 + $0x560] sm:$0xff] }
 0x48e   :  { %2431 = vmatprep.subr.bf16.mxu0 %v1680_v28  ;;  %5987 = vmatprep.subr.bf16.mxu1 %v1793_v29  ;;  %v1933_v28 = vld [vmem:[#allocation3 + $0xab0] sm:$0xff]  ;;  %v1771_v29 = vld [vmem:[#allocation3 + $0x5a0] sm:$0xff] }
 0x491   :  { %2432 = vmatpush1.bf16.msra.mxu0 %v1679_v30  ;;  %5988 = vmatpush3.bf16.msra.mxu1 %v1737_v31  ;;  %v1996_v30 = vld [vmem:[#allocation3 + $0xca8] sm:$0xff]  ;;  %v1770_v31 = vld [vmem:[#allocation3 + $0x598] sm:$0xff] }
 0x492   :  { %2433 = vmatprep.subr.bf16.mxu0 %v1687_v32  ;;  %5989 = vmatprep.subr.bf16.mxu1 %v1800_v33  ;;  %v1940_v32 = vld [vmem:[#allocation3 + $0xae8] sm:$0xff]  ;;  %v1778_v33 = vld [vmem:[#allocation3 + $0x5d8] sm:$0xff] }
 0x495   :  { %2434 = vmatpush1.bf16.msra.mxu0 %v1686_v34  ;;  %5990 = vmatpush3.bf16.msra.mxu1 %v1744_v35  ;;  %v2003_v34 = vld [vmem:[#allocation3 + $0xce0] sm:$0xff]  ;;  %v1777_v35 = vld [vmem:[#allocation3 + $0x5d0] sm:$0xff] }
 0x496   :  { %2435 = vmatprep.subr.bf16.mxu0 %v1694_v36  ;;  %5991 = vmatprep.subr.bf16.mxu1 %v1807_v37  ;;  %v1947_v36 = vld [vmem:[#allocation3 + $0xb20] sm:$0xff]  ;;  %v1785_v37 = vld [vmem:[#allocation3 + $0x610] sm:$0xff] }
 0x499   :  { %2436 = vmatpush1.bf16.msra.mxu0 %v1693_v38  ;;  %5992 = vmatpush3.bf16.msra.mxu1 %v1751_v39  ;;  %v2010_v38 = vld [vmem:[#allocation3 + $0xd18] sm:$0xff]  ;;  %v1784_v39 = vld [vmem:[#allocation3 + $0x608] sm:$0xff] }
 0x49a   :  { %2437 = vmatprep.subr.bf16.mxu0 %v1701_v43  ;;  %5993 = vmatprep.subr.bf16.mxu1 %v1814_v44  ;;  %v1954_v43 = vld [vmem:[#allocation3 + $0xb58] sm:$0xff]  ;;  %v1792_v44 = vld [vmem:[#allocation3 + $0x648] sm:$0xff] }
 0x49d   :  { %2438 = vmatpush1.bf16.msra.mxu0 %v1700_v45  ;;  %5994 = vmatpush3.bf16.msra.mxu1 %v1758_v14  ;;  %v2017_v45 = vld [vmem:[#allocation3 + $0xd50] sm:$0xff]  ;;  %v1791_v14 = vld [vmem:[#allocation3 + $0x640] sm:$0xff] }
 0x49e   :  { %2448 = vmatprep.subr.bf16.mxu0 %v1708_v46  ;;  %6001 = vmatprep.subr.bf16.mxu1 %v1877_v47  ;;  %v1961_v46 = vld [vmem:[#allocation3 + $0xb90] sm:$0xff]  ;;  %v1799_v47 = vld [vmem:[#allocation3 + $0x680] sm:$0xff] }
 0x4a0   :  { %2440 = vmatmul.mubr.bf16.vlgmr.msra.gmra.mrb[12].mxu0 %v7034_v59  ;;  %2644 = vmatmul.mubr.bf16.vlgmr.msra.gmra.mrb[16].mxu1 %v7036_v60  ;;  %v1835_v59 = vld [vmem:[#allocation3 + $0x7a0] sm:$0xff] }
 0x4a1   :  { %2449 = vmatpush1.bf16.msra.mxu0 %v1707_v48  ;;  %6002 = vmatpush3.bf16.msra.mxu1 %v1821_v61  ;;  %v2024_v48 = vld [vmem:[#allocation3 + $0xd88] sm:$0xff]  ;;  %v1798_v61 = vld [vmem:[#allocation3 + $0x678] sm:$0xff] }
 0x4a2   :  { %2450 = vmatprep.subr.bf16.mxu0 %v1715_v49  ;;  %6003 = vmatprep.subr.bf16.mxu1 %v1884_v50  ;;  %v1968_v49 = vld [vmem:[#allocation3 + $0xbc8] sm:$0xff]  ;;  %v1806_v50 = vld [vmem:[#allocation3 + $0x6b8] sm:$0xff] }
 0x4a3   :  { %2480 = vmatprep.mubr.bf16.mxu0 %v7040_v62  ;;  %2683 = vmatprep.mubr.bf16.mxu1 %v7064_v22  ;;  %v1735_v62 = vld [vmem:[#allocation3 + $0x480] sm:$0xff] }
 0x4a5   :  { %2451 = vmatpush1.bf16.msra.mxu0 %v1714_v51  ;;  %6004 = vmatpush3.bf16.msra.mxu1 %v1828_v52  ;;  %v2031_v51 = vld [vmem:[#allocation3 + $0xdc0] sm:$0xff]  ;;  %v1805_v52 = vld [vmem:[#allocation3 + $0x6b0] sm:$0xff] }
 0x4a6   :  { %2452 = vmatprep.subr.bf16.mxu0 %v1722_v53  ;;  %6005 = vmatprep.subr.bf16.mxu1 %v1891_v54  ;;  %v1975_v53 = vld [vmem:[#allocation3 + $0xc00] sm:$0xff]  ;;  %v1813_v54 = vld [vmem:[#allocation3 + $0x6f0] sm:$0xff] }
 0x4a9   :  { %2453 = vmatpush1.bf16.msra.mxu0 %v1721_v55  ;;  %6006 = vmatpush3.bf16.msra.mxu1 %v1835_v59  ;;  %v2038_v55 = vld [vmem:[#allocation3 + $0xdf8] sm:$0xff]  ;;  %v1812_v59 = vld [vmem:[#allocation3 + $0x6e8] sm:$0xff] }
 0x4aa   :  { %2454 = vmatprep.subr.bf16.mxu0 %v1729_v56  ;;  %6007 = vmatprep.subr.bf16.mxu1 %v1898_v57  ;;  %v1982_v56 = vld [vmem:[#allocation3 + $0xc38] sm:$0xff]  ;;  %v1820_v57 = vld [vmem:[#allocation3 + $0x728] sm:$0xff] }
 0x4ad   :  { %2455 = vmatpush1.bf16.msra.mxu0 %v1728_v58  ;;  %6008 = vmatpush3.bf16.msra.mxu1 %v1842_v63  ;;  %v1819_v58 = vld [vmem:[#allocation3 + $0x720] sm:$0xff] }
 0x4ae   :  { %2456 = vmatprep.subr.bf16.mxu0 %v1736_v0  ;;  %6009 = vmatprep.subr.bf16.mxu1 %v1905_v1  ;;  %v1827_v63 = vld [vmem:[#allocation3 + $0x760] sm:$0xff]  ;;  %v1826_v0 = vld [vmem:[#allocation3 + $0x758] sm:$0xff] }
 0x4af   :  { %v1834_v1 = vld [vmem:[#allocation3 + $0x798] sm:$0xff] }
 0x4b1   :  { %2457 = vmatpush1.bf16.msra.mxu0 %v1735_v62  ;;  %6010 = vmatpush3.bf16.msra.mxu1 %v1849_v7  ;;  %v1833_v62 = vld [vmem:[#allocation3 + $0x790] sm:$0xff] }
 0x4b2   :  { %2458 = vmatprep.subr.bf16.mxu0 %v1743_v4  ;;  %6011 = vmatprep.subr.bf16.mxu1 %v1912_v5  ;;  %v1841_v7 = vld [vmem:[#allocation3 + $0x7d0] sm:$0xff]  ;;  %v1840_v4 = vld [vmem:[#allocation3 + $0x7c8] sm:$0xff] }
 0x4b3   :  { %v1848_v5 = vld [vmem:[#allocation3 + $0x808] sm:$0xff] }
 0x4b5   :  { %2459 = vmatpush1.bf16.msra.mxu0 %v1742_v9  ;;  %6012 = vmatpush3.bf16.msra.mxu1 %v1856_v8  ;;  %v1847_v9 = vld [vmem:[#allocation3 + $0x800] sm:$0xff]  ;;  %v1854_v8 = vld [vmem:[#allocation3 + $0x838] sm:$0xff] }
 0x4b6   :  { %2460 = vmatprep.subr.bf16.mxu0 %v1750_v11  ;;  %6013 = vmatprep.subr.bf16.mxu1 %v1919_v10  ;;  %v1862_v11 = vld [vmem:[#allocation3 + $0x878] sm:$0xff]  ;;  %v1869_v10 = vld [vmem:[#allocation3 + $0x8b0] sm:$0xff] }
 0x4b9   :  { %2461 = vmatpush1.bf16.msra.mxu0 %v1749_v12  ;;  %6014 = vmatpush3.bf16.msra.mxu1 %v1863_v16  ;;  %v1868_v12 = vld [vmem:[#allocation3 + $0x8a8] sm:$0xff] }
 0x4ba   :  { %2462 = vmatprep.subr.bf16.mxu0 %v1757_v13  ;;  %6015 = vmatprep.subr.bf16.mxu1 %v1926_v18  ;;  %v1876_v16 = vld [vmem:[#allocation3 + $0x8e8] sm:$0xff]  ;;  %v1875_v13 = vld [vmem:[#allocation3 + $0x8e0] sm:$0xff] }
 0x4bb   :  { %v1883_v18 = vld [vmem:[#allocation3 + $0x920] sm:$0xff] }
 0x4bd   :  { %2463 = vmatpush1.bf16.msra.mxu0 %v1756_v19  ;;  %6016 = vmatpush3.bf16.msra.mxu1 %v1870_v20  ;;  %v1882_v19 = vld [vmem:[#allocation3 + $0x918] sm:$0xff] }
 0x4be   :  { %2464 = vmatprep.subr.bf16.mxu0 %v1764_v15  ;;  %6023 = vmatprep.subr.bf16.mxu1 %v1989_v21  ;;  %v1890_v20 = vld [vmem:[#allocation3 + $0x958] sm:$0xff]  ;;  %v1889_v15 = vld [vmem:[#allocation3 + $0x950] sm:$0xff] }
 0x4bf   :  { %v1897_v21 = vld [vmem:[#allocation3 + $0x990] sm:$0xff] }
 0x4c0   :  { %2684 = vmatmul.mubr.bf16.vlgmr.msra.gmra.mrb[20].mxu1 %v7060_v2 }
 0x4c1   :  { %2465 = vmatpush1.bf16.msra.mxu0 %v1763_v27  ;;  %6024 = vmatpush3.bf16.msra.mxu1 %v1933_v28  ;;  %v1896_v27 = vld [vmem:[#allocation3 + $0x988] sm:$0xff] }
 0x4c2   :  { %2466 = vmatprep.subr.bf16.mxu0 %v1771_v29  ;;  %6025 = vmatprep.subr.bf16.mxu1 %v1996_v30  ;;  %v1904_v28 = vld [vmem:[#allocation3 + $0x9c8] sm:$0xff]  ;;  %v1903_v29 = vld [vmem:[#allocation3 + $0x9c0] sm:$0xff] }
 0x4c3   :  { %2723 = vmatprep.mubr.bf16.mxu1 %v7066_v3  ;;  %v1911_v30 = vld [vmem:[#allocation3 + $0xa00] sm:$0xff] }
 0x4c5   :  { %2467 = vmatpush1.bf16.msra.mxu0 %v1770_v31  ;;  %6026 = vmatpush3.bf16.msra.mxu1 %v1940_v32  ;;  %v1910_v31 = vld [vmem:[#allocation3 + $0x9f8] sm:$0xff] }
 0x4c6   :  { %2468 = vmatprep.subr.bf16.mxu0 %v1778_v33  ;;  %6027 = vmatprep.subr.bf16.mxu1 %v2003_v34  ;;  %v1918_v32 = vld [vmem:[#allocation3 + $0xa38] sm:$0xff]  ;;  %v1917_v33 = vld [vmem:[#allocation3 + $0xa30] sm:$0xff] }
 0x4c7   :  { %v1925_v34 = vld [vmem:[#allocation3 + $0xa70] sm:$0xff] }
 0x4c9   :  { %2469 = vmatpush1.bf16.msra.mxu0 %v1777_v35  ;;  %6028 = vmatpush3.bf16.msra.mxu1 %v1947_v36  ;;  %v1924_v35 = vld [vmem:[#allocation3 + $0xa68] sm:$0xff] }
 0x4ca   :  { %2470 = vmatprep.subr.bf16.mxu0 %v1785_v37  ;;  %6029 = vmatprep.subr.bf16.mxu1 %v2010_v38  ;;  %v1932_v36 = vld [vmem:[#allocation3 + $0xaa8] sm:$0xff]  ;;  %v1931_v37 = vld [vmem:[#allocation3 + $0xaa0] sm:$0xff] }
 0x4cb   :  { %v1939_v38 = vld [vmem:[#allocation3 + $0xae0] sm:$0xff] }
 0x4cd   :  { %2471 = vmatpush1.bf16.msra.mxu0 %v1784_v39  ;;  %6030 = vmatpush3.bf16.msra.mxu1 %v1954_v43  ;;  %v1938_v39 = vld [vmem:[#allocation3 + $0xad8] sm:$0xff] }
 0x4ce   :  { %2472 = vmatprep.subr.bf16.mxu0 %v1792_v44  ;;  %6031 = vmatprep.subr.bf16.mxu1 %v2017_v45  ;;  %v1946_v43 = vld [vmem:[#allocation3 + $0xb18] sm:$0xff]  ;;  %v1945_v44 = vld [vmem:[#allocation3 + $0xb10] sm:$0xff] }
 0x4cf   :  { %v1953_v45 = vld [vmem:[#allocation3 + $0xb50] sm:$0xff] }
 0x4d1   :  { %2473 = vmatpush1.bf16.msra.mxu0 %v1791_v14  ;;  %6032 = vmatpush3.bf16.msra.mxu1 %v1961_v46  ;;  %v2040_v14 = vld [vmem:[#allocation13 + $0x1] ss:$8 sm:$0xf] }
 0x4d2   :  { %2474 = vmatprep.subr.bf16.mxu0 %v1799_v47  ;;  %6033 = vmatprep.subr.bf16.mxu1 %v2024_v48  ;;  %v2041_v46 = vld [vmem:[#allocation13 + $0x1] ss:$8 sm:$0xf0] }
 0x4d3   :  { %v1952_v47 = vld [vmem:[#allocation3 + $0xb48] sm:$0xff] }
 0x4d4   :  { %v1960_v48 = vld [vmem:[#allocation3 + $0xb88] sm:$0xff] }
 0x4d5   :  { %2475 = vmatpush1.bf16.msra.mxu0 %v1798_v61  ;;  %6034 = vmatpush3.bf16.msra.mxu1 %v1968_v49  ;;  %v7099_v61 = vor.u32 %v2041_v46, %v2040_v14  ;;  %v1967_v49 = vld [vmem:[#allocation3 + $0xbc0] sm:$0xff]  ;;  %v2037_v14 = vld [vmem:[#allocation3 + $0xdf0] sm:$0xff]  ;;  %v2036_v46 = vld [vmem:[#allocation3 + $0xde8] sm:$0xff] }
 0x4d6   :  { %2476 = vmatprep.subr.bf16.mxu0 %v1806_v50  ;;  %6035 = vmatprep.subr.bf16.mxu1 %v2031_v51 }
 0x4d7   :  { %v2055_v50 = vrot.slane %v7099_v61, %v7018_v24  ;;  %v2051_v51 = vrot.slane %v7099_v61, %v7021_v25 }
 0x4d9   :  { %2477 = vmatpush1.bf16.msra.mxu0 %v1805_v52  ;;  %6036 = vmatpush3.bf16.msra.mxu1 %v1975_v53  ;;  %v2059_v52 = vrot.slane %v7099_v61, %v7024_v26  ;;  %v1966_v53 = vld [vmem:[#allocation3 + $0xbb8] sm:$0xff] }
 0x4da   :  { %2478 = vmatprep.subr.bf16.mxu0 %v1813_v54  ;;  %6037 = vmatprep.subr.bf16.mxu1 %v2038_v55 }
 0x4dd   :  { %2479 = vmatpush1.bf16.msra.mxu0 %v1812_v59  ;;  %6038 = vmatpush3.bf16.msra.mxu1 %v1982_v56  ;;  %v1974_v59 = vld [vmem:[#allocation3 + $0xbf8] sm:$0xff] }
 0x4de   :  { %2489 = vmatprep.subr.bf16.mxu0 %v1820_v57 }
 0x4e0   :  { %2481 = vmatmul.mubr.bf16.vlgmr.msra.gmra.mrb[12].mxu0 %v7036_v60  ;;  %2724 = vmatmul.mubr.bf16.vlgmr.msra.gmra.mrb[24].mxu1 %v7062_v6  ;;  %v1855_v60 = vld [vmem:[#allocation3 + $0x840] sm:$0xff] }
 0x4e1   :  { %2490 = vmatpush1.bf16.msra.mxu0 %v1819_v58  ;;  %2521 = vmatprep.mubr.bf16.mxu0 %v7064_v22  ;;  %v1861_v22 = vld [vmem:[#allocation3 + $0x870] sm:$0xff] }
 0x4e2   :  { %2491 = vmatprep.subr.bf16.mxu0 %v1827_v63 }
 0x4e5   :  { %2492 = vmatpush1.bf16.msra.mxu0 %v1826_v0 }
 0x4e6   :  { %2493 = vmatprep.subr.bf16.mxu0 %v1834_v1 }
 0x4e9   :  { %2494 = vmatpush1.bf16.msra.mxu0 %v1833_v62 }
 0x4ea   :  { %2495 = vmatprep.subr.bf16.mxu0 %v1841_v7 }
 0x4ed   :  { %2496 = vmatpush1.bf16.msra.mxu0 %v1840_v4 }
 0x4ee   :  { %2497 = vmatprep.subr.bf16.mxu0 %v1848_v5 }
 0x4f1   :  { %2498 = vmatpush1.bf16.msra.mxu0 %v1847_v9 }
 0x4f2   :  { %2499 = vmatprep.subr.bf16.mxu0 %v1855_v60 }
 0x4f5   :  { %2500 = vmatpush1.bf16.msra.mxu0 %v1854_v8  ;;  %v1973_v8 = vld [vmem:[#allocation3 + $0xbf0] sm:$0xff] }
 0x4f6   :  { %2501 = vmatprep.subr.bf16.mxu0 %v1862_v11 }
 0x4f9   :  { %2502 = vmatpush1.bf16.msra.mxu0 %v1861_v22 }
 0x4fa   :  { %2503 = vmatprep.subr.bf16.mxu0 %v1869_v10  ;;  %v1981_v10 = vld [vmem:[#allocation3 + $0xc30] sm:$0xff] }
 0x4fd   :  { %2504 = vmatpush1.bf16.msra.mxu0 %v1868_v12 }
 0x4fe   :  { %2505 = vmatprep.subr.bf16.mxu0 %v1876_v16 }
 0x501   :  { %2506 = vmatpush1.bf16.msra.mxu0 %v1875_v13 }
 0x502   :  { %2507 = vmatprep.subr.bf16.mxu0 %v1883_v18 }
 0x505   :  { %2508 = vmatpush1.bf16.msra.mxu0 %v1882_v19  ;;  %v1980_v19 = vld [vmem:[#allocation3 + $0xc28] sm:$0xff] }
 0x506   :  { %2509 = vmatprep.subr.bf16.mxu0 %v1890_v20  ;;  %v1988_v20 = vld [vmem:[#allocation3 + $0xc68] sm:$0xff] }
 0x509   :  { %2510 = vmatpush1.bf16.msra.mxu0 %v1889_v15  ;;  %v1987_v15 = vld [vmem:[#allocation3 + $0xc60] sm:$0xff] }
 0x50a   :  { %2511 = vmatprep.subr.bf16.mxu0 %v1897_v21  ;;  %v1995_v21 = vld [vmem:[#allocation3 + $0xca0] sm:$0xff] }
 0x50d   :  { %2512 = vmatpush1.bf16.msra.mxu0 %v1896_v27  ;;  %v1994_v27 = vld [vmem:[#allocation3 + $0xc98] sm:$0xff] }
 0x50e   :  { %2513 = vmatprep.subr.bf16.mxu0 %v1904_v28  ;;  %v2002_v28 = vld [vmem:[#allocation3 + $0xcd8] sm:$0xff] }
 0x511   :  { %2514 = vmatpush1.bf16.msra.mxu0 %v1903_v29  ;;  %v2001_v29 = vld [vmem:[#allocation3 + $0xcd0] sm:$0xff] }
 0x512   :  { %2515 = vmatprep.subr.bf16.mxu0 %v1911_v30  ;;  %v2009_v30 = vld [vmem:[#allocation3 + $0xd10] sm:$0xff] }
 0x515   :  { %2516 = vmatpush1.bf16.msra.mxu0 %v1910_v31  ;;  %v2008_v31 = vld [vmem:[#allocation3 + $0xd08] sm:$0xff] }
 0x516   :  { %2517 = vmatprep.subr.bf16.mxu0 %v1918_v32  ;;  %v2016_v32 = vld [vmem:[#allocation3 + $0xd48] sm:$0xff] }
 0x519   :  { %2518 = vmatpush1.bf16.msra.mxu0 %v1917_v33  ;;  %v2015_v33 = vld [vmem:[#allocation3 + $0xd40] sm:$0xff] }
 0x51a   :  { %2519 = vmatprep.subr.bf16.mxu0 %v1925_v34  ;;  %v2023_v34 = vld [vmem:[#allocation3 + $0xd80] sm:$0xff] }
 0x51d   :  { %2520 = vmatpush1.bf16.msra.mxu0 %v1924_v35  ;;  %v2022_v35 = vld [vmem:[#allocation3 + $0xd78] sm:$0xff] }
 0x51e   :  { %2530 = vmatprep.subr.bf16.mxu0 %v1932_v36  ;;  %v2030_v36 = vld [vmem:[#allocation3 + $0xdb8] sm:$0xff] }
 0x520   :  { %2522 = vmatmul.mubr.bf16.vlgmr.msra.gmra.mrb[12].mxu0 %v7060_v2  ;;  %v1959_v2 = vld [vmem:[#allocation3 + $0xb80] sm:$0xff] }
 0x521   :  { %2531 = vmatpush1.bf16.msra.mxu0 %v1931_v37  ;;  %2562 = vmatprep.mubr.bf16.mxu0 %v7066_v3  ;;  %v2047_v3 = vrot.slane %v7099_v61, %v7015_v23 }
 0x522   :  { %2532 = vmatprep.subr.bf16.mxu0 %v1939_v38 }
 0x525   :  { %2533 = vmatpush1.bf16.msra.mxu0 %v1938_v39 }
 0x526   :  { %2534 = vmatprep.subr.bf16.mxu0 %v1946_v43 }
 0x529   :  { %2535 = vmatpush1.bf16.msra.mxu0 %v1945_v44  ;;  %v2029_v44 = vld [vmem:[#allocation3 + $0xdb0] sm:$0xff] }
 0x52a   :  { %2536 = vmatprep.subr.bf16.mxu0 %v1953_v45 }
 0x52d   :  { %2537 = vmatpush1.bf16.msra.mxu0 %v1952_v47  ;;  %v2071_v47 = vrot.slane %v7099_v61, %v902_v41 }
 0x52e   :  { %2538 = vmatprep.subr.bf16.mxu0 %v1960_v48 }
 0x531   :  { %2539 = vmatpush1.bf16.msra.mxu0 %v1959_v2 }
 0x532   :  { %2540 = vmatprep.subr.bf16.mxu0 %v1967_v49 }
 0x533   :  { %v2236_v54 = vpop.f32.mrb[8].mxu0  ;;  %v2400_v55 = vpop.f32.mrb[8].mxu1 }
 0x534   :  { %v6359_v56 = vadd.f32 %v2236_v54, %v2047_v3  ;;  %v6361_v57 = vadd.f32 %v2400_v55, %v2055_v50  ;;  %v2238_v58 = vpop.f32.mrb[9].mxu0  ;;  %v2402_v63 = vpop.f32.mrb[9].mxu1 }
 0x535   :  { %v6360_v0 = vadd.f32 %v2238_v58, %v2051_v51  ;;  %v6362_v1 = vadd.f32 %v2402_v63, %v2059_v52  ;;  %v2240_v62 = vpop.f32.mrb[10].mxu0  ;;  %v2404_v7 = vpop.f32.mrb[10].mxu1  ;;  %2541 = vmatpush1.bf16.msra.mxu0 %v1966_v53 }
 0x536   :  { %v2731_v4 = vmax.f32 %v6359_v56, 0.0  ;;  %v2733_v5 = vmax.f32 %v6361_v57, 0.0  ;;  %v2241_v9 = vpop.f32.mrb[11].mxu0  ;;  %v2405_v60 = vpop.f32.mrb[11].mxu1  ;;  %2542 = vmatprep.subr.bf16.mxu0 %v1974_v59  ;;  %v2063_v7 = vrot.slane %v7099_v61, %v7045_v40 }
 0x537   :  { %v2732_v11 = vmax.f32 %v6360_v0, 0.0  ;;  %v2734_v22 = vmax.f32 %v6362_v1, 0.0 }
 0x538   :  { %v7109_v12 = vpack.c.bf16 %v2731_v4, %v2731_v4  ;;  %v7111_v16 = vpack.c.bf16 %v2733_v5, %v2733_v5  ;;  %v2067_v4 = vrot.slane %v7099_v61, %v7049_v42 }
 0x539   :  { %v7113_v13 = vpack.c.bf16 %v2732_v11, %v2732_v11  ;;  %v7115_v18 = vpack.c.bf16 %v2734_v22, %v2734_v22  ;;  %2543 = vmatpush1.bf16.msra.mxu0 %v1973_v8 }
 0x53a   :  { %2544 = vmatprep.subr.bf16.mxu0 %v1981_v10 }
 0x53d   :  { %2545 = vmatpush1.bf16.msra.mxu0 %v1980_v19 }
 0x53e   :  { %2546 = vmatprep.subr.bf16.mxu0 %v1988_v20 }
 0x541   :  { %2547 = vmatpush1.bf16.msra.mxu0 %v1987_v15 }
 0x542   :  { %2548 = vmatprep.subr.bf16.mxu0 %v1995_v21 }
 0x545   :  { %2549 = vmatpush1.bf16.msra.mxu0 %v1994_v27 }
 0x546   :  { %2550 = vmatprep.subr.bf16.mxu0 %v2002_v28 }
 0x549   :  { %2551 = vmatpush1.bf16.msra.mxu0 %v2001_v29 }
 0x54a   :  { %2552 = vmatprep.subr.bf16.mxu0 %v2009_v30 }
 0x54d   :  { %2553 = vmatpush1.bf16.msra.mxu0 %v2008_v31 }
 0x54e   :  { %2554 = vmatprep.subr.bf16.mxu0 %v2016_v32 }
 0x551   :  { %2555 = vmatpush1.bf16.msra.mxu0 %v2015_v33 }
 0x552   :  { %2556 = vmatprep.subr.bf16.mxu0 %v2023_v34 }
 0x553   :  { %v5973_v37 = vpop.f32.mrb[12].mxu1 }
 0x554   :  { %v5974_v38 = vpop.f32.mrb[13].mxu1 }
 0x555   :  { %2557 = vmatpush1.bf16.msra.mxu0 %v2022_v35  ;;  %v5975_v39 = vadd.f32 %v5974_v38, %v5973_v37  ;;  %v5976_v43 = vpop.f32.mrb[14].mxu1 }
 0x556   :  { %2558 = vmatprep.subr.bf16.mxu0 %v2030_v36  ;;  %v5977_v45 = vpop.f32.mrb[15].mxu1 }
 0x557   :  { %v2606_v48 = vadd.f32 %v5975_v39, %v2071_v47 }
 0x559   :  { %2559 = vmatpush1.bf16.msra.mxu0 %v2029_v44 }
 0x55a   :  { %2560 = vmatprep.subr.bf16.mxu0 %v2037_v14 }
 0x55d   :  { %2561 = vmatpush1.bf16.msra.mxu0 %v2036_v46 }
 0x560   :  { %2563 = vmatmul.mubr.bf16.vlgmr.msra.gmra.mrb[12].mxu0 %v7062_v6 }
 0x573   :  { %v5995_v2 = vpop.f32.mrb[16].mxu1 }
 0x574   :  { %v5996_v49 = vpop.f32.mrb[17].mxu1 }
 0x575   :  { %v5997_v3 = vadd.f32 %v5996_v49, %v5995_v2  ;;  %v5998_v50 = vpop.f32.mrb[18].mxu1 }
 0x576   :  { %v5999_v51 = vpop.f32.mrb[19].mxu1 }
 0x577   :  { %v2646_v52 = vadd.f32 %v5997_v3, %v2606_v48 }
 0x593   :  { %v6017_v53 = vpop.f32.mrb[20].mxu1 }
 0x594   :  { %v6018_v54 = vpop.f32.mrb[21].mxu1 }
 0x595   :  { %v6019_v55 = vadd.f32 %v6018_v54, %v6017_v53  ;;  %v6020_v59 = vpop.f32.mrb[22].mxu1 }
 0x596   :  { %v6021_v56 = vpop.f32.mrb[23].mxu1 }
 0x597   :  { %v2686_v57 = vadd.f32 %v6019_v55, %v2646_v52 }
 0x5b3   :  { %v6039_v58 = vpop.f32.mrb[24].mxu1 }
 0x5b4   :  { %v6040_v63 = vpop.f32.mrb[25].mxu1 }
 0x5b5   :  { %v6041_v6 = vadd.f32 %v6040_v63, %v6039_v58  ;;  %v6042_v0 = vpop.f32.mrb[26].mxu1 }
 0x5b6   :  { %v6043_v17 = vpop.f32.mrb[27].mxu1 }
 0x5b7   :  { %v2726_v1 = vadd.f32 %v6041_v6, %v2686_v57 }
 0x5b9   :  { %v2737_v41 = vmax.f32 %v2726_v1, 0.0 }
 0x5bb   :  { %v7121_v62 = vpack.c.bf16 %v2737_v41, %v2737_v41 }
 0x633   :  { %v2564_v5 = vpop.f32.mrb[12].mxu0 }
 0x634   :  { %v6363_v9 = vadd.f32 %v2564_v5, %v2063_v7  ;;  %v2566_v60 = vpop.f32.mrb[13].mxu0 }
 0x635   :  { %v6364_v8 = vadd.f32 %v2566_v60, %v2067_v4  ;;  %v2568_v11 = vpop.f32.mrb[14].mxu0 }
 0x636   :  { %v2735_v22 = vmax.f32 %v6363_v9, 0.0  ;;  %v2569_v10 = vpop.f32.mrb[15].mxu0 }
 0x637   :  { %v2736_v19 = vmax.f32 %v6364_v8, 0.0 }
 0x638   :  { %v7127_v20 = vpack.c.bf16 %v2735_v22, %v2735_v22 }
 0x639   :  { %v7129_v15 = vpack.c.bf16 %v2736_v19, %v2736_v19 }
 0x63a   :  { %6676 = dma.done.wait [#allocation12 + $0x2], 43008 }
 0x63b   :  { %6677 = vsyncadd [#allocation12 + $0x2], 4294924288  ;;  %3152 = vmatprep.mubr.bf16.mxu1 %v7113_v13  ;;  %3316 = vmatprep.mubr.bf16.mxu0 %v7113_v13  ;;  %v2750_v21 = vld [vmem:[#allocation4 + $0x8] sm:$0xff]  ;;  %v2749_v61 = vld [vmem:[#allocation4] sm:$0xff] }
 0x63c   :  { %v2756_v27 = vld [vmem:[#allocation4 + $0x38] sm:$0xff]  ;;  %3120 = vmatprep.subr.bf16.mxu1 %v2750_v21  ;;  %v2755_v28 = vld [vmem:[#allocation4 + $0x30] sm:$0xff]  ;;  %v2762_v29 = vld [vmem:[#allocation4 + $0x68] sm:$0xff] }
 0x63d   :  { %3121 = vmatpush1.bf16.msra.mxu1 %v2749_v61  ;;  %v2761_v30 = vld [vmem:[#allocation4 + $0x60] sm:$0xff]  ;;  %v2768_v31 = vld [vmem:[#allocation4 + $0x98] sm:$0xff]  ;;  %v2767_v33 = vld [vmem:[#allocation4 + $0x90] sm:$0xff] }
 0x63e   :  { %3122 = vmatprep.subr.bf16.mxu1 %v2756_v27  ;;  %v2752_v32 = vld [vmem:[#allocation4 + $0x18] sm:$0xff]  ;;  %v2751_v34 = vld [vmem:[#allocation4 + $0x10] sm:$0xff]  ;;  %v2774_v35 = vld [vmem:[#allocation4 + $0xc8] sm:$0xff] }
 0x63f   :  { %3284 = vmatprep.subr.bf16.mxu0 %v2752_v32  ;;  %v2758_v36 = vld [vmem:[#allocation4 + $0x48] sm:$0xff]  ;;  %v2757_v37 = vld [vmem:[#allocation4 + $0x40] sm:$0xff]  ;;  %v2764_v38 = vld [vmem:[#allocation4 + $0x78] sm:$0xff] }
 0x640   :  { %3285 = vmatpush1.bf16.msra.mxu0 %v2751_v34  ;;  %v2773_v39 = vld [vmem:[#allocation4 + $0xc0] sm:$0xff]  ;;  %v2780_v43 = vld [vmem:[#allocation4 + $0xf8] sm:$0xff]  ;;  %v2763_v44 = vld [vmem:[#allocation4 + $0x70] sm:$0xff] }
 0x641   :  { %3123 = vmatpush1.bf16.msra.mxu1 %v2755_v28  ;;  %3286 = vmatprep.subr.bf16.mxu0 %v2758_v36  ;;  %v2770_v45 = vld [vmem:[#allocation4 + $0xa8] sm:$0xff]  ;;  %v2779_v14 = vld [vmem:[#allocation4 + $0xf0] sm:$0xff]  ;;  %v2769_v47 = vld [vmem:[#allocation4 + $0xa0] sm:$0xff] }
 0x642   :  { %3124 = vmatprep.subr.bf16.mxu1 %v2762_v29  ;;  %v2786_v46 = vld [vmem:[#allocation4 + $0x128] sm:$0xff]  ;;  %v2776_v48 = vld [vmem:[#allocation4 + $0xd8] sm:$0xff]  ;;  %v2785_v2 = vld [vmem:[#allocation4 + $0x120] sm:$0xff] }
 0x643   :  { %v2792_v49 = vld [vmem:[#allocation4 + $0x158] sm:$0xff]  ;;  %v2775_v3 = vld [vmem:[#allocation4 + $0xd0] sm:$0xff]  ;;  %v2782_v50 = vld [vmem:[#allocation4 + $0x108] sm:$0xff] }
 0x644   :  { %3287 = vmatpush1.bf16.msra.mxu0 %v2757_v37  ;;  %v2791_v51 = vld [vmem:[#allocation4 + $0x150] sm:$0xff]  ;;  %v2798_v52 = vld [vmem:[#allocation4 + $0x188] sm:$0xff]  ;;  %v2781_v53 = vld [vmem:[#allocation4 + $0x100] sm:$0xff] }
 0x645   :  { %3125 = vmatpush1.bf16.msra.mxu1 %v2761_v30  ;;  %3288 = vmatprep.subr.bf16.mxu0 %v2764_v38  ;;  %v2788_v54 = vld [vmem:[#allocation4 + $0x138] sm:$0xff]  ;;  %v2797_v55 = vld [vmem:[#allocation4 + $0x180] sm:$0xff]  ;;  %v2787_v56 = vld [vmem:[#allocation4 + $0x130] sm:$0xff] }
 0x646   :  { %3126 = vmatprep.subr.bf16.mxu1 %v2768_v31  ;;  %v2804_v59 = vld [vmem:[#allocation4 + $0x1b8] sm:$0xff]  ;;  %v2794_v57 = vld [vmem:[#allocation4 + $0x168] sm:$0xff]  ;;  %v2803_v58 = vld [vmem:[#allocation4 + $0x1b0] sm:$0xff] }
 0x647   :  { %v2810_v63 = vld [vmem:[#allocation4 + $0x1e8] sm:$0xff]  ;;  %v2793_v6 = vld [vmem:[#allocation4 + $0x160] sm:$0xff]  ;;  %v2800_v0 = vld [vmem:[#allocation4 + $0x198] sm:$0xff] }
 0x648   :  { %3289 = vmatpush1.bf16.msra.mxu0 %v2763_v44  ;;  %v2809_v17 = vld [vmem:[#allocation4 + $0x1e0] sm:$0xff]  ;;  %v2816_v1 = vld [vmem:[#allocation4 + $0x218] sm:$0xff]  ;;  %v2799_v41 = vld [vmem:[#allocation4 + $0x190] sm:$0xff] }
 0x649   :  { %3127 = vmatpush1.bf16.msra.mxu1 %v2767_v33  ;;  %3290 = vmatprep.subr.bf16.mxu0 %v2770_v45  ;;  %v2806_v7 = vld [vmem:[#allocation4 + $0x1c8] sm:$0xff]  ;;  %v2815_v4 = vld [vmem:[#allocation4 + $0x210] sm:$0xff]  ;;  %v2805_v9 = vld [vmem:[#allocation4 + $0x1c0] sm:$0xff] }
 0x64a   :  { %3128 = vmatprep.subr.bf16.mxu1 %v2774_v35  ;;  %v2822_v5 = vld [vmem:[#allocation4 + $0x248] sm:$0xff]  ;;  %v2812_v60 = vld [vmem:[#allocation4 + $0x1f8] sm:$0xff]  ;;  %v2821_v8 = vld [vmem:[#allocation4 + $0x240] sm:$0xff] }
 0x64b   :  { %v2828_v11 = vld [vmem:[#allocation4 + $0x278] sm:$0xff]  ;;  %v2811_v22 = vld [vmem:[#allocation4 + $0x1f0] sm:$0xff]  ;;  %v2818_v10 = vld [vmem:[#allocation4 + $0x228] sm:$0xff] }
 0x64c   :  { %3291 = vmatpush1.bf16.msra.mxu0 %v2769_v47  ;;  %v2827_v19 = vld [vmem:[#allocation4 + $0x270] sm:$0xff]  ;;  %v2834_v21 = vld [vmem:[#allocation4 + $0x2a8] sm:$0xff]  ;;  %v2817_v61 = vld [vmem:[#allocation4 + $0x220] sm:$0xff] }
 0x64d   :  { %3129 = vmatpush1.bf16.msra.mxu1 %v2773_v39  ;;  %3292 = vmatprep.subr.bf16.mxu0 %v2776_v48  ;;  %v2824_v27 = vld [vmem:[#allocation4 + $0x258] sm:$0xff]  ;;  %v2833_v28 = vld [vmem:[#allocation4 + $0x2a0] sm:$0xff]  ;;  %v2823_v30 = vld [vmem:[#allocation4 + $0x250] sm:$0xff] }
 0x64e   :  { %3130 = vmatprep.subr.bf16.mxu1 %v2780_v43  ;;  %v2840_v29 = vld [vmem:[#allocation4 + $0x2d8] sm:$0xff]  ;;  %v2830_v31 = vld [vmem:[#allocation4 + $0x288] sm:$0xff]  ;;  %v2839_v32 = vld [vmem:[#allocation4 + $0x2d0] sm:$0xff] }
 0x64f   :  { %v2846_v33 = vld [vmem:[#allocation4 + $0x308] sm:$0xff]  ;;  %v2829_v34 = vld [vmem:[#allocation4 + $0x280] sm:$0xff]  ;;  %v2836_v35 = vld [vmem:[#allocation4 + $0x2b8] sm:$0xff] }
 0x650   :  { %3293 = vmatpush1.bf16.msra.mxu0 %v2775_v3  ;;  %v2845_v36 = vld [vmem:[#allocation4 + $0x300] sm:$0xff]  ;;  %v2852_v37 = vld [vmem:[#allocation4 + $0x338] sm:$0xff]  ;;  %v2835_v38 = vld [vmem:[#allocation4 + $0x2b0] sm:$0xff] }
 0x651   :  { %3131 = vmatpush1.bf16.msra.mxu1 %v2779_v14  ;;  %3294 = vmatprep.subr.bf16.mxu0 %v2782_v50  ;;  %v2842_v39 = vld [vmem:[#allocation4 + $0x2e8] sm:$0xff]  ;;  %v2851_v43 = vld [vmem:[#allocation4 + $0x330] sm:$0xff]  ;;  %v2841_v45 = vld [vmem:[#allocation4 + $0x2e0] sm:$0xff] }
 0x652   :  { %3132 = vmatprep.subr.bf16.mxu1 %v2786_v46  ;;  %v2858_v44 = vld [vmem:[#allocation4 + $0x368] sm:$0xff]  ;;  %v2848_v14 = vld [vmem:[#allocation4 + $0x318] sm:$0xff]  ;;  %v2857_v46 = vld [vmem:[#allocation4 + $0x360] sm:$0xff] }
 0x653   :  { %v2864_v47 = vld [vmem:[#allocation4 + $0x398] sm:$0xff]  ;;  %v2847_v48 = vld [vmem:[#allocation4 + $0x310] sm:$0xff]  ;;  %v2870_v3 = vld [vmem:[#allocation4 + $0x3c8] sm:$0xff] }
 0x654   :  { %3295 = vmatpush1.bf16.msra.mxu0 %v2781_v53  ;;  %v2853_v50 = vld [vmem:[#allocation4 + $0x340] sm:$0xff]  ;;  %v2876_v53 = vld [vmem:[#allocation4 + $0x3f8] sm:$0xff] }
 0x655   :  { %3133 = vmatpush1.bf16.msra.mxu1 %v2785_v2  ;;  %3296 = vmatprep.subr.bf16.mxu0 %v2788_v54  ;;  %v2854_v2 = vld [vmem:[#allocation4 + $0x348] sm:$0xff]  ;;  %v2859_v54 = vld [vmem:[#allocation4 + $0x370] sm:$0xff] }
 0x656   :  { %3134 = vmatprep.subr.bf16.mxu1 %v2792_v49  ;;  %v2863_v49 = vld [vmem:[#allocation4 + $0x390] sm:$0xff] }
 0x658   :  { %3297 = vmatpush1.bf16.msra.mxu0 %v2787_v56  ;;  %v2882_v56 = vld [vmem:[#allocation4 + $0x428] sm:$0xff] }
 0x659   :  { %3135 = vmatpush1.bf16.msra.mxu1 %v2791_v51  ;;  %3298 = vmatprep.subr.bf16.mxu0 %v2794_v57  ;;  %v2860_v51 = vld [vmem:[#allocation4 + $0x378] sm:$0xff]  ;;  %v2865_v57 = vld [vmem:[#allocation4 + $0x3a0] sm:$0xff] }
 0x65a   :  { %3136 = vmatprep.subr.bf16.mxu1 %v2798_v52  ;;  %v2869_v52 = vld [vmem:[#allocation4 + $0x3c0] sm:$0xff] }
 0x65c   :  { %3299 = vmatpush1.bf16.msra.mxu0 %v2793_v6  ;;  %v2888_v6 = vld [vmem:[#allocation4 + $0x458] sm:$0xff] }
 0x65d   :  { %3137 = vmatpush1.bf16.msra.mxu1 %v2797_v55  ;;  %3300 = vmatprep.subr.bf16.mxu0 %v2800_v0  ;;  %v2866_v55 = vld [vmem:[#allocation4 + $0x3a8] sm:$0xff]  ;;  %v2871_v0 = vld [vmem:[#allocation4 + $0x3d0] sm:$0xff] }
 0x65e   :  { %3138 = vmatprep.subr.bf16.mxu1 %v2804_v59  ;;  %v2875_v59 = vld [vmem:[#allocation4 + $0x3f0] sm:$0xff] }
 0x660   :  { %3301 = vmatpush1.bf16.msra.mxu0 %v2799_v41  ;;  %v2894_v41 = vld [vmem:[#allocation4 + $0x488] sm:$0xff] }
 0x661   :  { %3139 = vmatpush1.bf16.msra.mxu1 %v2803_v58  ;;  %3302 = vmatprep.subr.bf16.mxu0 %v2806_v7  ;;  %v2872_v58 = vld [vmem:[#allocation4 + $0x3d8] sm:$0xff]  ;;  %v2877_v7 = vld [vmem:[#allocation4 + $0x400] sm:$0xff] }
 0x662   :  { %3140 = vmatprep.subr.bf16.mxu1 %v2810_v63  ;;  %v2881_v63 = vld [vmem:[#allocation4 + $0x420] sm:$0xff] }
 0x664   :  { %3303 = vmatpush1.bf16.msra.mxu0 %v2805_v9  ;;  %v2900_v9 = vld [vmem:[#allocation4 + $0x4b8] sm:$0xff] }
 0x665   :  { %3141 = vmatpush1.bf16.msra.mxu1 %v2809_v17  ;;  %3304 = vmatprep.subr.bf16.mxu0 %v2812_v60  ;;  %v2878_v17 = vld [vmem:[#allocation4 + $0x408] sm:$0xff]  ;;  %v2883_v60 = vld [vmem:[#allocation4 + $0x430] sm:$0xff] }
 0x666   :  { %3142 = vmatprep.subr.bf16.mxu1 %v2816_v1  ;;  %v2887_v1 = vld [vmem:[#allocation4 + $0x450] sm:$0xff] }
 0x668   :  { %3305 = vmatpush1.bf16.msra.mxu0 %v2811_v22  ;;  %v2906_v22 = vld [vmem:[#allocation4 + $0x4e8] sm:$0xff] }
 0x669   :  { %3143 = vmatpush1.bf16.msra.mxu1 %v2815_v4  ;;  %3306 = vmatprep.subr.bf16.mxu0 %v2818_v10  ;;  %v2884_v4 = vld [vmem:[#allocation4 + $0x438] sm:$0xff]  ;;  %v2889_v10 = vld [vmem:[#allocation4 + $0x460] sm:$0xff] }
 0x66a   :  { %3144 = vmatprep.subr.bf16.mxu1 %v2822_v5  ;;  %v2893_v5 = vld [vmem:[#allocation4 + $0x480] sm:$0xff] }
 0x66c   :  { %3307 = vmatpush1.bf16.msra.mxu0 %v2817_v61  ;;  %v2912_v61 = vld [vmem:[#allocation4 + $0x518] sm:$0xff] }
 0x66d   :  { %3145 = vmatpush1.bf16.msra.mxu1 %v2821_v8  ;;  %3308 = vmatprep.subr.bf16.mxu0 %v2824_v27  ;;  %v2890_v8 = vld [vmem:[#allocation4 + $0x468] sm:$0xff]  ;;  %v2895_v27 = vld [vmem:[#allocation4 + $0x490] sm:$0xff] }
 0x66e   :  { %3146 = vmatprep.subr.bf16.mxu1 %v2828_v11  ;;  %v2899_v11 = vld [vmem:[#allocation4 + $0x4b0] sm:$0xff] }
 0x670   :  { %3309 = vmatpush1.bf16.msra.mxu0 %v2823_v30  ;;  %v2918_v30 = vld [vmem:[#allocation4 + $0x548] sm:$0xff] }
 0x671   :  { %3147 = vmatpush1.bf16.msra.mxu1 %v2827_v19  ;;  %3310 = vmatprep.subr.bf16.mxu0 %v2830_v31  ;;  %v2896_v19 = vld [vmem:[#allocation4 + $0x498] sm:$0xff]  ;;  %v2901_v31 = vld [vmem:[#allocation4 + $0x4c0] sm:$0xff] }
 0x672   :  { %3148 = vmatprep.subr.bf16.mxu1 %v2834_v21  ;;  %v2905_v21 = vld [vmem:[#allocation4 + $0x4e0] sm:$0xff] }
 0x674   :  { %3311 = vmatpush1.bf16.msra.mxu0 %v2829_v34  ;;  %v2924_v34 = vld [vmem:[#allocation4 + $0x578] sm:$0xff] }
 0x675   :  { %3149 = vmatpush1.bf16.msra.mxu1 %v2833_v28  ;;  %3312 = vmatprep.subr.bf16.mxu0 %v2836_v35  ;;  %v2902_v28 = vld [vmem:[#allocation4 + $0x4c8] sm:$0xff]  ;;  %v2907_v35 = vld [vmem:[#allocation4 + $0x4f0] sm:$0xff] }
 0x676   :  { %3150 = vmatprep.subr.bf16.mxu1 %v2840_v29  ;;  %v2911_v29 = vld [vmem:[#allocation4 + $0x510] sm:$0xff] }
 0x678   :  { %3313 = vmatpush1.bf16.msra.mxu0 %v2835_v38  ;;  %v2930_v38 = vld [vmem:[#allocation4 + $0x5a8] sm:$0xff] }
 0x679   :  { %3151 = vmatpush1.bf16.msra.mxu1 %v2839_v32  ;;  %3314 = vmatprep.subr.bf16.mxu0 %v2842_v39  ;;  %v2908_v32 = vld [vmem:[#allocation4 + $0x4f8] sm:$0xff]  ;;  %v2913_v39 = vld [vmem:[#allocation4 + $0x520] sm:$0xff] }
 0x67a   :  { %3161 = vmatprep.subr.bf16.mxu1 %v2846_v33  ;;  %v2917_v33 = vld [vmem:[#allocation4 + $0x540] sm:$0xff] }
 0x67c   :  { %3153 = vmatmul.mubr.bf16.vlgmr.msra.gmra.mrb[28].mxu1 %v7109_v12  ;;  %3315 = vmatpush1.bf16.msra.mxu0 %v2841_v45  ;;  %v2936_v45 = vld [vmem:[#allocation4 + $0x5d8] sm:$0xff] }
 0x67d   :  { %3162 = vmatpush1.bf16.msra.mxu1 %v2845_v36  ;;  %3193 = vmatprep.mubr.bf16.mxu1 %v7115_v18  ;;  %v2914_v36 = vld [vmem:[#allocation4 + $0x528] sm:$0xff] }
 0x67e   :  { %3163 = vmatprep.subr.bf16.mxu1 %v2852_v37  ;;  %3325 = vmatprep.subr.bf16.mxu0 %v2848_v14  ;;  %v2923_v37 = vld [vmem:[#allocation4 + $0x570] sm:$0xff] }
 0x67f   :  { %3317 = vmatmul.mubr.bf16.vlgmr.msra.gmra.mrb[16].mxu0 %v7109_v12  ;;  %v2919_v14 = vld [vmem:[#allocation4 + $0x550] sm:$0xff] }
 0x680   :  { %3326 = vmatpush1.bf16.msra.mxu0 %v2847_v48  ;;  %3357 = vmatprep.mubr.bf16.mxu0 %v7115_v18  ;;  %v2942_v48 = vld [vmem:[#allocation4 + $0x608] sm:$0xff] }
 0x681   :  { %3164 = vmatpush1.bf16.msra.mxu1 %v2851_v43  ;;  %3327 = vmatprep.subr.bf16.mxu0 %v2854_v2  ;;  %v2920_v43 = vld [vmem:[#allocation4 + $0x558] sm:$0xff]  ;;  %v2925_v2 = vld [vmem:[#allocation4 + $0x580] sm:$0xff] }
 0x682   :  { %3165 = vmatprep.subr.bf16.mxu1 %v2858_v44  ;;  %v2929_v44 = vld [vmem:[#allocation4 + $0x5a0] sm:$0xff] }
 0x684   :  { %3328 = vmatpush1.bf16.msra.mxu0 %v2853_v50  ;;  %v2948_v50 = vld [vmem:[#allocation4 + $0x638] sm:$0xff] }
 0x685   :  { %3166 = vmatpush1.bf16.msra.mxu1 %v2857_v46  ;;  %3329 = vmatprep.subr.bf16.mxu0 %v2860_v51  ;;  %v2926_v46 = vld [vmem:[#allocation4 + $0x588] sm:$0xff]  ;;  %v2931_v51 = vld [vmem:[#allocation4 + $0x5b0] sm:$0xff] }
 0x686   :  { %3167 = vmatprep.subr.bf16.mxu1 %v2864_v47  ;;  %v2935_v47 = vld [vmem:[#allocation4 + $0x5d0] sm:$0xff] }
 0x688   :  { %3330 = vmatpush1.bf16.msra.mxu0 %v2859_v54  ;;  %v2954_v54 = vld [vmem:[#allocation4 + $0x668] sm:$0xff] }
 0x689   :  { %3168 = vmatpush1.bf16.msra.mxu1 %v2863_v49  ;;  %3331 = vmatprep.subr.bf16.mxu0 %v2866_v55  ;;  %v2932_v49 = vld [vmem:[#allocation4 + $0x5b8] sm:$0xff]  ;;  %v2937_v55 = vld [vmem:[#allocation4 + $0x5e0] sm:$0xff] }
 0x68a   :  { %3169 = vmatprep.subr.bf16.mxu1 %v2870_v3  ;;  %v2941_v3 = vld [vmem:[#allocation4 + $0x600] sm:$0xff] }
 0x68c   :  { %3332 = vmatpush1.bf16.msra.mxu0 %v2865_v57  ;;  %v2960_v57 = vld [vmem:[#allocation4 + $0x698] sm:$0xff] }
 0x68d   :  { %3170 = vmatpush1.bf16.msra.mxu1 %v2869_v52  ;;  %3333 = vmatprep.subr.bf16.mxu0 %v2872_v58  ;;  %v2938_v52 = vld [vmem:[#allocation4 + $0x5e8] sm:$0xff]  ;;  %v2943_v58 = vld [vmem:[#allocation4 + $0x610] sm:$0xff] }
 0x68e   :  { %3171 = vmatprep.subr.bf16.mxu1 %v2876_v53  ;;  %v2947_v53 = vld [vmem:[#allocation4 + $0x630] sm:$0xff] }
 0x690   :  { %3334 = vmatpush1.bf16.msra.mxu0 %v2871_v0  ;;  %v2966_v0 = vld [vmem:[#allocation4 + $0x6c8] sm:$0xff] }
 0x691   :  { %3172 = vmatpush1.bf16.msra.mxu1 %v2875_v59  ;;  %3335 = vmatprep.subr.bf16.mxu0 %v2878_v17  ;;  %v2944_v59 = vld [vmem:[#allocation4 + $0x618] sm:$0xff]  ;;  %v2949_v17 = vld [vmem:[#allocation4 + $0x640] sm:$0xff] }
 0x692   :  { %3173 = vmatprep.subr.bf16.mxu1 %v2882_v56  ;;  %v2953_v56 = vld [vmem:[#allocation4 + $0x660] sm:$0xff] }
 0x694   :  { %3336 = vmatpush1.bf16.msra.mxu0 %v2877_v7  ;;  %v2972_v7 = vld [vmem:[#allocation4 + $0x6f8] sm:$0xff] }
 0x695   :  { %3174 = vmatpush1.bf16.msra.mxu1 %v2881_v63  ;;  %3337 = vmatprep.subr.bf16.mxu0 %v2884_v4  ;;  %v2950_v63 = vld [vmem:[#allocation4 + $0x648] sm:$0xff]  ;;  %v2955_v4 = vld [vmem:[#allocation4 + $0x670] sm:$0xff] }
 0x696   :  { %3175 = vmatprep.subr.bf16.mxu1 %v2888_v6  ;;  %v2959_v6 = vld [vmem:[#allocation4 + $0x690] sm:$0xff] }
 0x698   :  { %3338 = vmatpush1.bf16.msra.mxu0 %v2883_v60  ;;  %v2978_v60 = vld [vmem:[#allocation4 + $0x728] sm:$0xff] }
 0x699   :  { %3176 = vmatpush1.bf16.msra.mxu1 %v2887_v1  ;;  %3339 = vmatprep.subr.bf16.mxu0 %v2890_v8  ;;  %v2956_v1 = vld [vmem:[#allocation4 + $0x678] sm:$0xff]  ;;  %v2961_v8 = vld [vmem:[#allocation4 + $0x6a0] sm:$0xff] }
 0x69a   :  { %3177 = vmatprep.subr.bf16.mxu1 %v2894_v41  ;;  %v2965_v41 = vld [vmem:[#allocation4 + $0x6c0] sm:$0xff] }
 0x69c   :  { %3340 = vmatpush1.bf16.msra.mxu0 %v2889_v10  ;;  %v2984_v10 = vld [vmem:[#allocation4 + $0x758] sm:$0xff] }
 0x69d   :  { %3178 = vmatpush1.bf16.msra.mxu1 %v2893_v5  ;;  %3341 = vmatprep.subr.bf16.mxu0 %v2896_v19  ;;  %v2962_v5 = vld [vmem:[#allocation4 + $0x6a8] sm:$0xff]  ;;  %v2967_v19 = vld [vmem:[#allocation4 + $0x6d0] sm:$0xff] }
 0x69e   :  { %3179 = vmatprep.subr.bf16.mxu1 %v2900_v9  ;;  %v2971_v9 = vld [vmem:[#allocation4 + $0x6f0] sm:$0xff] }
 0x6a0   :  { %3342 = vmatpush1.bf16.msra.mxu0 %v2895_v27  ;;  %v2990_v27 = vld [vmem:[#allocation4 + $0x788] sm:$0xff] }
 0x6a1   :  { %3180 = vmatpush1.bf16.msra.mxu1 %v2899_v11  ;;  %3343 = vmatprep.subr.bf16.mxu0 %v2902_v28  ;;  %v2968_v11 = vld [vmem:[#allocation4 + $0x6d8] sm:$0xff]  ;;  %v2973_v28 = vld [vmem:[#allocation4 + $0x700] sm:$0xff] }
 0x6a2   :  { %3181 = vmatprep.subr.bf16.mxu1 %v2906_v22  ;;  %v2977_v22 = vld [vmem:[#allocation4 + $0x720] sm:$0xff] }
 0x6a4   :  { %3344 = vmatpush1.bf16.msra.mxu0 %v2901_v31  ;;  %v2996_v31 = vld [vmem:[#allocation4 + $0x7b8] sm:$0xff] }
 0x6a5   :  { %3182 = vmatpush1.bf16.msra.mxu1 %v2905_v21  ;;  %3345 = vmatprep.subr.bf16.mxu0 %v2908_v32  ;;  %v2974_v21 = vld [vmem:[#allocation4 + $0x708] sm:$0xff]  ;;  %v2979_v32 = vld [vmem:[#allocation4 + $0x730] sm:$0xff] }
 0x6a6   :  { %3183 = vmatprep.subr.bf16.mxu1 %v2912_v61  ;;  %v2983_v61 = vld [vmem:[#allocation4 + $0x750] sm:$0xff] }
 0x6a8   :  { %3346 = vmatpush1.bf16.msra.mxu0 %v2907_v35  ;;  %v3002_v35 = vld [vmem:[#allocation4 + $0x7e8] sm:$0xff] }
 0x6a9   :  { %3184 = vmatpush1.bf16.msra.mxu1 %v2911_v29  ;;  %3347 = vmatprep.subr.bf16.mxu0 %v2914_v36  ;;  %v2980_v29 = vld [vmem:[#allocation4 + $0x738] sm:$0xff]  ;;  %v2985_v36 = vld [vmem:[#allocation4 + $0x760] sm:$0xff] }
 0x6aa   :  { %3185 = vmatprep.subr.bf16.mxu1 %v2918_v30  ;;  %v2989_v30 = vld [vmem:[#allocation4 + $0x780] sm:$0xff] }
 0x6ac   :  { %3348 = vmatpush1.bf16.msra.mxu0 %v2913_v39  ;;  %v3008_v39 = vld [vmem:[#allocation4 + $0x818] sm:$0xff] }
 0x6ad   :  { %3186 = vmatpush1.bf16.msra.mxu1 %v2917_v33  ;;  %3349 = vmatprep.subr.bf16.mxu0 %v2920_v43  ;;  %v2986_v33 = vld [vmem:[#allocation4 + $0x768] sm:$0xff]  ;;  %v2991_v43 = vld [vmem:[#allocation4 + $0x790] sm:$0xff] }
 0x6ae   :  { %3187 = vmatprep.subr.bf16.mxu1 %v2924_v34  ;;  %v2995_v34 = vld [vmem:[#allocation4 + $0x7b0] sm:$0xff] }
 0x6b0   :  { %3350 = vmatpush1.bf16.msra.mxu0 %v2919_v14  ;;  %v3014_v14 = vld [vmem:[#allocation4 + $0x848] sm:$0xff] }
 0x6b1   :  { %3188 = vmatpush1.bf16.msra.mxu1 %v2923_v37  ;;  %3351 = vmatprep.subr.bf16.mxu0 %v2926_v46  ;;  %v2992_v37 = vld [vmem:[#allocation4 + $0x798] sm:$0xff]  ;;  %v2997_v46 = vld [vmem:[#allocation4 + $0x7c0] sm:$0xff] }
 0x6b2   :  { %3189 = vmatprep.subr.bf16.mxu1 %v2930_v38  ;;  %v3001_v38 = vld [vmem:[#allocation4 + $0x7e0] sm:$0xff] }
 0x6b4   :  { %3352 = vmatpush1.bf16.msra.mxu0 %v2925_v2  ;;  %v3020_v2 = vld [vmem:[#allocation4 + $0x878] sm:$0xff] }
 0x6b5   :  { %3190 = vmatpush1.bf16.msra.mxu1 %v2929_v44  ;;  %3353 = vmatprep.subr.bf16.mxu0 %v2932_v49  ;;  %v2998_v44 = vld [vmem:[#allocation4 + $0x7c8] sm:$0xff]  ;;  %v3003_v49 = vld [vmem:[#allocation4 + $0x7f0] sm:$0xff] }
 0x6b6   :  { %3191 = vmatprep.subr.bf16.mxu1 %v2936_v45  ;;  %v3007_v45 = vld [vmem:[#allocation4 + $0x810] sm:$0xff] }
 0x6b8   :  { %3354 = vmatpush1.bf16.msra.mxu0 %v2931_v51  ;;  %v3026_v51 = vld [vmem:[#allocation4 + $0x8a8] sm:$0xff] }
 0x6b9   :  { %3192 = vmatpush1.bf16.msra.mxu1 %v2935_v47  ;;  %3355 = vmatprep.subr.bf16.mxu0 %v2938_v52  ;;  %v3004_v47 = vld [vmem:[#allocation4 + $0x7f8] sm:$0xff]  ;;  %v3009_v52 = vld [vmem:[#allocation4 + $0x820] sm:$0xff] }
 0x6ba   :  { %3202 = vmatprep.subr.bf16.mxu1 %v2942_v48  ;;  %v3013_v48 = vld [vmem:[#allocation4 + $0x840] sm:$0xff] }
 0x6bc   :  { %3194 = vmatmul.mubr.bf16.vlgmr.msra.gmra.mrb[28].mxu1 %v7111_v16  ;;  %3356 = vmatpush1.bf16.msra.mxu0 %v2937_v55  ;;  %v3032_v55 = vld [vmem:[#allocation4 + $0x8d8] sm:$0xff] }
 0x6bd   :  { %3203 = vmatpush1.bf16.msra.mxu1 %v2941_v3  ;;  %3234 = vmatprep.mubr.bf16.mxu1 %v7129_v15  ;;  %v3010_v3 = vld [vmem:[#allocation4 + $0x828] sm:$0xff] }
 0x6be   :  { %3204 = vmatprep.subr.bf16.mxu1 %v2948_v50  ;;  %3366 = vmatprep.subr.bf16.mxu0 %v2944_v59  ;;  %v3019_v50 = vld [vmem:[#allocation4 + $0x870] sm:$0xff] }
 0x6bf   :  { %3358 = vmatmul.mubr.bf16.vlgmr.msra.gmra.mrb[16].mxu0 %v7111_v16  ;;  %v3015_v59 = vld [vmem:[#allocation4 + $0x850] sm:$0xff] }
 0x6c0   :  { %3367 = vmatpush1.bf16.msra.mxu0 %v2943_v58  ;;  %3398 = vmatprep.mubr.bf16.mxu0 %v7129_v15  ;;  %v3038_v58 = vld [vmem:[#allocation4 + $0x908] sm:$0xff] }
 0x6c1   :  { %3205 = vmatpush1.bf16.msra.mxu1 %v2947_v53  ;;  %3368 = vmatprep.subr.bf16.mxu0 %v2950_v63  ;;  %v3016_v53 = vld [vmem:[#allocation4 + $0x858] sm:$0xff]  ;;  %v3021_v63 = vld [vmem:[#allocation4 + $0x880] sm:$0xff] }
 0x6c2   :  { %3206 = vmatprep.subr.bf16.mxu1 %v2954_v54  ;;  %v3025_v54 = vld [vmem:[#allocation4 + $0x8a0] sm:$0xff] }
 0x6c4   :  { %3369 = vmatpush1.bf16.msra.mxu0 %v2949_v17  ;;  %v3044_v17 = vld [vmem:[#allocation4 + $0x938] sm:$0xff] }
 0x6c5   :  { %3207 = vmatpush1.bf16.msra.mxu1 %v2953_v56  ;;  %3370 = vmatprep.subr.bf16.mxu0 %v2956_v1  ;;  %v3022_v56 = vld [vmem:[#allocation4 + $0x888] sm:$0xff]  ;;  %v3027_v1 = vld [vmem:[#allocation4 + $0x8b0] sm:$0xff] }
 0x6c6   :  { %3208 = vmatprep.subr.bf16.mxu1 %v2960_v57  ;;  %v3031_v57 = vld [vmem:[#allocation4 + $0x8d0] sm:$0xff] }
 0x6c8   :  { %3371 = vmatpush1.bf16.msra.mxu0 %v2955_v4  ;;  %v3043_v4 = vld [vmem:[#allocation4 + $0x930] sm:$0xff] }
 0x6c9   :  { %3209 = vmatpush1.bf16.msra.mxu1 %v2959_v6  ;;  %3372 = vmatprep.subr.bf16.mxu0 %v2962_v5  ;;  %v3028_v6 = vld [vmem:[#allocation4 + $0x8b8] sm:$0xff]  ;;  %v3050_v5 = vld [vmem:[#allocation4 + $0x968] sm:$0xff] }
 0x6ca   :  { %3210 = vmatprep.subr.bf16.mxu1 %v2966_v0  ;;  %v3037_v0 = vld [vmem:[#allocation4 + $0x900] sm:$0xff] }
 0x6cc   :  { %3373 = vmatpush1.bf16.msra.mxu0 %v2961_v8  ;;  %v3049_v8 = vld [vmem:[#allocation4 + $0x960] sm:$0xff] }
 0x6cd   :  { %3211 = vmatpush1.bf16.msra.mxu1 %v2965_v41  ;;  %3374 = vmatprep.subr.bf16.mxu0 %v2968_v11  ;;  %v6738_v41 = vmov 0   ;;  %v3056_v11 = vld [vmem:[#allocation4 + $0x998] sm:$0xff] }
 0x6ce   :  { %3212 = vmatprep.subr.bf16.mxu1 %v2972_v7  ;;  %v3034_v7 = vld [vmem:[#allocation4 + $0x8e8] sm:$0xff] }
 0x6d0   :  { %3375 = vmatpush1.bf16.msra.mxu0 %v2967_v19  ;;  %v3055_v19 = vld [vmem:[#allocation4 + $0x990] sm:$0xff] }
 0x6d1   :  { %3213 = vmatpush1.bf16.msra.mxu1 %v2971_v9  ;;  %3376 = vmatprep.subr.bf16.mxu0 %v2974_v21  ;;  %v3033_v9 = vld [vmem:[#allocation4 + $0x8e0] sm:$0xff]  ;;  %v3062_v21 = vld [vmem:[#allocation4 + $0x9c8] sm:$0xff] }
 0x6d2   :  { %3214 = vmatprep.subr.bf16.mxu1 %v2978_v60  ;;  %v3040_v60 = vld [vmem:[#allocation4 + $0x918] sm:$0xff] }
 0x6d4   :  { %3377 = vmatpush1.bf16.msra.mxu0 %v2973_v28  ;;  %v3061_v28 = vld [vmem:[#allocation4 + $0x9c0] sm:$0xff] }
 0x6d5   :  { %3215 = vmatpush1.bf16.msra.mxu1 %v2977_v22  ;;  %3378 = vmatprep.subr.bf16.mxu0 %v2980_v29  ;;  %v3039_v22 = vld [vmem:[#allocation4 + $0x910] sm:$0xff]  ;;  %v3068_v29 = vld [vmem:[#allocation4 + $0x9f8] sm:$0xff] }
 0x6d6   :  { %3216 = vmatprep.subr.bf16.mxu1 %v2984_v10  ;;  %v3046_v10 = vld [vmem:[#allocation4 + $0x948] sm:$0xff] }
 0x6d8   :  { %3379 = vmatpush1.bf16.msra.mxu0 %v2979_v32  ;;  %v3067_v32 = vld [vmem:[#allocation4 + $0x9f0] sm:$0xff] }
 0x6d9   :  { %3217 = vmatpush1.bf16.msra.mxu1 %v2983_v61  ;;  %3380 = vmatprep.subr.bf16.mxu0 %v2986_v33  ;;  %v3045_v61 = vld [vmem:[#allocation4 + $0x940] sm:$0xff]  ;;  %v3074_v33 = vld [vmem:[#allocation4 + $0xa28] sm:$0xff] }
 0x6da   :  { %3218 = vmatprep.subr.bf16.mxu1 %v2990_v27  ;;  %v3052_v27 = vld [vmem:[#allocation4 + $0x978] sm:$0xff] }
 0x6dc   :  { %3381 = vmatpush1.bf16.msra.mxu0 %v2985_v36  ;;  %v3073_v36 = vld [vmem:[#allocation4 + $0xa20] sm:$0xff] }
 0x6dd   :  { %3219 = vmatpush1.bf16.msra.mxu1 %v2989_v30  ;;  %3382 = vmatprep.subr.bf16.mxu0 %v2992_v37  ;;  %v3051_v30 = vld [vmem:[#allocation4 + $0x970] sm:$0xff]  ;;  %v3080_v37 = vld [vmem:[#allocation4 + $0xa58] sm:$0xff] }
 0x6de   :  { %3220 = vmatprep.subr.bf16.mxu1 %v2996_v31  ;;  %v3058_v31 = vld [vmem:[#allocation4 + $0x9a8] sm:$0xff] }
 0x6e0   :  { %3383 = vmatpush1.bf16.msra.mxu0 %v2991_v43  ;;  %v3079_v43 = vld [vmem:[#allocation4 + $0xa50] sm:$0xff] }
 0x6e1   :  { %3221 = vmatpush1.bf16.msra.mxu1 %v2995_v34  ;;  %3384 = vmatprep.subr.bf16.mxu0 %v2998_v44  ;;  %v3057_v34 = vld [vmem:[#allocation4 + $0x9a0] sm:$0xff]  ;;  %v2754_v44 = vld [vmem:[#allocation4 + $0x28] sm:$0xff] }
 0x6e2   :  { %3222 = vmatprep.subr.bf16.mxu1 %v3002_v35  ;;  %v3064_v35 = vld [vmem:[#allocation4 + $0x9d8] sm:$0xff] }
 0x6e4   :  { %3385 = vmatpush1.bf16.msra.mxu0 %v2997_v46  ;;  %v2753_v46 = vld [vmem:[#allocation4 + $0x20] sm:$0xff] }
 0x6e5   :  { %3223 = vmatpush1.bf16.msra.mxu1 %v3001_v38  ;;  %3386 = vmatprep.subr.bf16.mxu0 %v3004_v47  ;;  %v3063_v38 = vld [vmem:[#allocation4 + $0x9d0] sm:$0xff]  ;;  %v2760_v47 = vld [vmem:[#allocation4 + $0x58] sm:$0xff] }
 0x6e6   :  { %3224 = vmatprep.subr.bf16.mxu1 %v3008_v39  ;;  %v3070_v39 = vld [vmem:[#allocation4 + $0xa08] sm:$0xff] }
 0x6e8   :  { %3387 = vmatpush1.bf16.msra.mxu0 %v3003_v49  ;;  %v2759_v49 = vld [vmem:[#allocation4 + $0x50] sm:$0xff] }
 0x6e9   :  { %3225 = vmatpush1.bf16.msra.mxu1 %v3007_v45  ;;  %3388 = vmatprep.subr.bf16.mxu0 %v3010_v3  ;;  %v3069_v45 = vld [vmem:[#allocation4 + $0xa00] sm:$0xff]  ;;  %v2766_v3 = vld [vmem:[#allocation4 + $0x88] sm:$0xff] }
 0x6ea   :  { %3226 = vmatprep.subr.bf16.mxu1 %v3014_v14  ;;  %v3076_v14 = vld [vmem:[#allocation4 + $0xa38] sm:$0xff] }
 0x6ec   :  { %3389 = vmatpush1.bf16.msra.mxu0 %v3009_v52  ;;  %v2772_v52 = vld [vmem:[#allocation4 + $0xb8] sm:$0xff] }
 0x6ed   :  { %3227 = vmatpush1.bf16.msra.mxu1 %v3013_v48  ;;  %3390 = vmatprep.subr.bf16.mxu0 %v3016_v53  ;;  %v3075_v48 = vld [vmem:[#allocation4 + $0xa30] sm:$0xff] }
 0x6ee   :  { %3228 = vmatprep.subr.bf16.mxu1 %v3020_v2  ;;  %v3082_v2 = vld [vmem:[#allocation4 + $0xa68] sm:$0xff]  ;;  %v2771_v53 = vld [vmem:[#allocation4 + $0xb0] sm:$0xff] }
 0x6f0   :  { %3391 = vmatpush1.bf16.msra.mxu0 %v3015_v59  ;;  %v2783_v59 = vld [vmem:[#allocation4 + $0x110] sm:$0xff] }
 0x6f1   :  { %3229 = vmatpush1.bf16.msra.mxu1 %v3019_v50  ;;  %3392 = vmatprep.subr.bf16.mxu0 %v3022_v56  ;;  %v3081_v50 = vld [vmem:[#allocation4 + $0xa60] sm:$0xff]  ;;  %v2790_v56 = vld [vmem:[#allocation4 + $0x148] sm:$0xff] }
 0x6f2   :  { %3230 = vmatprep.subr.bf16.mxu1 %v3026_v51  ;;  %v2765_v51 = vld [vmem:[#allocation4 + $0x80] sm:$0xff] }
 0x6f4   :  { %3393 = vmatpush1.bf16.msra.mxu0 %v3021_v63  ;;  %v2795_v63 = vld [vmem:[#allocation4 + $0x170] sm:$0xff] }
 0x6f5   :  { %3231 = vmatpush1.bf16.msra.mxu1 %v3025_v54  ;;  %3394 = vmatprep.subr.bf16.mxu0 %v3028_v6  ;;  %v2778_v54 = vld [vmem:[#allocation4 + $0xe8] sm:$0xff] }
 0x6f6   :  { %3232 = vmatprep.subr.bf16.mxu1 %v3032_v55  ;;  %v2784_v55 = vld [vmem:[#allocation4 + $0x118] sm:$0xff]  ;;  %v2802_v6 = vld [vmem:[#allocation4 + $0x1a8] sm:$0xff] }
 0x6f8   :  { %3395 = vmatpush1.bf16.msra.mxu0 %v3027_v1  ;;  %v2807_v1 = vld [vmem:[#allocation4 + $0x1d0] sm:$0xff] }
 0x6f9   :  { %3233 = vmatpush1.bf16.msra.mxu1 %v3031_v57  ;;  %3396 = vmatprep.subr.bf16.mxu0 %v3034_v7  ;;  %v2789_v57 = vld [vmem:[#allocation4 + $0x140] sm:$0xff]  ;;  %v2814_v7 = vld [vmem:[#allocation4 + $0x208] sm:$0xff] }
 0x6fa   :  { %3243 = vmatprep.subr.bf16.mxu1 %v3038_v58  ;;  %v2796_v58 = vld [vmem:[#allocation4 + $0x178] sm:$0xff] }
 0x6fc   :  { %3235 = vmatmul.mubr.bf16.vlgmr.msra.gmra.mrb[28].mxu1 %v7127_v20  ;;  %3397 = vmatpush1.bf16.msra.mxu0 %v3033_v9  ;;  %v2819_v9 = vld [vmem:[#allocation4 + $0x230] sm:$0xff] }
 0x6fd   :  { %3244 = vmatpush1.bf16.msra.mxu1 %v3037_v0  ;;  %3275 = vmatprep.mubr.bf16.mxu1 %v6738_v41  ;;  %v2801_v0 = vld [vmem:[#allocation4 + $0x1a0] sm:$0xff] }
 0x6fe   :  { %3245 = vmatprep.subr.bf16.mxu1 %v3044_v17  ;;  %3407 = vmatprep.subr.bf16.mxu0 %v3040_v60  ;;  %v2808_v17 = vld [vmem:[#allocation4 + $0x1d8] sm:$0xff]  ;;  %v2826_v60 = vld [vmem:[#allocation4 + $0x268] sm:$0xff] }
 0x6ff   :  { %3399 = vmatmul.mubr.bf16.vlgmr.msra.gmra.mrb[16].mxu0 %v7127_v20 }
 0x700   :  { %3408 = vmatpush1.bf16.msra.mxu0 %v3039_v22  ;;  %3439 = vmatprep.mubr.bf16.mxu0 %v6738_v41  ;;  %v2831_v22 = vld [vmem:[#allocation4 + $0x290] sm:$0xff] }
 0x701   :  { %3246 = vmatpush1.bf16.msra.mxu1 %v3043_v4  ;;  %3409 = vmatprep.subr.bf16.mxu0 %v3046_v10  ;;  %v2813_v4 = vld [vmem:[#allocation4 + $0x200] sm:$0xff]  ;;  %v2838_v10 = vld [vmem:[#allocation4 + $0x2c8] sm:$0xff] }
 0x702   :  { %3247 = vmatprep.subr.bf16.mxu1 %v3050_v5  ;;  %v2820_v5 = vld [vmem:[#allocation4 + $0x238] sm:$0xff] }
 0x704   :  { %3410 = vmatpush1.bf16.msra.mxu0 %v3045_v61  ;;  %v2843_v61 = vld [vmem:[#allocation4 + $0x2f0] sm:$0xff] }
 0x705   :  { %3248 = vmatpush1.bf16.msra.mxu1 %v3049_v8  ;;  %3411 = vmatprep.subr.bf16.mxu0 %v3052_v27  ;;  %v2825_v8 = vld [vmem:[#allocation4 + $0x260] sm:$0xff]  ;;  %v2850_v27 = vld [vmem:[#allocation4 + $0x328] sm:$0xff] }
 0x706   :  { %3249 = vmatprep.subr.bf16.mxu1 %v3056_v11  ;;  %v2832_v11 = vld [vmem:[#allocation4 + $0x298] sm:$0xff] }
 0x708   :  { %3412 = vmatpush1.bf16.msra.mxu0 %v3051_v30  ;;  %v2855_v30 = vld [vmem:[#allocation4 + $0x350] sm:$0xff] }
 0x709   :  { %3250 = vmatpush1.bf16.msra.mxu1 %v3055_v19  ;;  %3413 = vmatprep.subr.bf16.mxu0 %v3058_v31  ;;  %v2837_v19 = vld [vmem:[#allocation4 + $0x2c0] sm:$0xff]  ;;  %v2862_v31 = vld [vmem:[#allocation4 + $0x388] sm:$0xff] }
 0x70a   :  { %3251 = vmatprep.subr.bf16.mxu1 %v3062_v21  ;;  %v2844_v21 = vld [vmem:[#allocation4 + $0x2f8] sm:$0xff] }
 0x70c   :  { %3414 = vmatpush1.bf16.msra.mxu0 %v3057_v34  ;;  %v2867_v34 = vld [vmem:[#allocation4 + $0x3b0] sm:$0xff] }
 0x70d   :  { %3252 = vmatpush1.bf16.msra.mxu1 %v3061_v28  ;;  %3415 = vmatprep.subr.bf16.mxu0 %v3064_v35  ;;  %v2849_v28 = vld [vmem:[#allocation4 + $0x320] sm:$0xff]  ;;  %v2874_v35 = vld [vmem:[#allocation4 + $0x3e8] sm:$0xff] }
 0x70e   :  { %3253 = vmatprep.subr.bf16.mxu1 %v3068_v29  ;;  %v2856_v29 = vld [vmem:[#allocation4 + $0x358] sm:$0xff] }
 0x710   :  { %3416 = vmatpush1.bf16.msra.mxu0 %v3063_v38  ;;  %v2886_v38 = vld [vmem:[#allocation4 + $0x448] sm:$0xff] }
 0x711   :  { %3254 = vmatpush1.bf16.msra.mxu1 %v3067_v32  ;;  %3417 = vmatprep.subr.bf16.mxu0 %v3070_v39  ;;  %v2861_v32 = vld [vmem:[#allocation4 + $0x380] sm:$0xff]  ;;  %v2892_v39 = vld [vmem:[#allocation4 + $0x478] sm:$0xff] }
 0x712   :  { %3255 = vmatprep.subr.bf16.mxu1 %v3074_v33  ;;  %v2868_v33 = vld [vmem:[#allocation4 + $0x3b8] sm:$0xff] }
 0x714   :  { %3418 = vmatpush1.bf16.msra.mxu0 %v3069_v45  ;;  %v2897_v45 = vld [vmem:[#allocation4 + $0x4a0] sm:$0xff] }
 0x715   :  { %3256 = vmatpush1.bf16.msra.mxu1 %v3073_v36  ;;  %3419 = vmatprep.subr.bf16.mxu0 %v3076_v14  ;;  %v2873_v36 = vld [vmem:[#allocation4 + $0x3e0] sm:$0xff]  ;;  %v2904_v14 = vld [vmem:[#allocation4 + $0x4d8] sm:$0xff] }
 0x716   :  { %3257 = vmatprep.subr.bf16.mxu1 %v3080_v37  ;;  %v2880_v37 = vld [vmem:[#allocation4 + $0x418] sm:$0xff] }
 0x718   :  { %3420 = vmatpush1.bf16.msra.mxu0 %v3075_v48  ;;  %v2909_v48 = vld [vmem:[#allocation4 + $0x500] sm:$0xff] }
 0x719   :  { %3258 = vmatpush1.bf16.msra.mxu1 %v3079_v43  ;;  %3421 = vmatprep.subr.bf16.mxu0 %v3082_v2  ;;  %v2891_v43 = vld [vmem:[#allocation4 + $0x470] sm:$0xff]  ;;  %v2916_v2 = vld [vmem:[#allocation4 + $0x538] sm:$0xff] }
 0x71a   :  { %3448 = vmatprep.subr.bf16.mxu1 %v2754_v44  ;;  %v2898_v44 = vld [vmem:[#allocation4 + $0x4a8] sm:$0xff] }
 0x71c   :  { %3276 = vmatmul.mubr.bf16.vlgmr.msra.gmra.mrb[28].mxu1 %v7121_v62  ;;  %3422 = vmatpush1.bf16.msra.mxu0 %v3081_v50  ;;  %v2921_v50 = vld [vmem:[#allocation4 + $0x560] sm:$0xff] }
 0x71d   :  { %3449 = vmatpush1.bf16.msra.mxu1 %v2753_v46  ;;  %3480 = vmatprep.mubr.bf16.mxu1 %v7113_v13  ;;  %v2777_v13 = vld [vmem:[#allocation4 + $0xe0] sm:$0xff]  ;;  %v2903_v46 = vld [vmem:[#allocation4 + $0x4d0] sm:$0xff] }
 0x71e   :  { %3450 = vmatprep.subr.bf16.mxu1 %v2760_v47  ;;  %v2910_v47 = vld [vmem:[#allocation4 + $0x508] sm:$0xff] }
 0x71f   :  { %3440 = vmatmul.mubr.bf16.vlgmr.msra.gmra.mrb[16].mxu0 %v7121_v62 }
 0x721   :  { %3451 = vmatpush1.bf16.msra.mxu1 %v2759_v49  ;;  %v2915_v49 = vld [vmem:[#allocation4 + $0x530] sm:$0xff] }
 0x722   :  { %3452 = vmatprep.subr.bf16.mxu1 %v2766_v3  ;;  %v2922_v3 = vld [vmem:[#allocation4 + $0x568] sm:$0xff] }
 0x725   :  { %3453 = vmatpush1.bf16.msra.mxu1 %v2765_v51  ;;  %v2928_v51 = vld [vmem:[#allocation4 + $0x598] sm:$0xff] }
 0x726   :  { %3454 = vmatprep.subr.bf16.mxu1 %v2772_v52  ;;  %v2927_v52 = vld [vmem:[#allocation4 + $0x590] sm:$0xff] }
 0x729   :  { %3455 = vmatpush1.bf16.msra.mxu1 %v2771_v53  ;;  %v2934_v53 = vld [vmem:[#allocation4 + $0x5c8] sm:$0xff] }
 0x72a   :  { %3456 = vmatprep.subr.bf16.mxu1 %v2778_v54  ;;  %v2933_v54 = vld [vmem:[#allocation4 + $0x5c0] sm:$0xff] }
 0x72d   :  { %3457 = vmatpush1.bf16.msra.mxu1 %v2777_v13  ;;  %v2940_v13 = vld [vmem:[#allocation4 + $0x5f8] sm:$0xff] }
 0x72e   :  { %3458 = vmatprep.subr.bf16.mxu1 %v2784_v55  ;;  %v2939_v55 = vld [vmem:[#allocation4 + $0x5f0] sm:$0xff] }
 0x731   :  { %3459 = vmatpush1.bf16.msra.mxu1 %v2783_v59  ;;  %v2946_v59 = vld [vmem:[#allocation4 + $0x628] sm:$0xff] }
 0x732   :  { %3460 = vmatprep.subr.bf16.mxu1 %v2790_v56  ;;  %v2945_v56 = vld [vmem:[#allocation4 + $0x620] sm:$0xff] }
 0x735   :  { %3461 = vmatpush1.bf16.msra.mxu1 %v2789_v57  ;;  %v2952_v57 = vld [vmem:[#allocation4 + $0x658] sm:$0xff] }
 0x736   :  { %3462 = vmatprep.subr.bf16.mxu1 %v2796_v58  ;;  %v2951_v58 = vld [vmem:[#allocation4 + $0x650] sm:$0xff] }
 0x739   :  { %3463 = vmatpush1.bf16.msra.mxu1 %v2795_v63  ;;  %v2958_v63 = vld [vmem:[#allocation4 + $0x688] sm:$0xff] }
 0x73a   :  { %3464 = vmatprep.subr.bf16.mxu1 %v2802_v6  ;;  %v2957_v6 = vld [vmem:[#allocation4 + $0x680] sm:$0xff] }
 0x73d   :  { %3465 = vmatpush1.bf16.msra.mxu1 %v2801_v0  ;;  %v2964_v0 = vld [vmem:[#allocation4 + $0x6b8] sm:$0xff] }
 0x73e   :  { %3466 = vmatprep.subr.bf16.mxu1 %v2808_v17  ;;  %v2963_v17 = vld [vmem:[#allocation4 + $0x6b0] sm:$0xff] }
 0x741   :  { %3467 = vmatpush1.bf16.msra.mxu1 %v2807_v1  ;;  %v2970_v1 = vld [vmem:[#allocation4 + $0x6e8] sm:$0xff] }
 0x742   :  { %3468 = vmatprep.subr.bf16.mxu1 %v2814_v7  ;;  %v2969_v7 = vld [vmem:[#allocation4 + $0x6e0] sm:$0xff] }
 0x745   :  { %3469 = vmatpush1.bf16.msra.mxu1 %v2813_v4  ;;  %v2976_v4 = vld [vmem:[#allocation4 + $0x718] sm:$0xff] }
 0x746   :  { %3470 = vmatprep.subr.bf16.mxu1 %v2820_v5  ;;  %v2982_v5 = vld [vmem:[#allocation4 + $0x748] sm:$0xff] }
 0x749   :  { %3471 = vmatpush1.bf16.msra.mxu1 %v2819_v9  ;;  %v2988_v9 = vld [vmem:[#allocation4 + $0x778] sm:$0xff] }
 0x74a   :  { %3472 = vmatprep.subr.bf16.mxu1 %v2826_v60  ;;  %v2987_v60 = vld [vmem:[#allocation4 + $0x770] sm:$0xff] }
 0x74d   :  { %3473 = vmatpush1.bf16.msra.mxu1 %v2825_v8  ;;  %v2994_v8 = vld [vmem:[#allocation4 + $0x7a8] sm:$0xff] }
 0x74e   :  { %3474 = vmatprep.subr.bf16.mxu1 %v2832_v11  ;;  %v2993_v11 = vld [vmem:[#allocation4 + $0x7a0] sm:$0xff] }
 0x751   :  { %3475 = vmatpush1.bf16.msra.mxu1 %v2831_v22  ;;  %v3000_v22 = vld [vmem:[#allocation4 + $0x7d8] sm:$0xff] }
 0x752   :  { %3476 = vmatprep.subr.bf16.mxu1 %v2838_v10  ;;  %v2999_v10 = vld [vmem:[#allocation4 + $0x7d0] sm:$0xff] }
 0x755   :  { %3477 = vmatpush1.bf16.msra.mxu1 %v2837_v19  ;;  %v3006_v19 = vld [vmem:[#allocation4 + $0x808] sm:$0xff] }
 0x756   :  { %3478 = vmatprep.subr.bf16.mxu1 %v2844_v21  ;;  %v3005_v21 = vld [vmem:[#allocation4 + $0x800] sm:$0xff] }
 0x759   :  { %3479 = vmatpush1.bf16.msra.mxu1 %v2843_v61  ;;  %v3012_v61 = vld [vmem:[#allocation4 + $0x838] sm:$0xff] }
 0x75a   :  { %3489 = vmatprep.subr.bf16.mxu1 %v2850_v27  ;;  %v3011_v27 = vld [vmem:[#allocation4 + $0x830] sm:$0xff] }
 0x75c   :  { %3481 = vmatmul.mubr.bf16.vlgmr.msra.gmra.mrb[32].mxu1 %v7109_v12  ;;  %v2879_v12 = vld [vmem:[#allocation4 + $0x410] sm:$0xff] }
 0x75d   :  { %3490 = vmatpush1.bf16.msra.mxu1 %v2849_v28  ;;  %3521 = vmatprep.mubr.bf16.mxu1 %v7115_v18  ;;  %v2885_v18 = vld [vmem:[#allocation4 + $0x440] sm:$0xff]  ;;  %v3018_v28 = vld [vmem:[#allocation4 + $0x868] sm:$0xff] }
 0x75e   :  { %3491 = vmatprep.subr.bf16.mxu1 %v2856_v29  ;;  %v3017_v29 = vld [vmem:[#allocation4 + $0x860] sm:$0xff] }
 0x761   :  { %3492 = vmatpush1.bf16.msra.mxu1 %v2855_v30  ;;  %v3024_v30 = vld [vmem:[#allocation4 + $0x898] sm:$0xff] }
 0x762   :  { %3493 = vmatprep.subr.bf16.mxu1 %v2862_v31  ;;  %v3023_v31 = vld [vmem:[#allocation4 + $0x890] sm:$0xff] }
 0x765   :  { %3494 = vmatpush1.bf16.msra.mxu1 %v2861_v32  ;;  %v3030_v32 = vld [vmem:[#allocation4 + $0x8c8] sm:$0xff] }
 0x766   :  { %3495 = vmatprep.subr.bf16.mxu1 %v2868_v33  ;;  %v3029_v33 = vld [vmem:[#allocation4 + $0x8c0] sm:$0xff] }
 0x769   :  { %3496 = vmatpush1.bf16.msra.mxu1 %v2867_v34  ;;  %v3036_v34 = vld [vmem:[#allocation4 + $0x8f8] sm:$0xff] }
 0x76a   :  { %3497 = vmatprep.subr.bf16.mxu1 %v2874_v35  ;;  %v3035_v35 = vld [vmem:[#allocation4 + $0x8f0] sm:$0xff] }
 0x76d   :  { %3498 = vmatpush1.bf16.msra.mxu1 %v2873_v36  ;;  %v3042_v36 = vld [vmem:[#allocation4 + $0x928] sm:$0xff] }
 0x76e   :  { %3499 = vmatprep.subr.bf16.mxu1 %v2880_v37  ;;  %v3041_v37 = vld [vmem:[#allocation4 + $0x920] sm:$0xff] }
 0x771   :  { %3500 = vmatpush1.bf16.msra.mxu1 %v2879_v12  ;;  %v3048_v12 = vld [vmem:[#allocation4 + $0x958] sm:$0xff] }
 0x772   :  { %3501 = vmatprep.subr.bf16.mxu1 %v2886_v38  ;;  %v3047_v38 = vld [vmem:[#allocation4 + $0x950] sm:$0xff] }
 0x775   :  { %3502 = vmatpush1.bf16.msra.mxu1 %v2885_v18  ;;  %v3054_v18 = vld [vmem:[#allocation4 + $0x988] sm:$0xff] }
 0x776   :  { %3503 = vmatprep.subr.bf16.mxu1 %v2892_v39  ;;  %v3053_v39 = vld [vmem:[#allocation4 + $0x980] sm:$0xff] }
 0x779   :  { %3504 = vmatpush1.bf16.msra.mxu1 %v2891_v43  ;;  %v3060_v43 = vld [vmem:[#allocation4 + $0x9b8] sm:$0xff] }
 0x77a   :  { %3505 = vmatprep.subr.bf16.mxu1 %v2898_v44  ;;  %v3086_v44 = vld [vmem:[#allocation13 + $0x2] ss:$8 sm:$0xf] }
 0x77d   :  { %3506 = vmatpush1.bf16.msra.mxu1 %v2897_v45  ;;  %v3087_v45 = vld [vmem:[#allocation13 + $0x2] ss:$8 sm:$0x30] }
 0x77e   :  { %3507 = vmatprep.subr.bf16.mxu1 %v2904_v14  ;;  %v3059_v14 = vld [vmem:[#allocation4 + $0x9b0] sm:$0xff] }
 0x781   :  { %3508 = vmatpush1.bf16.msra.mxu1 %v2903_v46  ;;  %v3066_v46 = vld [vmem:[#allocation4 + $0x9e8] sm:$0xff] }
 0x782   :  { %3509 = vmatprep.subr.bf16.mxu1 %v2910_v47  ;;  %v3088_v47 = vor.u32 %v3087_v45, %v3086_v44 }
 0x785   :  { %3510 = vmatpush1.bf16.msra.mxu1 %v2909_v48  ;;  %v3072_v48 = vld [vmem:[#allocation4 + $0xa18] sm:$0xff] }
 0x786   :  { %3511 = vmatprep.subr.bf16.mxu1 %v2916_v2  ;;  %v3093_v2 = vrot.slane %v3088_v47, %v7015_v23 }
 0x789   :  { %3512 = vmatpush1.bf16.msra.mxu1 %v2915_v49  ;;  %v3097_v49 = vrot.slane %v3088_v47, %v7021_v25 }
 0x78a   :  { %3513 = vmatprep.subr.bf16.mxu1 %v2922_v3  ;;  %v3071_v3 = vld [vmem:[#allocation4 + $0xa10] sm:$0xff] }
 0x78d   :  { %3514 = vmatpush1.bf16.msra.mxu1 %v2921_v50 }
 0x78e   :  { %3515 = vmatprep.subr.bf16.mxu1 %v2928_v51  ;;  %v3078_v51 = vld [vmem:[#allocation4 + $0xa48] sm:$0xff] }
 0x791   :  { %3516 = vmatpush1.bf16.msra.mxu1 %v2927_v52 }
 0x792   :  { %3517 = vmatprep.subr.bf16.mxu1 %v2934_v53 }
 0x795   :  { %3518 = vmatpush1.bf16.msra.mxu1 %v2933_v54 }
 0x796   :  { %3519 = vmatprep.subr.bf16.mxu1 %v2940_v13 }
 0x799   :  { %3520 = vmatpush1.bf16.msra.mxu1 %v2939_v55 }
 0x79a   :  { %3530 = vmatprep.subr.bf16.mxu1 %v2946_v59 }
 0x79c   :  { %3522 = vmatmul.mubr.bf16.vlgmr.msra.gmra.mrb[32].mxu1 %v7111_v16  ;;  %v2975_v16 = vld [vmem:[#allocation4 + $0x710] sm:$0xff] }
 0x79d   :  { %3531 = vmatpush1.bf16.msra.mxu1 %v2945_v56  ;;  %3562 = vmatprep.mubr.bf16.mxu1 %v7129_v15  ;;  %v2981_v15 = vld [vmem:[#allocation4 + $0x740] sm:$0xff] }
 0x79e   :  { %3532 = vmatprep.subr.bf16.mxu1 %v2952_v57  ;;  %v3077_v56 = vld [vmem:[#allocation4 + $0xa40] sm:$0xff] }
 0x7a1   :  { %3533 = vmatpush1.bf16.msra.mxu1 %v2951_v58  ;;  %v3084_v58 = vld [vmem:[#allocation4 + $0xa78] sm:$0xff] }
 0x7a2   :  { %3534 = vmatprep.subr.bf16.mxu1 %v2958_v63 }
 0x7a5   :  { %3535 = vmatpush1.bf16.msra.mxu1 %v2957_v6 }
 0x7a6   :  { %3536 = vmatprep.subr.bf16.mxu1 %v2964_v0  ;;  %v3083_v0 = vld [vmem:[#allocation4 + $0xa70] sm:$0xff] }
 0x7a9   :  { %3537 = vmatpush1.bf16.msra.mxu1 %v2963_v17  ;;  %v3101_v17 = vrot.slane %v3088_v47, %v7018_v24 }
 0x7aa   :  { %3538 = vmatprep.subr.bf16.mxu1 %v2970_v1  ;;  %v3105_v1 = vrot.slane %v3088_v47, %v7024_v26 }
 0x7ad   :  { %3539 = vmatpush1.bf16.msra.mxu1 %v2969_v7 }
 0x7ae   :  { %3540 = vmatprep.subr.bf16.mxu1 %v2976_v4 }
 0x7b1   :  { %3541 = vmatpush1.bf16.msra.mxu1 %v2975_v16 }
 0x7b2   :  { %3542 = vmatprep.subr.bf16.mxu1 %v2982_v5 }
 0x7b5   :  { %3543 = vmatpush1.bf16.msra.mxu1 %v2981_v15 }
 0x7b6   :  { %3544 = vmatprep.subr.bf16.mxu1 %v2988_v9 }
 0x7b9   :  { %3545 = vmatpush1.bf16.msra.mxu1 %v2987_v60 }
 0x7ba   :  { %3546 = vmatprep.subr.bf16.mxu1 %v2994_v8 }
 0x7bd   :  { %3547 = vmatpush1.bf16.msra.mxu1 %v2993_v11 }
 0x7be   :  { %3548 = vmatprep.subr.bf16.mxu1 %v3000_v22 }
 0x7c1   :  { %3549 = vmatpush1.bf16.msra.mxu1 %v2999_v10  ;;  %v3109_v10 = vrot.slane %v3088_v47, %v7045_v40 }
 0x7c2   :  { %3550 = vmatprep.subr.bf16.mxu1 %v3006_v19  ;;  %v3113_v19 = vrot.slane %v3088_v47, %v7049_v42 }
 0x7c5   :  { %3551 = vmatpush1.bf16.msra.mxu1 %v3005_v21 }
 0x7c6   :  { %3552 = vmatprep.subr.bf16.mxu1 %v3012_v61 }
 0x7c9   :  { %3553 = vmatpush1.bf16.msra.mxu1 %v3011_v27 }
 0x7ca   :  { %3554 = vmatprep.subr.bf16.mxu1 %v3018_v28 }
 0x7cd   :  { %3555 = vmatpush1.bf16.msra.mxu1 %v3017_v29 }
 0x7ce   :  { %3556 = vmatprep.subr.bf16.mxu1 %v3024_v30 }
 0x7d1   :  { %3557 = vmatpush1.bf16.msra.mxu1 %v3023_v31 }
 0x7d2   :  { %3558 = vmatprep.subr.bf16.mxu1 %v3030_v32 }
 0x7d5   :  { %3559 = vmatpush1.bf16.msra.mxu1 %v3029_v33 }
 0x7d6   :  { %3560 = vmatprep.subr.bf16.mxu1 %v3036_v34 }
 0x7d9   :  { %3561 = vmatpush1.bf16.msra.mxu1 %v3035_v35 }
 0x7da   :  { %3571 = vmatprep.subr.bf16.mxu1 %v3042_v36 }
 0x7dc   :  { %3563 = vmatmul.mubr.bf16.vlgmr.msra.gmra.mrb[32].mxu1 %v7127_v20  ;;  %v3065_v20 = vld [vmem:[#allocation4 + $0x9e0] sm:$0xff] }
 0x7dd   :  { %3572 = vmatpush1.bf16.msra.mxu1 %v3041_v37  ;;  %3603 = vmatprep.mubr.bf16.mxu1 %v6738_v41 }
 0x7de   :  { %3573 = vmatprep.subr.bf16.mxu1 %v3048_v12 }
 0x7e1   :  { %3574 = vmatpush1.bf16.msra.mxu1 %v3047_v38 }
 0x7e2   :  { %3575 = vmatprep.subr.bf16.mxu1 %v3054_v18 }
 0x7e5   :  { %3576 = vmatpush1.bf16.msra.mxu1 %v3053_v39 }
 0x7e6   :  { %3577 = vmatprep.subr.bf16.mxu1 %v3060_v43 }
 0x7e9   :  { %3578 = vmatpush1.bf16.msra.mxu1 %v3059_v14 }
 0x7ea   :  { %3579 = vmatprep.subr.bf16.mxu1 %v3066_v46 }
 0x7ed   :  { %3580 = vmatpush1.bf16.msra.mxu1 %v3065_v20 }
 0x7ee   :  { %3581 = vmatprep.subr.bf16.mxu1 %v3072_v48 }
 0x7ef   :  { %v3277_v50 = vpop.f32.mrb[28].mxu1 }
 0x7f0   :  { %v6365_v52 = vadd.f32 %v3277_v50, %v3093_v2  ;;  %v3279_v53 = vpop.f32.mrb[29].mxu1 }
 0x7f1   :  { %v6366_v54 = vadd.f32 %v3279_v53, %v3097_v49  ;;  %v3281_v13 = vpop.f32.mrb[30].mxu1  ;;  %3582 = vmatpush1.bf16.msra.mxu1 %v3071_v3 }
 0x7f2   :  { %v3612_v55 = vmax.f32 %v6365_v52, 0.0  ;;  %v3282_v59 = vpop.f32.mrb[31].mxu1  ;;  %3583 = vmatprep.subr.bf16.mxu1 %v3078_v51  ;;  %v3441_v7 = vpop.f32.mrb[16].mxu0 }
 0x7f3   :  { %v3613_v57 = vmax.f32 %v6366_v54, 0.0  ;;  %v6367_v4 = vadd.f32 %v3441_v7, %v3101_v17  ;;  %v3443_v16 = vpop.f32.mrb[17].mxu0 }
 0x7f4   :  { %v7156_v63 = vpack.c.bf16 %v3612_v55, %v3612_v55  ;;  %v6368_v5 = vadd.f32 %v3443_v16, %v3105_v1  ;;  %v3445_v15 = vpop.f32.mrb[18].mxu0 }
 0x7f5   :  { %v7158_v6 = vpack.c.bf16 %v3613_v57, %v3613_v57  ;;  %3584 = vmatpush1.bf16.msra.mxu1 %v3077_v56  ;;  %v3614_v9 = vmax.f32 %v6367_v4, 0.0  ;;  %v3446_v60 = vpop.f32.mrb[19].mxu0 }
 0x7f6   :  { %3585 = vmatprep.subr.bf16.mxu1 %v3084_v58  ;;  %v3615_v8 = vmax.f32 %v6368_v5, 0.0 }
 0x7f7   :  { %v7163_v11 = vpack.c.bf16 %v3614_v9, %v3614_v9 }
 0x7f8   :  { %v7165_v22 = vpack.c.bf16 %v3615_v8, %v3615_v8 }
 0x7f9   :  { %3586 = vmatpush1.bf16.msra.mxu1 %v3083_v0 }
 0x7fc   :  { %3604 = vmatmul.mubr.bf16.vlgmr.msra.gmra.mrb[32].mxu1 %v7121_v62 }
 0x8cf   :  { %v3605_v21 = vpop.f32.mrb[32].mxu1 }
 0x8d0   :  { %v6369_v61 = vadd.f32 %v3605_v21, %v3109_v10  ;;  %v3607_v27 = vpop.f32.mrb[33].mxu1 }
 0x8d1   :  { %v6370_v28 = vadd.f32 %v3607_v27, %v3113_v19  ;;  %v3609_v29 = vpop.f32.mrb[34].mxu1 }
 0x8d2   :  { %v3616_v30 = vmax.f32 %v6369_v61, 0.0  ;;  %v3610_v31 = vpop.f32.mrb[35].mxu1 }
 0x8d3   :  { %v3617_v32 = vmax.f32 %v6370_v28, 0.0 }
 0x8d4   :  { %v7169_v62 = vpack.c.bf16 %v3616_v30, %v3616_v30 }
 0x8d5   :  { %v7171_v33 = vpack.c.bf16 %v3617_v32, %v3617_v32 }
 0x8d6   :  { %6678 = dma.done.wait [#allocation12 + $0x3], 30720 }
 0x8d7   :  { %6679 = vsyncadd [#allocation12 + $0x3], 4294936576  ;;  %3930 = vmatprep.mubr.bf16.mxu0 %v7158_v6  ;;  %4053 = vmatprep.mubr.bf16.mxu1 %v7158_v6  ;;  %v3629_v34 = vld [vmem:[#allocation5 + $0x8] sm:$0xff]  ;;  %v3631_v42 = vld [vmem:[#allocation5 + $0x18] sm:$0xff] }
 0x8d8   :  { %v3628_v35 = vld [vmem:[#allocation5] sm:$0xff]  ;;  %3898 = vmatprep.subr.bf16.mxu0 %v3629_v34  ;;  %4021 = vmatprep.subr.bf16.mxu1 %v3631_v42  ;;  %v3630_v36 = vld [vmem:[#allocation5 + $0x10] sm:$0xff]  ;;  %v3633_v38 = vld [vmem:[#allocation5 + $0x28] sm:$0xff] }
 0x8d9   :  { %v3634_v37 = vld [vmem:[#allocation5 + $0x30] sm:$0xff]  ;;  %v3636_v12 = vld [vmem:[#allocation5 + $0x40] sm:$0xff]  ;;  %3899 = vmatpush1.bf16.msra.mxu0 %v3628_v35  ;;  %4022 = vmatpush1.bf16.msra.mxu1 %v3630_v36  ;;  %v3635_v18 = vld [vmem:[#allocation5 + $0x38] sm:$0xff] }
 0x8da   :  { %3900 = vmatprep.subr.bf16.mxu0 %v3634_v37  ;;  %4023 = vmatprep.subr.bf16.mxu1 %v3636_v12  ;;  %v3639_v39 = vld [vmem:[#allocation5 + $0x58] sm:$0xff]  ;;  %v3641_v43 = vld [vmem:[#allocation5 + $0x68] sm:$0xff]  ;;  %v3638_v44 = vld [vmem:[#allocation5 + $0x50] sm:$0xff] }
 0x8db   :  { %v3640_v45 = vld [vmem:[#allocation5 + $0x60] sm:$0xff]  ;;  %v3646_v46 = vld [vmem:[#allocation5 + $0x90] sm:$0xff]  ;;  %v3643_v47 = vld [vmem:[#allocation5 + $0x78] sm:$0xff] }
 0x8dc   :  { %v3644_v14 = vld [vmem:[#allocation5 + $0x80] sm:$0xff]  ;;  %v3645_v20 = vld [vmem:[#allocation5 + $0x88] sm:$0xff]  ;;  %v3651_v2 = vld [vmem:[#allocation5 + $0xb8] sm:$0xff] }
 0x8dd   :  { %3901 = vmatpush1.bf16.msra.mxu0 %v3633_v38  ;;  %4024 = vmatpush1.bf16.msra.mxu1 %v3635_v18  ;;  %v3649_v48 = vld [vmem:[#allocation5 + $0xa8] sm:$0xff]  ;;  %v3648_v49 = vld [vmem:[#allocation5 + $0xa0] sm:$0xff]  ;;  %v3650_v3 = vld [vmem:[#allocation5 + $0xb0] sm:$0xff] }
 0x8de   :  { %3902 = vmatprep.subr.bf16.mxu0 %v3639_v39  ;;  %4025 = vmatprep.subr.bf16.mxu1 %v3641_v43  ;;  %v3654_v50 = vld [vmem:[#allocation5 + $0xd0] sm:$0xff]  ;;  %v3656_v51 = vld [vmem:[#allocation5 + $0xe0] sm:$0xff]  ;;  %v3653_v52 = vld [vmem:[#allocation5 + $0xc8] sm:$0xff] }
 0x8df   :  { %v3655_v53 = vld [vmem:[#allocation5 + $0xd8] sm:$0xff]  ;;  %v3661_v13 = vld [vmem:[#allocation5 + $0x108] sm:$0xff]  ;;  %v3658_v55 = vld [vmem:[#allocation5 + $0xf0] sm:$0xff] }
 0x8e0   :  { %v3659_v54 = vld [vmem:[#allocation5 + $0xf8] sm:$0xff]  ;;  %v3660_v59 = vld [vmem:[#allocation5 + $0x100] sm:$0xff]  ;;  %v3666_v57 = vld [vmem:[#allocation5 + $0x130] sm:$0xff] }
 0x8e1   :  { %3903 = vmatpush1.bf16.msra.mxu0 %v3638_v44  ;;  %4026 = vmatpush1.bf16.msra.mxu1 %v3640_v45  ;;  %v3664_v56 = vld [vmem:[#allocation5 + $0x120] sm:$0xff]  ;;  %v3663_v58 = vld [vmem:[#allocation5 + $0x118] sm:$0xff]  ;;  %v3665_v0 = vld [vmem:[#allocation5 + $0x128] sm:$0xff] }
 0x8e2   :  { %3904 = vmatprep.subr.bf16.mxu0 %v3644_v14  ;;  %4027 = vmatprep.subr.bf16.mxu1 %v3646_v46  ;;  %v3669_v17 = vld [vmem:[#allocation5 + $0x148] sm:$0xff]  ;;  %v3671_v1 = vld [vmem:[#allocation5 + $0x158] sm:$0xff]  ;;  %v3668_v7 = vld [vmem:[#allocation5 + $0x140] sm:$0xff] }
 0x8e3   :  { %v3670_v4 = vld [vmem:[#allocation5 + $0x150] sm:$0xff]  ;;  %v3676_v5 = vld [vmem:[#allocation5 + $0x180] sm:$0xff]  ;;  %v3673_v15 = vld [vmem:[#allocation5 + $0x168] sm:$0xff] }
 0x8e4   :  { %v3674_v16 = vld [vmem:[#allocation5 + $0x170] sm:$0xff]  ;;  %v3675_v9 = vld [vmem:[#allocation5 + $0x178] sm:$0xff]  ;;  %v3681_v8 = vld [vmem:[#allocation5 + $0x1a8] sm:$0xff] }
 0x8e5   :  { %3905 = vmatpush1.bf16.msra.mxu0 %v3643_v47  ;;  %4028 = vmatpush1.bf16.msra.mxu1 %v3645_v20  ;;  %v3679_v60 = vld [vmem:[#allocation5 + $0x198] sm:$0xff]  ;;  %v3678_v10 = vld [vmem:[#allocation5 + $0x190] sm:$0xff]  ;;  %v3680_v19 = vld [vmem:[#allocation5 + $0x1a0] sm:$0xff] }
 0x8e6   :  { %3906 = vmatprep.subr.bf16.mxu0 %v3649_v48  ;;  %4029 = vmatprep.subr.bf16.mxu1 %v3651_v2  ;;  %v3684_v21 = vld [vmem:[#allocation5 + $0x1c0] sm:$0xff]  ;;  %v3686_v61 = vld [vmem:[#allocation5 + $0x1d0] sm:$0xff]  ;;  %v3683_v27 = vld [vmem:[#allocation5 + $0x1b8] sm:$0xff] }
 0x8e7   :  { %v3685_v28 = vld [vmem:[#allocation5 + $0x1c8] sm:$0xff]  ;;  %v3691_v30 = vld [vmem:[#allocation5 + $0x1f8] sm:$0xff]  ;;  %v3688_v31 = vld [vmem:[#allocation5 + $0x1e0] sm:$0xff] }
 0x8e8   :  { %v3689_v29 = vld [vmem:[#allocation5 + $0x1e8] sm:$0xff]  ;;  %v3690_v32 = vld [vmem:[#allocation5 + $0x1f0] sm:$0xff]  ;;  %v3696_v42 = vld [vmem:[#allocation5 + $0x220] sm:$0xff] }
 0x8e9   :  { %3907 = vmatpush1.bf16.msra.mxu0 %v3648_v49  ;;  %4030 = vmatpush1.bf16.msra.mxu1 %v3650_v3  ;;  %v3694_v34 = vld [vmem:[#allocation5 + $0x210] sm:$0xff]  ;;  %v3693_v35 = vld [vmem:[#allocation5 + $0x208] sm:$0xff]  ;;  %v3695_v36 = vld [vmem:[#allocation5 + $0x218] sm:$0xff] }
 0x8ea   :  { %3908 = vmatprep.subr.bf16.mxu0 %v3654_v50  ;;  %4031 = vmatprep.subr.bf16.mxu1 %v3656_v51  ;;  %v3699_v37 = vld [vmem:[#allocation5 + $0x238] sm:$0xff]  ;;  %v3701_v12 = vld [vmem:[#allocation5 + $0x248] sm:$0xff]  ;;  %v3698_v38 = vld [vmem:[#allocation5 + $0x230] sm:$0xff] }
 0x8eb   :  { %v3700_v18 = vld [vmem:[#allocation5 + $0x240] sm:$0xff]  ;;  %v3706_v43 = vld [vmem:[#allocation5 + $0x270] sm:$0xff]  ;;  %v3703_v44 = vld [vmem:[#allocation5 + $0x258] sm:$0xff] }
 0x8ec   :  { %v3704_v39 = vld [vmem:[#allocation5 + $0x260] sm:$0xff]  ;;  %v3705_v45 = vld [vmem:[#allocation5 + $0x268] sm:$0xff]  ;;  %v3711_v46 = vld [vmem:[#allocation5 + $0x298] sm:$0xff] }
 0x8ed   :  { %3909 = vmatpush1.bf16.msra.mxu0 %v3653_v52  ;;  %4032 = vmatpush1.bf16.msra.mxu1 %v3655_v53  ;;  %v3709_v14 = vld [vmem:[#allocation5 + $0x288] sm:$0xff]  ;;  %v3708_v47 = vld [vmem:[#allocation5 + $0x280] sm:$0xff]  ;;  %v3710_v20 = vld [vmem:[#allocation5 + $0x290] sm:$0xff] }
 0x8ee   :  { %3910 = vmatprep.subr.bf16.mxu0 %v3659_v54  ;;  %4033 = vmatprep.subr.bf16.mxu1 %v3661_v13  ;;  %v3714_v48 = vld [vmem:[#allocation5 + $0x2b0] sm:$0xff]  ;;  %v3716_v2 = vld [vmem:[#allocation5 + $0x2c0] sm:$0xff]  ;;  %v3713_v49 = vld [vmem:[#allocation5 + $0x2a8] sm:$0xff] }
 0x8ef   :  { %v3715_v3 = vld [vmem:[#allocation5 + $0x2b8] sm:$0xff]  ;;  %v3721_v51 = vld [vmem:[#allocation5 + $0x2e8] sm:$0xff]  ;;  %v3718_v52 = vld [vmem:[#allocation5 + $0x2d0] sm:$0xff] }
 0x8f0   :  { %v3719_v50 = vld [vmem:[#allocation5 + $0x2d8] sm:$0xff]  ;;  %v3720_v53 = vld [vmem:[#allocation5 + $0x2e0] sm:$0xff]  ;;  %v3726_v13 = vld [vmem:[#allocation5 + $0x310] sm:$0xff] }
 0x8f1   :  { %3911 = vmatpush1.bf16.msra.mxu0 %v3658_v55  ;;  %4034 = vmatpush1.bf16.msra.mxu1 %v3660_v59  ;;  %v3724_v54 = vld [vmem:[#allocation5 + $0x300] sm:$0xff]  ;;  %v3723_v55 = vld [vmem:[#allocation5 + $0x2f8] sm:$0xff]  ;;  %v3725_v59 = vld [vmem:[#allocation5 + $0x308] sm:$0xff] }
 0x8f2   :  { %3912 = vmatprep.subr.bf16.mxu0 %v3664_v56  ;;  %4035 = vmatprep.subr.bf16.mxu1 %v3666_v57  ;;  %v3729_v56 = vld [vmem:[#allocation5 + $0x328] sm:$0xff]  ;;  %v3731_v57 = vld [vmem:[#allocation5 + $0x338] sm:$0xff] }
 0x8f5   :  { %3913 = vmatpush1.bf16.msra.mxu0 %v3663_v58  ;;  %4036 = vmatpush1.bf16.msra.mxu1 %v3665_v0  ;;  %v3728_v58 = vld [vmem:[#allocation5 + $0x320] sm:$0xff]  ;;  %v3730_v0 = vld [vmem:[#allocation5 + $0x330] sm:$0xff] }
 0x8f6   :  { %3914 = vmatprep.subr.bf16.mxu0 %v3669_v17  ;;  %4037 = vmatprep.subr.bf16.mxu1 %v3671_v1  ;;  %v3734_v17 = vld [vmem:[#allocation5 + $0x350] sm:$0xff]  ;;  %v3736_v1 = vld [vmem:[#allocation5 + $0x360] sm:$0xff] }
 0x8f9   :  { %3915 = vmatpush1.bf16.msra.mxu0 %v3668_v7  ;;  %4038 = vmatpush1.bf16.msra.mxu1 %v3670_v4  ;;  %v3733_v7 = vld [vmem:[#allocation5 + $0x348] sm:$0xff]  ;;  %v3735_v4 = vld [vmem:[#allocation5 + $0x358] sm:$0xff] }
 0x8fa   :  { %3916 = vmatprep.subr.bf16.mxu0 %v3674_v16  ;;  %4039 = vmatprep.subr.bf16.mxu1 %v3676_v5  ;;  %v3739_v16 = vld [vmem:[#allocation5 + $0x378] sm:$0xff]  ;;  %v3741_v5 = vld [vmem:[#allocation5 + $0x388] sm:$0xff] }
 0x8fd   :  { %3917 = vmatpush1.bf16.msra.mxu0 %v3673_v15  ;;  %4040 = vmatpush1.bf16.msra.mxu1 %v3675_v9  ;;  %v3738_v15 = vld [vmem:[#allocation5 + $0x370] sm:$0xff]  ;;  %v3740_v9 = vld [vmem:[#allocation5 + $0x380] sm:$0xff] }
 0x8fe   :  { %3918 = vmatprep.subr.bf16.mxu0 %v3679_v60  ;;  %4041 = vmatprep.subr.bf16.mxu1 %v3681_v8  ;;  %v3744_v60 = vld [vmem:[#allocation5 + $0x3a0] sm:$0xff]  ;;  %v3746_v8 = vld [vmem:[#allocation5 + $0x3b0] sm:$0xff] }
 0x901   :  { %3919 = vmatpush1.bf16.msra.mxu0 %v3678_v10  ;;  %4042 = vmatpush1.bf16.msra.mxu1 %v3680_v19  ;;  %v3743_v10 = vld [vmem:[#allocation5 + $0x398] sm:$0xff]  ;;  %v3745_v19 = vld [vmem:[#allocation5 + $0x3a8] sm:$0xff] }
 0x902   :  { %3920 = vmatprep.subr.bf16.mxu0 %v3684_v21  ;;  %4043 = vmatprep.subr.bf16.mxu1 %v3686_v61  ;;  %v3749_v21 = vld [vmem:[#allocation5 + $0x3c8] sm:$0xff]  ;;  %v3751_v61 = vld [vmem:[#allocation5 + $0x3d8] sm:$0xff] }
 0x905   :  { %3921 = vmatpush1.bf16.msra.mxu0 %v3683_v27  ;;  %4044 = vmatpush1.bf16.msra.mxu1 %v3685_v28  ;;  %v3748_v27 = vld [vmem:[#allocation5 + $0x3c0] sm:$0xff]  ;;  %v3750_v28 = vld [vmem:[#allocation5 + $0x3d0] sm:$0xff] }
 0x906   :  { %3922 = vmatprep.subr.bf16.mxu0 %v3689_v29  ;;  %4045 = vmatprep.subr.bf16.mxu1 %v3691_v30  ;;  %v3754_v29 = vld [vmem:[#allocation5 + $0x3f0] sm:$0xff]  ;;  %v3756_v30 = vld [vmem:[#allocation5 + $0x400] sm:$0xff] }
 0x909   :  { %3923 = vmatpush1.bf16.msra.mxu0 %v3688_v31  ;;  %4046 = vmatpush1.bf16.msra.mxu1 %v3690_v32  ;;  %v3753_v31 = vld [vmem:[#allocation5 + $0x3e8] sm:$0xff]  ;;  %v3755_v32 = vld [vmem:[#allocation5 + $0x3f8] sm:$0xff] }
 0x90a   :  { %3924 = vmatprep.subr.bf16.mxu0 %v3694_v34  ;;  %4047 = vmatprep.subr.bf16.mxu1 %v3696_v42  ;;  %v3759_v34 = vld [vmem:[#allocation5 + $0x418] sm:$0xff]  ;;  %v3761_v42 = vld [vmem:[#allocation5 + $0x428] sm:$0xff] }
 0x90d   :  { %3925 = vmatpush1.bf16.msra.mxu0 %v3693_v35  ;;  %4048 = vmatpush1.bf16.msra.mxu1 %v3695_v36  ;;  %v3758_v35 = vld [vmem:[#allocation5 + $0x410] sm:$0xff]  ;;  %v3760_v36 = vld [vmem:[#allocation5 + $0x420] sm:$0xff] }
 0x90e   :  { %3926 = vmatprep.subr.bf16.mxu0 %v3699_v37  ;;  %4049 = vmatprep.subr.bf16.mxu1 %v3701_v12  ;;  %v3764_v37 = vld [vmem:[#allocation5 + $0x440] sm:$0xff]  ;;  %v3766_v12 = vld [vmem:[#allocation5 + $0x450] sm:$0xff] }
 0x911   :  { %3927 = vmatpush1.bf16.msra.mxu0 %v3698_v38  ;;  %4050 = vmatpush1.bf16.msra.mxu1 %v3700_v18  ;;  %v3763_v38 = vld [vmem:[#allocation5 + $0x438] sm:$0xff]  ;;  %v3765_v18 = vld [vmem:[#allocation5 + $0x448] sm:$0xff] }
 0x912   :  { %3928 = vmatprep.subr.bf16.mxu0 %v3704_v39  ;;  %4051 = vmatprep.subr.bf16.mxu1 %v3706_v43  ;;  %v3769_v39 = vld [vmem:[#allocation5 + $0x468] sm:$0xff]  ;;  %v3771_v43 = vld [vmem:[#allocation5 + $0x478] sm:$0xff] }
 0x915   :  { %3929 = vmatpush1.bf16.msra.mxu0 %v3703_v44  ;;  %4052 = vmatpush1.bf16.msra.mxu1 %v3705_v45  ;;  %v3768_v44 = vld [vmem:[#allocation5 + $0x460] sm:$0xff]  ;;  %v3770_v45 = vld [vmem:[#allocation5 + $0x470] sm:$0xff] }
 0x916   :  { %3939 = vmatprep.subr.bf16.mxu0 %v3709_v14  ;;  %4062 = vmatprep.subr.bf16.mxu1 %v3711_v46  ;;  %v3774_v14 = vld [vmem:[#allocation5 + $0x490] sm:$0xff]  ;;  %v3776_v46 = vld [vmem:[#allocation5 + $0x4a0] sm:$0xff] }
 0x918   :  { %3931 = vmatmul.mubr.bf16.vlgmr.msra.gmra.mrb[20].mxu0 %v7156_v63  ;;  %4054 = vmatmul.mubr.bf16.vlgmr.msra.gmra.mrb[36].mxu1 %v7156_v63 }
 0x919   :  { %3940 = vmatpush1.bf16.msra.mxu0 %v3708_v47  ;;  %4063 = vmatpush1.bf16.msra.mxu1 %v3710_v20  ;;  %v3773_v47 = vld [vmem:[#allocation5 + $0x488] sm:$0xff]  ;;  %v3775_v20 = vld [vmem:[#allocation5 + $0x498] sm:$0xff] }
 0x91a   :  { %3941 = vmatprep.subr.bf16.mxu0 %v3714_v48  ;;  %4064 = vmatprep.subr.bf16.mxu1 %v3716_v2  ;;  %v3779_v48 = vld [vmem:[#allocation5 + $0x4b8] sm:$0xff]  ;;  %v3781_v2 = vld [vmem:[#allocation5 + $0x4c8] sm:$0xff] }
 0x91b   :  { %3971 = vmatprep.mubr.bf16.mxu0 %v7165_v22  ;;  %4094 = vmatprep.mubr.bf16.mxu1 %v7165_v22 }
 0x91d   :  { %3942 = vmatpush1.bf16.msra.mxu0 %v3713_v49  ;;  %4065 = vmatpush1.bf16.msra.mxu1 %v3715_v3  ;;  %v3778_v49 = vld [vmem:[#allocation5 + $0x4b0] sm:$0xff]  ;;  %v3780_v3 = vld [vmem:[#allocation5 + $0x4c0] sm:$0xff] }
 0x91e   :  { %3943 = vmatprep.subr.bf16.mxu0 %v3719_v50  ;;  %4066 = vmatprep.subr.bf16.mxu1 %v3721_v51  ;;  %v3784_v50 = vld [vmem:[#allocation5 + $0x4e0] sm:$0xff]  ;;  %v3786_v51 = vld [vmem:[#allocation5 + $0x4f0] sm:$0xff] }
 0x921   :  { %3944 = vmatpush1.bf16.msra.mxu0 %v3718_v52  ;;  %4067 = vmatpush1.bf16.msra.mxu1 %v3720_v53  ;;  %v3783_v52 = vld [vmem:[#allocation5 + $0x4d8] sm:$0xff]  ;;  %v3785_v53 = vld [vmem:[#allocation5 + $0x4e8] sm:$0xff] }
 0x922   :  { %3945 = vmatprep.subr.bf16.mxu0 %v3724_v54  ;;  %4068 = vmatprep.subr.bf16.mxu1 %v3726_v13  ;;  %v3789_v54 = vld [vmem:[#allocation5 + $0x508] sm:$0xff]  ;;  %v3791_v13 = vld [vmem:[#allocation5 + $0x518] sm:$0xff] }
 0x925   :  { %3946 = vmatpush1.bf16.msra.mxu0 %v3723_v55  ;;  %4069 = vmatpush1.bf16.msra.mxu1 %v3725_v59  ;;  %v3788_v55 = vld [vmem:[#allocation5 + $0x500] sm:$0xff]  ;;  %v3790_v59 = vld [vmem:[#allocation5 + $0x510] sm:$0xff] }
 0x926   :  { %3947 = vmatprep.subr.bf16.mxu0 %v3729_v56  ;;  %4070 = vmatprep.subr.bf16.mxu1 %v3731_v57  ;;  %v3794_v56 = vld [vmem:[#allocation5 + $0x530] sm:$0xff]  ;;  %v3796_v57 = vld [vmem:[#allocation5 + $0x540] sm:$0xff] }
 0x929   :  { %3948 = vmatpush1.bf16.msra.mxu0 %v3728_v58  ;;  %4071 = vmatpush1.bf16.msra.mxu1 %v3730_v0  ;;  %v3793_v58 = vld [vmem:[#allocation5 + $0x528] sm:$0xff]  ;;  %v3795_v0 = vld [vmem:[#allocation5 + $0x538] sm:$0xff] }
 0x92a   :  { %3949 = vmatprep.subr.bf16.mxu0 %v3734_v17  ;;  %4072 = vmatprep.subr.bf16.mxu1 %v3736_v1  ;;  %v3799_v17 = vld [vmem:[#allocation5 + $0x558] sm:$0xff]  ;;  %v3801_v1 = vld [vmem:[#allocation5 + $0x568] sm:$0xff] }
 0x92d   :  { %3950 = vmatpush1.bf16.msra.mxu0 %v3733_v7  ;;  %4073 = vmatpush1.bf16.msra.mxu1 %v3735_v4  ;;  %v3798_v7 = vld [vmem:[#allocation5 + $0x550] sm:$0xff]  ;;  %v3800_v4 = vld [vmem:[#allocation5 + $0x560] sm:$0xff] }
 0x92e   :  { %3951 = vmatprep.subr.bf16.mxu0 %v3739_v16  ;;  %4074 = vmatprep.subr.bf16.mxu1 %v3741_v5  ;;  %v3804_v16 = vld [vmem:[#allocation5 + $0x580] sm:$0xff]  ;;  %v3806_v5 = vld [vmem:[#allocation5 + $0x590] sm:$0xff] }
 0x931   :  { %3952 = vmatpush1.bf16.msra.mxu0 %v3738_v15  ;;  %4075 = vmatpush1.bf16.msra.mxu1 %v3740_v9  ;;  %v3803_v15 = vld [vmem:[#allocation5 + $0x578] sm:$0xff]  ;;  %v3805_v9 = vld [vmem:[#allocation5 + $0x588] sm:$0xff] }
 0x932   :  { %3953 = vmatprep.subr.bf16.mxu0 %v3744_v60  ;;  %4076 = vmatprep.subr.bf16.mxu1 %v3746_v8  ;;  %v3809_v60 = vld [vmem:[#allocation5 + $0x5a8] sm:$0xff]  ;;  %v3811_v8 = vld [vmem:[#allocation5 + $0x5b8] sm:$0xff] }
 0x935   :  { %3954 = vmatpush1.bf16.msra.mxu0 %v3743_v10  ;;  %4077 = vmatpush1.bf16.msra.mxu1 %v3745_v19  ;;  %v3808_v10 = vld [vmem:[#allocation5 + $0x5a0] sm:$0xff]  ;;  %v3810_v19 = vld [vmem:[#allocation5 + $0x5b0] sm:$0xff] }
 0x936   :  { %3955 = vmatprep.subr.bf16.mxu0 %v3749_v21  ;;  %4078 = vmatprep.subr.bf16.mxu1 %v3751_v61  ;;  %v3814_v21 = vld [vmem:[#allocation5 + $0x5d0] sm:$0xff]  ;;  %v3816_v61 = vld [vmem:[#allocation5 + $0x5e0] sm:$0xff] }
 0x939   :  { %3956 = vmatpush1.bf16.msra.mxu0 %v3748_v27  ;;  %4079 = vmatpush1.bf16.msra.mxu1 %v3750_v28  ;;  %v3813_v27 = vld [vmem:[#allocation5 + $0x5c8] sm:$0xff]  ;;  %v3815_v28 = vld [vmem:[#allocation5 + $0x5d8] sm:$0xff] }
 0x93a   :  { %3957 = vmatprep.subr.bf16.mxu0 %v3754_v29  ;;  %4080 = vmatprep.subr.bf16.mxu1 %v3756_v30  ;;  %v3819_v29 = vld [vmem:[#allocation5 + $0x5f8] sm:$0xff]  ;;  %v3821_v30 = vld [vmem:[#allocation5 + $0x608] sm:$0xff] }
 0x93d   :  { %3958 = vmatpush1.bf16.msra.mxu0 %v3753_v31  ;;  %4081 = vmatpush1.bf16.msra.mxu1 %v3755_v32  ;;  %v3818_v31 = vld [vmem:[#allocation5 + $0x5f0] sm:$0xff]  ;;  %v3820_v32 = vld [vmem:[#allocation5 + $0x600] sm:$0xff] }
 0x93e   :  { %3959 = vmatprep.subr.bf16.mxu0 %v3759_v34  ;;  %4082 = vmatprep.subr.bf16.mxu1 %v3761_v42  ;;  %v3824_v34 = vld [vmem:[#allocation5 + $0x620] sm:$0xff]  ;;  %v3826_v42 = vld [vmem:[#allocation5 + $0x630] sm:$0xff] }
 0x941   :  { %3960 = vmatpush1.bf16.msra.mxu0 %v3758_v35  ;;  %4083 = vmatpush1.bf16.msra.mxu1 %v3760_v36  ;;  %v3823_v35 = vld [vmem:[#allocation5 + $0x618] sm:$0xff]  ;;  %v3825_v36 = vld [vmem:[#allocation5 + $0x628] sm:$0xff] }
 0x942   :  { %3961 = vmatprep.subr.bf16.mxu0 %v3764_v37  ;;  %4084 = vmatprep.subr.bf16.mxu1 %v3766_v12  ;;  %v3829_v37 = vld [vmem:[#allocation5 + $0x648] sm:$0xff]  ;;  %v3831_v12 = vld [vmem:[#allocation5 + $0x658] sm:$0xff] }
 0x945   :  { %3962 = vmatpush1.bf16.msra.mxu0 %v3763_v38  ;;  %4085 = vmatpush1.bf16.msra.mxu1 %v3765_v18  ;;  %v3828_v38 = vld [vmem:[#allocation5 + $0x640] sm:$0xff]  ;;  %v3830_v18 = vld [vmem:[#allocation5 + $0x650] sm:$0xff] }
 0x946   :  { %3963 = vmatprep.subr.bf16.mxu0 %v3769_v39  ;;  %4086 = vmatprep.subr.bf16.mxu1 %v3771_v43  ;;  %v3834_v39 = vld [vmem:[#allocation5 + $0x670] sm:$0xff]  ;;  %v3836_v43 = vld [vmem:[#allocation5 + $0x680] sm:$0xff] }
 0x949   :  { %3964 = vmatpush1.bf16.msra.mxu0 %v3768_v44  ;;  %4087 = vmatpush1.bf16.msra.mxu1 %v3770_v45  ;;  %v3833_v44 = vld [vmem:[#allocation5 + $0x668] sm:$0xff]  ;;  %v3835_v45 = vld [vmem:[#allocation5 + $0x678] sm:$0xff] }
 0x94a   :  { %3965 = vmatprep.subr.bf16.mxu0 %v3774_v14  ;;  %4088 = vmatprep.subr.bf16.mxu1 %v3776_v46  ;;  %v3839_v14 = vld [vmem:[#allocation5 + $0x698] sm:$0xff]  ;;  %v3841_v46 = vld [vmem:[#allocation5 + $0x6a8] sm:$0xff] }
 0x94d   :  { %3966 = vmatpush1.bf16.msra.mxu0 %v3773_v47  ;;  %4089 = vmatpush1.bf16.msra.mxu1 %v3775_v20  ;;  %v3838_v47 = vld [vmem:[#allocation5 + $0x690] sm:$0xff]  ;;  %v3840_v20 = vld [vmem:[#allocation5 + $0x6a0] sm:$0xff] }
 0x94e   :  { %3967 = vmatprep.subr.bf16.mxu0 %v3779_v48  ;;  %4090 = vmatprep.subr.bf16.mxu1 %v3781_v2  ;;  %v3844_v48 = vld [vmem:[#allocation5 + $0x6c0] sm:$0xff]  ;;  %v3846_v2 = vld [vmem:[#allocation5 + $0x6d0] sm:$0xff] }
 0x951   :  { %3968 = vmatpush1.bf16.msra.mxu0 %v3778_v49  ;;  %4091 = vmatpush1.bf16.msra.mxu1 %v3780_v3  ;;  %v3843_v49 = vld [vmem:[#allocation5 + $0x6b8] sm:$0xff]  ;;  %v3845_v3 = vld [vmem:[#allocation5 + $0x6c8] sm:$0xff] }
 0x952   :  { %3969 = vmatprep.subr.bf16.mxu0 %v3784_v50  ;;  %4092 = vmatprep.subr.bf16.mxu1 %v3786_v51  ;;  %v3849_v50 = vld [vmem:[#allocation5 + $0x6e8] sm:$0xff]  ;;  %v3851_v51 = vld [vmem:[#allocation5 + $0x6f8] sm:$0xff] }
 0x955   :  { %3970 = vmatpush1.bf16.msra.mxu0 %v3783_v52  ;;  %4093 = vmatpush1.bf16.msra.mxu1 %v3785_v53  ;;  %v3848_v52 = vld [vmem:[#allocation5 + $0x6e0] sm:$0xff]  ;;  %v3850_v53 = vld [vmem:[#allocation5 + $0x6f0] sm:$0xff] }
 0x956   :  { %3980 = vmatprep.subr.bf16.mxu0 %v3789_v54  ;;  %4103 = vmatprep.subr.bf16.mxu1 %v3791_v13  ;;  %v3854_v54 = vld [vmem:[#allocation5 + $0x710] sm:$0xff]  ;;  %v3856_v13 = vld [vmem:[#allocation5 + $0x720] sm:$0xff] }
 0x958   :  { %3972 = vmatmul.mubr.bf16.vlgmr.msra.gmra.mrb[20].mxu0 %v7163_v11  ;;  %4095 = vmatmul.mubr.bf16.vlgmr.msra.gmra.mrb[36].mxu1 %v7163_v11 }
 0x959   :  { %3981 = vmatpush1.bf16.msra.mxu0 %v3788_v55  ;;  %4104 = vmatpush1.bf16.msra.mxu1 %v3790_v59  ;;  %v3853_v55 = vld [vmem:[#allocation5 + $0x708] sm:$0xff]  ;;  %v3855_v59 = vld [vmem:[#allocation5 + $0x718] sm:$0xff] }
 0x95a   :  { %3982 = vmatprep.subr.bf16.mxu0 %v3794_v56  ;;  %4105 = vmatprep.subr.bf16.mxu1 %v3796_v57  ;;  %v3859_v56 = vld [vmem:[#allocation5 + $0x738] sm:$0xff]  ;;  %v3861_v57 = vld [vmem:[#allocation5 + $0x748] sm:$0xff] }
 0x95b   :  { %4012 = vmatprep.mubr.bf16.mxu0 %v7171_v33  ;;  %4135 = vmatprep.mubr.bf16.mxu1 %v7171_v33 }
 0x95d   :  { %3983 = vmatpush1.bf16.msra.mxu0 %v3793_v58  ;;  %4106 = vmatpush1.bf16.msra.mxu1 %v3795_v0  ;;  %v3858_v58 = vld [vmem:[#allocation5 + $0x730] sm:$0xff]  ;;  %v3860_v0 = vld [vmem:[#allocation5 + $0x740] sm:$0xff] }
 0x95e   :  { %3984 = vmatprep.subr.bf16.mxu0 %v3799_v17  ;;  %4107 = vmatprep.subr.bf16.mxu1 %v3801_v1  ;;  %v3864_v17 = vld [vmem:[#allocation5 + $0x760] sm:$0xff]  ;;  %v3866_v1 = vld [vmem:[#allocation5 + $0x770] sm:$0xff] }
 0x961   :  { %3985 = vmatpush1.bf16.msra.mxu0 %v3798_v7  ;;  %4108 = vmatpush1.bf16.msra.mxu1 %v3800_v4  ;;  %v3863_v7 = vld [vmem:[#allocation5 + $0x758] sm:$0xff]  ;;  %v3865_v4 = vld [vmem:[#allocation5 + $0x768] sm:$0xff] }
 0x962   :  { %3986 = vmatprep.subr.bf16.mxu0 %v3804_v16  ;;  %4109 = vmatprep.subr.bf16.mxu1 %v3806_v5  ;;  %v3672_v16 = vld [vmem:[#allocation5 + $0x160] sm:$0xff] }
 0x963   :  { %v3632_v5 = vld [vmem:[#allocation5 + $0x20] sm:$0xff] }
 0x965   :  { %3987 = vmatpush1.bf16.msra.mxu0 %v3803_v15  ;;  %4110 = vmatpush1.bf16.msra.mxu1 %v3805_v9  ;;  %v3677_v15 = vld [vmem:[#allocation5 + $0x188] sm:$0xff] }
 0x966   :  { %3988 = vmatprep.subr.bf16.mxu0 %v3809_v60  ;;  %4111 = vmatprep.subr.bf16.mxu1 %v3811_v8  ;;  %v3637_v9 = vld [vmem:[#allocation5 + $0x48] sm:$0xff]  ;;  %v3682_v60 = vld [vmem:[#allocation5 + $0x1b0] sm:$0xff] }
 0x967   :  { %v3642_v8 = vld [vmem:[#allocation5 + $0x70] sm:$0xff] }
 0x969   :  { %3989 = vmatpush1.bf16.msra.mxu0 %v3808_v10  ;;  %4112 = vmatpush1.bf16.msra.mxu1 %v3810_v19  ;;  %v3687_v10 = vld [vmem:[#allocation5 + $0x1d8] sm:$0xff] }
 0x96a   :  { %3990 = vmatprep.subr.bf16.mxu0 %v3814_v21  ;;  %4113 = vmatprep.subr.bf16.mxu1 %v3816_v61  ;;  %v3647_v19 = vld [vmem:[#allocation5 + $0x98] sm:$0xff]  ;;  %v3692_v21 = vld [vmem:[#allocation5 + $0x200] sm:$0xff] }
 0x96b   :  { %v3652_v61 = vld [vmem:[#allocation5 + $0xc0] sm:$0xff] }
 0x96d   :  { %3991 = vmatpush1.bf16.msra.mxu0 %v3813_v27  ;;  %4114 = vmatpush1.bf16.msra.mxu1 %v3815_v28  ;;  %v3697_v27 = vld [vmem:[#allocation5 + $0x228] sm:$0xff] }
 0x96e   :  { %3992 = vmatprep.subr.bf16.mxu0 %v3819_v29  ;;  %4115 = vmatprep.subr.bf16.mxu1 %v3821_v30  ;;  %v3657_v28 = vld [vmem:[#allocation5 + $0xe8] sm:$0xff]  ;;  %v3702_v29 = vld [vmem:[#allocation5 + $0x250] sm:$0xff]  ;;  %v3707_v30 = vld [vmem:[#allocation5 + $0x278] sm:$0xff] }
 0x971   :  { %3993 = vmatpush1.bf16.msra.mxu0 %v3818_v31  ;;  %4116 = vmatpush1.bf16.msra.mxu1 %v3820_v32  ;;  %v3667_v31 = vld [vmem:[#allocation5 + $0x138] sm:$0xff]  ;;  %v3752_v32 = vld [vmem:[#allocation5 + $0x3e0] sm:$0xff] }
 0x972   :  { %3994 = vmatprep.subr.bf16.mxu0 %v3824_v34  ;;  %4117 = vmatprep.subr.bf16.mxu1 %v3826_v42  ;;  %v3712_v34 = vld [vmem:[#allocation5 + $0x2a0] sm:$0xff]  ;;  %v3757_v42 = vld [vmem:[#allocation5 + $0x408] sm:$0xff] }
 0x975   :  { %3995 = vmatpush1.bf16.msra.mxu0 %v3823_v35  ;;  %4118 = vmatpush1.bf16.msra.mxu1 %v3825_v36  ;;  %v3717_v35 = vld [vmem:[#allocation5 + $0x2c8] sm:$0xff]  ;;  %v3762_v36 = vld [vmem:[#allocation5 + $0x430] sm:$0xff] }
 0x976   :  { %3996 = vmatprep.subr.bf16.mxu0 %v3829_v37  ;;  %4119 = vmatprep.subr.bf16.mxu1 %v3831_v12  ;;  %v3722_v37 = vld [vmem:[#allocation5 + $0x2f0] sm:$0xff]  ;;  %v3767_v12 = vld [vmem:[#allocation5 + $0x458] sm:$0xff] }
 0x979   :  { %3997 = vmatpush1.bf16.msra.mxu0 %v3828_v38  ;;  %4120 = vmatpush1.bf16.msra.mxu1 %v3830_v18  ;;  %v3727_v38 = vld [vmem:[#allocation5 + $0x318] sm:$0xff]  ;;  %v3772_v18 = vld [vmem:[#allocation5 + $0x480] sm:$0xff] }
 0x97a   :  { %3998 = vmatprep.subr.bf16.mxu0 %v3834_v39  ;;  %4121 = vmatprep.subr.bf16.mxu1 %v3836_v43  ;;  %v3732_v39 = vld [vmem:[#allocation5 + $0x340] sm:$0xff]  ;;  %v3777_v43 = vld [vmem:[#allocation5 + $0x4a8] sm:$0xff] }
 0x97d   :  { %3999 = vmatpush1.bf16.msra.mxu0 %v3833_v44  ;;  %4122 = vmatpush1.bf16.msra.mxu1 %v3835_v45  ;;  %v3782_v44 = vld [vmem:[#allocation5 + $0x4d0] sm:$0xff]  ;;  %v3787_v45 = vld [vmem:[#allocation5 + $0x4f8] sm:$0xff] }
 0x97e   :  { %4000 = vmatprep.subr.bf16.mxu0 %v3839_v14  ;;  %4123 = vmatprep.subr.bf16.mxu1 %v3841_v46  ;;  %v3747_v14 = vld [vmem:[#allocation5 + $0x3b8] sm:$0xff]  ;;  %v3832_v46 = vld [vmem:[#allocation5 + $0x660] sm:$0xff] }
 0x981   :  { %4001 = vmatpush1.bf16.msra.mxu0 %v3838_v47  ;;  %4124 = vmatpush1.bf16.msra.mxu1 %v3840_v20  ;;  %v3792_v47 = vld [vmem:[#allocation5 + $0x520] sm:$0xff]  ;;  %v3837_v20 = vld [vmem:[#allocation5 + $0x688] sm:$0xff] }
 0x982   :  { %4002 = vmatprep.subr.bf16.mxu0 %v3844_v48  ;;  %4125 = vmatprep.subr.bf16.mxu1 %v3846_v2  ;;  %v3797_v48 = vld [vmem:[#allocation5 + $0x548] sm:$0xff]  ;;  %v3842_v2 = vld [vmem:[#allocation5 + $0x6b0] sm:$0xff] }
 0x985   :  { %4003 = vmatpush1.bf16.msra.mxu0 %v3843_v49  ;;  %4126 = vmatpush1.bf16.msra.mxu1 %v3845_v3  ;;  %v3802_v49 = vld [vmem:[#allocation5 + $0x570] sm:$0xff]  ;;  %v3847_v3 = vld [vmem:[#allocation5 + $0x6d8] sm:$0xff] }
 0x986   :  { %4004 = vmatprep.subr.bf16.mxu0 %v3849_v50  ;;  %4127 = vmatprep.subr.bf16.mxu1 %v3851_v51  ;;  %v3807_v50 = vld [vmem:[#allocation5 + $0x598] sm:$0xff]  ;;  %v3852_v51 = vld [vmem:[#allocation5 + $0x700] sm:$0xff] }
 0x989   :  { %4005 = vmatpush1.bf16.msra.mxu0 %v3848_v52  ;;  %4128 = vmatpush1.bf16.msra.mxu1 %v3850_v53  ;;  %v3812_v52 = vld [vmem:[#allocation5 + $0x5c0] sm:$0xff]  ;;  %v3857_v53 = vld [vmem:[#allocation5 + $0x728] sm:$0xff] }
 0x98a   :  { %4006 = vmatprep.subr.bf16.mxu0 %v3854_v54  ;;  %4129 = vmatprep.subr.bf16.mxu1 %v3856_v13  ;;  %v3862_v54 = vld [vmem:[#allocation5 + $0x750] sm:$0xff]  ;;  %v3867_v13 = vld [vmem:[#allocation5 + $0x778] sm:$0xff] }
 0x98d   :  { %4007 = vmatpush1.bf16.msra.mxu0 %v3853_v55  ;;  %4130 = vmatpush1.bf16.msra.mxu1 %v3855_v59  ;;  %v3827_v55 = vld [vmem:[#allocation5 + $0x638] sm:$0xff] }
 0x98e   :  { %4008 = vmatprep.subr.bf16.mxu0 %v3859_v56  ;;  %4131 = vmatprep.subr.bf16.mxu1 %v3861_v57  ;;  %v3869_v59 = vld [vmem:[#allocation13 + $0x3] ss:$8 sm:$0xf] }
 0x98f   :  { %v3870_v56 = vld [vmem:[#allocation13 + $0x3] ss:$8 sm:$0x10] }
 0x990   :  { %v3871_v57 = vor.u32 %v3870_v56, %v3869_v59 }
 0x991   :  { %4009 = vmatpush1.bf16.msra.mxu0 %v3858_v58  ;;  %4132 = vmatpush1.bf16.msra.mxu1 %v3860_v0 }
 0x992   :  { %4010 = vmatprep.subr.bf16.mxu0 %v3864_v17  ;;  %4133 = vmatprep.subr.bf16.mxu1 %v3866_v1  ;;  %v3876_v58 = vrot.slane %v3871_v57, %v7015_v23  ;;  %v3884_v0 = vrot.slane %v3871_v57, %v7018_v24  ;;  %v3880_v17 = vrot.slane %v3871_v57, %v7021_v25 }
 0x993   :  { %v3888_v1 = vrot.slane %v3871_v57, %v7024_v26 }
 0x995   :  { %4011 = vmatpush1.bf16.msra.mxu0 %v3863_v7  ;;  %4134 = vmatpush1.bf16.msra.mxu1 %v3865_v4 }
 0x996   :  { %6045 = vmatprep.subr.bf16.mxu0 %v3672_v16 }
 0x998   :  { %4013 = vmatmul.mubr.bf16.vlgmr.msra.gmra.mrb[20].mxu0 %v7169_v62  ;;  %4136 = vmatmul.mubr.bf16.vlgmr.msra.gmra.mrb[36].mxu1 %v7169_v62 }
 0x999   :  { %6046 = vmatpush3.bf16.msra.mxu0 %v3632_v5  ;;  %4176 = vmatprep.mubr.bf16.mxu0 %v7158_v6  ;;  %v3662_v6 = vld [vmem:[#allocation5 + $0x110] sm:$0xff] }
 0x99a   :  { %6047 = vmatprep.subr.bf16.mxu0 %v3677_v15 }
 0x99d   :  { %6048 = vmatpush3.bf16.msra.mxu0 %v3637_v9 }
 0x99e   :  { %6049 = vmatprep.subr.bf16.mxu0 %v3682_v60 }
 0x9a1   :  { %6050 = vmatpush3.bf16.msra.mxu0 %v3642_v8 }
 0x9a2   :  { %6051 = vmatprep.subr.bf16.mxu0 %v3687_v10 }
 0x9a5   :  { %6052 = vmatpush3.bf16.msra.mxu0 %v3647_v19 }
 0x9a6   :  { %6053 = vmatprep.subr.bf16.mxu0 %v3692_v21 }
 0x9a9   :  { %6054 = vmatpush3.bf16.msra.mxu0 %v3652_v61 }
 0x9aa   :  { %6055 = vmatprep.subr.bf16.mxu0 %v3697_v27 }
 0x9ad   :  { %6056 = vmatpush3.bf16.msra.mxu0 %v3657_v28 }
 0x9ae   :  { %6057 = vmatprep.subr.bf16.mxu0 %v3702_v29 }
 0x9b1   :  { %6058 = vmatpush3.bf16.msra.mxu0 %v3662_v6 }
 0x9b2   :  { %6059 = vmatprep.subr.bf16.mxu0 %v3707_v30 }
 0x9b5   :  { %6060 = vmatpush3.bf16.msra.mxu0 %v3667_v31 }
 0x9b6   :  { %6067 = vmatprep.subr.bf16.mxu0 %v3752_v32 }
 0x9b8   :  { %4177 = vmatmul.mubr.bf16.vlgmr.msra.gmra.mrb[24].mxu0 %v7156_v63  ;;  %v3737_v63 = vld [vmem:[#allocation5 + $0x368] sm:$0xff] }
 0x9b9   :  { %6068 = vmatpush3.bf16.msra.mxu0 %v3712_v34  ;;  %4216 = vmatprep.mubr.bf16.mxu0 %v7165_v22  ;;  %v3742_v22 = vld [vmem:[#allocation5 + $0x390] sm:$0xff] }
 0x9ba   :  { %6069 = vmatprep.subr.bf16.mxu0 %v3757_v42 }
 0x9bd   :  { %6070 = vmatpush3.bf16.msra.mxu0 %v3717_v35 }
 0x9be   :  { %6071 = vmatprep.subr.bf16.mxu0 %v3762_v36 }
 0x9c1   :  { %6072 = vmatpush3.bf16.msra.mxu0 %v3722_v37 }
 0x9c2   :  { %6073 = vmatprep.subr.bf16.mxu0 %v3767_v12  ;;  %v3892_v12 = vrot.slane %v3871_v57, %v7045_v40 }
 0x9c5   :  { %6074 = vmatpush3.bf16.msra.mxu0 %v3727_v38 }
 0x9c6   :  { %6075 = vmatprep.subr.bf16.mxu0 %v3772_v18 }
 0x9c9   :  { %6076 = vmatpush3.bf16.msra.mxu0 %v3732_v39 }
 0x9ca   :  { %6077 = vmatprep.subr.bf16.mxu0 %v3777_v43 }
 0x9cd   :  { %6078 = vmatpush3.bf16.msra.mxu0 %v3737_v63 }
 0x9ce   :  { %6079 = vmatprep.subr.bf16.mxu0 %v3782_v44 }
 0x9d1   :  { %6080 = vmatpush3.bf16.msra.mxu0 %v3742_v22 }
 0x9d2   :  { %6081 = vmatprep.subr.bf16.mxu0 %v3787_v45 }
 0x9d5   :  { %6082 = vmatpush3.bf16.msra.mxu0 %v3747_v14 }
 0x9d6   :  { %6089 = vmatprep.subr.bf16.mxu0 %v3832_v46 }
 0x9d8   :  { %4217 = vmatmul.mubr.bf16.vlgmr.msra.gmra.mrb[28].mxu0 %v7163_v11  ;;  %v3817_v11 = vld [vmem:[#allocation5 + $0x5e8] sm:$0xff] }
 0x9d9   :  { %6090 = vmatpush3.bf16.msra.mxu0 %v3792_v47  ;;  %4256 = vmatprep.mubr.bf16.mxu0 %v7171_v33  ;;  %v3822_v33 = vld [vmem:[#allocation5 + $0x610] sm:$0xff] }
 0x9da   :  { %6091 = vmatprep.subr.bf16.mxu0 %v3837_v20 }
 0x9dd   :  { %6092 = vmatpush3.bf16.msra.mxu0 %v3797_v48 }
 0x9de   :  { %6093 = vmatprep.subr.bf16.mxu0 %v3842_v2 }
 0x9e1   :  { %6094 = vmatpush3.bf16.msra.mxu0 %v3802_v49 }
 0x9e2   :  { %6095 = vmatprep.subr.bf16.mxu0 %v3847_v3 }
 0x9e5   :  { %6096 = vmatpush3.bf16.msra.mxu0 %v3807_v50 }
 0x9e6   :  { %6097 = vmatprep.subr.bf16.mxu0 %v3852_v51 }
 0x9e9   :  { %6098 = vmatpush3.bf16.msra.mxu0 %v3812_v52 }
 0x9ea   :  { %6099 = vmatprep.subr.bf16.mxu0 %v3857_v53 }
 0x9ed   :  { %6100 = vmatpush3.bf16.msra.mxu0 %v3817_v11 }
 0x9ee   :  { %6101 = vmatprep.subr.bf16.mxu0 %v3862_v54 }
 0x9f1   :  { %6102 = vmatpush3.bf16.msra.mxu0 %v3822_v33 }
 0x9f2   :  { %6103 = vmatprep.subr.bf16.mxu0 %v3867_v13 }
 0x9f5   :  { %6104 = vmatpush3.bf16.msra.mxu0 %v3827_v55 }
 0x9f8   :  { %4257 = vmatmul.mubr.bf16.vlgmr.msra.gmra.mrb[32].mxu0 %v7169_v62 }
 0xa6b   :  { %v4014_v7 = vpop.f32.mrb[20].mxu0  ;;  %v4137_v4 = vpop.f32.mrb[36].mxu1 }
 0xa6c   :  { %v6371_v16 = vadd.f32 %v4014_v7, %v3876_v58  ;;  %v6373_v5 = vadd.f32 %v4137_v4, %v3884_v0  ;;  %v4016_v15 = vpop.f32.mrb[21].mxu0  ;;  %v4139_v9 = vpop.f32.mrb[37].mxu1 }
 0xa6d   :  { %v6372_v60 = vadd.f32 %v4016_v15, %v3880_v17  ;;  %v6374_v8 = vadd.f32 %v4139_v9, %v3888_v1  ;;  %v4018_v62 = vpop.f32.mrb[22].mxu0  ;;  %v4141_v10 = vpop.f32.mrb[38].mxu1 }
 0xa6e   :  { %v4264_v19 = vmax.f32 %v6371_v16, 0.0  ;;  %v4266_v21 = vmax.f32 %v6373_v5, 0.0  ;;  %v4019_v61 = vpop.f32.mrb[23].mxu0  ;;  %v4142_v27 = vpop.f32.mrb[39].mxu1 }
 0xa6f   :  { %v4265_v28 = vmax.f32 %v6372_v60, 0.0  ;;  %v4267_v29 = vmax.f32 %v6374_v8, 0.0 }
 0xa70   :  { %v7195_v6 = vpack.c.bf16 %v4264_v19, %v4264_v19  ;;  %v7197_v30 = vpack.c.bf16 %v4266_v21, %v4266_v21 }
 0xa71   :  { %v4270_v31 = vpack.c.bf16 %v4265_v28, %v4265_v28  ;;  %v7199_v32 = vpack.c.bf16 %v4267_v29, %v4267_v29 }
 0xa8b   :  { %v6061_v34 = vpop.f32.mrb[24].mxu0 }
 0xa8c   :  { %v6062_v42 = vpop.f32.mrb[25].mxu0 }
 0xa8d   :  { %v6063_v35 = vadd.f32 %v6062_v42, %v6061_v34  ;;  %v6064_v36 = vpop.f32.mrb[26].mxu0 }
 0xa8e   :  { %v6065_v37 = vpop.f32.mrb[27].mxu0 }
 0xa8f   :  { %v4179_v39 = vadd.f32 %v6063_v35, %v3892_v12 }
 0xaab   :  { %v6083_v38 = vpop.f32.mrb[28].mxu0 }
 0xaac   :  { %v6084_v18 = vpop.f32.mrb[29].mxu0 }
 0xaad   :  { %v6085_v43 = vadd.f32 %v6084_v18, %v6083_v38  ;;  %v6086_v63 = vpop.f32.mrb[30].mxu0 }
 0xaae   :  { %v6087_v44 = vpop.f32.mrb[31].mxu0 }
 0xaaf   :  { %v4219_v22 = vadd.f32 %v6085_v43, %v4179_v39 }
 0xacb   :  { %v6105_v45 = vpop.f32.mrb[32].mxu0 }
 0xacc   :  { %v6106_v14 = vpop.f32.mrb[33].mxu0 }
 0xacd   :  { %v6107_v46 = vadd.f32 %v6106_v14, %v6105_v45  ;;  %v6108_v47 = vpop.f32.mrb[34].mxu0 }
 0xace   :  { %v6109_v20 = vpop.f32.mrb[35].mxu0 }
 0xacf   :  { %v4259_v48 = vadd.f32 %v6107_v46, %v4219_v22 }
 0xad1   :  { %v4268_v2 = vmax.f32 %v4259_v48, 0.0 }
 0xad3   :  { %v7202_v49 = vpack.c.bf16 %v4268_v2, %v4268_v2 }
 0xad4   :  { %6680 = dma.done.wait [#allocation12 + $0x4], 20480 }
 0xad5   :  { %6681 = vsyncadd [#allocation12 + $0x4], 4294946816  ;;  %4493 = vmatprep.mubr.bf16.mxu0 %v4270_v31  ;;  %4616 = vmatprep.mubr.bf16.mxu1 %v4270_v31  ;;  %v4279_v40 = vld [vmem:[#allocation6 + $0x8] sm:$0xff]  ;;  %v4281_v3 = vld [vmem:[#allocation6 + $0x18] sm:$0xff] }
 0xad6   :  { %v4278_v50 = vld [vmem:[#allocation6] sm:$0xff]  ;;  %4461 = vmatprep.subr.bf16.mxu0 %v4279_v40  ;;  %4584 = vmatprep.subr.bf16.mxu1 %v4281_v3  ;;  %v4280_v51 = vld [vmem:[#allocation6 + $0x10] sm:$0xff]  ;;  %v4283_v52 = vld [vmem:[#allocation6 + $0x28] sm:$0xff] }
 0xad7   :  { %v4285_v53 = vld [vmem:[#allocation6 + $0x38] sm:$0xff]  ;;  %4462 = vmatpush1.bf16.msra.mxu0 %v4278_v50  ;;  %4585 = vmatpush1.bf16.msra.mxu1 %v4280_v51  ;;  %v4282_v11 = vld [vmem:[#allocation6 + $0x20] sm:$0xff]  ;;  %v4284_v54 = vld [vmem:[#allocation6 + $0x30] sm:$0xff] }
 0xad8   :  { %4463 = vmatprep.subr.bf16.mxu0 %v4283_v52  ;;  %4586 = vmatprep.subr.bf16.mxu1 %v4285_v53  ;;  %v4287_v33 = vld [vmem:[#allocation6 + $0x48] sm:$0xff]  ;;  %v4289_v13 = vld [vmem:[#allocation6 + $0x58] sm:$0xff]  ;;  %v4286_v55 = vld [vmem:[#allocation6 + $0x40] sm:$0xff] }
 0xad9   :  { %v4288_v59 = vld [vmem:[#allocation6 + $0x50] sm:$0xff]  ;;  %v4291_v56 = vld [vmem:[#allocation6 + $0x68] sm:$0xff]  ;;  %v4293_v57 = vld [vmem:[#allocation6 + $0x78] sm:$0xff] }
 0xada   :  { %v4290_v58 = vld [vmem:[#allocation6 + $0x60] sm:$0xff]  ;;  %v4292_v0 = vld [vmem:[#allocation6 + $0x70] sm:$0xff]  ;;  %v4295_v17 = vld [vmem:[#allocation6 + $0x88] sm:$0xff] }
 0xadb   :  { %4464 = vmatpush1.bf16.msra.mxu0 %v4282_v11  ;;  %4587 = vmatpush1.bf16.msra.mxu1 %v4284_v54  ;;  %v4297_v1 = vld [vmem:[#allocation6 + $0x98] sm:$0xff]  ;;  %v4294_v7 = vld [vmem:[#allocation6 + $0x80] sm:$0xff]  ;;  %v4296_v4 = vld [vmem:[#allocation6 + $0x90] sm:$0xff] }
 0xadc   :  { %4465 = vmatprep.subr.bf16.mxu0 %v4287_v33  ;;  %4588 = vmatprep.subr.bf16.mxu1 %v4289_v13  ;;  %v4299_v16 = vld [vmem:[#allocation6 + $0xa8] sm:$0xff]  ;;  %v4301_v5 = vld [vmem:[#allocation6 + $0xb8] sm:$0xff]  ;;  %v4298_v15 = vld [vmem:[#allocation6 + $0xa0] sm:$0xff] }
 0xadd   :  { %v4300_v9 = vld [vmem:[#allocation6 + $0xb0] sm:$0xff]  ;;  %v4303_v60 = vld [vmem:[#allocation6 + $0xc8] sm:$0xff]  ;;  %v4305_v8 = vld [vmem:[#allocation6 + $0xd8] sm:$0xff] }
 0xade   :  { %v4302_v62 = vld [vmem:[#allocation6 + $0xc0] sm:$0xff]  ;;  %v4304_v10 = vld [vmem:[#allocation6 + $0xd0] sm:$0xff]  ;;  %v4307_v19 = vld [vmem:[#allocation6 + $0xe8] sm:$0xff] }
 0xadf   :  { %4466 = vmatpush1.bf16.msra.mxu0 %v4286_v55  ;;  %4589 = vmatpush1.bf16.msra.mxu1 %v4288_v59  ;;  %v4309_v21 = vld [vmem:[#allocation6 + $0xf8] sm:$0xff]  ;;  %v4306_v61 = vld [vmem:[#allocation6 + $0xe0] sm:$0xff]  ;;  %v4308_v27 = vld [vmem:[#allocation6 + $0xf0] sm:$0xff] }
 0xae0   :  { %4467 = vmatprep.subr.bf16.mxu0 %v4291_v56  ;;  %4590 = vmatprep.subr.bf16.mxu1 %v4293_v57  ;;  %v4311_v28 = vld [vmem:[#allocation6 + $0x108] sm:$0xff]  ;;  %v4313_v29 = vld [vmem:[#allocation6 + $0x118] sm:$0xff]  ;;  %v4310_v31 = vld [vmem:[#allocation6 + $0x100] sm:$0xff] }
 0xae1   :  { %v4312_v34 = vld [vmem:[#allocation6 + $0x110] sm:$0xff]  ;;  %v4315_v42 = vld [vmem:[#allocation6 + $0x128] sm:$0xff]  ;;  %v4317_v35 = vld [vmem:[#allocation6 + $0x138] sm:$0xff] }
 0xae2   :  { %v4314_v36 = vld [vmem:[#allocation6 + $0x120] sm:$0xff]  ;;  %v4316_v37 = vld [vmem:[#allocation6 + $0x130] sm:$0xff]  ;;  %v4319_v12 = vld [vmem:[#allocation6 + $0x148] sm:$0xff] }
 0xae3   :  { %4468 = vmatpush1.bf16.msra.mxu0 %v4290_v58  ;;  %4591 = vmatpush1.bf16.msra.mxu1 %v4292_v0  ;;  %v4321_v38 = vld [vmem:[#allocation6 + $0x158] sm:$0xff]  ;;  %v4318_v18 = vld [vmem:[#allocation6 + $0x140] sm:$0xff]  ;;  %v4320_v39 = vld [vmem:[#allocation6 + $0x150] sm:$0xff] }
 0xae4   :  { %4469 = vmatprep.subr.bf16.mxu0 %v4295_v17  ;;  %4592 = vmatprep.subr.bf16.mxu1 %v4297_v1  ;;  %v4323_v43 = vld [vmem:[#allocation6 + $0x168] sm:$0xff]  ;;  %v4325_v63 = vld [vmem:[#allocation6 + $0x178] sm:$0xff]  ;;  %v4322_v44 = vld [vmem:[#allocation6 + $0x160] sm:$0xff] }
 0xae5   :  { %v4324_v22 = vld [vmem:[#allocation6 + $0x170] sm:$0xff]  ;;  %v4327_v45 = vld [vmem:[#allocation6 + $0x188] sm:$0xff]  ;;  %v4329_v14 = vld [vmem:[#allocation6 + $0x198] sm:$0xff] }
 0xae6   :  { %v4326_v46 = vld [vmem:[#allocation6 + $0x180] sm:$0xff]  ;;  %v4328_v47 = vld [vmem:[#allocation6 + $0x190] sm:$0xff]  ;;  %v4331_v20 = vld [vmem:[#allocation6 + $0x1a8] sm:$0xff] }
 0xae7   :  { %4470 = vmatpush1.bf16.msra.mxu0 %v4294_v7  ;;  %4593 = vmatpush1.bf16.msra.mxu1 %v4296_v4  ;;  %v4333_v48 = vld [vmem:[#allocation6 + $0x1b8] sm:$0xff]  ;;  %v4330_v2 = vld [vmem:[#allocation6 + $0x1a0] sm:$0xff]  ;;  %v4332_v40 = vld [vmem:[#allocation6 + $0x1b0] sm:$0xff] }
 0xae8   :  { %4471 = vmatprep.subr.bf16.mxu0 %v4299_v16  ;;  %4594 = vmatprep.subr.bf16.mxu1 %v4301_v5  ;;  %v4335_v3 = vld [vmem:[#allocation6 + $0x1c8] sm:$0xff]  ;;  %v4337_v50 = vld [vmem:[#allocation6 + $0x1d8] sm:$0xff]  ;;  %v4334_v51 = vld [vmem:[#allocation6 + $0x1c0] sm:$0xff] }
 0xae9   :  { %v4336_v52 = vld [vmem:[#allocation6 + $0x1d0] sm:$0xff]  ;;  %v4339_v53 = vld [vmem:[#allocation6 + $0x1e8] sm:$0xff]  ;;  %v4341_v11 = vld [vmem:[#allocation6 + $0x1f8] sm:$0xff] }
 0xaea   :  { %v4338_v54 = vld [vmem:[#allocation6 + $0x1e0] sm:$0xff]  ;;  %v4340_v33 = vld [vmem:[#allocation6 + $0x1f0] sm:$0xff]  ;;  %v4343_v13 = vld [vmem:[#allocation6 + $0x208] sm:$0xff] }
 0xaeb   :  { %4472 = vmatpush1.bf16.msra.mxu0 %v4298_v15  ;;  %4595 = vmatpush1.bf16.msra.mxu1 %v4300_v9  ;;  %v4345_v55 = vld [vmem:[#allocation6 + $0x218] sm:$0xff]  ;;  %v4342_v59 = vld [vmem:[#allocation6 + $0x200] sm:$0xff]  ;;  %v4344_v56 = vld [vmem:[#allocation6 + $0x210] sm:$0xff] }
 0xaec   :  { %4473 = vmatprep.subr.bf16.mxu0 %v4303_v60  ;;  %4596 = vmatprep.subr.bf16.mxu1 %v4305_v8  ;;  %v4347_v57 = vld [vmem:[#allocation6 + $0x228] sm:$0xff]  ;;  %v4349_v58 = vld [vmem:[#allocation6 + $0x238] sm:$0xff]  ;;  %v4346_v0 = vld [vmem:[#allocation6 + $0x220] sm:$0xff] }
 0xaed   :  { %v4348_v17 = vld [vmem:[#allocation6 + $0x230] sm:$0xff]  ;;  %v4351_v1 = vld [vmem:[#allocation6 + $0x248] sm:$0xff]  ;;  %v4353_v7 = vld [vmem:[#allocation6 + $0x258] sm:$0xff] }
 0xaee   :  { %v4350_v4 = vld [vmem:[#allocation6 + $0x240] sm:$0xff]  ;;  %v4352_v16 = vld [vmem:[#allocation6 + $0x250] sm:$0xff]  ;;  %v4355_v5 = vld [vmem:[#allocation6 + $0x268] sm:$0xff] }
 0xaef   :  { %4474 = vmatpush1.bf16.msra.mxu0 %v4302_v62  ;;  %4597 = vmatpush1.bf16.msra.mxu1 %v4304_v10  ;;  %v4354_v15 = vld [vmem:[#allocation6 + $0x260] sm:$0xff]  ;;  %v4356_v9 = vld [vmem:[#allocation6 + $0x270] sm:$0xff]  ;;  %v4359_v60 = vld [vmem:[#allocation6 + $0x288] sm:$0xff] }
 0xaf0   :  { %4475 = vmatprep.subr.bf16.mxu0 %v4307_v19  ;;  %4598 = vmatprep.subr.bf16.mxu1 %v4309_v21  ;;  %v4361_v8 = vld [vmem:[#allocation6 + $0x298] sm:$0xff]  ;;  %v4360_v62 = vld [vmem:[#allocation6 + $0x290] sm:$0xff]  ;;  %v4363_v10 = vld [vmem:[#allocation6 + $0x2a8] sm:$0xff] }
 0xaf1   :  { %v4365_v19 = vld [vmem:[#allocation6 + $0x2b8] sm:$0xff]  ;;  %v4362_v21 = vld [vmem:[#allocation6 + $0x2a0] sm:$0xff] }
 0xaf3   :  { %4476 = vmatpush1.bf16.msra.mxu0 %v4306_v61  ;;  %4599 = vmatpush1.bf16.msra.mxu1 %v4308_v27  ;;  %v4364_v61 = vld [vmem:[#allocation6 + $0x2b0] sm:$0xff]  ;;  %v4367_v27 = vld [vmem:[#allocation6 + $0x2c8] sm:$0xff] }
 0xaf4   :  { %4477 = vmatprep.subr.bf16.mxu0 %v4311_v28  ;;  %4600 = vmatprep.subr.bf16.mxu1 %v4313_v29  ;;  %v4369_v28 = vld [vmem:[#allocation6 + $0x2d8] sm:$0xff]  ;;  %v4366_v29 = vld [vmem:[#allocation6 + $0x2c0] sm:$0xff] }
 0xaf7   :  { %4478 = vmatpush1.bf16.msra.mxu0 %v4310_v31  ;;  %4601 = vmatpush1.bf16.msra.mxu1 %v4312_v34  ;;  %v4368_v31 = vld [vmem:[#allocation6 + $0x2d0] sm:$0xff]  ;;  %v4371_v34 = vld [vmem:[#allocation6 + $0x2e8] sm:$0xff] }
 0xaf8   :  { %4479 = vmatprep.subr.bf16.mxu0 %v4315_v42  ;;  %4602 = vmatprep.subr.bf16.mxu1 %v4317_v35  ;;  %v4373_v42 = vld [vmem:[#allocation6 + $0x2f8] sm:$0xff]  ;;  %v4370_v35 = vld [vmem:[#allocation6 + $0x2e0] sm:$0xff] }
 0xafb   :  { %4480 = vmatpush1.bf16.msra.mxu0 %v4314_v36  ;;  %4603 = vmatpush1.bf16.msra.mxu1 %v4316_v37  ;;  %v4372_v36 = vld [vmem:[#allocation6 + $0x2f0] sm:$0xff]  ;;  %v4375_v37 = vld [vmem:[#allocation6 + $0x308] sm:$0xff] }
 0xafc   :  { %4481 = vmatprep.subr.bf16.mxu0 %v4319_v12  ;;  %4604 = vmatprep.subr.bf16.mxu1 %v4321_v38  ;;  %v4377_v12 = vld [vmem:[#allocation6 + $0x318] sm:$0xff]  ;;  %v4374_v38 = vld [vmem:[#allocation6 + $0x300] sm:$0xff] }
 0xaff   :  { %4482 = vmatpush1.bf16.msra.mxu0 %v4318_v18  ;;  %4605 = vmatpush1.bf16.msra.mxu1 %v4320_v39  ;;  %v4376_v18 = vld [vmem:[#allocation6 + $0x310] sm:$0xff]  ;;  %v4379_v39 = vld [vmem:[#allocation6 + $0x328] sm:$0xff] }
 0xb00   :  { %4483 = vmatprep.subr.bf16.mxu0 %v4323_v43  ;;  %4606 = vmatprep.subr.bf16.mxu1 %v4325_v63  ;;  %v4381_v43 = vld [vmem:[#allocation6 + $0x338] sm:$0xff]  ;;  %v4378_v63 = vld [vmem:[#allocation6 + $0x320] sm:$0xff] }
 0xb03   :  { %4484 = vmatpush1.bf16.msra.mxu0 %v4322_v44  ;;  %4607 = vmatpush1.bf16.msra.mxu1 %v4324_v22  ;;  %v4380_v44 = vld [vmem:[#allocation6 + $0x330] sm:$0xff]  ;;  %v4383_v22 = vld [vmem:[#allocation6 + $0x348] sm:$0xff] }
 0xb04   :  { %4485 = vmatprep.subr.bf16.mxu0 %v4327_v45  ;;  %4608 = vmatprep.subr.bf16.mxu1 %v4329_v14  ;;  %v4385_v45 = vld [vmem:[#allocation6 + $0x358] sm:$0xff]  ;;  %v4382_v14 = vld [vmem:[#allocation6 + $0x340] sm:$0xff] }
 0xb07   :  { %4486 = vmatpush1.bf16.msra.mxu0 %v4326_v46  ;;  %4609 = vmatpush1.bf16.msra.mxu1 %v4328_v47  ;;  %v4384_v46 = vld [vmem:[#allocation6 + $0x350] sm:$0xff]  ;;  %v4387_v47 = vld [vmem:[#allocation6 + $0x368] sm:$0xff] }
 0xb08   :  { %4487 = vmatprep.subr.bf16.mxu0 %v4331_v20  ;;  %4610 = vmatprep.subr.bf16.mxu1 %v4333_v48  ;;  %v4389_v20 = vld [vmem:[#allocation6 + $0x378] sm:$0xff]  ;;  %v4386_v48 = vld [vmem:[#allocation6 + $0x360] sm:$0xff] }
 0xb0b   :  { %4488 = vmatpush1.bf16.msra.mxu0 %v4330_v2  ;;  %4611 = vmatpush1.bf16.msra.mxu1 %v4332_v40  ;;  %v4388_v2 = vld [vmem:[#allocation6 + $0x370] sm:$0xff]  ;;  %v4391_v40 = vld [vmem:[#allocation6 + $0x388] sm:$0xff] }
 0xb0c   :  { %4489 = vmatprep.subr.bf16.mxu0 %v4335_v3  ;;  %4612 = vmatprep.subr.bf16.mxu1 %v4337_v50  ;;  %v4393_v3 = vld [vmem:[#allocation6 + $0x398] sm:$0xff]  ;;  %v4390_v50 = vld [vmem:[#allocation6 + $0x380] sm:$0xff] }
 0xb0f   :  { %4490 = vmatpush1.bf16.msra.mxu0 %v4334_v51  ;;  %4613 = vmatpush1.bf16.msra.mxu1 %v4336_v52  ;;  %v4392_v51 = vld [vmem:[#allocation6 + $0x390] sm:$0xff]  ;;  %v4395_v52 = vld [vmem:[#allocation6 + $0x3a8] sm:$0xff] }
 0xb10   :  { %4491 = vmatprep.subr.bf16.mxu0 %v4339_v53  ;;  %4614 = vmatprep.subr.bf16.mxu1 %v4341_v11  ;;  %v4397_v53 = vld [vmem:[#allocation6 + $0x3b8] sm:$0xff]  ;;  %v4394_v11 = vld [vmem:[#allocation6 + $0x3a0] sm:$0xff] }
 0xb13   :  { %4492 = vmatpush1.bf16.msra.mxu0 %v4338_v54  ;;  %4615 = vmatpush1.bf16.msra.mxu1 %v4340_v33  ;;  %v4396_v54 = vld [vmem:[#allocation6 + $0x3b0] sm:$0xff]  ;;  %v4399_v33 = vld [vmem:[#allocation6 + $0x3c8] sm:$0xff] }
 0xb14   :  { %4502 = vmatprep.subr.bf16.mxu0 %v4343_v13  ;;  %4625 = vmatprep.subr.bf16.mxu1 %v4345_v55  ;;  %v4401_v13 = vld [vmem:[#allocation6 + $0x3d8] sm:$0xff]  ;;  %v4398_v55 = vld [vmem:[#allocation6 + $0x3c0] sm:$0xff] }
 0xb16   :  { %4494 = vmatmul.mubr.bf16.vlgmr.msra.gmra.mrb[36].mxu0 %v7195_v6  ;;  %4617 = vmatmul.mubr.bf16.vlgmr.msra.gmra.mrb[40].mxu1 %v7195_v6  ;;  %v4357_v6 = vld [vmem:[#allocation6 + $0x278] sm:$0xff] }
 0xb17   :  { %4503 = vmatpush1.bf16.msra.mxu0 %v4342_v59  ;;  %4626 = vmatpush1.bf16.msra.mxu1 %v4344_v56  ;;  %v4400_v59 = vld [vmem:[#allocation6 + $0x3d0] sm:$0xff]  ;;  %v4403_v56 = vld [vmem:[#allocation6 + $0x3e8] sm:$0xff] }
 0xb18   :  { %4504 = vmatprep.subr.bf16.mxu0 %v4347_v57  ;;  %4627 = vmatprep.subr.bf16.mxu1 %v4349_v58  ;;  %v4405_v57 = vld [vmem:[#allocation6 + $0x3f8] sm:$0xff]  ;;  %v4402_v58 = vld [vmem:[#allocation6 + $0x3e0] sm:$0xff] }
 0xb19   :  { %4534 = vmatprep.mubr.bf16.mxu0 %v7199_v32  ;;  %4657 = vmatprep.mubr.bf16.mxu1 %v7199_v32  ;;  %v4358_v32 = vld [vmem:[#allocation6 + $0x280] sm:$0xff] }
 0xb1b   :  { %4505 = vmatpush1.bf16.msra.mxu0 %v4346_v0  ;;  %4628 = vmatpush1.bf16.msra.mxu1 %v4348_v17  ;;  %v4404_v0 = vld [vmem:[#allocation6 + $0x3f0] sm:$0xff]  ;;  %v4407_v17 = vld [vmem:[#allocation6 + $0x408] sm:$0xff] }
 0xb1c   :  { %4506 = vmatprep.subr.bf16.mxu0 %v4351_v1  ;;  %4629 = vmatprep.subr.bf16.mxu1 %v4353_v7  ;;  %v4409_v1 = vld [vmem:[#allocation6 + $0x418] sm:$0xff]  ;;  %v4406_v7 = vld [vmem:[#allocation6 + $0x400] sm:$0xff] }
 0xb1f   :  { %4507 = vmatpush1.bf16.msra.mxu0 %v4350_v4  ;;  %4630 = vmatpush1.bf16.msra.mxu1 %v4352_v16  ;;  %v4408_v4 = vld [vmem:[#allocation6 + $0x410] sm:$0xff]  ;;  %v4411_v16 = vld [vmem:[#allocation6 + $0x428] sm:$0xff] }
 0xb20   :  { %4508 = vmatprep.subr.bf16.mxu0 %v4355_v5  ;;  %4631 = vmatprep.subr.bf16.mxu1 %v4357_v6  ;;  %v4413_v5 = vld [vmem:[#allocation6 + $0x438] sm:$0xff]  ;;  %v4410_v6 = vld [vmem:[#allocation6 + $0x420] sm:$0xff] }
 0xb23   :  { %4509 = vmatpush1.bf16.msra.mxu0 %v4354_v15  ;;  %4632 = vmatpush1.bf16.msra.mxu1 %v4356_v9  ;;  %v4412_v15 = vld [vmem:[#allocation6 + $0x430] sm:$0xff]  ;;  %v4415_v9 = vld [vmem:[#allocation6 + $0x448] sm:$0xff] }
 0xb24   :  { %4510 = vmatprep.subr.bf16.mxu0 %v4359_v60  ;;  %4633 = vmatprep.subr.bf16.mxu1 %v4361_v8  ;;  %v4417_v60 = vld [vmem:[#allocation6 + $0x458] sm:$0xff]  ;;  %v4414_v8 = vld [vmem:[#allocation6 + $0x440] sm:$0xff] }
 0xb27   :  { %4511 = vmatpush1.bf16.msra.mxu0 %v4358_v32  ;;  %4634 = vmatpush1.bf16.msra.mxu1 %v4360_v62  ;;  %v4416_v32 = vld [vmem:[#allocation6 + $0x450] sm:$0xff]  ;;  %v4419_v62 = vld [vmem:[#allocation6 + $0x468] sm:$0xff] }
 0xb28   :  { %4512 = vmatprep.subr.bf16.mxu0 %v4363_v10  ;;  %4635 = vmatprep.subr.bf16.mxu1 %v4365_v19  ;;  %v4418_v10 = vld [vmem:[#allocation6 + $0x460] sm:$0xff]  ;;  %v4420_v19 = vld [vmem:[#allocation6 + $0x470] sm:$0xff] }
 0xb2b   :  { %4513 = vmatpush1.bf16.msra.mxu0 %v4362_v21  ;;  %4636 = vmatpush1.bf16.msra.mxu1 %v4364_v61  ;;  %v4423_v21 = vld [vmem:[#allocation6 + $0x488] sm:$0xff]  ;;  %v4425_v61 = vld [vmem:[#allocation6 + $0x498] sm:$0xff] }
 0xb2c   :  { %4514 = vmatprep.subr.bf16.mxu0 %v4367_v27  ;;  %4637 = vmatprep.subr.bf16.mxu1 %v4369_v28  ;;  %v4422_v27 = vld [vmem:[#allocation6 + $0x480] sm:$0xff]  ;;  %v4424_v28 = vld [vmem:[#allocation6 + $0x490] sm:$0xff] }
 0xb2f   :  { %4515 = vmatpush1.bf16.msra.mxu0 %v4366_v29  ;;  %4638 = vmatpush1.bf16.msra.mxu1 %v4368_v31  ;;  %v4427_v29 = vld [vmem:[#allocation6 + $0x4a8] sm:$0xff]  ;;  %v4429_v31 = vld [vmem:[#allocation6 + $0x4b8] sm:$0xff] }
 0xb30   :  { %4516 = vmatprep.subr.bf16.mxu0 %v4371_v34  ;;  %4639 = vmatprep.subr.bf16.mxu1 %v4373_v42  ;;  %v4426_v34 = vld [vmem:[#allocation6 + $0x4a0] sm:$0xff]  ;;  %v4428_v42 = vld [vmem:[#allocation6 + $0x4b0] sm:$0xff] }
 0xb33   :  { %4517 = vmatpush1.bf16.msra.mxu0 %v4370_v35  ;;  %4640 = vmatpush1.bf16.msra.mxu1 %v4372_v36  ;;  %v4431_v35 = vld [vmem:[#allocation6 + $0x4c8] sm:$0xff]  ;;  %v4433_v36 = vld [vmem:[#allocation6 + $0x4d8] sm:$0xff] }
 0xb34   :  { %4518 = vmatprep.subr.bf16.mxu0 %v4375_v37  ;;  %4641 = vmatprep.subr.bf16.mxu1 %v4377_v12  ;;  %v4430_v37 = vld [vmem:[#allocation6 + $0x4c0] sm:$0xff]  ;;  %v4432_v12 = vld [vmem:[#allocation6 + $0x4d0] sm:$0xff] }
 0xb37   :  { %4519 = vmatpush1.bf16.msra.mxu0 %v4374_v38  ;;  %4642 = vmatpush1.bf16.msra.mxu1 %v4376_v18  ;;  %v4435_v38 = vld [vmem:[#allocation6 + $0x4e8] sm:$0xff]  ;;  %v4437_v18 = vld [vmem:[#allocation6 + $0x4f8] sm:$0xff] }
 0xb38   :  { %4520 = vmatprep.subr.bf16.mxu0 %v4379_v39  ;;  %4643 = vmatprep.subr.bf16.mxu1 %v4381_v43  ;;  %v4434_v39 = vld [vmem:[#allocation6 + $0x4e0] sm:$0xff]  ;;  %v4436_v43 = vld [vmem:[#allocation6 + $0x4f0] sm:$0xff] }
 0xb3b   :  { %4521 = vmatpush1.bf16.msra.mxu0 %v4378_v63  ;;  %4644 = vmatpush1.bf16.msra.mxu1 %v4380_v44  ;;  %v4439_v63 = vld [vmem:[#allocation13 + $0x4] ss:$8 sm:$0xf] }
 0xb3c   :  { %4522 = vmatprep.subr.bf16.mxu0 %v4383_v22  ;;  %4645 = vmatprep.subr.bf16.mxu1 %v4385_v45  ;;  %v4444_v44 = vrot.slane %v4439_v63, %v7015_v23  ;;  %v4452_v22 = vrot.slane %v4439_v63, %v7018_v24  ;;  %v4448_v45 = vrot.slane %v4439_v63, %v7021_v25 }
 0xb3f   :  { %4523 = vmatpush1.bf16.msra.mxu0 %v4382_v14  ;;  %4646 = vmatpush1.bf16.msra.mxu1 %v4384_v46  ;;  %v4456_v14 = vrot.slane %v4439_v63, %v7024_v26 }
 0xb40   :  { %4524 = vmatprep.subr.bf16.mxu0 %v4387_v47  ;;  %4647 = vmatprep.subr.bf16.mxu1 %v4389_v20 }
 0xb43   :  { %4525 = vmatpush1.bf16.msra.mxu0 %v4386_v48  ;;  %4648 = vmatpush1.bf16.msra.mxu1 %v4388_v2 }
 0xb44   :  { %4526 = vmatprep.subr.bf16.mxu0 %v4391_v40  ;;  %4649 = vmatprep.subr.bf16.mxu1 %v4393_v3 }
 0xb47   :  { %4527 = vmatpush1.bf16.msra.mxu0 %v4390_v50  ;;  %4650 = vmatpush1.bf16.msra.mxu1 %v4392_v51 }
 0xb48   :  { %4528 = vmatprep.subr.bf16.mxu0 %v4395_v52  ;;  %4651 = vmatprep.subr.bf16.mxu1 %v4397_v53 }
 0xb4b   :  { %4529 = vmatpush1.bf16.msra.mxu0 %v4394_v11  ;;  %4652 = vmatpush1.bf16.msra.mxu1 %v4396_v54 }
 0xb4c   :  { %4530 = vmatprep.subr.bf16.mxu0 %v4399_v33  ;;  %4653 = vmatprep.subr.bf16.mxu1 %v4401_v13 }
 0xb4f   :  { %4531 = vmatpush1.bf16.msra.mxu0 %v4398_v55  ;;  %4654 = vmatpush1.bf16.msra.mxu1 %v4400_v59 }
 0xb50   :  { %4532 = vmatprep.subr.bf16.mxu0 %v4403_v56  ;;  %4655 = vmatprep.subr.bf16.mxu1 %v4405_v57 }
 0xb53   :  { %4533 = vmatpush1.bf16.msra.mxu0 %v4402_v58  ;;  %4656 = vmatpush1.bf16.msra.mxu1 %v4404_v0 }
 0xb54   :  { %4543 = vmatprep.subr.bf16.mxu0 %v4407_v17  ;;  %4666 = vmatprep.subr.bf16.mxu1 %v4409_v1 }
 0xb56   :  { %4535 = vmatmul.mubr.bf16.vlgmr.msra.gmra.mrb[36].mxu0 %v7197_v30  ;;  %4658 = vmatmul.mubr.bf16.vlgmr.msra.gmra.mrb[40].mxu1 %v7197_v30  ;;  %v4421_v30 = vld [vmem:[#allocation6 + $0x478] sm:$0xff] }
 0xb57   :  { %4544 = vmatpush1.bf16.msra.mxu0 %v4406_v7  ;;  %4667 = vmatpush1.bf16.msra.mxu1 %v4408_v4 }
 0xb58   :  { %4545 = vmatprep.subr.bf16.mxu0 %v4411_v16  ;;  %4668 = vmatprep.subr.bf16.mxu1 %v4413_v5 }
 0xb59   :  { %4575 = vmatprep.mubr.bf16.mxu0 %v6738_v41  ;;  %4698 = vmatprep.mubr.bf16.mxu1 %v6738_v41 }
 0xb5b   :  { %4546 = vmatpush1.bf16.msra.mxu0 %v4410_v6  ;;  %4669 = vmatpush1.bf16.msra.mxu1 %v4412_v15 }
 0xb5c   :  { %4547 = vmatprep.subr.bf16.mxu0 %v4415_v9  ;;  %4670 = vmatprep.subr.bf16.mxu1 %v4417_v60 }
 0xb5f   :  { %4548 = vmatpush1.bf16.msra.mxu0 %v4414_v8  ;;  %4671 = vmatpush1.bf16.msra.mxu1 %v4416_v32 }
 0xb60   :  { %4549 = vmatprep.subr.bf16.mxu0 %v4419_v62  ;;  %4672 = vmatprep.subr.bf16.mxu1 %v4421_v30 }
 0xb63   :  { %4550 = vmatpush1.bf16.msra.mxu0 %v4418_v10  ;;  %4673 = vmatpush1.bf16.msra.mxu1 %v4420_v19 }
 0xb64   :  { %4551 = vmatprep.subr.bf16.mxu0 %v4423_v21  ;;  %4674 = vmatprep.subr.bf16.mxu1 %v4425_v61 }
 0xb67   :  { %4552 = vmatpush1.bf16.msra.mxu0 %v4422_v27  ;;  %4675 = vmatpush1.bf16.msra.mxu1 %v4424_v28 }
 0xb68   :  { %4553 = vmatprep.subr.bf16.mxu0 %v4427_v29  ;;  %4676 = vmatprep.subr.bf16.mxu1 %v4429_v31 }
 0xb6b   :  { %4554 = vmatpush1.bf16.msra.mxu0 %v4426_v34  ;;  %4677 = vmatpush1.bf16.msra.mxu1 %v4428_v42 }
 0xb6c   :  { %4555 = vmatprep.subr.bf16.mxu0 %v4431_v35  ;;  %4678 = vmatprep.subr.bf16.mxu1 %v4433_v36 }
 0xb6f   :  { %4556 = vmatpush1.bf16.msra.mxu0 %v4430_v37  ;;  %4679 = vmatpush1.bf16.msra.mxu1 %v4432_v12 }
 0xb70   :  { %4557 = vmatprep.subr.bf16.mxu0 %v4435_v38  ;;  %4680 = vmatprep.subr.bf16.mxu1 %v4437_v18 }
 0xb73   :  { %4558 = vmatpush1.bf16.msra.mxu0 %v4434_v39  ;;  %4681 = vmatpush1.bf16.msra.mxu1 %v4436_v43 }
 0xb76   :  { %4576 = vmatmul.mubr.bf16.vlgmr.msra.gmra.mrb[36].mxu0 %v7202_v49  ;;  %4699 = vmatmul.mubr.bf16.vlgmr.msra.gmra.mrb[40].mxu1 %v7202_v49 }
 0xc49   :  { %v4577_v46 = vpop.f32.mrb[36].mxu0  ;;  %v4700_v47 = vpop.f32.mrb[40].mxu1 }
 0xc4a   :  { %v6375_v20 = vadd.f32 %v4577_v46, %v4444_v44  ;;  %v6377_v48 = vadd.f32 %v4700_v47, %v4452_v22  ;;  %v4579_v2 = vpop.f32.mrb[37].mxu0  ;;  %v4702_v40 = vpop.f32.mrb[41].mxu1 }
 0xc4b   :  { %v6376_v3 = vadd.f32 %v4579_v2, %v4448_v45  ;;  %v6378_v50 = vadd.f32 %v4702_v40, %v4456_v14  ;;  %v4581_v51 = vpop.f32.mrb[38].mxu0  ;;  %v4704_v52 = vpop.f32.mrb[42].mxu1 }
 0xc4c   :  { %v4707_v49 = vmax.f32 %v6375_v20, 0.0  ;;  %v4709_v53 = vmax.f32 %v6377_v48, 0.0  ;;  %v4582_v11 = vpop.f32.mrb[39].mxu0  ;;  %v4705_v54 = vpop.f32.mrb[43].mxu1 }
 0xc4d   :  { %v4708_v33 = vmax.f32 %v6376_v3, 0.0  ;;  %v4710_v13 = vmax.f32 %v6378_v50, 0.0 }
 0xc4e   :  { %v7218_v55 = vpack.c.bf16 %v4707_v49, %v4707_v49  ;;  %v7220_v59 = vpack.c.bf16 %v4709_v53, %v4709_v53 }
 0xc4f   :  { %v4712_v56 = vpack.c.bf16 %v4708_v33, %v4708_v33  ;;  %v7222_v57 = vpack.c.bf16 %v4710_v13, %v4710_v13 }
 0xc50   :  { %6682 = dma.done.wait [#allocation12 + $0x5], 16384 }
 0xc51   :  { %6683 = vsyncadd [#allocation12 + $0x5], 4294950912  ;;  %4902 = vmatprep.mubr.bf16.mxu0 %v4712_v56  ;;  %4984 = vmatprep.mubr.bf16.mxu1 %v4712_v56  ;;  %v4720_v58 = vld [vmem:[#allocation7 + $0x8] sm:$0xff]  ;;  %v4722_v0 = vld [vmem:[#allocation7 + $0x18] sm:$0xff] }
 0xc52   :  { %v4719_v17 = vld [vmem:[#allocation7] sm:$0xff]  ;;  %4870 = vmatprep.subr.bf16.mxu0 %v4720_v58  ;;  %4952 = vmatprep.subr.bf16.mxu1 %v4722_v0  ;;  %v4721_v1 = vld [vmem:[#allocation7 + $0x10] sm:$0xff]  ;;  %v4724_v7 = vld [vmem:[#allocation7 + $0x28] sm:$0xff] }
 0xc53   :  { %v4726_v4 = vld [vmem:[#allocation7 + $0x38] sm:$0xff]  ;;  %4871 = vmatpush1.bf16.msra.mxu0 %v4719_v17  ;;  %4953 = vmatpush1.bf16.msra.mxu1 %v4721_v1  ;;  %v4723_v16 = vld [vmem:[#allocation7 + $0x20] sm:$0xff]  ;;  %v4725_v5 = vld [vmem:[#allocation7 + $0x30] sm:$0xff] }
 0xc54   :  { %4872 = vmatprep.subr.bf16.mxu0 %v4724_v7  ;;  %4954 = vmatprep.subr.bf16.mxu1 %v4726_v4  ;;  %v4728_v6 = vld [vmem:[#allocation7 + $0x48] sm:$0xff]  ;;  %v4730_v15 = vld [vmem:[#allocation7 + $0x58] sm:$0xff]  ;;  %v4727_v9 = vld [vmem:[#allocation7 + $0x40] sm:$0xff] }
 0xc55   :  { %v4729_v60 = vld [vmem:[#allocation7 + $0x50] sm:$0xff]  ;;  %v4732_v8 = vld [vmem:[#allocation7 + $0x68] sm:$0xff]  ;;  %v4734_v32 = vld [vmem:[#allocation7 + $0x78] sm:$0xff] }
 0xc56   :  { %v4731_v62 = vld [vmem:[#allocation7 + $0x60] sm:$0xff]  ;;  %v4733_v30 = vld [vmem:[#allocation7 + $0x70] sm:$0xff]  ;;  %v4736_v10 = vld [vmem:[#allocation7 + $0x88] sm:$0xff] }
 0xc57   :  { %4873 = vmatpush1.bf16.msra.mxu0 %v4723_v16  ;;  %4955 = vmatpush1.bf16.msra.mxu1 %v4725_v5  ;;  %v4738_v19 = vld [vmem:[#allocation7 + $0x98] sm:$0xff]  ;;  %v4735_v21 = vld [vmem:[#allocation7 + $0x80] sm:$0xff]  ;;  %v4737_v61 = vld [vmem:[#allocation7 + $0x90] sm:$0xff] }
 0xc58   :  { %4874 = vmatprep.subr.bf16.mxu0 %v4728_v6  ;;  %4956 = vmatprep.subr.bf16.mxu1 %v4730_v15  ;;  %v4740_v27 = vld [vmem:[#allocation7 + $0xa8] sm:$0xff]  ;;  %v4742_v28 = vld [vmem:[#allocation7 + $0xb8] sm:$0xff]  ;;  %v4739_v29 = vld [vmem:[#allocation7 + $0xa0] sm:$0xff] }
 0xc59   :  { %v4741_v31 = vld [vmem:[#allocation7 + $0xb0] sm:$0xff]  ;;  %v4744_v34 = vld [vmem:[#allocation7 + $0xc8] sm:$0xff]  ;;  %v4746_v42 = vld [vmem:[#allocation7 + $0xd8] sm:$0xff] }
 0xc5a   :  { %v4743_v35 = vld [vmem:[#allocation7 + $0xc0] sm:$0xff]  ;;  %v4745_v36 = vld [vmem:[#allocation7 + $0xd0] sm:$0xff]  ;;  %v4748_v37 = vld [vmem:[#allocation7 + $0xe8] sm:$0xff] }
 0xc5b   :  { %4875 = vmatpush1.bf16.msra.mxu0 %v4727_v9  ;;  %4957 = vmatpush1.bf16.msra.mxu1 %v4729_v60  ;;  %v4750_v12 = vld [vmem:[#allocation7 + $0xf8] sm:$0xff]  ;;  %v4747_v38 = vld [vmem:[#allocation7 + $0xe0] sm:$0xff]  ;;  %v4749_v18 = vld [vmem:[#allocation7 + $0xf0] sm:$0xff] }
 0xc5c   :  { %4876 = vmatprep.subr.bf16.mxu0 %v4732_v8  ;;  %4958 = vmatprep.subr.bf16.mxu1 %v4734_v32  ;;  %v4752_v39 = vld [vmem:[#allocation7 + $0x108] sm:$0xff]  ;;  %v4754_v43 = vld [vmem:[#allocation7 + $0x118] sm:$0xff]  ;;  %v4751_v63 = vld [vmem:[#allocation7 + $0x100] sm:$0xff] }
 0xc5d   :  { %v4753_v44 = vld [vmem:[#allocation7 + $0x110] sm:$0xff]  ;;  %v4756_v22 = vld [vmem:[#allocation7 + $0x128] sm:$0xff]  ;;  %v4758_v45 = vld [vmem:[#allocation7 + $0x138] sm:$0xff] }
 0xc5e   :  { %v4755_v14 = vld [vmem:[#allocation7 + $0x120] sm:$0xff]  ;;  %v4757_v46 = vld [vmem:[#allocation7 + $0x130] sm:$0xff]  ;;  %v4760_v47 = vld [vmem:[#allocation7 + $0x148] sm:$0xff] }
 0xc5f   :  { %4877 = vmatpush1.bf16.msra.mxu0 %v4731_v62  ;;  %4959 = vmatpush1.bf16.msra.mxu1 %v4733_v30  ;;  %v4762_v20 = vld [vmem:[#allocation7 + $0x158] sm:$0xff]  ;;  %v4759_v48 = vld [vmem:[#allocation7 + $0x140] sm:$0xff]  ;;  %v4761_v2 = vld [vmem:[#allocation7 + $0x150] sm:$0xff] }
 0xc60   :  { %4878 = vmatprep.subr.bf16.mxu0 %v4736_v10  ;;  %4960 = vmatprep.subr.bf16.mxu1 %v4738_v19  ;;  %v4764_v40 = vld [vmem:[#allocation7 + $0x168] sm:$0xff]  ;;  %v4766_v3 = vld [vmem:[#allocation7 + $0x178] sm:$0xff]  ;;  %v4763_v50 = vld [vmem:[#allocation7 + $0x160] sm:$0xff] }
 0xc61   :  { %v4765_v51 = vld [vmem:[#allocation7 + $0x170] sm:$0xff]  ;;  %v4768_v52 = vld [vmem:[#allocation7 + $0x188] sm:$0xff]  ;;  %v4770_v49 = vld [vmem:[#allocation7 + $0x198] sm:$0xff] }
 0xc62   :  { %v4767_v53 = vld [vmem:[#allocation7 + $0x180] sm:$0xff]  ;;  %v4769_v11 = vld [vmem:[#allocation7 + $0x190] sm:$0xff]  ;;  %v4772_v54 = vld [vmem:[#allocation7 + $0x1a8] sm:$0xff] }
 0xc63   :  { %4879 = vmatpush1.bf16.msra.mxu0 %v4735_v21  ;;  %4961 = vmatpush1.bf16.msra.mxu1 %v4737_v61  ;;  %v4774_v33 = vld [vmem:[#allocation7 + $0x1b8] sm:$0xff]  ;;  %v4771_v13 = vld [vmem:[#allocation7 + $0x1a0] sm:$0xff]  ;;  %v4773_v56 = vld [vmem:[#allocation7 + $0x1b0] sm:$0xff] }
 0xc64   :  { %4880 = vmatprep.subr.bf16.mxu0 %v4740_v27  ;;  %4962 = vmatprep.subr.bf16.mxu1 %v4742_v28  ;;  %v4776_v58 = vld [vmem:[#allocation7 + $0x1c8] sm:$0xff]  ;;  %v4778_v0 = vld [vmem:[#allocation7 + $0x1d8] sm:$0xff]  ;;  %v4775_v17 = vld [vmem:[#allocation7 + $0x1c0] sm:$0xff] }
 0xc65   :  { %v4777_v1 = vld [vmem:[#allocation7 + $0x1d0] sm:$0xff]  ;;  %v4780_v7 = vld [vmem:[#allocation7 + $0x1e8] sm:$0xff]  ;;  %v4782_v4 = vld [vmem:[#allocation7 + $0x1f8] sm:$0xff] }
 0xc66   :  { %v4779_v16 = vld [vmem:[#allocation7 + $0x1e0] sm:$0xff]  ;;  %v4781_v5 = vld [vmem:[#allocation7 + $0x1f0] sm:$0xff]  ;;  %v4784_v6 = vld [vmem:[#allocation7 + $0x208] sm:$0xff] }
 0xc67   :  { %4881 = vmatpush1.bf16.msra.mxu0 %v4739_v29  ;;  %4963 = vmatpush1.bf16.msra.mxu1 %v4741_v31  ;;  %v4786_v15 = vld [vmem:[#allocation7 + $0x218] sm:$0xff]  ;;  %v4783_v9 = vld [vmem:[#allocation7 + $0x200] sm:$0xff]  ;;  %v4785_v60 = vld [vmem:[#allocation7 + $0x210] sm:$0xff] }
 0xc68   :  { %4882 = vmatprep.subr.bf16.mxu0 %v4744_v34  ;;  %4964 = vmatprep.subr.bf16.mxu1 %v4746_v42  ;;  %v4788_v8 = vld [vmem:[#allocation7 + $0x228] sm:$0xff]  ;;  %v4790_v32 = vld [vmem:[#allocation7 + $0x238] sm:$0xff]  ;;  %v4787_v62 = vld [vmem:[#allocation7 + $0x220] sm:$0xff] }
 0xc69   :  { %v4789_v30 = vld [vmem:[#allocation7 + $0x230] sm:$0xff]  ;;  %v4792_v10 = vld [vmem:[#allocation7 + $0x248] sm:$0xff]  ;;  %v4794_v19 = vld [vmem:[#allocation7 + $0x258] sm:$0xff] }
 0xc6a   :  { %v4791_v21 = vld [vmem:[#allocation7 + $0x240] sm:$0xff]  ;;  %v4793_v61 = vld [vmem:[#allocation7 + $0x250] sm:$0xff]  ;;  %v4796_v27 = vld [vmem:[#allocation7 + $0x268] sm:$0xff] }
 0xc6b   :  { %4883 = vmatpush1.bf16.msra.mxu0 %v4743_v35  ;;  %4965 = vmatpush1.bf16.msra.mxu1 %v4745_v36  ;;  %v4795_v28 = vld [vmem:[#allocation7 + $0x260] sm:$0xff]  ;;  %v4797_v29 = vld [vmem:[#allocation7 + $0x270] sm:$0xff]  ;;  %v4800_v31 = vld [vmem:[#allocation7 + $0x288] sm:$0xff] }
 0xc6c   :  { %4884 = vmatprep.subr.bf16.mxu0 %v4748_v37  ;;  %4966 = vmatprep.subr.bf16.mxu1 %v4750_v12  ;;  %v4802_v34 = vld [vmem:[#allocation7 + $0x298] sm:$0xff]  ;;  %v4801_v42 = vld [vmem:[#allocation7 + $0x290] sm:$0xff]  ;;  %v4804_v35 = vld [vmem:[#allocation7 + $0x2a8] sm:$0xff] }
 0xc6d   :  { %v4806_v36 = vld [vmem:[#allocation7 + $0x2b8] sm:$0xff]  ;;  %v4803_v37 = vld [vmem:[#allocation7 + $0x2a0] sm:$0xff]  ;;  %v4805_v12 = vld [vmem:[#allocation7 + $0x2b0] sm:$0xff] }
 0xc6f   :  { %4885 = vmatpush1.bf16.msra.mxu0 %v4747_v38  ;;  %4967 = vmatpush1.bf16.msra.mxu1 %v4749_v18  ;;  %v4808_v38 = vld [vmem:[#allocation7 + $0x2c8] sm:$0xff]  ;;  %v4810_v18 = vld [vmem:[#allocation7 + $0x2d8] sm:$0xff] }
 0xc70   :  { %4886 = vmatprep.subr.bf16.mxu0 %v4752_v39  ;;  %4968 = vmatprep.subr.bf16.mxu1 %v4754_v43  ;;  %v4807_v39 = vld [vmem:[#allocation7 + $0x2c0] sm:$0xff]  ;;  %v4809_v43 = vld [vmem:[#allocation7 + $0x2d0] sm:$0xff] }
 0xc73   :  { %4887 = vmatpush1.bf16.msra.mxu0 %v4751_v63  ;;  %4969 = vmatpush1.bf16.msra.mxu1 %v4753_v44  ;;  %v4812_v63 = vld [vmem:[#allocation7 + $0x2e8] sm:$0xff]  ;;  %v4814_v44 = vld [vmem:[#allocation7 + $0x2f8] sm:$0xff] }
 0xc74   :  { %4888 = vmatprep.subr.bf16.mxu0 %v4756_v22  ;;  %4970 = vmatprep.subr.bf16.mxu1 %v4758_v45  ;;  %v4811_v22 = vld [vmem:[#allocation7 + $0x2e0] sm:$0xff]  ;;  %v4813_v45 = vld [vmem:[#allocation7 + $0x2f0] sm:$0xff] }
 0xc77   :  { %4889 = vmatpush1.bf16.msra.mxu0 %v4755_v14  ;;  %4971 = vmatpush1.bf16.msra.mxu1 %v4757_v46  ;;  %v4816_v14 = vld [vmem:[#allocation7 + $0x308] sm:$0xff]  ;;  %v4818_v46 = vld [vmem:[#allocation7 + $0x318] sm:$0xff] }
 0xc78   :  { %4890 = vmatprep.subr.bf16.mxu0 %v4760_v47  ;;  %4972 = vmatprep.subr.bf16.mxu1 %v4762_v20  ;;  %v4815_v47 = vld [vmem:[#allocation7 + $0x300] sm:$0xff]  ;;  %v4817_v20 = vld [vmem:[#allocation7 + $0x310] sm:$0xff] }
 0xc7b   :  { %4891 = vmatpush1.bf16.msra.mxu0 %v4759_v48  ;;  %4973 = vmatpush1.bf16.msra.mxu1 %v4761_v2  ;;  %v4820_v48 = vld [vmem:[#allocation7 + $0x328] sm:$0xff]  ;;  %v4822_v2 = vld [vmem:[#allocation7 + $0x338] sm:$0xff] }
 0xc7c   :  { %4892 = vmatprep.subr.bf16.mxu0 %v4764_v40  ;;  %4974 = vmatprep.subr.bf16.mxu1 %v4766_v3  ;;  %v4819_v40 = vld [vmem:[#allocation7 + $0x320] sm:$0xff]  ;;  %v4821_v3 = vld [vmem:[#allocation7 + $0x330] sm:$0xff] }
 0xc7f   :  { %4893 = vmatpush1.bf16.msra.mxu0 %v4763_v50  ;;  %4975 = vmatpush1.bf16.msra.mxu1 %v4765_v51  ;;  %v4824_v50 = vld [vmem:[#allocation7 + $0x348] sm:$0xff]  ;;  %v4826_v51 = vld [vmem:[#allocation7 + $0x358] sm:$0xff] }
 0xc80   :  { %4894 = vmatprep.subr.bf16.mxu0 %v4768_v52  ;;  %4976 = vmatprep.subr.bf16.mxu1 %v4770_v49  ;;  %v4823_v52 = vld [vmem:[#allocation7 + $0x340] sm:$0xff]  ;;  %v4825_v49 = vld [vmem:[#allocation7 + $0x350] sm:$0xff] }
 0xc83   :  { %4895 = vmatpush1.bf16.msra.mxu0 %v4767_v53  ;;  %4977 = vmatpush1.bf16.msra.mxu1 %v4769_v11  ;;  %v4828_v53 = vld [vmem:[#allocation7 + $0x368] sm:$0xff]  ;;  %v4830_v11 = vld [vmem:[#allocation7 + $0x378] sm:$0xff] }
 0xc84   :  { %4896 = vmatprep.subr.bf16.mxu0 %v4772_v54  ;;  %4978 = vmatprep.subr.bf16.mxu1 %v4774_v33  ;;  %v4827_v54 = vld [vmem:[#allocation7 + $0x360] sm:$0xff]  ;;  %v4829_v33 = vld [vmem:[#allocation7 + $0x370] sm:$0xff] }
 0xc87   :  { %4897 = vmatpush1.bf16.msra.mxu0 %v4771_v13  ;;  %4979 = vmatpush1.bf16.msra.mxu1 %v4773_v56  ;;  %v4832_v13 = vld [vmem:[#allocation7 + $0x388] sm:$0xff]  ;;  %v4834_v56 = vld [vmem:[#allocation7 + $0x398] sm:$0xff] }
 0xc88   :  { %4898 = vmatprep.subr.bf16.mxu0 %v4776_v58  ;;  %4980 = vmatprep.subr.bf16.mxu1 %v4778_v0  ;;  %v4831_v58 = vld [vmem:[#allocation7 + $0x380] sm:$0xff]  ;;  %v4833_v0 = vld [vmem:[#allocation7 + $0x390] sm:$0xff] }
 0xc8b   :  { %4899 = vmatpush1.bf16.msra.mxu0 %v4775_v17  ;;  %4981 = vmatpush1.bf16.msra.mxu1 %v4777_v1  ;;  %v4836_v17 = vld [vmem:[#allocation7 + $0x3a8] sm:$0xff]  ;;  %v4838_v1 = vld [vmem:[#allocation7 + $0x3b8] sm:$0xff] }
 0xc8c   :  { %4900 = vmatprep.subr.bf16.mxu0 %v4780_v7  ;;  %4982 = vmatprep.subr.bf16.mxu1 %v4782_v4  ;;  %v4835_v7 = vld [vmem:[#allocation7 + $0x3a0] sm:$0xff]  ;;  %v4837_v4 = vld [vmem:[#allocation7 + $0x3b0] sm:$0xff] }
 0xc8f   :  { %4901 = vmatpush1.bf16.msra.mxu0 %v4779_v16  ;;  %4983 = vmatpush1.bf16.msra.mxu1 %v4781_v5  ;;  %v4840_v16 = vld [vmem:[#allocation7 + $0x3c8] sm:$0xff]  ;;  %v4842_v5 = vld [vmem:[#allocation7 + $0x3d8] sm:$0xff] }
 0xc90   :  { %4911 = vmatprep.subr.bf16.mxu0 %v4784_v6  ;;  %4993 = vmatprep.subr.bf16.mxu1 %v4786_v15  ;;  %v4839_v6 = vld [vmem:[#allocation7 + $0x3c0] sm:$0xff]  ;;  %v4841_v15 = vld [vmem:[#allocation7 + $0x3d0] sm:$0xff] }
 0xc92   :  { %4903 = vmatmul.mubr.bf16.vlgmr.msra.gmra.mrb[40].mxu0 %v7218_v55  ;;  %4985 = vmatmul.mubr.bf16.vlgmr.msra.gmra.mrb[44].mxu1 %v7218_v55  ;;  %v4798_v55 = vld [vmem:[#allocation7 + $0x278] sm:$0xff] }
 0xc93   :  { %4912 = vmatpush1.bf16.msra.mxu0 %v4783_v9  ;;  %4994 = vmatpush1.bf16.msra.mxu1 %v4785_v60  ;;  %v4844_v9 = vld [vmem:[#allocation7 + $0x3e8] sm:$0xff]  ;;  %v4846_v60 = vld [vmem:[#allocation7 + $0x3f8] sm:$0xff] }
 0xc94   :  { %4913 = vmatprep.subr.bf16.mxu0 %v4788_v8  ;;  %4995 = vmatprep.subr.bf16.mxu1 %v4790_v32  ;;  %v4843_v8 = vld [vmem:[#allocation7 + $0x3e0] sm:$0xff]  ;;  %v4845_v32 = vld [vmem:[#allocation7 + $0x3f0] sm:$0xff] }
 0xc95   :  { %4943 = vmatprep.mubr.bf16.mxu0 %v7222_v57  ;;  %5025 = vmatprep.mubr.bf16.mxu1 %v7222_v57  ;;  %v4799_v57 = vld [vmem:[#allocation7 + $0x280] sm:$0xff] }
 0xc97   :  { %4914 = vmatpush1.bf16.msra.mxu0 %v4787_v62  ;;  %4996 = vmatpush1.bf16.msra.mxu1 %v4789_v30  ;;  %v4848_v62 = vld [vmem:[#allocation13 + $0x5] ss:$8 sm:$0xf] }
 0xc98   :  { %4915 = vmatprep.subr.bf16.mxu0 %v4792_v10  ;;  %4997 = vmatprep.subr.bf16.mxu1 %v4794_v19  ;;  %v4853_v30 = vrot.slane %v4848_v62, %v7015_v23  ;;  %v4861_v10 = vrot.slane %v4848_v62, %v7018_v24  ;;  %v4857_v19 = vrot.slane %v4848_v62, %v7021_v25 }
 0xc9b   :  { %4916 = vmatpush1.bf16.msra.mxu0 %v4791_v21  ;;  %4998 = vmatpush1.bf16.msra.mxu1 %v4793_v61  ;;  %v4865_v21 = vrot.slane %v4848_v62, %v7024_v26 }
 0xc9c   :  { %4917 = vmatprep.subr.bf16.mxu0 %v4796_v27  ;;  %4999 = vmatprep.subr.bf16.mxu1 %v4798_v55 }
 0xc9f   :  { %4918 = vmatpush1.bf16.msra.mxu0 %v4795_v28  ;;  %5000 = vmatpush1.bf16.msra.mxu1 %v4797_v29 }
 0xca0   :  { %4919 = vmatprep.subr.bf16.mxu0 %v4800_v31  ;;  %5001 = vmatprep.subr.bf16.mxu1 %v4802_v34 }
 0xca3   :  { %4920 = vmatpush1.bf16.msra.mxu0 %v4799_v57  ;;  %5002 = vmatpush1.bf16.msra.mxu1 %v4801_v42 }
 0xca4   :  { %4921 = vmatprep.subr.bf16.mxu0 %v4804_v35  ;;  %5003 = vmatprep.subr.bf16.mxu1 %v4806_v36 }
 0xca7   :  { %4922 = vmatpush1.bf16.msra.mxu0 %v4803_v37  ;;  %5004 = vmatpush1.bf16.msra.mxu1 %v4805_v12 }
 0xca8   :  { %4923 = vmatprep.subr.bf16.mxu0 %v4808_v38  ;;  %5005 = vmatprep.subr.bf16.mxu1 %v4810_v18 }
 0xcab   :  { %4924 = vmatpush1.bf16.msra.mxu0 %v4807_v39  ;;  %5006 = vmatpush1.bf16.msra.mxu1 %v4809_v43 }
 0xcac   :  { %4925 = vmatprep.subr.bf16.mxu0 %v4812_v63  ;;  %5007 = vmatprep.subr.bf16.mxu1 %v4814_v44 }
 0xcaf   :  { %4926 = vmatpush1.bf16.msra.mxu0 %v4811_v22  ;;  %5008 = vmatpush1.bf16.msra.mxu1 %v4813_v45 }
 0xcb0   :  { %4927 = vmatprep.subr.bf16.mxu0 %v4816_v14  ;;  %5009 = vmatprep.subr.bf16.mxu1 %v4818_v46 }
 0xcb3   :  { %4928 = vmatpush1.bf16.msra.mxu0 %v4815_v47  ;;  %5010 = vmatpush1.bf16.msra.mxu1 %v4817_v20 }
 0xcb4   :  { %4929 = vmatprep.subr.bf16.mxu0 %v4820_v48  ;;  %5011 = vmatprep.subr.bf16.mxu1 %v4822_v2 }
 0xcb7   :  { %4930 = vmatpush1.bf16.msra.mxu0 %v4819_v40  ;;  %5012 = vmatpush1.bf16.msra.mxu1 %v4821_v3 }
 0xcb8   :  { %4931 = vmatprep.subr.bf16.mxu0 %v4824_v50  ;;  %5013 = vmatprep.subr.bf16.mxu1 %v4826_v51 }
 0xcbb   :  { %4932 = vmatpush1.bf16.msra.mxu0 %v4823_v52  ;;  %5014 = vmatpush1.bf16.msra.mxu1 %v4825_v49 }
 0xcbc   :  { %4933 = vmatprep.subr.bf16.mxu0 %v4828_v53  ;;  %5015 = vmatprep.subr.bf16.mxu1 %v4830_v11 }
 0xcbf   :  { %4934 = vmatpush1.bf16.msra.mxu0 %v4827_v54  ;;  %5016 = vmatpush1.bf16.msra.mxu1 %v4829_v33 }
 0xcc0   :  { %4935 = vmatprep.subr.bf16.mxu0 %v4832_v13  ;;  %5017 = vmatprep.subr.bf16.mxu1 %v4834_v56 }
 0xcc3   :  { %4936 = vmatpush1.bf16.msra.mxu0 %v4831_v58  ;;  %5018 = vmatpush1.bf16.msra.mxu1 %v4833_v0 }
 0xcc4   :  { %4937 = vmatprep.subr.bf16.mxu0 %v4836_v17  ;;  %5019 = vmatprep.subr.bf16.mxu1 %v4838_v1 }
 0xcc7   :  { %4938 = vmatpush1.bf16.msra.mxu0 %v4835_v7  ;;  %5020 = vmatpush1.bf16.msra.mxu1 %v4837_v4 }
 0xcc8   :  { %4939 = vmatprep.subr.bf16.mxu0 %v4840_v16  ;;  %5021 = vmatprep.subr.bf16.mxu1 %v4842_v5 }
 0xccb   :  { %4940 = vmatpush1.bf16.msra.mxu0 %v4839_v6  ;;  %5022 = vmatpush1.bf16.msra.mxu1 %v4841_v15 }
 0xccc   :  { %4941 = vmatprep.subr.bf16.mxu0 %v4844_v9  ;;  %5023 = vmatprep.subr.bf16.mxu1 %v4846_v60 }
 0xccf   :  { %4942 = vmatpush1.bf16.msra.mxu0 %v4843_v8  ;;  %5024 = vmatpush1.bf16.msra.mxu1 %v4845_v32 }
 0xcd2   :  { %4944 = vmatmul.mubr.bf16.vlgmr.msra.gmra.mrb[40].mxu0 %v7220_v59  ;;  %5026 = vmatmul.mubr.bf16.vlgmr.msra.gmra.mrb[44].mxu1 %v7220_v59 }
 0xda5   :  { %v4945_v61 = vpop.f32.mrb[40].mxu0  ;;  %v5027_v27 = vpop.f32.mrb[44].mxu1 }
 0xda6   :  { %v6379_v55 = vadd.f32 %v4945_v61, %v4853_v30  ;;  %v6381_v28 = vadd.f32 %v5027_v27, %v4861_v10  ;;  %v4947_v29 = vpop.f32.mrb[41].mxu0  ;;  %v5029_v31 = vpop.f32.mrb[45].mxu1 }
 0xda7   :  { %v6380_v34 = vadd.f32 %v4947_v29, %v4857_v19  ;;  %v6382_v57 = vadd.f32 %v5029_v31, %v4865_v21  ;;  %v4949_v42 = vpop.f32.mrb[42].mxu0  ;;  %v5031_v35 = vpop.f32.mrb[46].mxu1 }
 0xda8   :  { %v5034_v59 = vmax.f32 %v6379_v55, 0.0  ;;  %v5036_v36 = vmax.f32 %v6381_v28, 0.0  ;;  %v4950_v37 = vpop.f32.mrb[43].mxu0  ;;  %v5032_v12 = vpop.f32.mrb[47].mxu1 }
 0xda9   :  { %v5035_v38 = vmax.f32 %v6380_v34, 0.0  ;;  %v5037_v18 = vmax.f32 %v6382_v57, 0.0 }
 0xdaa   :  { %v7234_v39 = vpack.c.bf16 %v5034_v59, %v5034_v59  ;;  %v7236_v43 = vpack.c.bf16 %v5036_v36, %v5036_v36 }
 0xdab   :  { %v5039_v26 = vpack.c.bf16 %v5035_v38, %v5035_v38  ;;  %v7238_v63 = vpack.c.bf16 %v5037_v18, %v5037_v18 }
 0xdac   :  { %6684 = dma.done.wait [#allocation12 + $0x6], 12288 }
 0xdad   :  { %6685 = vsyncadd [#allocation12 + $0x6], 4294955008  ;;  %5191 = vmatprep.mubr.bf16.mxu0 %v5039_v26  ;;  %5273 = vmatprep.mubr.bf16.mxu1 %v5039_v26  ;;  %v5046_v44 = vld [vmem:[#allocation8 + $0x8] sm:$0xff]  ;;  %v5045_v22 = vld [vmem:[#allocation8] sm:$0xff] }
 0xdae   :  { %v5049_v45 = vld [vmem:[#allocation8 + $0x20] sm:$0xff]  ;;  %5159 = vmatprep.subr.bf16.mxu0 %v5046_v44  ;;  %v5048_v14 = vld [vmem:[#allocation8 + $0x18] sm:$0xff]  ;;  %v5071_v47 = vld [vmem:[#allocation8 + $0xd0] sm:$0xff] }
 0xdaf   :  { %5160 = vmatpush1.bf16.msra.mxu0 %v5045_v22  ;;  %v5052_v46 = vld [vmem:[#allocation8 + $0x38] sm:$0xff]  ;;  %6111 = vmatprep.subr.bf16.mxu1 %v5071_v47  ;;  %v5047_v20 = vld [vmem:[#allocation8 + $0x10] sm:$0xff]  ;;  %v5074_v2 = vld [vmem:[#allocation8 + $0xe8] sm:$0xff] }
 0xdb0   :  { %5161 = vmatprep.subr.bf16.mxu0 %v5049_v45  ;;  %v5051_v48 = vld [vmem:[#allocation8 + $0x30] sm:$0xff]  ;;  %6112 = vmatpush3.bf16.msra.mxu1 %v5047_v20  ;;  %v5050_v3 = vld [vmem:[#allocation8 + $0x28] sm:$0xff]  ;;  %v5077_v50 = vld [vmem:[#allocation8 + $0x100] sm:$0xff] }
 0xdb1   :  { %v5055_v40 = vld [vmem:[#allocation8 + $0x50] sm:$0xff]  ;;  %6113 = vmatprep.subr.bf16.mxu1 %v5074_v2  ;;  %v5054_v51 = vld [vmem:[#allocation8 + $0x48] sm:$0xff]  ;;  %v5053_v49 = vld [vmem:[#allocation8 + $0x40] sm:$0xff] }
 0xdb2   :  { %v5058_v52 = vld [vmem:[#allocation8 + $0x68] sm:$0xff]  ;;  %v5080_v53 = vld [vmem:[#allocation8 + $0x118] sm:$0xff]  ;;  %v5057_v11 = vld [vmem:[#allocation8 + $0x60] sm:$0xff] }
 0xdb3   :  { %5162 = vmatpush1.bf16.msra.mxu0 %v5048_v14  ;;  %v5061_v54 = vld [vmem:[#allocation8 + $0x80] sm:$0xff]  ;;  %v5056_v33 = vld [vmem:[#allocation8 + $0x58] sm:$0xff]  ;;  %v5083_v13 = vld [vmem:[#allocation8 + $0x130] sm:$0xff] }
 0xdb4   :  { %5163 = vmatprep.subr.bf16.mxu0 %v5052_v46  ;;  %6114 = vmatpush3.bf16.msra.mxu1 %v5050_v3  ;;  %v5060_v56 = vld [vmem:[#allocation8 + $0x78] sm:$0xff]  ;;  %v5059_v0 = vld [vmem:[#allocation8 + $0x70] sm:$0xff]  ;;  %v5086_v17 = vld [vmem:[#allocation8 + $0x148] sm:$0xff] }
 0xdb5   :  { %6115 = vmatprep.subr.bf16.mxu1 %v5077_v50  ;;  %v5064_v58 = vld [vmem:[#allocation8 + $0x98] sm:$0xff]  ;;  %v5063_v1 = vld [vmem:[#allocation8 + $0x90] sm:$0xff]  ;;  %v5062_v4 = vld [vmem:[#allocation8 + $0x88] sm:$0xff] }
 0xdb6   :  { %v5067_v7 = vld [vmem:[#allocation8 + $0xb0] sm:$0xff]  ;;  %v5089_v16 = vld [vmem:[#allocation8 + $0x160] sm:$0xff]  ;;  %v5066_v5 = vld [vmem:[#allocation8 + $0xa8] sm:$0xff] }
 0xdb7   :  { %5164 = vmatpush1.bf16.msra.mxu0 %v5051_v48  ;;  %v5070_v6 = vld [vmem:[#allocation8 + $0xc8] sm:$0xff]  ;;  %v5065_v15 = vld [vmem:[#allocation8 + $0xa0] sm:$0xff]  ;;  %v5092_v9 = vld [vmem:[#allocation8 + $0x178] sm:$0xff] }
 0xdb8   :  { %5165 = vmatprep.subr.bf16.mxu0 %v5055_v40  ;;  %6116 = vmatpush3.bf16.msra.mxu1 %v5053_v49  ;;  %v5069_v60 = vld [vmem:[#allocation8 + $0xc0] sm:$0xff]  ;;  %v5068_v32 = vld [vmem:[#allocation8 + $0xb8] sm:$0xff]  ;;  %v5119_v62 = vld [vmem:[#allocation8 + $0x250] sm:$0xff] }
 0xdb9   :  { %6117 = vmatprep.subr.bf16.mxu1 %v5080_v53  ;;  %v5073_v8 = vld [vmem:[#allocation8 + $0xe0] sm:$0xff]  ;;  %v5072_v30 = vld [vmem:[#allocation8 + $0xd8] sm:$0xff]  ;;  %v5095_v19 = vld [vmem:[#allocation8 + $0x190] sm:$0xff] }
 0xdba   :  { %v5076_v10 = vld [vmem:[#allocation8 + $0xf8] sm:$0xff]  ;;  %v5122_v21 = vld [vmem:[#allocation8 + $0x268] sm:$0xff]  ;;  %v5075_v61 = vld [vmem:[#allocation8 + $0xf0] sm:$0xff] }
 0xdbb   :  { %5166 = vmatpush1.bf16.msra.mxu0 %v5054_v51  ;;  %v5079_v27 = vld [vmem:[#allocation8 + $0x110] sm:$0xff]  ;;  %v5098_v55 = vld [vmem:[#allocation8 + $0x1a8] sm:$0xff]  ;;  %v5125_v28 = vld [vmem:[#allocation8 + $0x280] sm:$0xff] }
 0xdbc   :  { %5167 = vmatprep.subr.bf16.mxu0 %v5058_v52  ;;  %6118 = vmatpush3.bf16.msra.mxu1 %v5056_v33  ;;  %v5078_v29 = vld [vmem:[#allocation8 + $0x108] sm:$0xff]  ;;  %v5101_v34 = vld [vmem:[#allocation8 + $0x1c0] sm:$0xff]  ;;  %v5128_v57 = vld [vmem:[#allocation8 + $0x298] sm:$0xff] }
 0xdbd   :  { %6119 = vmatprep.subr.bf16.mxu1 %v5083_v13  ;;  %v5082_v31 = vld [vmem:[#allocation8 + $0x128] sm:$0xff]  ;;  %v5081_v42 = vld [vmem:[#allocation8 + $0x120] sm:$0xff]  ;;  %v5104_v59 = vld [vmem:[#allocation8 + $0x1d8] sm:$0xff] }
 0xdbe   :  { %v5085_v35 = vld [vmem:[#allocation8 + $0x140] sm:$0xff]  ;;  %v5131_v36 = vld [vmem:[#allocation8 + $0x2b0] sm:$0xff]  ;;  %v5084_v37 = vld [vmem:[#allocation8 + $0x138] sm:$0xff] }
 0xdbf   :  { %5168 = vmatpush1.bf16.msra.mxu0 %v5057_v11  ;;  %v5088_v12 = vld [vmem:[#allocation8 + $0x158] sm:$0xff]  ;;  %v5107_v38 = vld [vmem:[#allocation8 + $0x1f0] sm:$0xff]  ;;  %v5134_v18 = vld [vmem:[#allocation8 + $0x2c8] sm:$0xff] }
 0xdc0   :  { %5169 = vmatprep.subr.bf16.mxu0 %v5061_v54  ;;  %6120 = vmatpush3.bf16.msra.mxu1 %v5059_v0  ;;  %v5087_v26 = vld [vmem:[#allocation8 + $0x150] sm:$0xff]  ;;  %v5110_v22 = vld [vmem:[#allocation8 + $0x208] sm:$0xff]  ;;  %v5137_v45 = vld [vmem:[#allocation8 + $0x2e0] sm:$0xff] }
 0xdc1   :  { %6121 = vmatprep.subr.bf16.mxu1 %v5086_v17  ;;  %v5091_v44 = vld [vmem:[#allocation8 + $0x170] sm:$0xff]  ;;  %v5090_v14 = vld [vmem:[#allocation8 + $0x168] sm:$0xff]  ;;  %v5113_v47 = vld [vmem:[#allocation8 + $0x220] sm:$0xff] }
 0xdc2   :  { %v5094_v46 = vld [vmem:[#allocation8 + $0x188] sm:$0xff]  ;;  %v5140_v20 = vld [vmem:[#allocation8 + $0x2f8] sm:$0xff]  ;;  %v5093_v48 = vld [vmem:[#allocation8 + $0x180] sm:$0xff] }
 0xdc3   :  { %5170 = vmatpush1.bf16.msra.mxu0 %v5060_v56  ;;  %v5097_v2 = vld [vmem:[#allocation8 + $0x1a0] sm:$0xff]  ;;  %v5116_v40 = vld [vmem:[#allocation8 + $0x238] sm:$0xff]  ;;  %v5099_v51 = vld [vmem:[#allocation8 + $0x1b0] sm:$0xff] }
 0xdc4   :  { %5171 = vmatprep.subr.bf16.mxu0 %v5064_v58  ;;  %6122 = vmatpush3.bf16.msra.mxu1 %v5062_v4  ;;  %v5096_v3 = vld [vmem:[#allocation8 + $0x198] sm:$0xff]  ;;  %v5103_v52 = vld [vmem:[#allocation8 + $0x1d0] sm:$0xff]  ;;  %v5102_v49 = vld [vmem:[#allocation8 + $0x1c8] sm:$0xff] }
 0xdc5   :  { %6123 = vmatprep.subr.bf16.mxu1 %v5089_v16  ;;  %v5100_v50 = vld [vmem:[#allocation8 + $0x1b8] sm:$0xff]  ;;  %v5106_v53 = vld [vmem:[#allocation8 + $0x1e8] sm:$0xff]  ;;  %v5109_v11 = vld [vmem:[#allocation8 + $0x200] sm:$0xff] }
 0xdc6   :  { %v5112_v54 = vld [vmem:[#allocation8 + $0x218] sm:$0xff]  ;;  %v5111_v33 = vld [vmem:[#allocation8 + $0x210] sm:$0xff]  ;;  %v5114_v56 = vld [vmem:[#allocation8 + $0x228] sm:$0xff] }
 0xdc7   :  { %5172 = vmatpush1.bf16.msra.mxu0 %v5063_v1  ;;  %v5115_v13 = vld [vmem:[#allocation8 + $0x230] sm:$0xff]  ;;  %v5118_v58 = vld [vmem:[#allocation8 + $0x248] sm:$0xff]  ;;  %v5117_v0 = vld [vmem:[#allocation8 + $0x240] sm:$0xff] }
 0xdc8   :  { %5173 = vmatprep.subr.bf16.mxu0 %v5067_v7  ;;  %6124 = vmatpush3.bf16.msra.mxu1 %v5065_v15  ;;  %v5121_v17 = vld [vmem:[#allocation8 + $0x260] sm:$0xff]  ;;  %v5120_v1 = vld [vmem:[#allocation8 + $0x258] sm:$0xff]  ;;  %v5123_v4 = vld [vmem:[#allocation8 + $0x270] sm:$0xff] }
 0xdc9   :  { %6125 = vmatprep.subr.bf16.mxu1 %v5092_v9  ;;  %v5124_v7 = vld [vmem:[#allocation8 + $0x278] sm:$0xff]  ;;  %v5127_v16 = vld [vmem:[#allocation8 + $0x290] sm:$0xff]  ;;  %v5129_v15 = vld [vmem:[#allocation8 + $0x2a0] sm:$0xff] }
 0xdca   :  { %v5133_v9 = vld [vmem:[#allocation8 + $0x2c0] sm:$0xff] }
 0xdcb   :  { %5174 = vmatpush1.bf16.msra.mxu0 %v5066_v5  ;;  %v5126_v5 = vld [vmem:[#allocation8 + $0x288] sm:$0xff] }
 0xdcc   :  { %5175 = vmatprep.subr.bf16.mxu0 %v5070_v6  ;;  %6126 = vmatpush3.bf16.msra.mxu1 %v5068_v32  ;;  %v5130_v6 = vld [vmem:[#allocation8 + $0x2a8] sm:$0xff]  ;;  %v5135_v32 = vld [vmem:[#allocation8 + $0x2d0] sm:$0xff] }
 0xdcd   :  { %6133 = vmatprep.subr.bf16.mxu1 %v5119_v62  ;;  %v5139_v62 = vld [vmem:[#allocation8 + $0x2f0] sm:$0xff] }
 0xdcf   :  { %5176 = vmatpush1.bf16.msra.mxu0 %v5069_v60  ;;  %5274 = vmatmul.mubr.bf16.vlgmr.msra.gmra.mrb[48].mxu1 %v7234_v39  ;;  %v5132_v60 = vld [vmem:[#allocation8 + $0x2b8] sm:$0xff] }
 0xdd0   :  { %5177 = vmatprep.subr.bf16.mxu0 %v5073_v8  ;;  %6134 = vmatpush3.bf16.msra.mxu1 %v5095_v19  ;;  %v5136_v8 = vld [vmem:[#allocation8 + $0x2d8] sm:$0xff] }
 0xdd1   :  { %6135 = vmatprep.subr.bf16.mxu1 %v5122_v21  ;;  %5313 = vmatprep.mubr.bf16.mxu1 %v7238_v63 }
 0xdd3   :  { %5178 = vmatpush1.bf16.msra.mxu0 %v5072_v30  ;;  %v5138_v30 = vld [vmem:[#allocation8 + $0x2e8] sm:$0xff] }
 0xdd4   :  { %5179 = vmatprep.subr.bf16.mxu0 %v5076_v10  ;;  %6136 = vmatpush3.bf16.msra.mxu1 %v5098_v55  ;;  %v5142_v55 = vld [vmem:[#allocation13 + $0x6] ss:$8 sm:$0x7] }
 0xdd5   :  { %6137 = vmatprep.subr.bf16.mxu1 %v5125_v28  ;;  %v5155_v28 = vrot.slane %v5142_v55, %v7018_v24 }
 0xdd7   :  { %5180 = vmatpush1.bf16.msra.mxu0 %v5075_v61 }
 0xdd8   :  { %5181 = vmatprep.subr.bf16.mxu0 %v5079_v27  ;;  %6138 = vmatpush3.bf16.msra.mxu1 %v5101_v34 }
 0xdd9   :  { %6139 = vmatprep.subr.bf16.mxu1 %v5128_v57 }
 0xddb   :  { %5182 = vmatpush1.bf16.msra.mxu0 %v5078_v29 }
 0xddc   :  { %5183 = vmatprep.subr.bf16.mxu0 %v5082_v31  ;;  %6140 = vmatpush3.bf16.msra.mxu1 %v5104_v59 }
 0xddd   :  { %6141 = vmatprep.subr.bf16.mxu1 %v5131_v36 }
 0xddf   :  { %5184 = vmatpush1.bf16.msra.mxu0 %v5081_v42 }
 0xde0   :  { %5185 = vmatprep.subr.bf16.mxu0 %v5085_v35  ;;  %6142 = vmatpush3.bf16.msra.mxu1 %v5107_v38 }
 0xde1   :  { %6143 = vmatprep.subr.bf16.mxu1 %v5134_v18 }
 0xde3   :  { %5186 = vmatpush1.bf16.msra.mxu0 %v5084_v37 }
 0xde4   :  { %5187 = vmatprep.subr.bf16.mxu0 %v5088_v12  ;;  %6144 = vmatpush3.bf16.msra.mxu1 %v5110_v22  ;;  %v5151_v12 = vrot.slane %v5142_v55, %v7021_v25 }
 0xde5   :  { %6145 = vmatprep.subr.bf16.mxu1 %v5137_v45 }
 0xde7   :  { %5188 = vmatpush1.bf16.msra.mxu0 %v5087_v26 }
 0xde8   :  { %5189 = vmatprep.subr.bf16.mxu0 %v5091_v44  ;;  %6146 = vmatpush3.bf16.msra.mxu1 %v5113_v47 }
 0xde9   :  { %6147 = vmatprep.subr.bf16.mxu1 %v5140_v20 }
 0xdeb   :  { %5190 = vmatpush1.bf16.msra.mxu0 %v5090_v14 }
 0xdec   :  { %5200 = vmatprep.subr.bf16.mxu0 %v5094_v46  ;;  %6148 = vmatpush3.bf16.msra.mxu1 %v5116_v40 }
 0xdee   :  { %5192 = vmatmul.mubr.bf16.vlgmr.msra.gmra.mrb[44].mxu0 %v7234_v39  ;;  %v5105_v39 = vld [vmem:[#allocation8 + $0x1e0] sm:$0xff] }
 0xdef   :  { %5201 = vmatpush1.bf16.msra.mxu0 %v5093_v48  ;;  %5232 = vmatprep.mubr.bf16.mxu0 %v7238_v63  ;;  %v5108_v63 = vld [vmem:[#allocation8 + $0x1f8] sm:$0xff] }
 0xdf0   :  { %5202 = vmatprep.subr.bf16.mxu0 %v5097_v2  ;;  %5314 = vmatmul.mubr.bf16.vlgmr.msra.gmra.mrb[52].mxu1 %v7236_v43 }
 0xdf3   :  { %5203 = vmatpush1.bf16.msra.mxu0 %v5096_v3 }
 0xdf4   :  { %5204 = vmatprep.subr.bf16.mxu0 %v5100_v50 }
 0xdf7   :  { %5205 = vmatpush1.bf16.msra.mxu0 %v5099_v51 }
 0xdf8   :  { %5206 = vmatprep.subr.bf16.mxu0 %v5103_v52 }
 0xdfb   :  { %5207 = vmatpush1.bf16.msra.mxu0 %v5102_v49 }
 0xdfc   :  { %5208 = vmatprep.subr.bf16.mxu0 %v5106_v53 }
 0xdff   :  { %5209 = vmatpush1.bf16.msra.mxu0 %v5105_v39 }
 0xe00   :  { %5210 = vmatprep.subr.bf16.mxu0 %v5109_v11 }
 0xe03   :  { %5211 = vmatpush1.bf16.msra.mxu0 %v5108_v63 }
 0xe04   :  { %5212 = vmatprep.subr.bf16.mxu0 %v5112_v54 }
 0xe07   :  { %5213 = vmatpush1.bf16.msra.mxu0 %v5111_v33 }
 0xe08   :  { %5214 = vmatprep.subr.bf16.mxu0 %v5115_v13 }
 0xe0b   :  { %5215 = vmatpush1.bf16.msra.mxu0 %v5114_v56 }
 0xe0c   :  { %5216 = vmatprep.subr.bf16.mxu0 %v5118_v58 }
 0xe0f   :  { %5217 = vmatpush1.bf16.msra.mxu0 %v5117_v0 }
 0xe10   :  { %5218 = vmatprep.subr.bf16.mxu0 %v5121_v17 }
 0xe13   :  { %5219 = vmatpush1.bf16.msra.mxu0 %v5120_v1 }
 0xe14   :  { %5220 = vmatprep.subr.bf16.mxu0 %v5124_v7 }
 0xe17   :  { %5221 = vmatpush1.bf16.msra.mxu0 %v5123_v4 }
 0xe18   :  { %5222 = vmatprep.subr.bf16.mxu0 %v5127_v16 }
 0xe1b   :  { %5223 = vmatpush1.bf16.msra.mxu0 %v5126_v5 }
 0xe1c   :  { %5224 = vmatprep.subr.bf16.mxu0 %v5130_v6 }
 0xe1f   :  { %5225 = vmatpush1.bf16.msra.mxu0 %v5129_v15 }
 0xe20   :  { %5226 = vmatprep.subr.bf16.mxu0 %v5133_v9 }
 0xe23   :  { %5227 = vmatpush1.bf16.msra.mxu0 %v5132_v60 }
 0xe24   :  { %5228 = vmatprep.subr.bf16.mxu0 %v5136_v8 }
 0xe27   :  { %5229 = vmatpush1.bf16.msra.mxu0 %v5135_v32 }
 0xe28   :  { %5230 = vmatprep.subr.bf16.mxu0 %v5139_v62 }
 0xe2b   :  { %5231 = vmatpush1.bf16.msra.mxu0 %v5138_v30 }
 0xe2e   :  { %5233 = vmatmul.mubr.bf16.vlgmr.msra.gmra.mrb[44].mxu0 %v7236_v43  ;;  %v5147_v43 = vrot.slane %v5142_v55, %v7015_v23 }
 0xea2   :  { %v6127_v10 = vpop.f32.mrb[48].mxu1 }
 0xea3   :  { %v6128_v19 = vpop.f32.mrb[49].mxu1 }
 0xea4   :  { %v6129_v21 = vadd.f32 %v6128_v19, %v6127_v10  ;;  %v6130_v61 = vpop.f32.mrb[50].mxu1 }
 0xea5   :  { %v6131_v27 = vpop.f32.mrb[51].mxu1 }
 0xea6   :  { %v5276_v29 = vadd.f32 %v6129_v21, %v5155_v28 }
 0xec3   :  { %v6149_v31 = vpop.f32.mrb[52].mxu1 }
 0xec4   :  { %v6150_v34 = vpop.f32.mrb[53].mxu1 }
 0xec5   :  { %v6151_v57 = vadd.f32 %v6150_v34, %v6149_v31  ;;  %v6152_v42 = vpop.f32.mrb[54].mxu1 }
 0xec6   :  { %v6153_v35 = vpop.f32.mrb[55].mxu1 }
 0xec7   :  { %v5316_v59 = vadd.f32 %v6151_v57, %v5276_v29 }
 0xec9   :  { %v5323_v36 = vmax.f32 %v5316_v59, 0.0 }
 0xecb   :  { %v7247_v37 = vpack.c.bf16 %v5323_v36, %v5323_v36 }
 0xf01   :  { %v5234_v38 = vpop.f32.mrb[44].mxu0 }
 0xf02   :  { %v6383_v18 = vadd.f32 %v5234_v38, %v5147_v43  ;;  %v5236_v26 = vpop.f32.mrb[45].mxu0 }
 0xf03   :  { %v6384_v44 = vadd.f32 %v5236_v26, %v5151_v12  ;;  %v5238_v22 = vpop.f32.mrb[46].mxu0 }
 0xf04   :  { %v5321_v24 = vmax.f32 %v6383_v18, 0.0  ;;  %v5239_v45 = vpop.f32.mrb[47].mxu0 }
 0xf05   :  { %v5322_v14 = vmax.f32 %v6384_v44, 0.0 }
 0xf06   :  { %v7251_v46 = vpack.c.bf16 %v5321_v24, %v5321_v24 }
 0xf07   :  { %v5325_v47 = vpack.c.bf16 %v5322_v14, %v5322_v14 }
 0xf08   :  { %6686 = dma.done.wait [#allocation12 + $0x7], 6144 }
 0xf09   :  { %6687 = vsyncadd [#allocation12 + $0x7], 4294961152  ;;  %5424 = vmatprep.mubr.bf16.mxu1 %v5325_v47  ;;  %v5332_v20 = vld [vmem:[#allocation9 + $0x8] sm:$0xff]  ;;  %v5331_v48 = vld [vmem:[#allocation9] sm:$0xff] }
 0xf0a   :  { %v5334_v2 = vld [vmem:[#allocation9 + $0x18] sm:$0xff]  ;;  %5392 = vmatprep.subr.bf16.mxu1 %v5332_v20  ;;  %v5333_v40 = vld [vmem:[#allocation9 + $0x10] sm:$0xff]  ;;  %v5336_v3 = vld [vmem:[#allocation9 + $0x28] sm:$0xff] }
 0xf0b   :  { %5393 = vmatpush1.bf16.msra.mxu1 %v5331_v48  ;;  %v5335_v50 = vld [vmem:[#allocation9 + $0x20] sm:$0xff]  ;;  %v5338_v51 = vld [vmem:[#allocation9 + $0x38] sm:$0xff]  ;;  %v5337_v52 = vld [vmem:[#allocation9 + $0x30] sm:$0xff] }
 0xf0c   :  { %5394 = vmatprep.subr.bf16.mxu1 %v5334_v2  ;;  %v5340_v49 = vld [vmem:[#allocation9 + $0x48] sm:$0xff]  ;;  %v5339_v53 = vld [vmem:[#allocation9 + $0x40] sm:$0xff]  ;;  %v5342_v39 = vld [vmem:[#allocation9 + $0x58] sm:$0xff] }
 0xf0d   :  { %v5341_v11 = vld [vmem:[#allocation9 + $0x50] sm:$0xff]  ;;  %v5344_v63 = vld [vmem:[#allocation9 + $0x68] sm:$0xff]  ;;  %v5343_v54 = vld [vmem:[#allocation9 + $0x60] sm:$0xff] }
 0xf0e   :  { %v5346_v33 = vld [vmem:[#allocation9 + $0x78] sm:$0xff]  ;;  %v5345_v13 = vld [vmem:[#allocation9 + $0x70] sm:$0xff]  ;;  %v5348_v56 = vld [vmem:[#allocation9 + $0x88] sm:$0xff] }
 0xf0f   :  { %5395 = vmatpush1.bf16.msra.mxu1 %v5333_v40  ;;  %v5347_v58 = vld [vmem:[#allocation9 + $0x80] sm:$0xff]  ;;  %v5350_v0 = vld [vmem:[#allocation9 + $0x98] sm:$0xff]  ;;  %v5349_v17 = vld [vmem:[#allocation9 + $0x90] sm:$0xff] }
 0xf10   :  { %5396 = vmatprep.subr.bf16.mxu1 %v5336_v3  ;;  %v5352_v1 = vld [vmem:[#allocation9 + $0xa8] sm:$0xff]  ;;  %v5351_v7 = vld [vmem:[#allocation9 + $0xa0] sm:$0xff]  ;;  %v5354_v4 = vld [vmem:[#allocation9 + $0xb8] sm:$0xff] }
 0xf11   :  { %v5353_v16 = vld [vmem:[#allocation9 + $0xb0] sm:$0xff]  ;;  %v5356_v5 = vld [vmem:[#allocation9 + $0xc8] sm:$0xff]  ;;  %v5355_v6 = vld [vmem:[#allocation9 + $0xc0] sm:$0xff] }
 0xf12   :  { %v5358_v15 = vld [vmem:[#allocation9 + $0xd8] sm:$0xff]  ;;  %v5357_v9 = vld [vmem:[#allocation9 + $0xd0] sm:$0xff]  ;;  %v5360_v60 = vld [vmem:[#allocation9 + $0xe8] sm:$0xff] }
 0xf13   :  { %5397 = vmatpush1.bf16.msra.mxu1 %v5335_v50  ;;  %v5359_v8 = vld [vmem:[#allocation9 + $0xe0] sm:$0xff]  ;;  %v5362_v32 = vld [vmem:[#allocation9 + $0xf8] sm:$0xff]  ;;  %v5361_v62 = vld [vmem:[#allocation9 + $0xf0] sm:$0xff] }
 0xf14   :  { %5398 = vmatprep.subr.bf16.mxu1 %v5338_v51  ;;  %v5364_v30 = vld [vmem:[#allocation9 + $0x108] sm:$0xff]  ;;  %v5363_v10 = vld [vmem:[#allocation9 + $0x100] sm:$0xff]  ;;  %v5366_v19 = vld [vmem:[#allocation9 + $0x118] sm:$0xff] }
 0xf15   :  { %v5365_v21 = vld [vmem:[#allocation9 + $0x110] sm:$0xff]  ;;  %v5368_v61 = vld [vmem:[#allocation9 + $0x128] sm:$0xff]  ;;  %v5367_v27 = vld [vmem:[#allocation9 + $0x120] sm:$0xff] }
 0xf16   :  { %v5370_v55 = vld [vmem:[#allocation9 + $0x138] sm:$0xff]  ;;  %v5369_v28 = vld [vmem:[#allocation9 + $0x130] sm:$0xff]  ;;  %v5372_v29 = vld [vmem:[#allocation9 + $0x148] sm:$0xff] }
 0xf17   :  { %5399 = vmatpush1.bf16.msra.mxu1 %v5337_v52  ;;  %v5371_v31 = vld [vmem:[#allocation9 + $0x140] sm:$0xff]  ;;  %v5374_v34 = vld [vmem:[#allocation9 + $0x158] sm:$0xff]  ;;  %v5373_v57 = vld [vmem:[#allocation9 + $0x150] sm:$0xff] }
 0xf18   :  { %5400 = vmatprep.subr.bf16.mxu1 %v5340_v49  ;;  %v5376_v42 = vld [vmem:[#allocation9 + $0x168] sm:$0xff]  ;;  %v5378_v35 = vld [vmem:[#allocation9 + $0x178] sm:$0xff]  ;;  %v5377_v59 = vld [vmem:[#allocation9 + $0x170] sm:$0xff] }
 0xf19   :  { %v5380_v36 = vld [vmem:[#allocation13 + $0x7] ss:$8 sm:$0x3] }
 0xf1a   :  { %v5385_v43 = vrot.slane %v5380_v36, %v7015_v23  ;;  %v5389_v12 = vrot.slane %v5380_v36, %v7021_v25 }
 0xf1b   :  { %5401 = vmatpush1.bf16.msra.mxu1 %v5339_v53 }
 0xf1c   :  { %5402 = vmatprep.subr.bf16.mxu1 %v5342_v39 }
 0xf1f   :  { %5403 = vmatpush1.bf16.msra.mxu1 %v5341_v11 }
 0xf20   :  { %5404 = vmatprep.subr.bf16.mxu1 %v5344_v63 }
 0xf23   :  { %5405 = vmatpush1.bf16.msra.mxu1 %v5343_v54 }
 0xf24   :  { %5406 = vmatprep.subr.bf16.mxu1 %v5346_v33 }
 0xf27   :  { %5407 = vmatpush1.bf16.msra.mxu1 %v5345_v13 }
 0xf28   :  { %5408 = vmatprep.subr.bf16.mxu1 %v5348_v56 }
 0xf2b   :  { %5409 = vmatpush1.bf16.msra.mxu1 %v5347_v58 }
 0xf2c   :  { %5410 = vmatprep.subr.bf16.mxu1 %v5350_v0 }
 0xf2f   :  { %5411 = vmatpush1.bf16.msra.mxu1 %v5349_v17 }
 0xf30   :  { %5412 = vmatprep.subr.bf16.mxu1 %v5352_v1 }
 0xf33   :  { %5413 = vmatpush1.bf16.msra.mxu1 %v5351_v7 }
 0xf34   :  { %5414 = vmatprep.subr.bf16.mxu1 %v5354_v4 }
 0xf37   :  { %5415 = vmatpush1.bf16.msra.mxu1 %v5353_v16 }
 0xf38   :  { %5416 = vmatprep.subr.bf16.mxu1 %v5356_v5 }
 0xf3b   :  { %5417 = vmatpush1.bf16.msra.mxu1 %v5355_v6 }
 0xf3c   :  { %5418 = vmatprep.subr.bf16.mxu1 %v5358_v15 }
 0xf3f   :  { %5419 = vmatpush1.bf16.msra.mxu1 %v5357_v9 }
 0xf40   :  { %5420 = vmatprep.subr.bf16.mxu1 %v5360_v60 }
 0xf43   :  { %5421 = vmatpush1.bf16.msra.mxu1 %v5359_v8 }
 0xf44   :  { %5422 = vmatprep.subr.bf16.mxu1 %v5362_v32 }
 0xf47   :  { %5423 = vmatpush1.bf16.msra.mxu1 %v5361_v62 }
 0xf48   :  { %5433 = vmatprep.subr.bf16.mxu1 %v5364_v30 }
 0xf4a   :  { %5425 = vmatmul.mubr.bf16.vlgmr.msra.gmra.mrb[56].mxu1 %v7251_v46 }
 0xf4b   :  { %5434 = vmatpush1.bf16.msra.mxu1 %v5363_v10  ;;  %5465 = vmatprep.mubr.bf16.mxu1 %v6738_v41  ;;  %v5375_v41 = vld [vmem:[#allocation9 + $0x160] sm:$0xff] }
 0xf4c   :  { %5435 = vmatprep.subr.bf16.mxu1 %v5366_v19 }
 0xf4f   :  { %5436 = vmatpush1.bf16.msra.mxu1 %v5365_v21 }
 0xf50   :  { %5437 = vmatprep.subr.bf16.mxu1 %v5368_v61 }
 0xf53   :  { %5438 = vmatpush1.bf16.msra.mxu1 %v5367_v27 }
 0xf54   :  { %5439 = vmatprep.subr.bf16.mxu1 %v5370_v55 }
 0xf57   :  { %5440 = vmatpush1.bf16.msra.mxu1 %v5369_v28 }
 0xf58   :  { %5441 = vmatprep.subr.bf16.mxu1 %v5372_v29 }
 0xf5b   :  { %5442 = vmatpush1.bf16.msra.mxu1 %v5371_v31 }
 0xf5c   :  { %5443 = vmatprep.subr.bf16.mxu1 %v5374_v34 }
 0xf5f   :  { %5444 = vmatpush1.bf16.msra.mxu1 %v5373_v57 }
 0xf60   :  { %5445 = vmatprep.subr.bf16.mxu1 %v5376_v42 }
 0xf63   :  { %5446 = vmatpush1.bf16.msra.mxu1 %v5375_v41 }
 0xf64   :  { %5447 = vmatprep.subr.bf16.mxu1 %v5378_v35 }
 0xf67   :  { %5448 = vmatpush1.bf16.msra.mxu1 %v5377_v59 }
 0xf6a   :  { %5466 = vmatmul.mubr.bf16.vlgmr.msra.gmra.mrb[56].mxu1 %v7247_v37 }
0x103d   :  { %v5467_v38 = vpop.f32.mrb[56].mxu1 }
0x103e   :  { %v6385_v18 = vadd.f32 %v5467_v38, %v5385_v43  ;;  %v5469_v26 = vpop.f32.mrb[57].mxu1 }
0x103f   :  { %v6386_v44 = vadd.f32 %v5469_v26, %v5389_v12  ;;  %v5471_v22 = vpop.f32.mrb[58].mxu1 }
0x1040   :  { %v5474_v24 = vmax.f32 %v6385_v18, 0.0  ;;  %v5472_v45 = vpop.f32.mrb[59].mxu1 }
0x1041   :  { %v5475_v14 = vmax.f32 %v6386_v44, 0.0 }
0x1042   :  { %v5476_v46 = vpack.c.bf16 %v5474_v24, %v5474_v24 }
0x1043   :  { %v5477_v47 = vpack.c.bf16 %v5475_v14, %v5475_v14 }
0x1044   :  { %6688 = dma.done.wait [#allocation12 + $0x8], 2048 }
0x1045   :  { %6689 = vsyncadd [#allocation12 + $0x8], 4294965248  ;;  %5531 = vmatprep.mubr.bf16.mxu0 %v5477_v47  ;;  %v5490_v20 = vld [vmem:[#allocation10 + $0x40] sm:$0xff]  ;;  %v5491_v48 = vld [vmem:[#allocation10 + $0x48] sm:$0xff] }
0x1046   :  { %v5482_v37 = vld [vmem:[#allocation10] sm:$0xff]  ;;  %6155 = vmatprep.subr.bf16.mxu0 %v5490_v20  ;;  %v5483_v23 = vld [vmem:[#allocation10 + $0x8] sm:$0xff]  ;;  %v5492_v25 = vld [vmem:[#allocation10 + $0x50] sm:$0xff] }
0x1047   :  { %6156 = vmatpush3.bf16.msra.mxu0 %v5482_v37  ;;  %v5484_v2 = vld [vmem:[#allocation10 + $0x10] sm:$0xff]  ;;  %v5493_v40 = vld [vmem:[#allocation10 + $0x58] sm:$0xff]  ;;  %v5494_v50 = vld [vmem:[#allocation10 + $0x60] sm:$0xff] }
0x1048   :  { %6157 = vmatprep.subr.bf16.mxu0 %v5491_v48  ;;  %v5485_v3 = vld [vmem:[#allocation10 + $0x18] sm:$0xff]  ;;  %v5486_v51 = vld [vmem:[#allocation10 + $0x20] sm:$0xff]  ;;  %v5495_v52 = vld [vmem:[#allocation10 + $0x68] sm:$0xff] }
0x1049   :  { %v5487_v49 = vld [vmem:[#allocation10 + $0x28] sm:$0xff]  ;;  %v5496_v53 = vld [vmem:[#allocation10 + $0x70] sm:$0xff]  ;;  %v5497_v11 = vld [vmem:[#allocation10 + $0x78] sm:$0xff] }
0x104a   :  { %v5488_v39 = vld [vmem:[#allocation10 + $0x30] sm:$0xff]  ;;  %v5489_v63 = vld [vmem:[#allocation10 + $0x38] sm:$0xff]  ;;  %v5498_v33 = vld [vmem:[#allocation13 + $0x40] ss:$0 sm:$0xff] }
0x104b   :  { %6158 = vmatpush3.bf16.msra.mxu0 %v5483_v23 }
0x104c   :  { %6159 = vmatprep.subr.bf16.mxu0 %v5492_v25 }
0x104f   :  { %6160 = vmatpush3.bf16.msra.mxu0 %v5484_v2 }
0x1050   :  { %6161 = vmatprep.subr.bf16.mxu0 %v5493_v40 }
0x1053   :  { %6162 = vmatpush3.bf16.msra.mxu0 %v5485_v3 }
0x1054   :  { %6163 = vmatprep.subr.bf16.mxu0 %v5494_v50 }
0x1057   :  { %6164 = vmatpush3.bf16.msra.mxu0 %v5486_v51 }
0x1058   :  { %6165 = vmatprep.subr.bf16.mxu0 %v5495_v52 }
0x105b   :  { %6166 = vmatpush3.bf16.msra.mxu0 %v5487_v49 }
0x105c   :  { %6167 = vmatprep.subr.bf16.mxu0 %v5496_v53 }
0x105f   :  { %6168 = vmatpush3.bf16.msra.mxu0 %v5488_v39 }
0x1060   :  { %6169 = vmatprep.subr.bf16.mxu0 %v5497_v11 }
0x1063   :  { %6170 = vmatpush3.bf16.msra.mxu0 %v5489_v63 }
0x1066   :  { %5532 = vmatmul.mubr.bf16.vlgmr.msra.gmra.mrb[48].mxu0 %v5476_v46 }
0x1139   :  { %v6171_v54 = vpop.f32.mrb[48].mxu0 }
0x113a   :  { %v6172_v13 = vpop.f32.mrb[49].mxu0 }
0x113b   :  { %v6173_v56 = vadd.f32 %v6172_v13, %v6171_v54  ;;  %v6174_v58 = vpop.f32.mrb[50].mxu0 }
0x113c   :  { %v6175_v0 = vpop.f32.mrb[51].mxu0 }
0x113d   :  { %v5534_v17 = vadd.f32 %v6173_v56, %v5498_v33 }
0x113f   :  { %v5539_v1 = vmax.f32 %v5534_v17, 0.0 }
0x1141   :  { %v5540_v7 = vpack.c.bf16 %v5539_v1, %v5539_v1 }
0x1142   :  { %6690 = dma.done.wait [#allocation12 + $0x9], 6144 }
0x1143   :  { %6691 = vsyncadd [#allocation12 + $0x9], 4294961152  ;;  %v6739_v4 = vmov 0.0   ;;  %vm6740_vm0 = vmmov 0   ;;  %v5546_v16 = vld [vmem:[#allocation11] sm:$0xff]  ;;  %v5547_v5 = vld [vmem:[#allocation11 + $0x8] sm:$0xff] }
0x1144   :  { %6231 = vmatprep.subr.bf16.mxu0 %v6739_v4  ;;  %6247 = vmatprep.mubr.msk.bf16.mxu0 %vm6740_vm0, %v6739_v4  ;;  %v5598_v6 = vld [vmem:[#allocation11 + $0x40] sm:$0xff]  ;;  %v5599_v15 = vld [vmem:[#allocation11 + $0x48] sm:$0xff]  ;;  %v5548_v9 = vld [vmem:[#allocation11 + $0x10] sm:$0xff] }
0x1145   :  { %6251 = vmatprep.subr.bf16.mxu1 %v6739_v4  ;;  %6267 = vmatprep.mubr.msk.bf16.mxu1 %vm6740_vm0, %v6739_v4  ;;  %v5600_v60 = vld [vmem:[#allocation11 + $0x50] sm:$0xff]  ;;  %v5549_v8 = vld [vmem:[#allocation11 + $0x18] sm:$0xff]  ;;  %v5550_v62 = vld [vmem:[#allocation11 + $0x20] sm:$0xff] }
0x1146   :  { %6232 = vmatpush3.bf16.msra.mxu0 %v5546_v16  ;;  %6252 = vmatpush3.bf16.msra.mxu1 %v5598_v6  ;;  %v5601_v32 = vld [vmem:[#allocation11 + $0x58] sm:$0xff]  ;;  %v5602_v30 = vld [vmem:[#allocation11 + $0x60] sm:$0xff]  ;;  %v5551_v10 = vld [vmem:[#allocation11 + $0x28] sm:$0xff] }
0x1147   :  { %6233 = vmatprep.subr.bf16.mxu0 %v6739_v4  ;;  %6253 = vmatprep.subr.bf16.mxu1 %v6739_v4  ;;  %v5603_v19 = vld [vmem:[#allocation11 + $0x68] sm:$0xff]  ;;  %v5552_v21 = vld [vmem:[#allocation11 + $0x30] sm:$0xff]  ;;  %v5553_v61 = vld [vmem:[#allocation11 + $0x38] sm:$0xff] }
0x1148   :  { %v5604_v27 = vld [vmem:[#allocation11 + $0x70] sm:$0xff]  ;;  %v5605_v55 = vld [vmem:[#allocation11 + $0x78] sm:$0xff]  ;;  %v5650_v28 = vld [vmem:[#allocation11 + $0x80] sm:$0xff] }
0x1149   :  { %v5651_v29 = vld [vmem:[#allocation11 + $0x88] sm:$0xff]  ;;  %v5652_v31 = vld [vmem:[#allocation11 + $0x90] sm:$0xff]  ;;  %v5653_v34 = vld [vmem:[#allocation11 + $0x98] sm:$0xff] }
0x114a   :  { %6234 = vmatpush3.bf16.msra.mxu0 %v5547_v5  ;;  %6254 = vmatpush3.bf16.msra.mxu1 %v5599_v15  ;;  %v5654_v57 = vld [vmem:[#allocation11 + $0xa0] sm:$0xff]  ;;  %v5655_v42 = vld [vmem:[#allocation11 + $0xa8] sm:$0xff]  ;;  %v5656_v26 = vld [vmem:[#allocation11 + $0xb0] sm:$0xff] }
0x114b   :  { %6235 = vmatprep.subr.bf16.mxu0 %v6739_v4  ;;  %6255 = vmatprep.subr.bf16.mxu1 %v6739_v4  ;;  %v5554_v41 = vld [vmem:[#allocation13 + $0x41] ss:$0 sm:$0xff]  ;;  %v5657_v44 = vld [vmem:[#allocation11 + $0xb8] sm:$0xff]  ;;  %v5703_v24 = vld [vmem:[#allocation11 + $0xc8] sm:$0xff] }
0x114c   :  { %v5702_v22 = vld [vmem:[#allocation11 + $0xc0] sm:$0xff]  ;;  %v5704_v45 = vld [vmem:[#allocation11 + $0xd0] sm:$0xff]  ;;  %v5705_v14 = vld [vmem:[#allocation11 + $0xd8] sm:$0xff] }
0x114d   :  { %v5706_v46 = vld [vmem:[#allocation11 + $0xe0] sm:$0xff]  ;;  %v5707_v47 = vld [vmem:[#allocation11 + $0xe8] sm:$0xff]  ;;  %v5708_v50 = vld [vmem:[#allocation11 + $0xf0] sm:$0xff] }
0x114e   :  { %6236 = vmatpush3.bf16.msra.mxu0 %v5548_v9  ;;  %6256 = vmatpush3.bf16.msra.mxu1 %v5600_v60  ;;  %v5606_v20 = vld [vmem:[#allocation13 + $0x42] ss:$0 sm:$0xff]  ;;  %v5709_v51 = vld [vmem:[#allocation11 + $0xf8] sm:$0xff]  ;;  %v5755_v49 = vld [vmem:[#allocation11 + $0x108] sm:$0xff] }
0x114f   :  { %6237 = vmatprep.subr.bf16.mxu0 %v6739_v4  ;;  %6257 = vmatprep.subr.bf16.mxu1 %v6739_v4  ;;  %v5754_v52 = vld [vmem:[#allocation11 + $0x100] sm:$0xff]  ;;  %v5756_v53 = vld [vmem:[#allocation11 + $0x110] sm:$0xff]  ;;  %v5757_v39 = vld [vmem:[#allocation11 + $0x118] sm:$0xff] }
0x1150   :  { %v5758_v11 = vld [vmem:[#allocation11 + $0x120] sm:$0xff]  ;;  %v5759_v63 = vld [vmem:[#allocation11 + $0x128] sm:$0xff]  ;;  %v5761_v16 = vld [vmem:[#allocation11 + $0x138] sm:$0xff] }
0x1151   :  { %v5658_v54 = vld [vmem:[#allocation13 + $0x43] ss:$0 sm:$0xff]  ;;  %v5807_v6 = vld [vmem:[#allocation11 + $0x148] sm:$0xff]  ;;  %v5808_v15 = vld [vmem:[#allocation11 + $0x150] sm:$0xff] }
0x1152   :  { %6238 = vmatpush3.bf16.msra.mxu0 %v5549_v8  ;;  %6258 = vmatpush3.bf16.msra.mxu1 %v5601_v32  ;;  %v5806_v5 = vld [vmem:[#allocation11 + $0x140] sm:$0xff]  ;;  %v5809_v9 = vld [vmem:[#allocation11 + $0x158] sm:$0xff]  ;;  %v5811_v8 = vld [vmem:[#allocation11 + $0x168] sm:$0xff] }
0x1153   :  { %6239 = vmatprep.subr.bf16.mxu0 %v6739_v4  ;;  %6259 = vmatprep.subr.bf16.mxu1 %v6739_v4  ;;  %v5810_v60 = vld [vmem:[#allocation11 + $0x160] sm:$0xff] }
0x1154   :  { %v5710_v32 = vld [vmem:[#allocation13 + $0x44] ss:$0 sm:$0xff] }
0x1156   :  { %6240 = vmatpush3.bf16.msra.mxu0 %v5550_v62  ;;  %6260 = vmatpush3.bf16.msra.mxu1 %v5602_v30 }
0x1157   :  { %6241 = vmatprep.subr.bf16.mxu0 %v6739_v4  ;;  %6261 = vmatprep.subr.bf16.mxu1 %v6739_v4 }
0x115a   :  { %6242 = vmatpush3.bf16.msra.mxu0 %v5551_v10  ;;  %6262 = vmatpush3.bf16.msra.mxu1 %v5603_v19 }
0x115b   :  { %6243 = vmatprep.subr.bf16.mxu0 %v6739_v4  ;;  %6263 = vmatprep.subr.bf16.mxu1 %v6739_v4 }
0x115e   :  { %6244 = vmatpush3.bf16.msra.mxu0 %v5552_v21  ;;  %6264 = vmatpush3.bf16.msra.mxu1 %v5604_v27 }
0x115f   :  { %6245 = vmatprep.subr.bf16.mxu0 %v6739_v4  ;;  %6265 = vmatprep.subr.bf16.mxu1 %v6739_v4 }
0x1162   :  { %6246 = vmatpush3.bf16.msra.mxu0 %v5553_v61  ;;  %6266 = vmatpush3.bf16.msra.mxu1 %v5605_v55  ;;  %v5812_v55 = vld [vmem:[#allocation11 + $0x170] sm:$0xff] }
0x1163   :  { %6271 = vmatprep.subr.bf16.mxu0 %v6739_v4  ;;  %6291 = vmatprep.subr.bf16.mxu1 %v6739_v4 }
0x1165   :  { %6248 = vmatmul.mubr.bf16.vlgmr.msra.gmra.mrb[52].mxu0 %v5540_v7  ;;  %v5760_v7 = vld [vmem:[#allocation11 + $0x130] sm:$0xff] }
0x1166   :  { %6287 = vmatprep.mubr.msk.bf16.mxu0 %vm6740_vm0, %v6739_v4  ;;  %6272 = vmatpush3.bf16.msra.mxu0 %v5650_v28  ;;  %v5813_v28 = vld [vmem:[#allocation11 + $0x178] sm:$0xff] }
0x1167   :  { %6273 = vmatprep.subr.bf16.mxu0 %v6739_v4 }
0x116a   :  { %6274 = vmatpush3.bf16.msra.mxu0 %v5651_v29  ;;  %v5762_v29 = vld [vmem:[#allocation13 + $0x45] ss:$0 sm:$0xff] }
0x116b   :  { %6275 = vmatprep.subr.bf16.mxu0 %v6739_v4 }
0x116e   :  { %6276 = vmatpush3.bf16.msra.mxu0 %v5652_v31 }
0x116f   :  { %6277 = vmatprep.subr.bf16.mxu0 %v6739_v4 }
0x1172   :  { %6278 = vmatpush3.bf16.msra.mxu0 %v5653_v34 }
0x1173   :  { %6279 = vmatprep.subr.bf16.mxu0 %v6739_v4 }
0x1176   :  { %6280 = vmatpush3.bf16.msra.mxu0 %v5654_v57 }
0x1177   :  { %6281 = vmatprep.subr.bf16.mxu0 %v6739_v4 }
0x117a   :  { %6282 = vmatpush3.bf16.msra.mxu0 %v5655_v42 }
0x117b   :  { %6283 = vmatprep.subr.bf16.mxu0 %v6739_v4 }
0x117e   :  { %6284 = vmatpush3.bf16.msra.mxu0 %v5656_v26 }
0x117f   :  { %6285 = vmatprep.subr.bf16.mxu0 %v6739_v4 }
0x1182   :  { %6286 = vmatpush3.bf16.msra.mxu0 %v5657_v44 }
0x1183   :  { %6311 = vmatprep.subr.bf16.mxu0 %v6739_v4 }
0x1238   :  { %v5589_v35 = vpop.f32.mrb[52].mxu0 }
0x1239   :  { %v5590_v59 = vadd.f32 %v5589_v35, %v5554_v41  ;;  %v6249_v36 = vpop.f32.mrb[53].mxu0 }
0x123a   :  { %v5592_v43 = vpop.f32.mrb[54].mxu0  ;;  %v5814_v36 = vld [vmem:[#allocation13 + $0x46] ss:$0 sm:$0xff] }
0x123b   :  { %v5595_v12 = vmax.f32 %v5590_v59, 0.0  ;;  %v6250_v38 = vpop.f32.mrb[55].mxu0 }
0x123d   :  { %v5596_v18 = vpack.c.bf16 %v5595_v12, %v5595_v12 }
0x123f   :  { %6268 = vmatmul.mubr.bf16.vlgmr.msra.gmra.mrb[60].mxu1 %v5596_v18 }
0x1240   :  { %6307 = vmatprep.mubr.msk.bf16.mxu1 %vm6740_vm0, %v6739_v4  ;;  %6292 = vmatpush3.bf16.msra.mxu1 %v5702_v22 }
0x1241   :  { %6293 = vmatprep.subr.bf16.mxu1 %v6739_v4 }
0x1244   :  { %6294 = vmatpush3.bf16.msra.mxu1 %v5703_v24 }
0x1245   :  { %6295 = vmatprep.subr.bf16.mxu1 %v6739_v4 }
0x1248   :  { %6296 = vmatpush3.bf16.msra.mxu1 %v5704_v45 }
0x1249   :  { %6297 = vmatprep.subr.bf16.mxu1 %v6739_v4 }
0x124c   :  { %6298 = vmatpush3.bf16.msra.mxu1 %v5705_v14 }
0x124d   :  { %6299 = vmatprep.subr.bf16.mxu1 %v6739_v4 }
0x1250   :  { %6300 = vmatpush3.bf16.msra.mxu1 %v5706_v46 }
0x1251   :  { %6301 = vmatprep.subr.bf16.mxu1 %v6739_v4 }
0x1254   :  { %6302 = vmatpush3.bf16.msra.mxu1 %v5707_v47 }
0x1255   :  { %6303 = vmatprep.subr.bf16.mxu1 %v6739_v4 }
0x1258   :  { %6304 = vmatpush3.bf16.msra.mxu1 %v5708_v50 }
0x1259   :  { %6305 = vmatprep.subr.bf16.mxu1 %v6739_v4 }
0x125c   :  { %6306 = vmatpush3.bf16.msra.mxu1 %v5709_v51 }
0x125d   :  { %6331 = vmatprep.subr.bf16.mxu1 %v6739_v4 }
0x1312   :  { %v5641_v37 = vpop.f32.mrb[60].mxu1 }
0x1313   :  { %v5642_v48 = vadd.f32 %v5641_v37, %v5606_v20  ;;  %v6269_v23 = vpop.f32.mrb[61].mxu1 }
0x1314   :  { %v5644_v25 = vpop.f32.mrb[62].mxu1 }
0x1315   :  { %v5647_v2 = vmax.f32 %v5642_v48, 0.0  ;;  %v6270_v40 = vpop.f32.mrb[63].mxu1 }
0x1317   :  { %v5648_v3 = vpack.c.bf16 %v5647_v2, %v5647_v2 }
0x1319   :  { %6288 = vmatmul.mubr.bf16.vlgmr.msra.gmra.mrb[56].mxu0 %v5648_v3 }
0x131a   :  { %6327 = vmatprep.mubr.msk.bf16.mxu0 %vm6740_vm0, %v6739_v4  ;;  %6312 = vmatpush3.bf16.msra.mxu0 %v5754_v52 }
0x131b   :  { %6313 = vmatprep.subr.bf16.mxu0 %v6739_v4 }
0x131e   :  { %6314 = vmatpush3.bf16.msra.mxu0 %v5755_v49 }
0x131f   :  { %6315 = vmatprep.subr.bf16.mxu0 %v6739_v4 }
0x1322   :  { %6316 = vmatpush3.bf16.msra.mxu0 %v5756_v53 }
0x1323   :  { %6317 = vmatprep.subr.bf16.mxu0 %v6739_v4 }
0x1326   :  { %6318 = vmatpush3.bf16.msra.mxu0 %v5757_v39 }
0x1327   :  { %6319 = vmatprep.subr.bf16.mxu0 %v6739_v4 }
0x132a   :  { %6320 = vmatpush3.bf16.msra.mxu0 %v5758_v11 }
0x132b   :  { %6321 = vmatprep.subr.bf16.mxu0 %v6739_v4 }
0x132e   :  { %6322 = vmatpush3.bf16.msra.mxu0 %v5759_v63 }
0x132f   :  { %6323 = vmatprep.subr.bf16.mxu0 %v6739_v4 }
0x1332   :  { %6324 = vmatpush3.bf16.msra.mxu0 %v5760_v7 }
0x1333   :  { %6325 = vmatprep.subr.bf16.mxu0 %v6739_v4 }
0x1336   :  { %6326 = vmatpush3.bf16.msra.mxu0 %v5761_v16 }
0x13ec   :  { %v5693_v33 = vpop.f32.mrb[56].mxu0 }
0x13ed   :  { %v5694_v13 = vadd.f32 %v5693_v33, %v5658_v54  ;;  %v6289_v56 = vpop.f32.mrb[57].mxu0 }
0x13ee   :  { %v5696_v58 = vpop.f32.mrb[58].mxu0 }
0x13ef   :  { %v5699_v0 = vmax.f32 %v5694_v13, 0.0  ;;  %v6290_v17 = vpop.f32.mrb[59].mxu0 }
0x13f1   :  { %v5700_v1 = vpack.c.bf16 %v5699_v0, %v5699_v0 }
0x13f3   :  { %6308 = vmatmul.mubr.bf16.vlgmr.msra.gmra.mrb[64].mxu1 %v5700_v1 }
0x13f4   :  { %6347 = vmatprep.mubr.msk.bf16.mxu1 %vm6740_vm0, %v6739_v4  ;;  %6332 = vmatpush3.bf16.msra.mxu1 %v5806_v5 }
0x13f5   :  { %6333 = vmatprep.subr.bf16.mxu1 %v6739_v4 }
0x13f8   :  { %6334 = vmatpush3.bf16.msra.mxu1 %v5807_v6 }
0x13f9   :  { %6335 = vmatprep.subr.bf16.mxu1 %v6739_v4 }
0x13fc   :  { %6336 = vmatpush3.bf16.msra.mxu1 %v5808_v15 }
0x13fd   :  { %6337 = vmatprep.subr.bf16.mxu1 %v6739_v4 }
0x1400   :  { %6338 = vmatpush3.bf16.msra.mxu1 %v5809_v9 }
0x1401   :  { %6339 = vmatprep.subr.bf16.mxu1 %v6739_v4 }
0x1404   :  { %6340 = vmatpush3.bf16.msra.mxu1 %v5810_v60 }
0x1405   :  { %6341 = vmatprep.subr.bf16.mxu1 %v6739_v4 }
0x1408   :  { %6342 = vmatpush3.bf16.msra.mxu1 %v5811_v8 }
0x1409   :  { %6343 = vmatprep.subr.bf16.mxu1 %v6739_v4 }
0x140c   :  { %6344 = vmatpush3.bf16.msra.mxu1 %v5812_v55 }
0x140d   :  { %6345 = vmatprep.subr.bf16.mxu1 %v6739_v4 }
0x1410   :  { %6346 = vmatpush3.bf16.msra.mxu1 %v5813_v28 }
0x14c6   :  { %v5745_v62 = vpop.f32.mrb[64].mxu1 }
0x14c7   :  { %v5746_v30 = vadd.f32 %v5745_v62, %v5710_v32  ;;  %v6309_v10 = vpop.f32.mrb[65].mxu1 }
0x14c8   :  { %v5748_v19 = vpop.f32.mrb[66].mxu1 }
0x14c9   :  { %v5751_v21 = vmax.f32 %v5746_v30, 0.0  ;;  %v6310_v61 = vpop.f32.mrb[67].mxu1 }
0x14cb   :  { %v5752_v27 = vpack.c.bf16 %v5751_v21, %v5751_v21 }
0x14cd   :  { %6328 = vmatmul.mubr.bf16.vlgmr.msra.gmra.mrb[60].mxu0 %v5752_v27 }
0x15a0   :  { %v5797_v31 = vpop.f32.mrb[60].mxu0 }
0x15a1   :  { %v5798_v34 = vadd.f32 %v5797_v31, %v5762_v29  ;;  %v6329_v57 = vpop.f32.mrb[61].mxu0 }
0x15a2   :  { %v5800_v42 = vpop.f32.mrb[62].mxu0 }
0x15a3   :  { %v5803_v41 = vmax.f32 %v5798_v34, 0.0  ;;  %v6330_v35 = vpop.f32.mrb[63].mxu0 }
0x15a5   :  { %v5804_v59 = vpack.c.bf16 %v5803_v41, %v5803_v41 }
0x15a7   :  { %6348 = vmatmul.mubr.bf16.vlgmr.msra.gmra.mrb[68].mxu1 %v5804_v59 }
0x167a   :  { %v5849_v43 = vpop.f32.mrb[68].mxu1 }
0x167b   :  { %v5850_v12 = vadd.f32 %v5849_v43, %v5814_v36  ;;  %v6349_v38 = vpop.f32.mrb[69].mxu1 }
0x167c   :  { %v5852_v18 = vpop.f32.mrb[70].mxu1 }
0x167d   :  { %v5855_v26 = vmax.f32 %v5850_v12, 0.0  ;;  %v6350_v44 = vpop.f32.mrb[71].mxu1 }
0x167f   :  { %5856 = vst [vmem:[%s7333_s12] sm:$0xff] %v5855_v26 }
0x1680   :  { %5861 = vsyncpa [#allocation14], 1 }
0x1681   :  { %5862 = vsyncmov [#allocation12] }
0x1684   :  { %s5863_s8 = vpop.sfrf %5862 }
0x1685   :  { %p5947_p10 = scmp.ne.s32.totalorder %s5863_s8, 0 }
0x1687   :  { %5867 = shalt.err (%p5947_p10)  }
0x1688   :  { %5869 = vsyncmov [#allocation12 + $0x1] }
0x168b   :  { %s5870_s11 = vpop.sfrf %5869 }
0x168c   :  { %p5948_p11 = scmp.ne.s32.totalorder %s5870_s11, 0 }
0x168e   :  { %5874 = shalt.err (%p5948_p11)  }
0x168f   :  { %5876 = vsyncmov [#allocation12 + $0x2] }
0x1692   :  { %s5877_s3 = vpop.sfrf %5876 }
0x1693   :  { %p5949_p12 = scmp.ne.s32.totalorder %s5877_s3, 0 }
0x1695   :  { %5881 = shalt.err (%p5949_p12)  }
0x1696   :  { %5883 = vsyncmov [#allocation12 + $0x3] }
0x1699   :  { %s5884_s23 = vpop.sfrf %5883 }
0x169a   :  { %p5950_p13 = scmp.ne.s32.totalorder %s5884_s23, 0 }
0x169c   :  { %5888 = shalt.err (%p5950_p13)  }
0x169d   :  { %5890 = vsyncmov [#allocation12 + $0x4] }
0x16a0   :  { %s5891_s24 = vpop.sfrf %5890 }
0x16a1   :  { %p5951_p0 = scmp.ne.s32.totalorder %s5891_s24, 0 }
0x16a3   :  { %5895 = shalt.err (%p5951_p0)  }
0x16a4   :  { %5897 = vsyncmov [#allocation12 + $0x5] }
0x16a7   :  { %s5898_s12 = vpop.sfrf %5897 }
0x16a8   :  { %p5952_p1 = scmp.ne.s32.totalorder %s5898_s12, 0 }
0x16aa   :  { %5902 = shalt.err (%p5952_p1)  }
0x16ab   :  { %5904 = vsyncmov [#allocation12 + $0x6] }
0x16ae   :  { %s5905_s6 = vpop.sfrf %5904 }
0x16af   :  { %p5953_p2 = scmp.ne.s32.totalorder %s5905_s6, 0 }
0x16b1   :  { %5909 = shalt.err (%p5953_p2)  }
0x16b2   :  { %5911 = vsyncmov [#allocation12 + $0x7] }
0x16b5   :  { %s5912_s26 = vpop.sfrf %5911 }
0x16b6   :  { %p5954_p3 = scmp.ne.s32.totalorder %s5912_s26, 0 }
0x16b8   :  { %5916 = shalt.err (%p5954_p3)  }
0x16b9   :  { %5918 = vsyncmov [#allocation12 + $0x8] }
0x16bc   :  { %s5919_s27 = vpop.sfrf %5918 }
0x16bd   :  { %p5955_p4 = scmp.ne.s32.totalorder %s5919_s27, 0 }
0x16bf   :  { %5923 = shalt.err (%p5955_p4)  }
0x16c0   :  { %5925 = vsyncmov [#allocation12 + $0x9] }
0x16c3   :  { %s5926_s28 = vpop.sfrf %5925 }
0x16c4   :  { %p5956_p5 = scmp.ne.s32.totalorder %s5926_s28, 0 }
0x16c6   :  { %5930 = shalt.err (%p5956_p5)  }

</bundles_post_ra>
